<compile_context>
chip_gen: v5e
topology: v5e:2x2
jax: 0.10.0
libtpu: 0.0.40
codegen_flags: <defaults>
</compile_context>

<pallas_src>
import functools
import math

import numpy as np

import jax
import jax.numpy as jnp
from jax import lax
from jax.experimental import pallas as pl
from jax.experimental.pallas import tpu as pltpu


LANES = 128  # channel padding width used inside the conv kernels

# Tap enumeration for a k=3, stride=2, padding=1, output_padding=1 ConvTranspose2d.
# Output position (2a+pi, 2b+pj) receives x[a+da, b+db] @ W[:, :, pi+1-2*da, pj+1-2*db].
CT_TAPS = tuple(
    (pi, pj, da, db)
    for pi in range(2)
    for pj in range(2)
    for da in range(pi + 1)
    for db in range(pj + 1)
)


def _round_up(x, m):
    return ((x + m - 1) // m) * m


def _gelu(x):
    # tanh-approximate GELU (EUP tanh slot) per the performance review.
    c = 0.7978845608028654  # sqrt(2/pi)
    return 0.5 * x * (1.0 + jnp.tanh(c * (x + 0.044715 * x * x * x)))


def _apply_act(x, name):
    if name == "gelu":
        return _gelu(x)
    if name == "tanh":
        return jnp.tanh(x)
    return x


# ----------------------------------------------------------------------------
# Stage A: Linear + GELU + ConvTranspose#1 (as dense matmul) + GELU
# ----------------------------------------------------------------------------
def _stage_a_kernel(x_ref, wl_ref, bl_ref, d1_ref, b1_ref, o_ref):
    x = x_ref[...].astype(jnp.bfloat16)
    z = jnp.dot(x, wl_ref[...], preferred_element_type=jnp.float32)
    z = _gelu(z + bl_ref[...])
    y = jnp.dot(z.astype(jnp.bfloat16), d1_ref[...],
                preferred_element_type=jnp.float32)
    o_ref[...] = _gelu(y + b1_ref[...])


def _stage_a(x, wl, bl, d1, b1):
    B, L = x.shape
    N1 = wl.shape[1]
    NO = d1.shape[1]
    return pl.pallas_call(
        _stage_a_kernel,
        out_shape=jax.ShapeDtypeStruct((B, NO), jnp.float32),
        grid_spec=pltpu.PrefetchScalarGridSpec(
            num_scalar_prefetch=0,
            grid=(1,),
            in_specs=[
                pl.BlockSpec((B, L), lambda i: (0, 0)),
                pl.BlockSpec((L, N1), lambda i: (0, 0)),
                pl.BlockSpec((1, N1), lambda i: (0, 0)),
                pl.BlockSpec((N1, NO), lambda i: (0, 0)),
                pl.BlockSpec((1, NO), lambda i: (0, 0)),
            ],
            out_specs=pl.BlockSpec((B, NO), lambda i: (0, 0)),
        ),
        compiler_params=pltpu.CompilerParams(
            dimension_semantics=("arbitrary",)),
    )(x, wl, bl, d1, b1)


# ----------------------------------------------------------------------------
# Stage BC / DE: Conv2d(3x3, pad=1) + act  fused with  ConvTranspose2d(3x3, s=2,
# pad=1, out_pad=1) + act, via implicit GEMM and output-phase decomposition.
# One grid step per batch element ("parallel" -> both TCs on v7x get work).
# ----------------------------------------------------------------------------
def _conv_ct_kernel(x_ref, wc_ref, bc_ref, wt_ref, bt_ref,
                    o00, o01, o10, o11, s1, s2,
                    *, H, W, cin, pad, act_mid, act_out):
    HW = H * W
    Cp = LANES

    # Row index (within this batch element's H*W rows) and its w coordinate.
    r = lax.broadcasted_iota(jnp.int32, (HW, Cp), 0)
    w_idx = r & (W - 1)  # W is a power of two (8 / 16)

    # ---- 3x3 conv (padding=1) as 9 accumulated matmuls ----------------------
    s1[...] = jnp.zeros((HW + 2 * pad, Cp), jnp.float32)
    s1[pl.ds(pad, HW), pl.ds(0, cin)] = x_ref[...]

    acc = jnp.zeros((HW, Cp), jnp.float32)
    for kh in range(3):
        for kw in range(3):
            dh, dw = kh - 1, kw - 1
            xt = s1[pl.ds(pad + dh * W + dw, HW), :]
            valid = ((r + dh * W >= 0) & (r + dh * W < HW)
                     & (w_idx + dw >= 0) & (w_idx + dw < W))
            xt = jnp.where(valid, xt, 0.0).astype(jnp.bfloat16)
            acc = acc + jnp.dot(xt, wc_ref[kh * 3 + kw],
                                preferred_element_type=jnp.float32)
    mid = _apply_act(acc + bc_ref[...], act_mid)

    # ---- stride-2 transposed conv via phase decomposition -------------------
    s2[...] = jnp.zeros((HW + 2 * pad, Cp), jnp.float32)
    s2[pl.ds(pad, HW), :] = mid

    out_refs = ((o00, o01), (o10, o11))
    for pi in range(2):
        for pj in range(2):
            pacc = jnp.zeros((HW, Cp), jnp.float32)
            for da in range(pi + 1):
                for db in range(pj + 1):
                    t = CT_TAPS.index((pi, pj, da, db))
                    xt = s2[pl.ds(pad + da * W + db, HW), :]
                    valid = (r + da * W < HW) & (w_idx + db < W)
                    xt = jnp.where(valid, xt, 0.0).astype(jnp.bfloat16)
                    pacc = pacc + jnp.dot(xt, wt_ref[t],
                                          preferred_element_type=jnp.float32)
            out_refs[pi][pj][...] = _apply_act(pacc + bt_ref[...], act_out)


def _conv_ct_stage(x, wc, bc, wt, bt, *, B, H, W, act_mid, act_out):
    assert W & (W - 1) == 0, "spatial width must be a power of two"
    HW = H * W
    assert x.shape[0] == B * HW
    cin = x.shape[1]
    pad = _round_up(W + 1, 8)  # halo rows, 8-aligned for clean sublane stores

    kern = functools.partial(_conv_ct_kernel, H=H, W=W, cin=cin, pad=pad,
                             act_mid=act_mid, act_out=act_out)
    out_shape = tuple(jax.ShapeDtypeStruct((B * HW, LANES), jnp.float32)
                      for _ in range(4))
    return pl.pallas_call(
        kern,
        out_shape=out_shape,
        grid_spec=pltpu.PrefetchScalarGridSpec(
            num_scalar_prefetch=0,
            grid=(B,),
            in_specs=[
                pl.BlockSpec((HW, cin), lambda b: (b, 0)),
                pl.BlockSpec((9, LANES, LANES), lambda b: (0, 0, 0)),
                pl.BlockSpec((1, LANES), lambda b: (0, 0)),
                pl.BlockSpec((9, LANES, LANES), lambda b: (0, 0, 0)),
                pl.BlockSpec((1, LANES), lambda b: (0, 0)),
            ],
            out_specs=tuple(pl.BlockSpec((HW, LANES), lambda b: (b, 0))
                            for _ in range(4)),
            scratch_shapes=[
                pltpu.VMEM((HW + 2 * pad, LANES), jnp.float32),
                pltpu.VMEM((HW + 2 * pad, LANES), jnp.float32),
            ],
        ),
        compiler_params=pltpu.CompilerParams(
            dimension_semantics=("parallel",)),
    )(x, wc, bc, wt, bt)


def _interleave_phases(p00, p01, p10, p11, B, H, W):
    """Depth-to-space: out[b, 2a+pi, 2b'+pj, :] = p_{pi,pj}[b*H*W + a*W + b', :]."""
    C = p00.shape[-1]

    def r(p):
        return p.reshape(B, H, W, C)

    row0 = jnp.stack([r(p00), r(p01)], axis=3)   # (B, H, W, 2, C): pj
    row1 = jnp.stack([r(p10), r(p11)], axis=3)
    full = jnp.stack([row0, row1], axis=2)       # (B, H, 2, W, 2, C): pi
    return full.reshape(B, 2 * H, 2 * W, C)


# ----------------------------------------------------------------------------
# Decoder forward
# ----------------------------------------------------------------------------
def decoder_forward(params, x, *, num_input_channels):
    """x: (B, latent_dim) -> (B, num_input_channels, 32, 32)."""
    B = x.shape[0]

    # Stage A: Linear+GELU and ConvTranspose#1 (4x4 -> 8x8) as one dense chain.
    yA = _stage_a(x, params["lin_w"], params["lin_b"],
                  params["d1_w"], params["d1_b"])            # (B, 64*2c)
    c1_in = yA.reshape(B * 64, yA.shape[1] // 64)            # rows=(b,h,w), cols=2c

    # Stage BC: Conv(2c->2c)+GELU, then ConvTranspose#2 phases (8x8->16x16)+GELU.
    p = _conv_ct_stage(c1_in, params["c1_w"], params["c1_b"],
                       params["ct2_w"], params["ct2_b"],
                       B=B, H=8, W=8, act_mid="gelu", act_out="gelu")
    h16 = _interleave_phases(*p, B, 8, 8).reshape(B * 256, LANES)

    # Stage DE: Conv(c->c)+GELU, then ConvTranspose#3 phases (16x16->32x32)+Tanh.
    q = _conv_ct_stage(h16, params["c2_w"], params["c2_b"],
                       params["ct3_w"], params["ct3_b"],
                       B=B, H=16, W=16, act_mid="gelu", act_out="tanh")
    y32 = _interleave_phases(*q, B, 16, 16)                   # (B, 32, 32, 128)
    y = y32[..., :num_input_channels]
    return jnp.transpose(y, (0, 3, 1, 2))                     # NCHW like torch


# ----------------------------------------------------------------------------
# Parameter init (torch layouts) and one-time packing into kernel layouts
# ----------------------------------------------------------------------------
def init_decoder_params(key, num_input_channels, base_channel_size, latent_dim):
    c = base_channel_size

    def unif(k, shape, fan_in):
        bound = 1.0 / math.sqrt(fan_in)
        return jax.random.uniform(k, shape, jnp.float32, -bound, bound)

    ks = jax.random.split(key, 12)
    raw = {}
    raw["lin_w"] = unif(ks[0], (latent_dim, 4 * 4 * 2 * c), latent_dim)   # torch W.T
    raw["lin_b"] = unif(ks[1], (4 * 4 * 2 * c,), latent_dim)
    raw["ct1_w"] = unif(ks[2], (2 * c, 2 * c, 3, 3), 2 * c * 9)           # (in,out,kh,kw)
    raw["ct1_b"] = unif(ks[3], (2 * c,), 2 * c * 9)
    raw["c1_w"] = unif(ks[4], (2 * c, 2 * c, 3, 3), 2 * c * 9)            # (out,in,kh,kw)
    raw["c1_b"] = unif(ks[5], (2 * c,), 2 * c * 9)
    raw["ct2_w"] = unif(ks[6], (2 * c, c, 3, 3), 2 * c * 9)
    raw["ct2_b"] = unif(ks[7], (c,), 2 * c * 9)
    raw["c2_w"] = unif(ks[8], (c, c, 3, 3), c * 9)
    raw["c2_b"] = unif(ks[9], (c,), c * 9)
    raw["ct3_w"] = unif(ks[10], (c, num_input_channels, 3, 3), c * 9)
    raw["ct3_b"] = unif(ks[11], (num_input_channels,), c * 9)
    return raw


def pack_decoder_params(raw, num_input_channels, base_channel_size, latent_dim):
    """One-time packing of torch-layout weights into kernel-friendly layouts.

    The returned dict contains ONLY jnp arrays (no Python scalars), so it can be
    passed straight through jax.jit.
    """
    c = base_channel_size
    C1, C2, C3 = 2 * c, c, num_input_channels
    N1 = 4 * 4 * C1
    N1p = _round_up(N1, LANES)

    def to_np(a):
        return np.asarray(jax.device_get(a), dtype=np.float32)

    p = {}

    # Linear(latent -> 32c): columns kept in torch order (ch*16 + h*4 + w).
    wl = np.zeros((latent_dim, N1p), np.float32)
    wl[:, :N1] = to_np(raw["lin_w"])
    bl = np.zeros((1, N1p), np.float32)
    bl[0, :N1] = to_np(raw["lin_b"])
    p["lin_w"] = jnp.asarray(wl).astype(jnp.bfloat16)
    p["lin_b"] = jnp.asarray(bl)

    # ConvTranspose#1 on the fixed 4x4 input, folded into a dense (N1p, 64*C1) matmul
    # whose output columns are ordered (h*8 + w)-major then channel (NHWC rows later).
    w1 = to_np(raw["ct1_w"])                       # (C1, C1, 3, 3)
    d = np.zeros((C1, 4, 4, 8, 8, C1), np.float32)
    for kh in range(3):
        for kw in range(3):
            for a in range(4):
                for b in range(4):
                    i = 2 * a - 1 + kh
                    j = 2 * b - 1 + kw
                    if 0 <= i < 8 and 0 <= j < 8:
                        d[:, a, b, i, j, :] += w1[:, :, kh, kw]
    d1 = np.zeros((N1p, 64 * C1), np.float32)
    d1[:N1, :] = d.reshape(N1, 64 * C1)
    b1 = np.tile(to_np(raw["ct1_b"]), 64)[None, :]
    p["d1_w"] = jnp.asarray(d1).astype(jnp.bfloat16)
    p["d1_b"] = jnp.asarray(b1)

    def pack_conv(w, cin, cout):
        w = to_np(w)                               # (cout, cin, 3, 3)
        taps = np.zeros((9, LANES, LANES), np.float32)
        for kh in range(3):
            for kw in range(3):
                taps[kh * 3 + kw, :cin, :cout] = w[:, :, kh, kw].T
        return jnp.asarray(taps).astype(jnp.bfloat16)

    def pack_ct(w, cin, cout):
        w = to_np(w)                               # (cin, cout, 3, 3)
        taps = np.zeros((9, LANES, LANES), np.float32)
        for t, (pi, pj, da, db) in enumerate(CT_TAPS):
            kh = pi + 1 - 2 * da
            kw = pj + 1 - 2 * db
            taps[t, :cin, :cout] = w[:, :, kh, kw]
        return jnp.asarray(taps).astype(jnp.bfloat16)

    def pack_bias(b, cout):
        out = np.zeros((1, LANES), np.float32)
        out[0, :cout] = to_np(b)
        return jnp.asarray(out)

    p["c1_w"] = pack_conv(raw["c1_w"], C1, C1)
    p["c1_b"] = pack_bias(raw["c1_b"], C1)
    p["ct2_w"] = pack_ct(raw["ct2_w"], C1, C2)
    p["ct2_b"] = pack_bias(raw["ct2_b"], C2)
    p["c2_w"] = pack_conv(raw["c2_w"], C2, C2)
    p["c2_b"] = pack_bias(raw["c2_b"], C2)
    p["ct3_w"] = pack_ct(raw["ct3_w"], C2, C3)
    p["ct3_b"] = pack_bias(raw["ct3_b"], C3)
    return p


if __name__ == "__main__":
    B, num_input_channels, base_channel_size, latent_dim = 2, 3, 8, 16

    key = jax.random.PRNGKey(0)
    k_params, k_x = jax.random.split(key)
    raw = init_decoder_params(k_params, num_input_channels,
                              base_channel_size, latent_dim)
    params = pack_decoder_params(raw, num_input_channels,
                                 base_channel_size, latent_dim)
    x = jax.random.normal(k_x, (B, latent_dim), jnp.float32)

    fwd = jax.jit(functools.partial(decoder_forward,
                                    num_input_channels=num_input_channels))
    y = fwd(params, x)
    jax.block_until_ready(y)

    assert y.shape == (B, num_input_channels, 32, 32), y.shape
    assert y.dtype == jnp.float32
    print("KERNEL_OK")
</pallas_src>

<mosaic_0001>
module attributes {stable_mosaic.version = 11 : i64} {
  func.func @_stage_a_kernel(%arg0: i32, %arg1: memref<2x16xf32, #tpu.memory_space<vmem>>, %arg2: memref<16x256xbf16, #tpu.memory_space<vmem>>, %arg3: memref<1x256xf32, #tpu.memory_space<vmem>>, %arg4: memref<256x1024xbf16, #tpu.memory_space<vmem>>, %arg5: memref<1x1024xf32, #tpu.memory_space<vmem>>, %arg6: memref<2x1024xf32, #tpu.memory_space<vmem>>) attributes {dimension_semantics = [#tpu.dimension_semantics<arbitrary>], iteration_bounds = array<i64: 1>, scalar_prefetch = 0 : i64, scratch_operands = 0 : i64, tpu.core_type = #tpu.core_type<tc>, window_params = [{pipeline_mode = #tpu.pipeline_mode<synchronous>, transform_indices = @transform_0, window_bounds = array<i64: 2, 16>}, {pipeline_mode = #tpu.pipeline_mode<synchronous>, transform_indices = @transform_1, window_bounds = array<i64: 16, 256>}, {pipeline_mode = #tpu.pipeline_mode<synchronous>, transform_indices = @transform_2, window_bounds = array<i64: 1, 256>}, {pipeline_mode = #tpu.pipeline_mode<synchronous>, transform_indices = @transform_3, window_bounds = array<i64: 256, 1024>}, {pipeline_mode = #tpu.pipeline_mode<synchronous>, transform_indices = @transform_4, window_bounds = array<i64: 1, 1024>}, {pipeline_mode = #tpu.pipeline_mode<synchronous>, transform_indices = @transform_5, window_bounds = array<i64: 2, 1024>}]} {
    %c0 = arith.constant 0 : index
    %c0_0 = arith.constant 0 : index
    %0 = vector.load %arg1[%c0, %c0_0] : memref<2x16xf32, #tpu.memory_space<vmem>>, vector<2x16xf32>
    %1 = arith.truncf %0 : vector<2x16xf32> to vector<2x16xbf16>
    %c0_1 = arith.constant 0 : index
    %c0_2 = arith.constant 0 : index
    %2 = vector.load %arg2[%c0_1, %c0_2] : memref<16x256xbf16, #tpu.memory_space<vmem>>, vector<16x256xbf16>
    %cst = arith.constant dense<0.000000e+00> : vector<2x256xf32>
    %3 = tpu.matmul %1, %2, %cst {dimension_numbers = #tpu.dot_dimension_numbers<[1], [0], [0], [1], [0, 0, 1, 1], [], []>} : vector<2x16xbf16>, vector<16x256xbf16>, vector<2x256xf32> -> vector<2x256xf32>
    %c0_3 = arith.constant 0 : index
    %c0_4 = arith.constant 0 : index
    %4 = vector.load %arg3[%c0_3, %c0_4] : memref<1x256xf32, #tpu.memory_space<vmem>>, vector<1x256xf32>
    %5 = vector.broadcast %4 : vector<1x256xf32> to vector<2x256xf32>
    %6 = arith.addf %3, %5 : vector<2x256xf32>
    %cst_5 = arith.constant 5.000000e-01 : f32
    %7 = vector.broadcast %cst_5 : f32 to vector<2x256xf32>
    %8 = arith.mulf %7, %6 : vector<2x256xf32>
    %cst_6 = arith.constant 4.471500e-02 : f32
    %9 = vector.broadcast %cst_6 : f32 to vector<2x256xf32>
    %10 = arith.mulf %9, %6 : vector<2x256xf32>
    %11 = arith.mulf %10, %6 : vector<2x256xf32>
    %12 = arith.mulf %11, %6 : vector<2x256xf32>
    %13 = arith.addf %6, %12 : vector<2x256xf32>
    %cst_7 = arith.constant 0.797884583 : f32
    %14 = vector.broadcast %cst_7 : f32 to vector<2x256xf32>
    %15 = arith.mulf %14, %13 : vector<2x256xf32>
    %16 = math.tanh %15 : vector<2x256xf32>
    %cst_8 = arith.constant 1.000000e+00 : f32
    %17 = vector.broadcast %cst_8 : f32 to vector<2x256xf32>
    %18 = arith.addf %17, %16 : vector<2x256xf32>
    %19 = arith.mulf %8, %18 : vector<2x256xf32>
    %20 = arith.truncf %19 : vector<2x256xf32> to vector<2x256xbf16>
    %c0_9 = arith.constant 0 : index
    %c0_10 = arith.constant 0 : index
    %21 = vector.load %arg4[%c0_9, %c0_10] : memref<256x1024xbf16, #tpu.memory_space<vmem>>, vector<256x1024xbf16>
    %cst_11 = arith.constant dense<0.000000e+00> : vector<2x1024xf32>
    %22 = tpu.matmul %20, %21, %cst_11 {dimension_numbers = #tpu.dot_dimension_numbers<[1], [0], [0], [1], [0, 0, 1, 1], [], []>} : vector<2x256xbf16>, vector<256x1024xbf16>, vector<2x1024xf32> -> vector<2x1024xf32>
    %c0_12 = arith.constant 0 : index
    %c0_13 = arith.constant 0 : index
    %23 = vector.load %arg5[%c0_12, %c0_13] : memref<1x1024xf32, #tpu.memory_space<vmem>>, vector<1x1024xf32>
    %24 = vector.broadcast %23 : vector<1x1024xf32> to vector<2x1024xf32>
    %25 = arith.addf %22, %24 : vector<2x1024xf32>
    %cst_14 = arith.constant 5.000000e-01 : f32
    %26 = vector.broadcast %cst_14 : f32 to vector<2x1024xf32>
    %27 = arith.mulf %26, %25 : vector<2x1024xf32>
    %cst_15 = arith.constant 4.471500e-02 : f32
    %28 = vector.broadcast %cst_15 : f32 to vector<2x1024xf32>
    %29 = arith.mulf %28, %25 : vector<2x1024xf32>
    %30 = arith.mulf %29, %25 : vector<2x1024xf32>
    %31 = arith.mulf %30, %25 : vector<2x1024xf32>
    %32 = arith.addf %25, %31 : vector<2x1024xf32>
    %cst_16 = arith.constant 0.797884583 : f32
    %33 = vector.broadcast %cst_16 : f32 to vector<2x1024xf32>
    %34 = arith.mulf %33, %32 : vector<2x1024xf32>
    %35 = math.tanh %34 : vector<2x1024xf32>
    %cst_17 = arith.constant 1.000000e+00 : f32
    %36 = vector.broadcast %cst_17 : f32 to vector<2x1024xf32>
    %37 = arith.addf %36, %35 : vector<2x1024xf32>
    %38 = arith.mulf %27, %37 : vector<2x1024xf32>
    %c0_18 = arith.constant 0 : index
    %c0_19 = arith.constant 0 : index
    %39 = vector.load %arg6[%c0_18, %c0_19] : memref<2x1024xf32, #tpu.memory_space<vmem>>, vector<2x1024xf32>
    tpu.vector_store %arg6[%c0_18, %c0_19], %38 {strides = array<i32>} : memref<2x1024xf32, #tpu.memory_space<vmem>>, vector<2x1024xf32>,
    return
  }
  func.func @transform_0(%arg0: i32) -> (i32, i32) {
    %c0_i32 = arith.constant 0 : i32
    %c0_i32_0 = arith.constant 0 : i32
    %c0_i32_1 = arith.constant 0 : i32
    return %c0_i32, %c0_i32_0 : i32, i32
  }
  func.func @transform_1(%arg0: i32) -> (i32, i32) {
    %c0_i32 = arith.constant 0 : i32
    %c0_i32_0 = arith.constant 0 : i32
    %c0_i32_1 = arith.constant 0 : i32
    return %c0_i32, %c0_i32_0 : i32, i32
  }
  func.func @transform_2(%arg0: i32) -> (i32, i32) {
    %c0_i32 = arith.constant 0 : i32
    %c0_i32_0 = arith.constant 0 : i32
    %c0_i32_1 = arith.constant 0 : i32
    return %c0_i32, %c0_i32_0 : i32, i32
  }
  func.func @transform_3(%arg0: i32) -> (i32, i32) {
    %c0_i32 = arith.constant 0 : i32
    %c0_i32_0 = arith.constant 0 : i32
    %c0_i32_1 = arith.constant 0 : i32
    return %c0_i32, %c0_i32_0 : i32, i32
  }
  func.func @transform_4(%arg0: i32) -> (i32, i32) {
    %c0_i32 = arith.constant 0 : i32
    %c0_i32_0 = arith.constant 0 : i32
    %c0_i32_1 = arith.constant 0 : i32
    return %c0_i32, %c0_i32_0 : i32, i32
  }
  func.func @transform_5(%arg0: i32) -> (i32, i32) {
    %c0_i32 = arith.constant 0 : i32
    %c0_i32_0 = arith.constant 0 : i32
    %c0_i32_1 = arith.constant 0 : i32
    return %c0_i32, %c0_i32_0 : i32, i32
  }
}

module attributes {stable_mosaic.version = 11 : i64} {
  func.func @_conv_ct_kernel(%arg0: i32, %arg1: memref<64x16xf32, #tpu.memory_space<vmem>>, %arg2: memref<9x128x128xbf16, #tpu.memory_space<vmem>>, %arg3: memref<1x128xf32, #tpu.memory_space<vmem>>, %arg4: memref<9x128x128xbf16, #tpu.memory_space<vmem>>, %arg5: memref<1x128xf32, #tpu.memory_space<vmem>>, %arg6: memref<64x128xf32, #tpu.memory_space<vmem>>, %arg7: memref<64x128xf32, #tpu.memory_space<vmem>>, %arg8: memref<64x128xf32, #tpu.memory_space<vmem>>, %arg9: memref<64x128xf32, #tpu.memory_space<vmem>>, %arg10: memref<96x128xf32, #tpu.memory_space<vmem>>, %arg11: memref<96x128xf32, #tpu.memory_space<vmem>>) attributes {dimension_semantics = [#tpu.dimension_semantics<parallel>], iteration_bounds = array<i64: 2>, scalar_prefetch = 0 : i64, scratch_operands = 2 : i64, tpu.core_type = #tpu.core_type<tc>, window_params = [{transform_indices = @transform_0, window_bounds = array<i64: 64, 16>}, {pipeline_mode = #tpu.pipeline_mode<synchronous>, transform_indices = @transform_1, window_bounds = array<i64: 9, 128, 128>}, {pipeline_mode = #tpu.pipeline_mode<synchronous>, transform_indices = @transform_2, window_bounds = array<i64: 1, 128>}, {pipeline_mode = #tpu.pipeline_mode<synchronous>, transform_indices = @transform_3, window_bounds = array<i64: 9, 128, 128>}, {pipeline_mode = #tpu.pipeline_mode<synchronous>, transform_indices = @transform_4, window_bounds = array<i64: 1, 128>}, {transform_indices = @transform_5, window_bounds = array<i64: 64, 128>}, {transform_indices = @transform_6, window_bounds = array<i64: 64, 128>}, {transform_indices = @transform_7, window_bounds = array<i64: 64, 128>}, {transform_indices = @transform_8, window_bounds = array<i64: 64, 128>}]} {
    %0 = tpu.iota {dimensions = array<i32: 0>} : vector<64x128xi32>
    %c7_i32 = arith.constant 7 : i32
    %1 = vector.broadcast %c7_i32 : i32 to vector<64x128xi32>
    %2 = arith.andi %0, %1 : vector<64x128xi32>
    %cst = arith.constant 0.000000e+00 : f32
    %3 = vector.broadcast %cst : f32 to vector<96x128xf32>
    %c0 = arith.constant 0 : index
    %c0_0 = arith.constant 0 : index
    %4 = vector.load %arg10[%c0, %c0_0] : memref<96x128xf32, #tpu.memory_space<vmem>>, vector<96x128xf32>
    tpu.vector_store %arg10[%c0, %c0_0], %3 {strides = array<i32>} : memref<96x128xf32, #tpu.memory_space<vmem>>, vector<96x128xf32>,
    %c0_1 = arith.constant 0 : index
    %c0_2 = arith.constant 0 : index
    %5 = vector.load %arg1[%c0_1, %c0_2] : memref<64x16xf32, #tpu.memory_space<vmem>>, vector<64x16xf32>
    %c16 = arith.constant 16 : index
    %c0_3 = arith.constant 0 : index
    %6 = vector.load %arg10[%c16, %c0_3] : memref<96x128xf32, #tpu.memory_space<vmem>>, vector<64x16xf32>
    tpu.vector_store %arg10[%c16, %c0_3], %5 {strides = array<i32>} : memref<96x128xf32, #tpu.memory_space<vmem>>, vector<64x16xf32>,
    %cst_4 = arith.constant 0.000000e+00 : f32
    %7 = vector.broadcast %cst_4 : f32 to vector<64x128xf32>
    %c7 = arith.constant 7 : index
    %c0_5 = arith.constant 0 : index
    %8 = vector.load %arg10[%c7, %c0_5] : memref<96x128xf32, #tpu.memory_space<vmem>>, vector<64x128xf32>
    %c-8_i32 = arith.constant -8 : i32
    %9 = vector.broadcast %c-8_i32 : i32 to vector<64x128xi32>
    %10 = arith.addi %0, %9 : vector<64x128xi32>
    %c0_i32 = arith.constant 0 : i32
    %11 = vector.broadcast %c0_i32 : i32 to vector<64x128xi32>
    %12 = arith.cmpi sge, %10, %11 : vector<64x128xi32>
    %c-8_i32_6 = arith.constant -8 : i32
    %13 = vector.broadcast %c-8_i32_6 : i32 to vector<64x128xi32>
    %14 = arith.addi %0, %13 : vector<64x128xi32>
    %c64_i32 = arith.constant 64 : i32
    %15 = vector.broadcast %c64_i32 : i32 to vector<64x128xi32>
    %16 = arith.cmpi slt, %14, %15 : vector<64x128xi32>
    %17 = arith.andi %12, %16 : vector<64x128xi1>
    %c-1_i32 = arith.constant -1 : i32
    %18 = vector.broadcast %c-1_i32 : i32 to vector<64x128xi32>
    %19 = arith.addi %2, %18 : vector<64x128xi32>
    %c0_i32_7 = arith.constant 0 : i32
    %20 = vector.broadcast %c0_i32_7 : i32 to vector<64x128xi32>
    %21 = arith.cmpi sge, %19, %20 : vector<64x128xi32>
    %22 = arith.andi %17, %21 : vector<64x128xi1>
    %c-1_i32_8 = arith.constant -1 : i32
    %23 = vector.broadcast %c-1_i32_8 : i32 to vector<64x128xi32>
    %24 = arith.addi %2, %23 : vector<64x128xi32>
    %c8_i32 = arith.constant 8 : i32
    %25 = vector.broadcast %c8_i32 : i32 to vector<64x128xi32>
    %26 = arith.cmpi slt, %24, %25 : vector<64x128xi32>
    %27 = arith.andi %22, %26 : vector<64x128xi1>
    %cst_9 = arith.constant 0.000000e+00 : f32
    %28 = vector.broadcast %cst_9 : f32 to vector<64x128xf32>
    %29 = arith.select %27, %8, %28 : vector<64x128xi1>, vector<64x128xf32>
    %30 = arith.truncf %29 : vector<64x128xf32> to vector<64x128xbf16>
    %c0_10 = arith.constant 0 : index
    %c0_11 = arith.constant 0 : index
    %c0_12 = arith.constant 0 : index
    %31 = vector.load %arg2[%c0_10, %c0_11, %c0_12] : memref<9x128x128xbf16, #tpu.memory_space<vmem>>, vector<1x128x128xbf16>
    %32 = vector.shape_cast %31 : vector<1x128x128xbf16> to vector<128x128xbf16>
    %cst_13 = arith.constant dense<0.000000e+00> : vector<64x128xf32>
    %33 = tpu.matmul %30, %32, %cst_13 {dimension_numbers = #tpu.dot_dimension_numbers<[1], [0], [0], [1], [0, 0, 1, 1], [], []>} : vector<64x128xbf16>, vector<128x128xbf16>, vector<64x128xf32> -> vector<64x128xf32>
    %34 = arith.addf %7, %33 : vector<64x128xf32>
    %c8 = arith.constant 8 : index
    %c0_14 = arith.constant 0 : index
    %35 = vector.load %arg10[%c8, %c0_14] : memref<96x128xf32, #tpu.memory_space<vmem>>, vector<64x128xf32>
    %c-8_i32_15 = arith.constant -8 : i32
    %36 = vector.broadcast %c-8_i32_15 : i32 to vector<64x128xi32>
    %37 = arith.addi %0, %36 : vector<64x128xi32>
    %c0_i32_16 = arith.constant 0 : i32
    %38 = vector.broadcast %c0_i32_16 : i32 to vector<64x128xi32>
    %39 = arith.cmpi sge, %37, %38 : vector<64x128xi32>
    %c-8_i32_17 = arith.constant -8 : i32
    %40 = vector.broadcast %c-8_i32_17 : i32 to vector<64x128xi32>
    %41 = arith.addi %0, %40 : vector<64x128xi32>
    %c64_i32_18 = arith.constant 64 : i32
    %42 = vector.broadcast %c64_i32_18 : i32 to vector<64x128xi32>
    %43 = arith.cmpi slt, %41, %42 : vector<64x128xi32>
    %44 = arith.andi %39, %43 : vector<64x128xi1>
    %c0_i32_19 = arith.constant 0 : i32
    %45 = vector.broadcast %c0_i32_19 : i32 to vector<64x128xi32>
    %46 = arith.addi %2, %45 : vector<64x128xi32>
    %c0_i32_20 = arith.constant 0 : i32
    %47 = vector.broadcast %c0_i32_20 : i32 to vector<64x128xi32>
    %48 = arith.cmpi sge, %46, %47 : vector<64x128xi32>
    %49 = arith.andi %44, %48 : vector<64x128xi1>
    %c0_i32_21 = arith.constant 0 : i32
    %50 = vector.broadcast %c0_i32_21 : i32 to vector<64x128xi32>
    %51 = arith.addi %2, %50 : vector<64x128xi32>
    %c8_i32_22 = arith.constant 8 : i32
    %52 = vector.broadcast %c8_i32_22 : i32 to vector<64x128xi32>
    %53 = arith.cmpi slt, %51, %52 : vector<64x128xi32>
    %54 = arith.andi %49, %53 : vector<64x128xi1>
    %cst_23 = arith.constant 0.000000e+00 : f32
    %55 = vector.broadcast %cst_23 : f32 to vector<64x128xf32>
    %56 = arith.select %54, %35, %55 : vector<64x128xi1>, vector<64x128xf32>
    %57 = arith.truncf %56 : vector<64x128xf32> to vector<64x128xbf16>
    %c1 = arith.constant 1 : index
    %c0_24 = arith.constant 0 : index
    %c0_25 = arith.constant 0 : index
    %58 = vector.load %arg2[%c1, %c0_24, %c0_25] : memref<9x128x128xbf16, #tpu.memory_space<vmem>>, vector<1x128x128xbf16>
    %59 = vector.shape_cast %58 : vector<1x128x128xbf16> to vector<128x128xbf16>
    %cst_26 = arith.constant dense<0.000000e+00> : vector<64x128xf32>
    %60 = tpu.matmul %57, %59, %cst_26 {dimension_numbers = #tpu.dot_dimension_numbers<[1], [0], [0], [1], [0, 0, 1, 1], [], []>} : vector<64x128xbf16>, vector<128x128xbf16>, vector<64x128xf32> -> vector<64x128xf32>
    %61 = arith.addf %34, %60 : vector<64x128xf32>
    %c9 = arith.constant 9 : index
    %c0_27 = arith.constant 0 : index
    %62 = vector.load %arg10[%c9, %c0_27] : memref<96x128xf32, #tpu.memory_space<vmem>>, vector<64x128xf32>
    %c-8_i32_28 = arith.constant -8 : i32
    %63 = vector.broadcast %c-8_i32_28 : i32 to vector<64x128xi32>
    %64 = arith.addi %0, %63 : vector<64x128xi32>
    %c0_i32_29 = arith.constant 0 : i32
    %65 = vector.broadcast %c0_i32_29 : i32 to vector<64x128xi32>
    %66 = arith.cmpi sge, %64, %65 : vector<64x128xi32>
    %c-8_i32_30 = arith.constant -8 : i32
    %67 = vector.broadcast %c-8_i32_30 : i32 to vector<64x128xi32>
    %68 = arith.addi %0, %67 : vector<64x128xi32>
    %c64_i32_31 = arith.constant 64 : i32
    %69 = vector.broadcast %c64_i32_31 : i32 to vector<64x128xi32>
    %70 = arith.cmpi slt, %68, %69 : vector<64x128xi32>
    %71 = arith.andi %66, %70 : vector<64x128xi1>
    %c1_i32 = arith.constant 1 : i32
    %72 = vector.broadcast %c1_i32 : i32 to vector<64x128xi32>
    %73 = arith.addi %2, %72 : vector<64x128xi32>
    %c0_i32_32 = arith.constant 0 : i32
    %74 = vector.broadcast %c0_i32_32 : i32 to vector<64x128xi32>
    %75 = arith.cmpi sge, %73, %74 : vector<64x128xi32>
    %76 = arith.andi %71, %75 : vector<64x128xi1>
    %c1_i32_33 = arith.constant 1 : i32
    %77 = vector.broadcast %c1_i32_33 : i32 to vector<64x128xi32>
    %78 = arith.addi %2, %77 : vector<64x128xi32>
    %c8_i32_34 = arith.constant 8 : i32
    %79 = vector.broadcast %c8_i32_34 : i32 to vector<64x128xi32>
    %80 = arith.cmpi slt, %78, %79 : vector<64x128xi32>
    %81 = arith.andi %76, %80 : vector<64x128xi1>
    %cst_35 = arith.constant 0.000000e+00 : f32
    %82 = vector.broadcast %cst_35 : f32 to vector<64x128xf32>
    %83 = arith.select %81, %62, %82 : vector<64x128xi1>, vector<64x128xf32>
    %84 = arith.truncf %83 : vector<64x128xf32> to vector<64x128xbf16>
    %c2 = arith.constant 2 : index
    %c0_36 = arith.constant 0 : index
    %c0_37 = arith.constant 0 : index
    %85 = vector.load %arg2[%c2, %c0_36, %c0_37] : memref<9x128x128xbf16, #tpu.memory_space<vmem>>, vector<1x128x128xbf16>
    %86 = vector.shape_cast %85 : vector<1x128x128xbf16> to vector<128x128xbf16>
    %cst_38 = arith.constant dense<0.000000e+00> : vector<64x128xf32>
    %87 = tpu.matmul %84, %86, %cst_38 {dimension_numbers = #tpu.dot_dimension_numbers<[1], [0], [0], [1], [0, 0, 1, 1], [], []>} : vector<64x128xbf16>, vector<128x128xbf16>, vector<64x128xf32> -> vector<64x128xf32>
    %88 = arith.addf %61, %87 : vector<64x128xf32>
    %c15 = arith.constant 15 : index
    %c0_39 = arith.constant 0 : index
    %89 = vector.load %arg10[%c15, %c0_39] : memref<96x128xf32, #tpu.memory_space<vmem>>, vector<64x128xf32>
    %c0_i32_40 = arith.constant 0 : i32
    %90 = vector.broadcast %c0_i32_40 : i32 to vector<64x128xi32>
    %91 = arith.addi %0, %90 : vector<64x128xi32>
    %c0_i32_41 = arith.constant 0 : i32
    %92 = vector.broadcast %c0_i32_41 : i32 to vector<64x128xi32>
    %93 = arith.cmpi sge, %91, %92 : vector<64x128xi32>
    %c0_i32_42 = arith.constant 0 : i32
    %94 = vector.broadcast %c0_i32_42 : i32 to vector<64x128xi32>
    %95 = arith.addi %0, %94 : vector<64x128xi32>
    %c64_i32_43 = arith.constant 64 : i32
    %96 = vector.broadcast %c64_i32_43 : i32 to vector<64x128xi32>
    %97 = arith.cmpi slt, %95, %96 : vector<64x128xi32>
    %98 = arith.andi %93, %97 : vector<64x128xi1>
    %c-1_i32_44 = arith.constant -1 : i32
    %99 = vector.broadcast %c-1_i32_44 : i32 to vector<64x128xi32>
    %100 = arith.addi %2, %99 : vector<64x128xi32>
    %c0_i32_45 = arith.constant 0 : i32
    %101 = vector.broadcast %c0_i32_45 : i32 to vector<64x128xi32>
    %102 = arith.cmpi sge, %100, %101 : vector<64x128xi32>
    %103 = arith.andi %98, %102 : vector<64x128xi1>
    %c-1_i32_46 = arith.constant -1 : i32
    %104 = vector.broadcast %c-1_i32_46 : i32 to vector<64x128xi32>
    %105 = arith.addi %2, %104 : vector<64x128xi32>
    %c8_i32_47 = arith.constant 8 : i32
    %106 = vector.broadcast %c8_i32_47 : i32 to vector<64x128xi32>
    %107 = arith.cmpi slt, %105, %106 : vector<64x128xi32>
    %108 = arith.andi %103, %107 : vector<64x128xi1>
    %cst_48 = arith.constant 0.000000e+00 : f32
    %109 = vector.broadcast %cst_48 : f32 to vector<64x128xf32>
    %110 = arith.select %108, %89, %109 : vector<64x128xi1>, vector<64x128xf32>
    %111 = arith.truncf %110 : vector<64x128xf32> to vector<64x128xbf16>
    %c3 = arith.constant 3 : index
    %c0_49 = arith.constant 0 : index
    %c0_50 = arith.constant 0 : index
    %112 = vector.load %arg2[%c3, %c0_49, %c0_50] : memref<9x128x128xbf16, #tpu.memory_space<vmem>>, vector<1x128x128xbf16>
    %113 = vector.shape_cast %112 : vector<1x128x128xbf16> to vector<128x128xbf16>
    %cst_51 = arith.constant dense<0.000000e+00> : vector<64x128xf32>
    %114 = tpu.matmul %111, %113, %cst_51 {dimension_numbers = #tpu.dot_dimension_numbers<[1], [0], [0], [1], [0, 0, 1, 1], [], []>} : vector<64x128xbf16>, vector<128x128xbf16>, vector<64x128xf32> -> vector<64x128xf32>
    %115 = arith.addf %88, %114 : vector<64x128xf32>
    %c16_52 = arith.constant 16 : index
    %c0_53 = arith.constant 0 : index
    %116 = vector.load %arg10[%c16_52, %c0_53] : memref<96x128xf32, #tpu.memory_space<vmem>>, vector<64x128xf32>
    %c0_i32_54 = arith.constant 0 : i32
    %117 = vector.broadcast %c0_i32_54 : i32 to vector<64x128xi32>
    %118 = arith.addi %0, %117 : vector<64x128xi32>
    %c0_i32_55 = arith.constant 0 : i32
    %119 = vector.broadcast %c0_i32_55 : i32 to vector<64x128xi32>
    %120 = arith.cmpi sge, %118, %119 : vector<64x128xi32>
    %c0_i32_56 = arith.constant 0 : i32
    %121 = vector.broadcast %c0_i32_56 : i32 to vector<64x128xi32>
    %122 = arith.addi %0, %121 : vector<64x128xi32>
    %c64_i32_57 = arith.constant 64 : i32
    %123 = vector.broadcast %c64_i32_57 : i32 to vector<64x128xi32>
    %124 = arith.cmpi slt, %122, %123 : vector<64x128xi32>
    %125 = arith.andi %120, %124 : vector<64x128xi1>
    %c0_i32_58 = arith.constant 0 : i32
    %126 = vector.broadcast %c0_i32_58 : i32 to vector<64x128xi32>
    %127 = arith.addi %2, %126 : vector<64x128xi32>
    %c0_i32_59 = arith.constant 0 : i32
    %128 = vector.broadcast %c0_i32_59 : i32 to vector<64x128xi32>
    %129 = arith.cmpi sge, %127, %128 : vector<64x128xi32>
    %130 = arith.andi %125, %129 : vector<64x128xi1>
    %c0_i32_60 = arith.constant 0 : i32
    %131 = vector.broadcast %c0_i32_60 : i32 to vector<64x128xi32>
    %132 = arith.addi %2, %131 : vector<64x128xi32>
    %c8_i32_61 = arith.constant 8 : i32
    %133 = vector.broadcast %c8_i32_61 : i32 to vector<64x128xi32>
    %134 = arith.cmpi slt, %132, %133 : vector<64x128xi32>
    %135 = arith.andi %130, %134 : vector<64x128xi1>
    %cst_62 = arith.constant 0.000000e+00 : f32
    %136 = vector.broadcast %cst_62 : f32 to vector<64x128xf32>
    %137 = arith.select %135, %116, %136 : vector<64x128xi1>, vector<64x128xf32>
    %138 = arith.truncf %137 : vector<64x128xf32> to vector<64x128xbf16>
    %c4 = arith.constant 4 : index
    %c0_63 = arith.constant 0 : index
    %c0_64 = arith.constant 0 : index
    %139 = vector.load %arg2[%c4, %c0_63, %c0_64] : memref<9x128x128xbf16, #tpu.memory_space<vmem>>, vector<1x128x128xbf16>
    %140 = vector.shape_cast %139 : vector<1x128x128xbf16> to vector<128x128xbf16>
    %cst_65 = arith.constant dense<0.000000e+00> : vector<64x128xf32>
    %141 = tpu.matmul %138, %140, %cst_65 {dimension_numbers = #tpu.dot_dimension_numbers<[1], [0], [0], [1], [0, 0, 1, 1], [], []>} : vector<64x128xbf16>, vector<128x128xbf16>, vector<64x128xf32> -> vector<64x128xf32>
    %142 = arith.addf %115, %141 : vector<64x128xf32>
    %c17 = arith.constant 17 : index
    %c0_66 = arith.constant 0 : index
    %143 = vector.load %arg10[%c17, %c0_66] : memref<96x128xf32, #tpu.memory_space<vmem>>, vector<64x128xf32>
    %c0_i32_67 = arith.constant 0 : i32
    %144 = vector.broadcast %c0_i32_67 : i32 to vector<64x128xi32>
    %145 = arith.addi %0, %144 : vector<64x128xi32>
    %c0_i32_68 = arith.constant 0 : i32
    %146 = vector.broadcast %c0_i32_68 : i32 to vector<64x128xi32>
    %147 = arith.cmpi sge, %145, %146 : vector<64x128xi32>
    %c0_i32_69 = arith.constant 0 : i32
    %148 = vector.broadcast %c0_i32_69 : i32 to vector<64x128xi32>
    %149 = arith.addi %0, %148 : vector<64x128xi32>
    %c64_i32_70 = arith.constant 64 : i32
    %150 = vector.broadcast %c64_i32_70 : i32 to vector<64x128xi32>
    %151 = arith.cmpi slt, %149, %150 : vector<64x128xi32>
    %152 = arith.andi %147, %151 : vector<64x128xi1>
    %c1_i32_71 = arith.constant 1 : i32
    %153 = vector.broadcast %c1_i32_71 : i32 to vector<64x128xi32>
    %154 = arith.addi %2, %153 : vector<64x128xi32>
    %c0_i32_72 = arith.constant 0 : i32
    %155 = vector.broadcast %c0_i32_72 : i32 to vector<64x128xi32>
    %156 = arith.cmpi sge, %154, %155 : vector<64x128xi32>
    %157 = arith.andi %152, %156 : vector<64x128xi1>
    %c1_i32_73 = arith.constant 1 : i32
    %158 = vector.broadcast %c1_i32_73 : i32 to vector<64x128xi32>
    %159 = arith.addi %2, %158 : vector<64x128xi32>
    %c8_i32_74 = arith.constant 8 : i32
    %160 = vector.broadcast %c8_i32_74 : i32 to vector<64x128xi32>
    %161 = arith.cmpi slt, %159, %160 : vector<64x128xi32>
    %162 = arith.andi %157, %161 : vector<64x128xi1>
    %cst_75 = arith.constant 0.000000e+00 : f32
    %163 = vector.broadcast %cst_75 : f32 to vector<64x128xf32>
    %164 = arith.select %162, %143, %163 : vector<64x128xi1>, vector<64x128xf32>
    %165 = arith.truncf %164 : vector<64x128xf32> to vector<64x128xbf16>
    %c5 = arith.constant 5 : index
    %c0_76 = arith.constant 0 : index
    %c0_77 = arith.constant 0 : index
    %166 = vector.load %arg2[%c5, %c0_76, %c0_77] : memref<9x128x128xbf16, #tpu.memory_space<vmem>>, vector<1x128x128xbf16>
    %167 = vector.shape_cast %166 : vector<1x128x128xbf16> to vector<128x128xbf16>
    %cst_78 = arith.constant dense<0.000000e+00> : vector<64x128xf32>
    %168 = tpu.matmul %165, %167, %cst_78 {dimension_numbers = #tpu.dot_dimension_numbers<[1], [0], [0], [1], [0, 0, 1, 1], [], []>} : vector<64x128xbf16>, vector<128x128xbf16>, vector<64x128xf32> -> vector<64x128xf32>
    %169 = arith.addf %142, %168 : vector<64x128xf32>
    %c23 = arith.constant 23 : index
    %c0_79 = arith.constant 0 : index
    %170 = vector.load %arg10[%c23, %c0_79] : memref<96x128xf32, #tpu.memory_space<vmem>>, vector<64x128xf32>
    %c8_i32_80 = arith.constant 8 : i32
    %171 = vector.broadcast %c8_i32_80 : i32 to vector<64x128xi32>
    %172 = arith.addi %0, %171 : vector<64x128xi32>
    %c0_i32_81 = arith.constant 0 : i32
    %173 = vector.broadcast %c0_i32_81 : i32 to vector<64x128xi32>
    %174 = arith.cmpi sge, %172, %173 : vector<64x128xi32>
    %c8_i32_82 = arith.constant 8 : i32
    %175 = vector.broadcast %c8_i32_82 : i32 to vector<64x128xi32>
    %176 = arith.addi %0, %175 : vector<64x128xi32>
    %c64_i32_83 = arith.constant 64 : i32
    %177 = vector.broadcast %c64_i32_83 : i32 to vector<64x128xi32>
    %178 = arith.cmpi slt, %176, %177 : vector<64x128xi32>
    %179 = arith.andi %174, %178 : vector<64x128xi1>
    %c-1_i32_84 = arith.constant -1 : i32
    %180 = vector.broadcast %c-1_i32_84 : i32 to vector<64x128xi32>
    %181 = arith.addi %2, %180 : vector<64x128xi32>
    %c0_i32_85 = arith.constant 0 : i32
    %182 = vector.broadcast %c0_i32_85 : i32 to vector<64x128xi32>
    %183 = arith.cmpi sge, %181, %182 : vector<64x128xi32>
    %184 = arith.andi %179, %183 : vector<64x128xi1>
    %c-1_i32_86 = arith.constant -1 : i32
    %185 = vector.broadcast %c-1_i32_86 : i32 to vector<64x128xi32>
    %186 = arith.addi %2, %185 : vector<64x128xi32>
    %c8_i32_87 = arith.constant 8 : i32
    %187 = vector.broadcast %c8_i32_87 : i32 to vector<64x128xi32>
    %188 = arith.cmpi slt, %186, %187 : vector<64x128xi32>
    %189 = arith.andi %184, %188 : vector<64x128xi1>
    %cst_88 = arith.constant 0.000000e+00 : f32
    %190 = vector.broadcast %cst_88 : f32 to vector<64x128xf32>
    %191 = arith.select %189, %170, %190 : vector<64x128xi1>, vector<64x128xf32>
    %192 = arith.truncf %191 : vector<64x128xf32> to vector<64x128xbf16>
    %c6 = arith.constant 6 : index
    %c0_89 = arith.constant 0 : index
    %c0_90 = arith.constant 0 : index
    %193 = vector.load %arg2[%c6, %c0_89, %c0_90] : memref<9x128x128xbf16, #tpu.memory_space<vmem>>, vector<1x128x128xbf16>
    %194 = vector.shape_cast %193 : vector<1x128x128xbf16> to vector<128x128xbf16>
    %cst_91 = arith.constant dense<0.000000e+00> : vector<64x128xf32>
    %195 = tpu.matmul %192, %194, %cst_91 {dimension_numbers = #tpu.dot_dimension_numbers<[1], [0], [0], [1], [0, 0, 1, 1], [], []>} : vector<64x128xbf16>, vector<128x128xbf16>, vector<64x128xf32> -> vector<64x128xf32>
    %196 = arith.addf %169, %195 : vector<64x128xf32>
    %c24 = arith.constant 24 : index
    %c0_92 = arith.constant 0 : index
    %197 = vector.load %arg10[%c24, %c0_92] : memref<96x128xf32, #tpu.memory_space<vmem>>, vector<64x128xf32>
    %c8_i32_93 = arith.constant 8 : i32
    %198 = vector.broadcast %c8_i32_93 : i32 to vector<64x128xi32>
    %199 = arith.addi %0, %198 : vector<64x128xi32>
    %c0_i32_94 = arith.constant 0 : i32
    %200 = vector.broadcast %c0_i32_94 : i32 to vector<64x128xi32>
    %201 = arith.cmpi sge, %199, %200 : vector<64x128xi32>
    %c8_i32_95 = arith.constant 8 : i32
    %202 = vector.broadcast %c8_i32_95 : i32 to vector<64x128xi32>
    %203 = arith.addi %0, %202 : vector<64x128xi32>
    %c64_i32_96 = arith.constant 64 : i32
    %204 = vector.broadcast %c64_i32_96 : i32 to vector<64x128xi32>
    %205 = arith.cmpi slt, %203, %204 : vector<64x128xi32>
    %206 = arith.andi %201, %205 : vector<64x128xi1>
    %c0_i32_97 = arith.constant 0 : i32
    %207 = vector.broadcast %c0_i32_97 : i32 to vector<64x128xi32>
    %208 = arith.addi %2, %207 : vector<64x128xi32>
    %c0_i32_98 = arith.constant 0 : i32
    %209 = vector.broadcast %c0_i32_98 : i32 to vector<64x128xi32>
    %210 = arith.cmpi sge, %208, %209 : vector<64x128xi32>
    %211 = arith.andi %206, %210 : vector<64x128xi1>
    %c0_i32_99 = arith.constant 0 : i32
    %212 = vector.broadcast %c0_i32_99 : i32 to vector<64x128xi32>
    %213 = arith.addi %2, %212 : vector<64x128xi32>
    %c8_i32_100 = arith.constant 8 : i32
    %214 = vector.broadcast %c8_i32_100 : i32 to vector<64x128xi32>
    %215 = arith.cmpi slt, %213, %214 : vector<64x128xi32>
    %216 = arith.andi %211, %215 : vector<64x128xi1>
    %cst_101 = arith.constant 0.000000e+00 : f32
    %217 = vector.broadcast %cst_101 : f32 to vector<64x128xf32>
    %218 = arith.select %216, %197, %217 : vector<64x128xi1>, vector<64x128xf32>
    %219 = arith.truncf %218 : vector<64x128xf32> to vector<64x128xbf16>
    %c7_102 = arith.constant 7 : index
    %c0_103 = arith.constant 0 : index
    %c0_104 = arith.constant 0 : index
    %220 = vector.load %arg2[%c7_102, %c0_103, %c0_104] : memref<9x128x128xbf16, #tpu.memory_space<vmem>>, vector<1x128x128xbf16>
    %221 = vector.shape_cast %220 : vector<1x128x128xbf16> to vector<128x128xbf16>
    %cst_105 = arith.constant dense<0.000000e+00> : vector<64x128xf32>
    %222 = tpu.matmul %219, %221, %cst_105 {dimension_numbers = #tpu.dot_dimension_numbers<[1], [0], [0], [1], [0, 0, 1, 1], [], []>} : vector<64x128xbf16>, vector<128x128xbf16>, vector<64x128xf32> -> vector<64x128xf32>
    %223 = arith.addf %196, %222 : vector<64x128xf32>
    %c25 = arith.constant 25 : index
    %c0_106 = arith.constant 0 : index
    %224 = vector.load %arg10[%c25, %c0_106] : memref<96x128xf32, #tpu.memory_space<vmem>>, vector<64x128xf32>
    %c8_i32_107 = arith.constant 8 : i32
    %225 = vector.broadcast %c8_i32_107 : i32 to vector<64x128xi32>
    %226 = arith.addi %0, %225 : vector<64x128xi32>
    %c0_i32_108 = arith.constant 0 : i32
    %227 = vector.broadcast %c0_i32_108 : i32 to vector<64x128xi32>
    %228 = arith.cmpi sge, %226, %227 : vector<64x128xi32>
    %c8_i32_109 = arith.constant 8 : i32
    %229 = vector.broadcast %c8_i32_109 : i32 to vector<64x128xi32>
    %230 = arith.addi %0, %229 : vector<64x128xi32>
    %c64_i32_110 = arith.constant 64 : i32
    %231 = vector.broadcast %c64_i32_110 : i32 to vector<64x128xi32>
    %232 = arith.cmpi slt, %230, %231 : vector<64x128xi32>
    %233 = arith.andi %228, %232 : vector<64x128xi1>
    %c1_i32_111 = arith.constant 1 : i32
    %234 = vector.broadcast %c1_i32_111 : i32 to vector<64x128xi32>
    %235 = arith.addi %2, %234 : vector<64x128xi32>
    %c0_i32_112 = arith.constant 0 : i32
    %236 = vector.broadcast %c0_i32_112 : i32 to vector<64x128xi32>
    %237 = arith.cmpi sge, %235, %236 : vector<64x128xi32>
    %238 = arith.andi %233, %237 : vector<64x128xi1>
    %c1_i32_113 = arith.constant 1 : i32
    %239 = vector.broadcast %c1_i32_113 : i32 to vector<64x128xi32>
    %240 = arith.addi %2, %239 : vector<64x128xi32>
    %c8_i32_114 = arith.constant 8 : i32
    %241 = vector.broadcast %c8_i32_114 : i32 to vector<64x128xi32>
    %242 = arith.cmpi slt, %240, %241 : vector<64x128xi32>
    %243 = arith.andi %238, %242 : vector<64x128xi1>
    %cst_115 = arith.constant 0.000000e+00 : f32
    %244 = vector.broadcast %cst_115 : f32 to vector<64x128xf32>
    %245 = arith.select %243, %224, %244 : vector<64x128xi1>, vector<64x128xf32>
    %246 = arith.truncf %245 : vector<64x128xf32> to vector<64x128xbf16>
    %c8_116 = arith.constant 8 : index
    %c0_117 = arith.constant 0 : index
    %c0_118 = arith.constant 0 : index
    %247 = vector.load %arg2[%c8_116, %c0_117, %c0_118] : memref<9x128x128xbf16, #tpu.memory_space<vmem>>, vector<1x128x128xbf16>
    %248 = vector.shape_cast %247 : vector<1x128x128xbf16> to vector<128x128xbf16>
    %cst_119 = arith.constant dense<0.000000e+00> : vector<64x128xf32>
    %249 = tpu.matmul %246, %248, %cst_119 {dimension_numbers = #tpu.dot_dimension_numbers<[1], [0], [0], [1], [0, 0, 1, 1], [], []>} : vector<64x128xbf16>, vector<128x128xbf16>, vector<64x128xf32> -> vector<64x128xf32>
    %250 = arith.addf %223, %249 : vector<64x128xf32>
    %c0_120 = arith.constant 0 : index
    %c0_121 = arith.constant 0 : index
    %251 = vector.load %arg3[%c0_120, %c0_121] : memref<1x128xf32, #tpu.memory_space<vmem>>, vector<1x128xf32>
    %252 = vector.broadcast %251 : vector<1x128xf32> to vector<64x128xf32>
    %253 = arith.addf %250, %252 : vector<64x128xf32>
    %cst_122 = arith.constant 5.000000e-01 : f32
    %254 = vector.broadcast %cst_122 : f32 to vector<64x128xf32>
    %255 = arith.mulf %254, %253 : vector<64x128xf32>
    %cst_123 = arith.constant 4.471500e-02 : f32
    %256 = vector.broadcast %cst_123 : f32 to vector<64x128xf32>
    %257 = arith.mulf %256, %253 : vector<64x128xf32>
    %258 = arith.mulf %257, %253 : vector<64x128xf32>
    %259 = arith.mulf %258, %253 : vector<64x128xf32>
    %260 = arith.addf %253, %259 : vector<64x128xf32>
    %cst_124 = arith.constant 0.797884583 : f32
    %261 = vector.broadcast %cst_124 : f32 to vector<64x128xf32>
    %262 = arith.mulf %261, %260 : vector<64x128xf32>
    %263 = math.tanh %262 : vector<64x128xf32>
    %cst_125 = arith.constant 1.000000e+00 : f32
    %264 = vector.broadcast %cst_125 : f32 to vector<64x128xf32>
    %265 = arith.addf %264, %263 : vector<64x128xf32>
    %266 = arith.mulf %255, %265 : vector<64x128xf32>
    %cst_126 = arith.constant 0.000000e+00 : f32
    %267 = vector.broadcast %cst_126 : f32 to vector<96x128xf32>
    %c0_127 = arith.constant 0 : index
    %c0_128 = arith.constant 0 : index
    %268 = vector.load %arg11[%c0_127, %c0_128] : memref<96x128xf32, #tpu.memory_space<vmem>>, vector<96x128xf32>
    tpu.vector_store %arg11[%c0_127, %c0_128], %267 {strides = array<i32>} : memref<96x128xf32, #tpu.memory_space<vmem>>, vector<96x128xf32>,
    %c16_129 = arith.constant 16 : index
    %c0_130 = arith.constant 0 : index
    %269 = vector.load %arg11[%c16_129, %c0_130] : memref<96x128xf32, #tpu.memory_space<vmem>>, vector<64x128xf32>
    tpu.vector_store %arg11[%c16_129, %c0_130], %266 {strides = array<i32>} : memref<96x128xf32, #tpu.memory_space<vmem>>, vector<64x128xf32>,
    %cst_131 = arith.constant 0.000000e+00 : f32
    %270 = vector.broadcast %cst_131 : f32 to vector<64x128xf32>
    %c16_132 = arith.constant 16 : index
    %c0_133 = arith.constant 0 : index
    %271 = vector.load %arg11[%c16_132, %c0_133] : memref<96x128xf32, #tpu.memory_space<vmem>>, vector<64x128xf32>
    %c0_i32_134 = arith.constant 0 : i32
    %272 = vector.broadcast %c0_i32_134 : i32 to vector<64x128xi32>
    %273 = arith.addi %0, %272 : vector<64x128xi32>
    %c64_i32_135 = arith.constant 64 : i32
    %274 = vector.broadcast %c64_i32_135 : i32 to vector<64x128xi32>
    %275 = arith.cmpi slt, %273, %274 : vector<64x128xi32>
    %c0_i32_136 = arith.constant 0 : i32
    %276 = vector.broadcast %c0_i32_136 : i32 to vector<64x128xi32>
    %277 = arith.addi %2, %276 : vector<64x128xi32>
    %c8_i32_137 = arith.constant 8 : i32
    %278 = vector.broadcast %c8_i32_137 : i32 to vector<64x128xi32>
    %279 = arith.cmpi slt, %277, %278 : vector<64x128xi32>
    %280 = arith.andi %275, %279 : vector<64x128xi1>
    %cst_138 = arith.constant 0.000000e+00 : f32
    %281 = vector.broadcast %cst_138 : f32 to vector<64x128xf32>
    %282 = arith.select %280, %271, %281 : vector<64x128xi1>, vector<64x128xf32>
    %283 = arith.truncf %282 : vector<64x128xf32> to vector<64x128xbf16>
    %c0_139 = arith.constant 0 : index
    %c0_140 = arith.constant 0 : index
    %c0_141 = arith.constant 0 : index
    %284 = vector.load %arg4[%c0_139, %c0_140, %c0_141] : memref<9x128x128xbf16, #tpu.memory_space<vmem>>, vector<1x128x128xbf16>
    %285 = vector.shape_cast %284 : vector<1x128x128xbf16> to vector<128x128xbf16>
    %cst_142 = arith.constant dense<0.000000e+00> : vector<64x128xf32>
    %286 = tpu.matmul %283, %285, %cst_142 {dimension_numbers = #tpu.dot_dimension_numbers<[1], [0], [0], [1], [0, 0, 1, 1], [], []>} : vector<64x128xbf16>, vector<128x128xbf16>, vector<64x128xf32> -> vector<64x128xf32>
    %287 = arith.addf %270, %286 : vector<64x128xf32>
    %c0_143 = arith.constant 0 : index
    %c0_144 = arith.constant 0 : index
    %288 = vector.load %arg5[%c0_143, %c0_144] : memref<1x128xf32, #tpu.memory_space<vmem>>, vector<1x128xf32>
    %289 = vector.broadcast %288 : vector<1x128xf32> to vector<64x128xf32>
    %290 = arith.addf %287, %289 : vector<64x128xf32>
    %cst_145 = arith.constant 5.000000e-01 : f32
    %291 = vector.broadcast %cst_145 : f32 to vector<64x128xf32>
    %292 = arith.mulf %291, %290 : vector<64x128xf32>
    %cst_146 = arith.constant 4.471500e-02 : f32
    %293 = vector.broadcast %cst_146 : f32 to vector<64x128xf32>
    %294 = arith.mulf %293, %290 : vector<64x128xf32>
    %295 = arith.mulf %294, %290 : vector<64x128xf32>
    %296 = arith.mulf %295, %290 : vector<64x128xf32>
    %297 = arith.addf %290, %296 : vector<64x128xf32>
    %cst_147 = arith.constant 0.797884583 : f32
    %298 = vector.broadcast %cst_147 : f32 to vector<64x128xf32>
    %299 = arith.mulf %298, %297 : vector<64x128xf32>
    %300 = math.tanh %299 : vector<64x128xf32>
    %cst_148 = arith.constant 1.000000e+00 : f32
    %301 = vector.broadcast %cst_148 : f32 to vector<64x128xf32>
    %302 = arith.addf %301, %300 : vector<64x128xf32>
    %303 = arith.mulf %292, %302 : vector<64x128xf32>
    %c0_149 = arith.constant 0 : index
    %c0_150 = arith.constant 0 : index
    %304 = vector.load %arg6[%c0_149, %c0_150] : memref<64x128xf32, #tpu.memory_space<vmem>>, vector<64x128xf32>
    tpu.vector_store %arg6[%c0_149, %c0_150], %303 {strides = array<i32>} : memref<64x128xf32, #tpu.memory_space<vmem>>, vector<64x128xf32>,
    %cst_151 = arith.constant 0.000000e+00 : f32
    %305 = vector.broadcast %cst_151 : f32 to vector<64x128xf32>
    %c16_152 = arith.constant 16 : index
    %c0_153 = arith.constant 0 : index
    %306 = vector.load %arg11[%c16_152, %c0_153] : memref<96x128xf32, #tpu.memory_space<vmem>>, vector<64x128xf32>
    %c0_i32_154 = arith.constant 0 : i32
    %307 = vector.broadcast %c0_i32_154 : i32 to vector<64x128xi32>
    %308 = arith.addi %0, %307 : vector<64x128xi32>
    %c64_i32_155 = arith.constant 64 : i32
    %309 = vector.broadcast %c64_i32_155 : i32 to vector<64x128xi32>
    %310 = arith.cmpi slt, %308, %309 : vector<64x128xi32>
    %c0_i32_156 = arith.constant 0 : i32
    %311 = vector.broadcast %c0_i32_156 : i32 to vector<64x128xi32>
    %312 = arith.addi %2, %311 : vector<64x128xi32>
    %c8_i32_157 = arith.constant 8 : i32
    %313 = vector.broadcast %c8_i32_157 : i32 to vector<64x128xi32>
    %314 = arith.cmpi slt, %312, %313 : vector<64x128xi32>
    %315 = arith.andi %310, %314 : vector<64x128xi1>
    %cst_158 = arith.constant 0.000000e+00 : f32
    %316 = vector.broadcast %cst_158 : f32 to vector<64x128xf32>
    %317 = arith.select %315, %306, %316 : vector<64x128xi1>, vector<64x128xf32>
    %318 = arith.truncf %317 : vector<64x128xf32> to vector<64x128xbf16>
    %c1_159 = arith.constant 1 : index
    %c0_160 = arith.constant 0 : index
    %c0_161 = arith.constant 0 : index
    %319 = vector.load %arg4[%c1_159, %c0_160, %c0_161] : memref<9x128x128xbf16, #tpu.memory_space<vmem>>, vector<1x128x128xbf16>
    %320 = vector.shape_cast %319 : vector<1x128x128xbf16> to vector<128x128xbf16>
    %cst_162 = arith.constant dense<0.000000e+00> : vector<64x128xf32>
    %321 = tpu.matmul %318, %320, %cst_162 {dimension_numbers = #tpu.dot_dimension_numbers<[1], [0], [0], [1], [0, 0, 1, 1], [], []>} : vector<64x128xbf16>, vector<128x128xbf16>, vector<64x128xf32> -> vector<64x128xf32>
    %322 = arith.addf %305, %321 : vector<64x128xf32>
    %c17_163 = arith.constant 17 : index
    %c0_164 = arith.constant 0 : index
    %323 = vector.load %arg11[%c17_163, %c0_164] : memref<96x128xf32, #tpu.memory_space<vmem>>, vector<64x128xf32>
    %c0_i32_165 = arith.constant 0 : i32
    %324 = vector.broadcast %c0_i32_165 : i32 to vector<64x128xi32>
    %325 = arith.addi %0, %324 : vector<64x128xi32>
    %c64_i32_166 = arith.constant 64 : i32
    %326 = vector.broadcast %c64_i32_166 : i32 to vector<64x128xi32>
    %327 = arith.cmpi slt, %325, %326 : vector<64x128xi32>
    %c1_i32_167 = arith.constant 1 : i32
    %328 = vector.broadcast %c1_i32_167 : i32 to vector<64x128xi32>
    %329 = arith.addi %2, %328 : vector<64x128xi32>
    %c8_i32_168 = arith.constant 8 : i32
    %330 = vector.broadcast %c8_i32_168 : i32 to vector<64x128xi32>
    %331 = arith.cmpi slt, %329, %330 : vector<64x128xi32>
    %332 = arith.andi %327, %331 : vector<64x128xi1>
    %cst_169 = arith.constant 0.000000e+00 : f32
    %333 = vector.broadcast %cst_169 : f32 to vector<64x128xf32>
    %334 = arith.select %332, %323, %333 : vector<64x128xi1>, vector<64x128xf32>
    %335 = arith.truncf %334 : vector<64x128xf32> to vector<64x128xbf16>
    %c2_170 = arith.constant 2 : index
    %c0_171 = arith.constant 0 : index
    %c0_172 = arith.constant 0 : index
    %336 = vector.load %arg4[%c2_170, %c0_171, %c0_172] : memref<9x128x128xbf16, #tpu.memory_space<vmem>>, vector<1x128x128xbf16>
    %337 = vector.shape_cast %336 : vector<1x128x128xbf16> to vector<128x128xbf16>
    %cst_173 = arith.constant dense<0.000000e+00> : vector<64x128xf32>
    %338 = tpu.matmul %335, %337, %cst_173 {dimension_numbers = #tpu.dot_dimension_numbers<[1], [0], [0], [1], [0, 0, 1, 1], [], []>} : vector<64x128xbf16>, vector<128x128xbf16>, vector<64x128xf32> -> vector<64x128xf32>
    %339 = arith.addf %322, %338 : vector<64x128xf32>
    %c0_174 = arith.constant 0 : index
    %c0_175 = arith.constant 0 : index
    %340 = vector.load %arg5[%c0_174, %c0_175] : memref<1x128xf32, #tpu.memory_space<vmem>>, vector<1x128xf32>
    %341 = vector.broadcast %340 : vector<1x128xf32> to vector<64x128xf32>
    %342 = arith.addf %339, %341 : vector<64x128xf32>
    %cst_176 = arith.constant 5.000000e-01 : f32
    %343 = vector.broadcast %cst_176 : f32 to vector<64x128xf32>
    %344 = arith.mulf %343, %342 : vector<64x128xf32>
    %cst_177 = arith.constant 4.471500e-02 : f32
    %345 = vector.broadcast %cst_177 : f32 to vector<64x128xf32>
    %346 = arith.mulf %345, %342 : vector<64x128xf32>
    %347 = arith.mulf %346, %342 : vector<64x128xf32>
    %348 = arith.mulf %347, %342 : vector<64x128xf32>
    %349 = arith.addf %342, %348 : vector<64x128xf32>
    %cst_178 = arith.constant 0.797884583 : f32
    %350 = vector.broadcast %cst_178 : f32 to vector<64x128xf32>
    %351 = arith.mulf %350, %349 : vector<64x128xf32>
    %352 = math.tanh %351 : vector<64x128xf32>
    %cst_179 = arith.constant 1.000000e+00 : f32
    %353 = vector.broadcast %cst_179 : f32 to vector<64x128xf32>
    %354 = arith.addf %353, %352 : vector<64x128xf32>
    %355 = arith.mulf %344, %354 : vector<64x128xf32>
    %c0_180 = arith.constant 0 : index
    %c0_181 = arith.constant 0 : index
    %356 = vector.load %arg7[%c0_180, %c0_181] : memref<64x128xf32, #tpu.memory_space<vmem>>, vector<64x128xf32>
    tpu.vector_store %arg7[%c0_180, %c0_181], %355 {strides = array<i32>} : memref<64x128xf32, #tpu.memory_space<vmem>>, vector<64x128xf32>,
    %cst_182 = arith.constant 0.000000e+00 : f32
    %357 = vector.broadcast %cst_182 : f32 to vector<64x128xf32>
    %c16_183 = arith.constant 16 : index
    %c0_184 = arith.constant 0 : index
    %358 = vector.load %arg11[%c16_183, %c0_184] : memref<96x128xf32, #tpu.memory_space<vmem>>, vector<64x128xf32>
    %c0_i32_185 = arith.constant 0 : i32
    %359 = vector.broadcast %c0_i32_185 : i32 to vector<64x128xi32>
    %360 = arith.addi %0, %359 : vector<64x128xi32>
    %c64_i32_186 = arith.constant 64 : i32
    %361 = vector.broadcast %c64_i32_186 : i32 to vector<64x128xi32>
    %362 = arith.cmpi slt, %360, %361 : vector<64x128xi32>
    %c0_i32_187 = arith.constant 0 : i32
    %363 = vector.broadcast %c0_i32_187 : i32 to vector<64x128xi32>
    %364 = arith.addi %2, %363 : vector<64x128xi32>
    %c8_i32_188 = arith.constant 8 : i32
    %365 = vector.broadcast %c8_i32_188 : i32 to vector<64x128xi32>
    %366 = arith.cmpi slt, %364, %365 : vector<64x128xi32>
    %367 = arith.andi %362, %366 : vector<64x128xi1>
    %cst_189 = arith.constant 0.000000e+00 : f32
    %368 = vector.broadcast %cst_189 : f32 to vector<64x128xf32>
    %369 = arith.select %367, %358, %368 : vector<64x128xi1>, vector<64x128xf32>
    %370 = arith.truncf %369 : vector<64x128xf32> to vector<64x128xbf16>
    %c3_190 = arith.constant 3 : index
    %c0_191 = arith.constant 0 : index
    %c0_192 = arith.constant 0 : index
    %371 = vector.load %arg4[%c3_190, %c0_191, %c0_192] : memref<9x128x128xbf16, #tpu.memory_space<vmem>>, vector<1x128x128xbf16>
    %372 = vector.shape_cast %371 : vector<1x128x128xbf16> to vector<128x128xbf16>
    %cst_193 = arith.constant dense<0.000000e+00> : vector<64x128xf32>
    %373 = tpu.matmul %370, %372, %cst_193 {dimension_numbers = #tpu.dot_dimension_numbers<[1], [0], [0], [1], [0, 0, 1, 1], [], []>} : vector<64x128xbf16>, vector<128x128xbf16>, vector<64x128xf32> -> vector<64x128xf32>
    %374 = arith.addf %357, %373 : vector<64x128xf32>
    %c24_194 = arith.constant 24 : index
    %c0_195 = arith.constant 0 : index
    %375 = vector.load %arg11[%c24_194, %c0_195] : memref<96x128xf32, #tpu.memory_space<vmem>>, vector<64x128xf32>
    %c8_i32_196 = arith.constant 8 : i32
    %376 = vector.broadcast %c8_i32_196 : i32 to vector<64x128xi32>
    %377 = arith.addi %0, %376 : vector<64x128xi32>
    %c64_i32_197 = arith.constant 64 : i32
    %378 = vector.broadcast %c64_i32_197 : i32 to vector<64x128xi32>
    %379 = arith.cmpi slt, %377, %378 : vector<64x128xi32>
    %c0_i32_198 = arith.constant 0 : i32
    %380 = vector.broadcast %c0_i32_198 : i32 to vector<64x128xi32>
    %381 = arith.addi %2, %380 : vector<64x128xi32>
    %c8_i32_199 = arith.constant 8 : i32
    %382 = vector.broadcast %c8_i32_199 : i32 to vector<64x128xi32>
    %383 = arith.cmpi slt, %381, %382 : vector<64x128xi32>
    %384 = arith.andi %379, %383 : vector<64x128xi1>
    %cst_200 = arith.constant 0.000000e+00 : f32
    %385 = vector.broadcast %cst_200 : f32 to vector<64x128xf32>
    %386 = arith.select %384, %375, %385 : vector<64x128xi1>, vector<64x128xf32>
    %387 = arith.truncf %386 : vector<64x128xf32> to vector<64x128xbf16>
    %c4_201 = arith.constant 4 : index
    %c0_202 = arith.constant 0 : index
    %c0_203 = arith.constant 0 : index
    %388 = vector.load %arg4[%c4_201, %c0_202, %c0_203] : memref<9x128x128xbf16, #tpu.memory_space<vmem>>, vector<1x128x128xbf16>
    %389 = vector.shape_cast %388 : vector<1x128x128xbf16> to vector<128x128xbf16>
    %cst_204 = arith.constant dense<0.000000e+00> : vector<64x128xf32>
    %390 = tpu.matmul %387, %389, %cst_204 {dimension_numbers = #tpu.dot_dimension_numbers<[1], [0], [0], [1], [0, 0, 1, 1], [], []>} : vector<64x128xbf16>, vector<128x128xbf16>, vector<64x128xf32> -> vector<64x128xf32>
    %391 = arith.addf %374, %390 : vector<64x128xf32>
    %c0_205 = arith.constant 0 : index
    %c0_206 = arith.constant 0 : index
    %392 = vector.load %arg5[%c0_205, %c0_206] : memref<1x128xf32, #tpu.memory_space<vmem>>, vector<1x128xf32>
    %393 = vector.broadcast %392 : vector<1x128xf32> to vector<64x128xf32>
    %394 = arith.addf %391, %393 : vector<64x128xf32>
    %cst_207 = arith.constant 5.000000e-01 : f32
    %395 = vector.broadcast %cst_207 : f32 to vector<64x128xf32>
    %396 = arith.mulf %395, %394 : vector<64x128xf32>
    %cst_208 = arith.constant 4.471500e-02 : f32
    %397 = vector.broadcast %cst_208 : f32 to vector<64x128xf32>
    %398 = arith.mulf %397, %394 : vector<64x128xf32>
    %399 = arith.mulf %398, %394 : vector<64x128xf32>
    %400 = arith.mulf %399, %394 : vector<64x128xf32>
    %401 = arith.addf %394, %400 : vector<64x128xf32>
    %cst_209 = arith.constant 0.797884583 : f32
    %402 = vector.broadcast %cst_209 : f32 to vector<64x128xf32>
    %403 = arith.mulf %402, %401 : vector<64x128xf32>
    %404 = math.tanh %403 : vector<64x128xf32>
    %cst_210 = arith.constant 1.000000e+00 : f32
    %405 = vector.broadcast %cst_210 : f32 to vector<64x128xf32>
    %406 = arith.addf %405, %404 : vector<64x128xf32>
    %407 = arith.mulf %396, %406 : vector<64x128xf32>
    %c0_211 = arith.constant 0 : index
    %c0_212 = arith.constant 0 : index
    %408 = vector.load %arg8[%c0_211, %c0_212] : memref<64x128xf32, #tpu.memory_space<vmem>>, vector<64x128xf32>
    tpu.vector_store %arg8[%c0_211, %c0_212], %407 {strides = array<i32>} : memref<64x128xf32, #tpu.memory_space<vmem>>, vector<64x128xf32>,
    %cst_213 = arith.constant 0.000000e+00 : f32
    %409 = vector.broadcast %cst_213 : f32 to vector<64x128xf32>
    %c16_214 = arith.constant 16 : index
    %c0_215 = arith.constant 0 : index
    %410 = vector.load %arg11[%c16_214, %c0_215] : memref<96x128xf32, #tpu.memory_space<vmem>>, vector<64x128xf32>
    %c0_i32_216 = arith.constant 0 : i32
    %411 = vector.broadcast %c0_i32_216 : i32 to vector<64x128xi32>
    %412 = arith.addi %0, %411 : vector<64x128xi32>
    %c64_i32_217 = arith.constant 64 : i32
    %413 = vector.broadcast %c64_i32_217 : i32 to vector<64x128xi32>
    %414 = arith.cmpi slt, %412, %413 : vector<64x128xi32>
    %c0_i32_218 = arith.constant 0 : i32
    %415 = vector.broadcast %c0_i32_218 : i32 to vector<64x128xi32>
    %416 = arith.addi %2, %415 : vector<64x128xi32>
    %c8_i32_219 = arith.constant 8 : i32
    %417 = vector.broadcast %c8_i32_219 : i32 to vector<64x128xi32>
    %418 = arith.cmpi slt, %416, %417 : vector<64x128xi32>
    %419 = arith.andi %414, %418 : vector<64x128xi1>
    %cst_220 = arith.constant 0.000000e+00 : f32
    %420 = vector.broadcast %cst_220 : f32 to vector<64x128xf32>
    %421 = arith.select %419, %410, %420 : vector<64x128xi1>, vector<64x128xf32>
    %422 = arith.truncf %421 : vector<64x128xf32> to vector<64x128xbf16>
    %c5_221 = arith.constant 5 : index
    %c0_222 = arith.constant 0 : index
    %c0_223 = arith.constant 0 : index
    %423 = vector.load %arg4[%c5_221, %c0_222, %c0_223] : memref<9x128x128xbf16, #tpu.memory_space<vmem>>, vector<1x128x128xbf16>
    %424 = vector.shape_cast %423 : vector<1x128x128xbf16> to vector<128x128xbf16>
    %cst_224 = arith.constant dense<0.000000e+00> : vector<64x128xf32>
    %425 = tpu.matmul %422, %424, %cst_224 {dimension_numbers = #tpu.dot_dimension_numbers<[1], [0], [0], [1], [0, 0, 1, 1], [], []>} : vector<64x128xbf16>, vector<128x128xbf16>, vector<64x128xf32> -> vector<64x128xf32>
    %426 = arith.addf %409, %425 : vector<64x128xf32>
    %c17_225 = arith.constant 17 : index
    %c0_226 = arith.constant 0 : index
    %427 = vector.load %arg11[%c17_225, %c0_226] : memref<96x128xf32, #tpu.memory_space<vmem>>, vector<64x128xf32>
    %c0_i32_227 = arith.constant 0 : i32
    %428 = vector.broadcast %c0_i32_227 : i32 to vector<64x128xi32>
    %429 = arith.addi %0, %428 : vector<64x128xi32>
    %c64_i32_228 = arith.constant 64 : i32
    %430 = vector.broadcast %c64_i32_228 : i32 to vector<64x128xi32>
    %431 = arith.cmpi slt, %429, %430 : vector<64x128xi32>
    %c1_i32_229 = arith.constant 1 : i32
    %432 = vector.broadcast %c1_i32_229 : i32 to vector<64x128xi32>
    %433 = arith.addi %2, %432 : vector<64x128xi32>
    %c8_i32_230 = arith.constant 8 : i32
    %434 = vector.broadcast %c8_i32_230 : i32 to vector<64x128xi32>
    %435 = arith.cmpi slt, %433, %434 : vector<64x128xi32>
    %436 = arith.andi %431, %435 : vector<64x128xi1>
    %cst_231 = arith.constant 0.000000e+00 : f32
    %437 = vector.broadcast %cst_231 : f32 to vector<64x128xf32>
    %438 = arith.select %436, %427, %437 : vector<64x128xi1>, vector<64x128xf32>
    %439 = arith.truncf %438 : vector<64x128xf32> to vector<64x128xbf16>
    %c6_232 = arith.constant 6 : index
    %c0_233 = arith.constant 0 : index
    %c0_234 = arith.constant 0 : index
    %440 = vector.load %arg4[%c6_232, %c0_233, %c0_234] : memref<9x128x128xbf16, #tpu.memory_space<vmem>>, vector<1x128x128xbf16>
    %441 = vector.shape_cast %440 : vector<1x128x128xbf16> to vector<128x128xbf16>
    %cst_235 = arith.constant dense<0.000000e+00> : vector<64x128xf32>
    %442 = tpu.matmul %439, %441, %cst_235 {dimension_numbers = #tpu.dot_dimension_numbers<[1], [0], [0], [1], [0, 0, 1, 1], [], []>} : vector<64x128xbf16>, vector<128x128xbf16>, vector<64x128xf32> -> vector<64x128xf32>
    %443 = arith.addf %426, %442 : vector<64x128xf32>
    %c24_236 = arith.constant 24 : index
    %c0_237 = arith.constant 0 : index
    %444 = vector.load %arg11[%c24_236, %c0_237] : memref<96x128xf32, #tpu.memory_space<vmem>>, vector<64x128xf32>
    %c8_i32_238 = arith.constant 8 : i32
    %445 = vector.broadcast %c8_i32_238 : i32 to vector<64x128xi32>
    %446 = arith.addi %0, %445 : vector<64x128xi32>
    %c64_i32_239 = arith.constant 64 : i32
    %447 = vector.broadcast %c64_i32_239 : i32 to vector<64x128xi32>
    %448 = arith.cmpi slt, %446, %447 : vector<64x128xi32>
    %c0_i32_240 = arith.constant 0 : i32
    %449 = vector.broadcast %c0_i32_240 : i32 to vector<64x128xi32>
    %450 = arith.addi %2, %449 : vector<64x128xi32>
    %c8_i32_241 = arith.constant 8 : i32
    %451 = vector.broadcast %c8_i32_241 : i32 to vector<64x128xi32>
    %452 = arith.cmpi slt, %450, %451 : vector<64x128xi32>
    %453 = arith.andi %448, %452 : vector<64x128xi1>
    %cst_242 = arith.constant 0.000000e+00 : f32
    %454 = vector.broadcast %cst_242 : f32 to vector<64x128xf32>
    %455 = arith.select %453, %444, %454 : vector<64x128xi1>, vector<64x128xf32>
    %456 = arith.truncf %455 : vector<64x128xf32> to vector<64x128xbf16>
    %c7_243 = arith.constant 7 : index
    %c0_244 = arith.constant 0 : index
    %c0_245 = arith.constant 0 : index
    %457 = vector.load %arg4[%c7_243, %c0_244, %c0_245] : memref<9x128x128xbf16, #tpu.memory_space<vmem>>, vector<1x128x128xbf16>
    %458 = vector.shape_cast %457 : vector<1x128x128xbf16> to vector<128x128xbf16>
    %cst_246 = arith.constant dense<0.000000e+00> : vector<64x128xf32>
    %459 = tpu.matmul %456, %458, %cst_246 {dimension_numbers = #tpu.dot_dimension_numbers<[1], [0], [0], [1], [0, 0, 1, 1], [], []>} : vector<64x128xbf16>, vector<128x128xbf16>, vector<64x128xf32> -> vector<64x128xf32>
    %460 = arith.addf %443, %459 : vector<64x128xf32>
    %c25_247 = arith.constant 25 : index
    %c0_248 = arith.constant 0 : index
    %461 = vector.load %arg11[%c25_247, %c0_248] : memref<96x128xf32, #tpu.memory_space<vmem>>, vector<64x128xf32>
    %c8_i32_249 = arith.constant 8 : i32
    %462 = vector.broadcast %c8_i32_249 : i32 to vector<64x128xi32>
    %463 = arith.addi %0, %462 : vector<64x128xi32>
    %c64_i32_250 = arith.constant 64 : i32
    %464 = vector.broadcast %c64_i32_250 : i32 to vector<64x128xi32>
    %465 = arith.cmpi slt, %463, %464 : vector<64x128xi32>
    %c1_i32_251 = arith.constant 1 : i32
    %466 = vector.broadcast %c1_i32_251 : i32 to vector<64x128xi32>
    %467 = arith.addi %2, %466 : vector<64x128xi32>
    %c8_i32_252 = arith.constant 8 : i32
    %468 = vector.broadcast %c8_i32_252 : i32 to vector<64x128xi32>
    %469 = arith.cmpi slt, %467, %468 : vector<64x128xi32>
    %470 = arith.andi %465, %469 : vector<64x128xi1>
    %cst_253 = arith.constant 0.000000e+00 : f32
    %471 = vector.broadcast %cst_253 : f32 to vector<64x128xf32>
    %472 = arith.select %470, %461, %471 : vector<64x128xi1>, vector<64x128xf32>
    %473 = arith.truncf %472 : vector<64x128xf32> to vector<64x128xbf16>
    %c8_254 = arith.constant 8 : index
    %c0_255 = arith.constant 0 : index
    %c0_256 = arith.constant 0 : index
    %474 = vector.load %arg4[%c8_254, %c0_255, %c0_256] : memref<9x128x128xbf16, #tpu.memory_space<vmem>>, vector<1x128x128xbf16>
    %475 = vector.shape_cast %474 : vector<1x128x128xbf16> to vector<128x128xbf16>
    %cst_257 = arith.constant dense<0.000000e+00> : vector<64x128xf32>
    %476 = tpu.matmul %473, %475, %cst_257 {dimension_numbers = #tpu.dot_dimension_numbers<[1], [0], [0], [1], [0, 0, 1, 1], [], []>} : vector<64x128xbf16>, vector<128x128xbf16>, vector<64x128xf32> -> vector<64x128xf32>
    %477 = arith.addf %460, %476 : vector<64x128xf32>
    %c0_258 = arith.constant 0 : index
    %c0_259 = arith.constant 0 : index
    %478 = vector.load %arg5[%c0_258, %c0_259] : memref<1x128xf32, #tpu.memory_space<vmem>>, vector<1x128xf32>
    %479 = vector.broadcast %478 : vector<1x128xf32> to vector<64x128xf32>
    %480 = arith.addf %477, %479 : vector<64x128xf32>
    %cst_260 = arith.constant 5.000000e-01 : f32
    %481 = vector.broadcast %cst_260 : f32 to vector<64x128xf32>
    %482 = arith.mulf %481, %480 : vector<64x128xf32>
    %cst_261 = arith.constant 4.471500e-02 : f32
    %483 = vector.broadcast %cst_261 : f32 to vector<64x128xf32>
    %484 = arith.mulf %483, %480 : vector<64x128xf32>
    %485 = arith.mulf %484, %480 : vector<64x128xf32>
    %486 = arith.mulf %485, %480 : vector<64x128xf32>
    %487 = arith.addf %480, %486 : vector<64x128xf32>
    %cst_262 = arith.constant 0.797884583 : f32
    %488 = vector.broadcast %cst_262 : f32 to vector<64x128xf32>
    %489 = arith.mulf %488, %487 : vector<64x128xf32>
    %490 = math.tanh %489 : vector<64x128xf32>
    %cst_263 = arith.constant 1.000000e+00 : f32
    %491 = vector.broadcast %cst_263 : f32 to vector<64x128xf32>
    %492 = arith.addf %491, %490 : vector<64x128xf32>
    %493 = arith.mulf %482, %492 : vector<64x128xf32>
    %c0_264 = arith.constant 0 : index
    %c0_265 = arith.constant 0 : index
    %494 = vector.load %arg9[%c0_264, %c0_265] : memref<64x128xf32, #tpu.memory_space<vmem>>, vector<64x128xf32>
    tpu.vector_store %arg9[%c0_264, %c0_265], %493 {strides = array<i32>} : memref<64x128xf32, #tpu.memory_space<vmem>>, vector<64x128xf32>,
    return
  }
  func.func @transform_0(%arg0: i32) -> (i32, i32) {
    %c0_i32 = arith.constant 0 : i32
    %c0_i32_0 = arith.constant 0 : i32
    return %arg0, %c0_i32 : i32, i32
  }
  func.func @transform_1(%arg0: i32) -> (i32, i32, i32) {
    %c0_i32 = arith.constant 0 : i32
    %c0_i32_0 = arith.constant 0 : i32
    %c0_i32_1 = arith.constant 0 : i32
    %c0_i32_2 = arith.constant 0 : i32
    return %c0_i32, %c0_i32_0, %c0_i32_1 : i32, i32, i32
  }
  func.func @transform_2(%arg0: i32) -> (i32, i32) {
    %c0_i32 = arith.constant 0 : i32
    %c0_i32_0 = arith.constant 0 : i32
    %c0_i32_1 = arith.constant 0 : i32
    return %c0_i32, %c0_i32_0 : i32, i32
  }
  func.func @transform_3(%arg0: i32) -> (i32, i32, i32) {
    %c0_i32 = arith.constant 0 : i32
    %c0_i32_0 = arith.constant 0 : i32
    %c0_i32_1 = arith.constant 0 : i32
    %c0_i32_2 = arith.constant 0 : i32
    return %c0_i32, %c0_i32_0, %c0_i32_1 : i32, i32, i32
  }
  func.func @transform_4(%arg0: i32) -> (i32, i32) {
    %c0_i32 = arith.constant 0 : i32
    %c0_i32_0 = arith.constant 0 : i32
    %c0_i32_1 = arith.constant 0 : i32
    return %c0_i32, %c0_i32_0 : i32, i32
  }
  func.func @transform_5(%arg0: i32) -> (i32, i32) {
    %c0_i32 = arith.constant 0 : i32
    %c0_i32_0 = arith.constant 0 : i32
    return %arg0, %c0_i32 : i32, i32
  }
  func.func @transform_6(%arg0: i32) -> (i32, i32) {
    %c0_i32 = arith.constant 0 : i32
    %c0_i32_0 = arith.constant 0 : i32
    return %arg0, %c0_i32 : i32, i32
  }
  func.func @transform_7(%arg0: i32) -> (i32, i32) {
    %c0_i32 = arith.constant 0 : i32
    %c0_i32_0 = arith.constant 0 : i32
    return %arg0, %c0_i32 : i32, i32
  }
  func.func @transform_8(%arg0: i32) -> (i32, i32) {
    %c0_i32 = arith.constant 0 : i32
    %c0_i32_0 = arith.constant 0 : i32
    return %arg0, %c0_i32 : i32, i32
  }
}

module attributes {stable_mosaic.version = 11 : i64} {
  func.func @_conv_ct_kernel(%arg0: i32, %arg1: memref<256x128xf32, #tpu.memory_space<vmem>>, %arg2: memref<9x128x128xbf16, #tpu.memory_space<vmem>>, %arg3: memref<1x128xf32, #tpu.memory_space<vmem>>, %arg4: memref<9x128x128xbf16, #tpu.memory_space<vmem>>, %arg5: memref<1x128xf32, #tpu.memory_space<vmem>>, %arg6: memref<256x128xf32, #tpu.memory_space<vmem>>, %arg7: memref<256x128xf32, #tpu.memory_space<vmem>>, %arg8: memref<256x128xf32, #tpu.memory_space<vmem>>, %arg9: memref<256x128xf32, #tpu.memory_space<vmem>>, %arg10: memref<304x128xf32, #tpu.memory_space<vmem>>, %arg11: memref<304x128xf32, #tpu.memory_space<vmem>>) attributes {dimension_semantics = [#tpu.dimension_semantics<parallel>], iteration_bounds = array<i64: 2>, scalar_prefetch = 0 : i64, scratch_operands = 2 : i64, tpu.core_type = #tpu.core_type<tc>, window_params = [{transform_indices = @transform_0, window_bounds = array<i64: 256, 128>}, {pipeline_mode = #tpu.pipeline_mode<synchronous>, transform_indices = @transform_1, window_bounds = array<i64: 9, 128, 128>}, {pipeline_mode = #tpu.pipeline_mode<synchronous>, transform_indices = @transform_2, window_bounds = array<i64: 1, 128>}, {pipeline_mode = #tpu.pipeline_mode<synchronous>, transform_indices = @transform_3, window_bounds = array<i64: 9, 128, 128>}, {pipeline_mode = #tpu.pipeline_mode<synchronous>, transform_indices = @transform_4, window_bounds = array<i64: 1, 128>}, {transform_indices = @transform_5, window_bounds = array<i64: 256, 128>}, {transform_indices = @transform_6, window_bounds = array<i64: 256, 128>}, {transform_indices = @transform_7, window_bounds = array<i64: 256, 128>}, {transform_indices = @transform_8, window_bounds = array<i64: 256, 128>}]} {
    %0 = tpu.iota {dimensions = array<i32: 0>} : vector<256x128xi32>
    %c15_i32 = arith.constant 15 : i32
    %1 = vector.broadcast %c15_i32 : i32 to vector<256x128xi32>
    %2 = arith.andi %0, %1 : vector<256x128xi32>
    %cst = arith.constant 0.000000e+00 : f32
    %3 = vector.broadcast %cst : f32 to vector<304x128xf32>
    %c0 = arith.constant 0 : index
    %c0_0 = arith.constant 0 : index
    %4 = vector.load %arg10[%c0, %c0_0] : memref<304x128xf32, #tpu.memory_space<vmem>>, vector<304x128xf32>
    tpu.vector_store %arg10[%c0, %c0_0], %3 {strides = array<i32>} : memref<304x128xf32, #tpu.memory_space<vmem>>, vector<304x128xf32>,
    %c0_1 = arith.constant 0 : index
    %c0_2 = arith.constant 0 : index
    %5 = vector.load %arg1[%c0_1, %c0_2] : memref<256x128xf32, #tpu.memory_space<vmem>>, vector<256x128xf32>
    %c24 = arith.constant 24 : index
    %c0_3 = arith.constant 0 : index
    %6 = vector.load %arg10[%c24, %c0_3] : memref<304x128xf32, #tpu.memory_space<vmem>>, vector<256x128xf32>
    tpu.vector_store %arg10[%c24, %c0_3], %5 {strides = array<i32>} : memref<304x128xf32, #tpu.memory_space<vmem>>, vector<256x128xf32>,
    %cst_4 = arith.constant 0.000000e+00 : f32
    %7 = vector.broadcast %cst_4 : f32 to vector<256x128xf32>
    %c7 = arith.constant 7 : index
    %c0_5 = arith.constant 0 : index
    %8 = vector.load %arg10[%c7, %c0_5] : memref<304x128xf32, #tpu.memory_space<vmem>>, vector<256x128xf32>
    %c-16_i32 = arith.constant -16 : i32
    %9 = vector.broadcast %c-16_i32 : i32 to vector<256x128xi32>
    %10 = arith.addi %0, %9 : vector<256x128xi32>
    %c0_i32 = arith.constant 0 : i32
    %11 = vector.broadcast %c0_i32 : i32 to vector<256x128xi32>
    %12 = arith.cmpi sge, %10, %11 : vector<256x128xi32>
    %c-16_i32_6 = arith.constant -16 : i32
    %13 = vector.broadcast %c-16_i32_6 : i32 to vector<256x128xi32>
    %14 = arith.addi %0, %13 : vector<256x128xi32>
    %c256_i32 = arith.constant 256 : i32
    %15 = vector.broadcast %c256_i32 : i32 to vector<256x128xi32>
    %16 = arith.cmpi slt, %14, %15 : vector<256x128xi32>
    %17 = arith.andi %12, %16 : vector<256x128xi1>
    %c-1_i32 = arith.constant -1 : i32
    %18 = vector.broadcast %c-1_i32 : i32 to vector<256x128xi32>
    %19 = arith.addi %2, %18 : vector<256x128xi32>
    %c0_i32_7 = arith.constant 0 : i32
    %20 = vector.broadcast %c0_i32_7 : i32 to vector<256x128xi32>
    %21 = arith.cmpi sge, %19, %20 : vector<256x128xi32>
    %22 = arith.andi %17, %21 : vector<256x128xi1>
    %c-1_i32_8 = arith.constant -1 : i32
    %23 = vector.broadcast %c-1_i32_8 : i32 to vector<256x128xi32>
    %24 = arith.addi %2, %23 : vector<256x128xi32>
    %c16_i32 = arith.constant 16 : i32
    %25 = vector.broadcast %c16_i32 : i32 to vector<256x128xi32>
    %26 = arith.cmpi slt, %24, %25 : vector<256x128xi32>
    %27 = arith.andi %22, %26 : vector<256x128xi1>
    %cst_9 = arith.constant 0.000000e+00 : f32
    %28 = vector.broadcast %cst_9 : f32 to vector<256x128xf32>
    %29 = arith.select %27, %8, %28 : vector<256x128xi1>, vector<256x128xf32>
    %30 = arith.truncf %29 : vector<256x128xf32> to vector<256x128xbf16>
    %c0_10 = arith.constant 0 : index
    %c0_11 = arith.constant 0 : index
    %c0_12 = arith.constant 0 : index
    %31 = vector.load %arg2[%c0_10, %c0_11, %c0_12] : memref<9x128x128xbf16, #tpu.memory_space<vmem>>, vector<1x128x128xbf16>
    %32 = vector.shape_cast %31 : vector<1x128x128xbf16> to vector<128x128xbf16>
    %cst_13 = arith.constant dense<0.000000e+00> : vector<256x128xf32>
    %33 = tpu.matmul %30, %32, %cst_13 {dimension_numbers = #tpu.dot_dimension_numbers<[1], [0], [0], [1], [0, 0, 1, 1], [], []>} : vector<256x128xbf16>, vector<128x128xbf16>, vector<256x128xf32> -> vector<256x128xf32>
    %34 = arith.addf %7, %33 : vector<256x128xf32>
    %c8 = arith.constant 8 : index
    %c0_14 = arith.constant 0 : index
    %35 = vector.load %arg10[%c8, %c0_14] : memref<304x128xf32, #tpu.memory_space<vmem>>, vector<256x128xf32>
    %c-16_i32_15 = arith.constant -16 : i32
    %36 = vector.broadcast %c-16_i32_15 : i32 to vector<256x128xi32>
    %37 = arith.addi %0, %36 : vector<256x128xi32>
    %c0_i32_16 = arith.constant 0 : i32
    %38 = vector.broadcast %c0_i32_16 : i32 to vector<256x128xi32>
    %39 = arith.cmpi sge, %37, %38 : vector<256x128xi32>
    %c-16_i32_17 = arith.constant -16 : i32
    %40 = vector.broadcast %c-16_i32_17 : i32 to vector<256x128xi32>
    %41 = arith.addi %0, %40 : vector<256x128xi32>
    %c256_i32_18 = arith.constant 256 : i32
    %42 = vector.broadcast %c256_i32_18 : i32 to vector<256x128xi32>
    %43 = arith.cmpi slt, %41, %42 : vector<256x128xi32>
    %44 = arith.andi %39, %43 : vector<256x128xi1>
    %c0_i32_19 = arith.constant 0 : i32
    %45 = vector.broadcast %c0_i32_19 : i32 to vector<256x128xi32>
    %46 = arith.addi %2, %45 : vector<256x128xi32>
    %c0_i32_20 = arith.constant 0 : i32
    %47 = vector.broadcast %c0_i32_20 : i32 to vector<256x128xi32>
    %48 = arith.cmpi sge, %46, %47 : vector<256x128xi32>
    %49 = arith.andi %44, %48 : vector<256x128xi1>
    %c0_i32_21 = arith.constant 0 : i32
    %50 = vector.broadcast %c0_i32_21 : i32 to vector<256x128xi32>
    %51 = arith.addi %2, %50 : vector<256x128xi32>
    %c16_i32_22 = arith.constant 16 : i32
    %52 = vector.broadcast %c16_i32_22 : i32 to vector<256x128xi32>
    %53 = arith.cmpi slt, %51, %52 : vector<256x128xi32>
    %54 = arith.andi %49, %53 : vector<256x128xi1>
    %cst_23 = arith.constant 0.000000e+00 : f32
    %55 = vector.broadcast %cst_23 : f32 to vector<256x128xf32>
    %56 = arith.select %54, %35, %55 : vector<256x128xi1>, vector<256x128xf32>
    %57 = arith.truncf %56 : vector<256x128xf32> to vector<256x128xbf16>
    %c1 = arith.constant 1 : index
    %c0_24 = arith.constant 0 : index
    %c0_25 = arith.constant 0 : index
    %58 = vector.load %arg2[%c1, %c0_24, %c0_25] : memref<9x128x128xbf16, #tpu.memory_space<vmem>>, vector<1x128x128xbf16>
    %59 = vector.shape_cast %58 : vector<1x128x128xbf16> to vector<128x128xbf16>
    %cst_26 = arith.constant dense<0.000000e+00> : vector<256x128xf32>
    %60 = tpu.matmul %57, %59, %cst_26 {dimension_numbers = #tpu.dot_dimension_numbers<[1], [0], [0], [1], [0, 0, 1, 1], [], []>} : vector<256x128xbf16>, vector<128x128xbf16>, vector<256x128xf32> -> vector<256x128xf32>
    %61 = arith.addf %34, %60 : vector<256x128xf32>
    %c9 = arith.constant 9 : index
    %c0_27 = arith.constant 0 : index
    %62 = vector.load %arg10[%c9, %c0_27] : memref<304x128xf32, #tpu.memory_space<vmem>>, vector<256x128xf32>
    %c-16_i32_28 = arith.constant -16 : i32
    %63 = vector.broadcast %c-16_i32_28 : i32 to vector<256x128xi32>
    %64 = arith.addi %0, %63 : vector<256x128xi32>
    %c0_i32_29 = arith.constant 0 : i32
    %65 = vector.broadcast %c0_i32_29 : i32 to vector<256x128xi32>
    %66 = arith.cmpi sge, %64, %65 : vector<256x128xi32>
    %c-16_i32_30 = arith.constant -16 : i32
    %67 = vector.broadcast %c-16_i32_30 : i32 to vector<256x128xi32>
    %68 = arith.addi %0, %67 : vector<256x128xi32>
    %c256_i32_31 = arith.constant 256 : i32
    %69 = vector.broadcast %c256_i32_31 : i32 to vector<256x128xi32>
    %70 = arith.cmpi slt, %68, %69 : vector<256x128xi32>
    %71 = arith.andi %66, %70 : vector<256x128xi1>
    %c1_i32 = arith.constant 1 : i32
    %72 = vector.broadcast %c1_i32 : i32 to vector<256x128xi32>
    %73 = arith.addi %2, %72 : vector<256x128xi32>
    %c0_i32_32 = arith.constant 0 : i32
    %74 = vector.broadcast %c0_i32_32 : i32 to vector<256x128xi32>
    %75 = arith.cmpi sge, %73, %74 : vector<256x128xi32>
    %76 = arith.andi %71, %75 : vector<256x128xi1>
    %c1_i32_33 = arith.constant 1 : i32
    %77 = vector.broadcast %c1_i32_33 : i32 to vector<256x128xi32>
    %78 = arith.addi %2, %77 : vector<256x128xi32>
    %c16_i32_34 = arith.constant 16 : i32
    %79 = vector.broadcast %c16_i32_34 : i32 to vector<256x128xi32>
    %80 = arith.cmpi slt, %78, %79 : vector<256x128xi32>
    %81 = arith.andi %76, %80 : vector<256x128xi1>
    %cst_35 = arith.constant 0.000000e+00 : f32
    %82 = vector.broadcast %cst_35 : f32 to vector<256x128xf32>
    %83 = arith.select %81, %62, %82 : vector<256x128xi1>, vector<256x128xf32>
    %84 = arith.truncf %83 : vector<256x128xf32> to vector<256x128xbf16>
    %c2 = arith.constant 2 : index
    %c0_36 = arith.constant 0 : index
    %c0_37 = arith.constant 0 : index
    %85 = vector.load %arg2[%c2, %c0_36, %c0_37] : memref<9x128x128xbf16, #tpu.memory_space<vmem>>, vector<1x128x128xbf16>
    %86 = vector.shape_cast %85 : vector<1x128x128xbf16> to vector<128x128xbf16>
    %cst_38 = arith.constant dense<0.000000e+00> : vector<256x128xf32>
    %87 = tpu.matmul %84, %86, %cst_38 {dimension_numbers = #tpu.dot_dimension_numbers<[1], [0], [0], [1], [0, 0, 1, 1], [], []>} : vector<256x128xbf16>, vector<128x128xbf16>, vector<256x128xf32> -> vector<256x128xf32>
    %88 = arith.addf %61, %87 : vector<256x128xf32>
    %c23 = arith.constant 23 : index
    %c0_39 = arith.constant 0 : index
    %89 = vector.load %arg10[%c23, %c0_39] : memref<304x128xf32, #tpu.memory_space<vmem>>, vector<256x128xf32>
    %c0_i32_40 = arith.constant 0 : i32
    %90 = vector.broadcast %c0_i32_40 : i32 to vector<256x128xi32>
    %91 = arith.addi %0, %90 : vector<256x128xi32>
    %c0_i32_41 = arith.constant 0 : i32
    %92 = vector.broadcast %c0_i32_41 : i32 to vector<256x128xi32>
    %93 = arith.cmpi sge, %91, %92 : vector<256x128xi32>
    %c0_i32_42 = arith.constant 0 : i32
    %94 = vector.broadcast %c0_i32_42 : i32 to vector<256x128xi32>
    %95 = arith.addi %0, %94 : vector<256x128xi32>
    %c256_i32_43 = arith.constant 256 : i32
    %96 = vector.broadcast %c256_i32_43 : i32 to vector<256x128xi32>
    %97 = arith.cmpi slt, %95, %96 : vector<256x128xi32>
    %98 = arith.andi %93, %97 : vector<256x128xi1>
    %c-1_i32_44 = arith.constant -1 : i32
    %99 = vector.broadcast %c-1_i32_44 : i32 to vector<256x128xi32>
    %100 = arith.addi %2, %99 : vector<256x128xi32>
    %c0_i32_45 = arith.constant 0 : i32
    %101 = vector.broadcast %c0_i32_45 : i32 to vector<256x128xi32>
    %102 = arith.cmpi sge, %100, %101 : vector<256x128xi32>
    %103 = arith.andi %98, %102 : vector<256x128xi1>
    %c-1_i32_46 = arith.constant -1 : i32
    %104 = vector.broadcast %c-1_i32_46 : i32 to vector<256x128xi32>
    %105 = arith.addi %2, %104 : vector<256x128xi32>
    %c16_i32_47 = arith.constant 16 : i32
    %106 = vector.broadcast %c16_i32_47 : i32 to vector<256x128xi32>
    %107 = arith.cmpi slt, %105, %106 : vector<256x128xi32>
    %108 = arith.andi %103, %107 : vector<256x128xi1>
    %cst_48 = arith.constant 0.000000e+00 : f32
    %109 = vector.broadcast %cst_48 : f32 to vector<256x128xf32>
    %110 = arith.select %108, %89, %109 : vector<256x128xi1>, vector<256x128xf32>
    %111 = arith.truncf %110 : vector<256x128xf32> to vector<256x128xbf16>
    %c3 = arith.constant 3 : index
    %c0_49 = arith.constant 0 : index
    %c0_50 = arith.constant 0 : index
    %112 = vector.load %arg2[%c3, %c0_49, %c0_50] : memref<9x128x128xbf16, #tpu.memory_space<vmem>>, vector<1x128x128xbf16>
    %113 = vector.shape_cast %112 : vector<1x128x128xbf16> to vector<128x128xbf16>
    %cst_51 = arith.constant dense<0.000000e+00> : vector<256x128xf32>
    %114 = tpu.matmul %111, %113, %cst_51 {dimension_numbers = #tpu.dot_dimension_numbers<[1], [0], [0], [1], [0, 0, 1, 1], [], []>} : vector<256x128xbf16>, vector<128x128xbf16>, vector<256x128xf32> -> vector<256x128xf32>
    %115 = arith.addf %88, %114 : vector<256x128xf32>
    %c24_52 = arith.constant 24 : index
    %c0_53 = arith.constant 0 : index
    %116 = vector.load %arg10[%c24_52, %c0_53] : memref<304x128xf32, #tpu.memory_space<vmem>>, vector<256x128xf32>
    %c0_i32_54 = arith.constant 0 : i32
    %117 = vector.broadcast %c0_i32_54 : i32 to vector<256x128xi32>
    %118 = arith.addi %0, %117 : vector<256x128xi32>
    %c0_i32_55 = arith.constant 0 : i32
    %119 = vector.broadcast %c0_i32_55 : i32 to vector<256x128xi32>
    %120 = arith.cmpi sge, %118, %119 : vector<256x128xi32>
    %c0_i32_56 = arith.constant 0 : i32
    %121 = vector.broadcast %c0_i32_56 : i32 to vector<256x128xi32>
    %122 = arith.addi %0, %121 : vector<256x128xi32>
    %c256_i32_57 = arith.constant 256 : i32
    %123 = vector.broadcast %c256_i32_57 : i32 to vector<256x128xi32>
    %124 = arith.cmpi slt, %122, %123 : vector<256x128xi32>
    %125 = arith.andi %120, %124 : vector<256x128xi1>
    %c0_i32_58 = arith.constant 0 : i32
    %126 = vector.broadcast %c0_i32_58 : i32 to vector<256x128xi32>
    %127 = arith.addi %2, %126 : vector<256x128xi32>
    %c0_i32_59 = arith.constant 0 : i32
    %128 = vector.broadcast %c0_i32_59 : i32 to vector<256x128xi32>
    %129 = arith.cmpi sge, %127, %128 : vector<256x128xi32>
    %130 = arith.andi %125, %129 : vector<256x128xi1>
    %c0_i32_60 = arith.constant 0 : i32
    %131 = vector.broadcast %c0_i32_60 : i32 to vector<256x128xi32>
    %132 = arith.addi %2, %131 : vector<256x128xi32>
    %c16_i32_61 = arith.constant 16 : i32
    %133 = vector.broadcast %c16_i32_61 : i32 to vector<256x128xi32>
    %134 = arith.cmpi slt, %132, %133 : vector<256x128xi32>
    %135 = arith.andi %130, %134 : vector<256x128xi1>
    %cst_62 = arith.constant 0.000000e+00 : f32
    %136 = vector.broadcast %cst_62 : f32 to vector<256x128xf32>
    %137 = arith.select %135, %116, %136 : vector<256x128xi1>, vector<256x128xf32>
    %138 = arith.truncf %137 : vector<256x128xf32> to vector<256x128xbf16>
    %c4 = arith.constant 4 : index
    %c0_63 = arith.constant 0 : index
    %c0_64 = arith.constant 0 : index
    %139 = vector.load %arg2[%c4, %c0_63, %c0_64] : memref<9x128x128xbf16, #tpu.memory_space<vmem>>, vector<1x128x128xbf16>
    %140 = vector.shape_cast %139 : vector<1x128x128xbf16> to vector<128x128xbf16>
    %cst_65 = arith.constant dense<0.000000e+00> : vector<256x128xf32>
    %141 = tpu.matmul %138, %140, %cst_65 {dimension_numbers = #tpu.dot_dimension_numbers<[1], [0], [0], [1], [0, 0, 1, 1], [], []>} : vector<256x128xbf16>, vector<128x128xbf16>, vector<256x128xf32> -> vector<256x128xf32>
    %142 = arith.addf %115, %141 : vector<256x128xf32>
    %c25 = arith.constant 25 : index
    %c0_66 = arith.constant 0 : index
    %143 = vector.load %arg10[%c25, %c0_66] : memref<304x128xf32, #tpu.memory_space<vmem>>, vector<256x128xf32>
    %c0_i32_67 = arith.constant 0 : i32
    %144 = vector.broadcast %c0_i32_67 : i32 to vector<256x128xi32>
    %145 = arith.addi %0, %144 : vector<256x128xi32>
    %c0_i32_68 = arith.constant 0 : i32
    %146 = vector.broadcast %c0_i32_68 : i32 to vector<256x128xi32>
    %147 = arith.cmpi sge, %145, %146 : vector<256x128xi32>
    %c0_i32_69 = arith.constant 0 : i32
    %148 = vector.broadcast %c0_i32_69 : i32 to vector<256x128xi32>
    %149 = arith.addi %0, %148 : vector<256x128xi32>
    %c256_i32_70 = arith.constant 256 : i32
    %150 = vector.broadcast %c256_i32_70 : i32 to vector<256x128xi32>
    %151 = arith.cmpi slt, %149, %150 : vector<256x128xi32>
    %152 = arith.andi %147, %151 : vector<256x128xi1>
    %c1_i32_71 = arith.constant 1 : i32
    %153 = vector.broadcast %c1_i32_71 : i32 to vector<256x128xi32>
    %154 = arith.addi %2, %153 : vector<256x128xi32>
    %c0_i32_72 = arith.constant 0 : i32
    %155 = vector.broadcast %c0_i32_72 : i32 to vector<256x128xi32>
    %156 = arith.cmpi sge, %154, %155 : vector<256x128xi32>
    %157 = arith.andi %152, %156 : vector<256x128xi1>
    %c1_i32_73 = arith.constant 1 : i32
    %158 = vector.broadcast %c1_i32_73 : i32 to vector<256x128xi32>
    %159 = arith.addi %2, %158 : vector<256x128xi32>
    %c16_i32_74 = arith.constant 16 : i32
    %160 = vector.broadcast %c16_i32_74 : i32 to vector<256x128xi32>
    %161 = arith.cmpi slt, %159, %160 : vector<256x128xi32>
    %162 = arith.andi %157, %161 : vector<256x128xi1>
    %cst_75 = arith.constant 0.000000e+00 : f32
    %163 = vector.broadcast %cst_75 : f32 to vector<256x128xf32>
    %164 = arith.select %162, %143, %163 : vector<256x128xi1>, vector<256x128xf32>
    %165 = arith.truncf %164 : vector<256x128xf32> to vector<256x128xbf16>
    %c5 = arith.constant 5 : index
    %c0_76 = arith.constant 0 : index
    %c0_77 = arith.constant 0 : index
    %166 = vector.load %arg2[%c5, %c0_76, %c0_77] : memref<9x128x128xbf16, #tpu.memory_space<vmem>>, vector<1x128x128xbf16>
    %167 = vector.shape_cast %166 : vector<1x128x128xbf16> to vector<128x128xbf16>
    %cst_78 = arith.constant dense<0.000000e+00> : vector<256x128xf32>
    %168 = tpu.matmul %165, %167, %cst_78 {dimension_numbers = #tpu.dot_dimension_numbers<[1], [0], [0], [1], [0, 0, 1, 1], [], []>} : vector<256x128xbf16>, vector<128x128xbf16>, vector<256x128xf32> -> vector<256x128xf32>
    %169 = arith.addf %142, %168 : vector<256x128xf32>
    %c39 = arith.constant 39 : index
    %c0_79 = arith.constant 0 : index
    %170 = vector.load %arg10[%c39, %c0_79] : memref<304x128xf32, #tpu.memory_space<vmem>>, vector<256x128xf32>
    %c16_i32_80 = arith.constant 16 : i32
    %171 = vector.broadcast %c16_i32_80 : i32 to vector<256x128xi32>
    %172 = arith.addi %0, %171 : vector<256x128xi32>
    %c0_i32_81 = arith.constant 0 : i32
    %173 = vector.broadcast %c0_i32_81 : i32 to vector<256x128xi32>
    %174 = arith.cmpi sge, %172, %173 : vector<256x128xi32>
    %c16_i32_82 = arith.constant 16 : i32
    %175 = vector.broadcast %c16_i32_82 : i32 to vector<256x128xi32>
    %176 = arith.addi %0, %175 : vector<256x128xi32>
    %c256_i32_83 = arith.constant 256 : i32
    %177 = vector.broadcast %c256_i32_83 : i32 to vector<256x128xi32>
    %178 = arith.cmpi slt, %176, %177 : vector<256x128xi32>
    %179 = arith.andi %174, %178 : vector<256x128xi1>
    %c-1_i32_84 = arith.constant -1 : i32
    %180 = vector.broadcast %c-1_i32_84 : i32 to vector<256x128xi32>
    %181 = arith.addi %2, %180 : vector<256x128xi32>
    %c0_i32_85 = arith.constant 0 : i32
    %182 = vector.broadcast %c0_i32_85 : i32 to vector<256x128xi32>
    %183 = arith.cmpi sge, %181, %182 : vector<256x128xi32>
    %184 = arith.andi %179, %183 : vector<256x128xi1>
    %c-1_i32_86 = arith.constant -1 : i32
    %185 = vector.broadcast %c-1_i32_86 : i32 to vector<256x128xi32>
    %186 = arith.addi %2, %185 : vector<256x128xi32>
    %c16_i32_87 = arith.constant 16 : i32
    %187 = vector.broadcast %c16_i32_87 : i32 to vector<256x128xi32>
    %188 = arith.cmpi slt, %186, %187 : vector<256x128xi32>
    %189 = arith.andi %184, %188 : vector<256x128xi1>
    %cst_88 = arith.constant 0.000000e+00 : f32
    %190 = vector.broadcast %cst_88 : f32 to vector<256x128xf32>
    %191 = arith.select %189, %170, %190 : vector<256x128xi1>, vector<256x128xf32>
    %192 = arith.truncf %191 : vector<256x128xf32> to vector<256x128xbf16>
    %c6 = arith.constant 6 : index
    %c0_89 = arith.constant 0 : index
    %c0_90 = arith.constant 0 : index
    %193 = vector.load %arg2[%c6, %c0_89, %c0_90] : memref<9x128x128xbf16, #tpu.memory_space<vmem>>, vector<1x128x128xbf16>
    %194 = vector.shape_cast %193 : vector<1x128x128xbf16> to vector<128x128xbf16>
    %cst_91 = arith.constant dense<0.000000e+00> : vector<256x128xf32>
    %195 = tpu.matmul %192, %194, %cst_91 {dimension_numbers = #tpu.dot_dimension_numbers<[1], [0], [0], [1], [0, 0, 1, 1], [], []>} : vector<256x128xbf16>, vector<128x128xbf16>, vector<256x128xf32> -> vector<256x128xf32>
    %196 = arith.addf %169, %195 : vector<256x128xf32>
    %c40 = arith.constant 40 : index
    %c0_92 = arith.constant 0 : index
    %197 = vector.load %arg10[%c40, %c0_92] : memref<304x128xf32, #tpu.memory_space<vmem>>, vector<256x128xf32>
    %c16_i32_93 = arith.constant 16 : i32
    %198 = vector.broadcast %c16_i32_93 : i32 to vector<256x128xi32>
    %199 = arith.addi %0, %198 : vector<256x128xi32>
    %c0_i32_94 = arith.constant 0 : i32
    %200 = vector.broadcast %c0_i32_94 : i32 to vector<256x128xi32>
    %201 = arith.cmpi sge, %199, %200 : vector<256x128xi32>
    %c16_i32_95 = arith.constant 16 : i32
    %202 = vector.broadcast %c16_i32_95 : i32 to vector<256x128xi32>
    %203 = arith.addi %0, %202 : vector<256x128xi32>
    %c256_i32_96 = arith.constant 256 : i32
    %204 = vector.broadcast %c256_i32_96 : i32 to vector<256x128xi32>
    %205 = arith.cmpi slt, %203, %204 : vector<256x128xi32>
    %206 = arith.andi %201, %205 : vector<256x128xi1>
    %c0_i32_97 = arith.constant 0 : i32
    %207 = vector.broadcast %c0_i32_97 : i32 to vector<256x128xi32>
    %208 = arith.addi %2, %207 : vector<256x128xi32>
    %c0_i32_98 = arith.constant 0 : i32
    %209 = vector.broadcast %c0_i32_98 : i32 to vector<256x128xi32>
    %210 = arith.cmpi sge, %208, %209 : vector<256x128xi32>
    %211 = arith.andi %206, %210 : vector<256x128xi1>
    %c0_i32_99 = arith.constant 0 : i32
    %212 = vector.broadcast %c0_i32_99 : i32 to vector<256x128xi32>
    %213 = arith.addi %2, %212 : vector<256x128xi32>
    %c16_i32_100 = arith.constant 16 : i32
    %214 = vector.broadcast %c16_i32_100 : i32 to vector<256x128xi32>
    %215 = arith.cmpi slt, %213, %214 : vector<256x128xi32>
    %216 = arith.andi %211, %215 : vector<256x128xi1>
    %cst_101 = arith.constant 0.000000e+00 : f32
    %217 = vector.broadcast %cst_101 : f32 to vector<256x128xf32>
    %218 = arith.select %216, %197, %217 : vector<256x128xi1>, vector<256x128xf32>
    %219 = arith.truncf %218 : vector<256x128xf32> to vector<256x128xbf16>
    %c7_102 = arith.constant 7 : index
    %c0_103 = arith.constant 0 : index
    %c0_104 = arith.constant 0 : index
    %220 = vector.load %arg2[%c7_102, %c0_103, %c0_104] : memref<9x128x128xbf16, #tpu.memory_space<vmem>>, vector<1x128x128xbf16>
    %221 = vector.shape_cast %220 : vector<1x128x128xbf16> to vector<128x128xbf16>
    %cst_105 = arith.constant dense<0.000000e+00> : vector<256x128xf32>
    %222 = tpu.matmul %219, %221, %cst_105 {dimension_numbers = #tpu.dot_dimension_numbers<[1], [0], [0], [1], [0, 0, 1, 1], [], []>} : vector<256x128xbf16>, vector<128x128xbf16>, vector<256x128xf32> -> vector<256x128xf32>
    %223 = arith.addf %196, %222 : vector<256x128xf32>
    %c41 = arith.constant 41 : index
    %c0_106 = arith.constant 0 : index
    %224 = vector.load %arg10[%c41, %c0_106] : memref<304x128xf32, #tpu.memory_space<vmem>>, vector<256x128xf32>
    %c16_i32_107 = arith.constant 16 : i32
    %225 = vector.broadcast %c16_i32_107 : i32 to vector<256x128xi32>
    %226 = arith.addi %0, %225 : vector<256x128xi32>
    %c0_i32_108 = arith.constant 0 : i32
    %227 = vector.broadcast %c0_i32_108 : i32 to vector<256x128xi32>
    %228 = arith.cmpi sge, %226, %227 : vector<256x128xi32>
    %c16_i32_109 = arith.constant 16 : i32
    %229 = vector.broadcast %c16_i32_109 : i32 to vector<256x128xi32>
    %230 = arith.addi %0, %229 : vector<256x128xi32>
    %c256_i32_110 = arith.constant 256 : i32
    %231 = vector.broadcast %c256_i32_110 : i32 to vector<256x128xi32>
    %232 = arith.cmpi slt, %230, %231 : vector<256x128xi32>
    %233 = arith.andi %228, %232 : vector<256x128xi1>
    %c1_i32_111 = arith.constant 1 : i32
    %234 = vector.broadcast %c1_i32_111 : i32 to vector<256x128xi32>
    %235 = arith.addi %2, %234 : vector<256x128xi32>
    %c0_i32_112 = arith.constant 0 : i32
    %236 = vector.broadcast %c0_i32_112 : i32 to vector<256x128xi32>
    %237 = arith.cmpi sge, %235, %236 : vector<256x128xi32>
    %238 = arith.andi %233, %237 : vector<256x128xi1>
    %c1_i32_113 = arith.constant 1 : i32
    %239 = vector.broadcast %c1_i32_113 : i32 to vector<256x128xi32>
    %240 = arith.addi %2, %239 : vector<256x128xi32>
    %c16_i32_114 = arith.constant 16 : i32
    %241 = vector.broadcast %c16_i32_114 : i32 to vector<256x128xi32>
    %242 = arith.cmpi slt, %240, %241 : vector<256x128xi32>
    %243 = arith.andi %238, %242 : vector<256x128xi1>
    %cst_115 = arith.constant 0.000000e+00 : f32
    %244 = vector.broadcast %cst_115 : f32 to vector<256x128xf32>
    %245 = arith.select %243, %224, %244 : vector<256x128xi1>, vector<256x128xf32>
    %246 = arith.truncf %245 : vector<256x128xf32> to vector<256x128xbf16>
    %c8_116 = arith.constant 8 : index
    %c0_117 = arith.constant 0 : index
    %c0_118 = arith.constant 0 : index
    %247 = vector.load %arg2[%c8_116, %c0_117, %c0_118] : memref<9x128x128xbf16, #tpu.memory_space<vmem>>, vector<1x128x128xbf16>
    %248 = vector.shape_cast %247 : vector<1x128x128xbf16> to vector<128x128xbf16>
    %cst_119 = arith.constant dense<0.000000e+00> : vector<256x128xf32>
    %249 = tpu.matmul %246, %248, %cst_119 {dimension_numbers = #tpu.dot_dimension_numbers<[1], [0], [0], [1], [0, 0, 1, 1], [], []>} : vector<256x128xbf16>, vector<128x128xbf16>, vector<256x128xf32> -> vector<256x128xf32>
    %250 = arith.addf %223, %249 : vector<256x128xf32>
    %c0_120 = arith.constant 0 : index
    %c0_121 = arith.constant 0 : index
    %251 = vector.load %arg3[%c0_120, %c0_121] : memref<1x128xf32, #tpu.memory_space<vmem>>, vector<1x128xf32>
    %252 = vector.broadcast %251 : vector<1x128xf32> to vector<256x128xf32>
    %253 = arith.addf %250, %252 : vector<256x128xf32>
    %cst_122 = arith.constant 5.000000e-01 : f32
    %254 = vector.broadcast %cst_122 : f32 to vector<256x128xf32>
    %255 = arith.mulf %254, %253 : vector<256x128xf32>
    %cst_123 = arith.constant 4.471500e-02 : f32
    %256 = vector.broadcast %cst_123 : f32 to vector<256x128xf32>
    %257 = arith.mulf %256, %253 : vector<256x128xf32>
    %258 = arith.mulf %257, %253 : vector<256x128xf32>
    %259 = arith.mulf %258, %253 : vector<256x128xf32>
    %260 = arith.addf %253, %259 : vector<256x128xf32>
    %cst_124 = arith.constant 0.797884583 : f32
    %261 = vector.broadcast %cst_124 : f32 to vector<256x128xf32>
    %262 = arith.mulf %261, %260 : vector<256x128xf32>
    %263 = math.tanh %262 : vector<256x128xf32>
    %cst_125 = arith.constant 1.000000e+00 : f32
    %264 = vector.broadcast %cst_125 : f32 to vector<256x128xf32>
    %265 = arith.addf %264, %263 : vector<256x128xf32>
    %266 = arith.mulf %255, %265 : vector<256x128xf32>
    %cst_126 = arith.constant 0.000000e+00 : f32
    %267 = vector.broadcast %cst_126 : f32 to vector<304x128xf32>
    %c0_127 = arith.constant 0 : index
    %c0_128 = arith.constant 0 : index
    %268 = vector.load %arg11[%c0_127, %c0_128] : memref<304x128xf32, #tpu.memory_space<vmem>>, vector<304x128xf32>
    tpu.vector_store %arg11[%c0_127, %c0_128], %267 {strides = array<i32>} : memref<304x128xf32, #tpu.memory_space<vmem>>, vector<304x128xf32>,
    %c24_129 = arith.constant 24 : index
    %c0_130 = arith.constant 0 : index
    %269 = vector.load %arg11[%c24_129, %c0_130] : memref<304x128xf32, #tpu.memory_space<vmem>>, vector<256x128xf32>
    tpu.vector_store %arg11[%c24_129, %c0_130], %266 {strides = array<i32>} : memref<304x128xf32, #tpu.memory_space<vmem>>, vector<256x128xf32>,
    %cst_131 = arith.constant 0.000000e+00 : f32
    %270 = vector.broadcast %cst_131 : f32 to vector<256x128xf32>
    %c24_132 = arith.constant 24 : index
    %c0_133 = arith.constant 0 : index
    %271 = vector.load %arg11[%c24_132, %c0_133] : memref<304x128xf32, #tpu.memory_space<vmem>>, vector<256x128xf32>
    %c0_i32_134 = arith.constant 0 : i32
    %272 = vector.broadcast %c0_i32_134 : i32 to vector<256x128xi32>
    %273 = arith.addi %0, %272 : vector<256x128xi32>
    %c256_i32_135 = arith.constant 256 : i32
    %274 = vector.broadcast %c256_i32_135 : i32 to vector<256x128xi32>
    %275 = arith.cmpi slt, %273, %274 : vector<256x128xi32>
    %c0_i32_136 = arith.constant 0 : i32
    %276 = vector.broadcast %c0_i32_136 : i32 to vector<256x128xi32>
    %277 = arith.addi %2, %276 : vector<256x128xi32>
    %c16_i32_137 = arith.constant 16 : i32
    %278 = vector.broadcast %c16_i32_137 : i32 to vector<256x128xi32>
    %279 = arith.cmpi slt, %277, %278 : vector<256x128xi32>
    %280 = arith.andi %275, %279 : vector<256x128xi1>
    %cst_138 = arith.constant 0.000000e+00 : f32
    %281 = vector.broadcast %cst_138 : f32 to vector<256x128xf32>
    %282 = arith.select %280, %271, %281 : vector<256x128xi1>, vector<256x128xf32>
    %283 = arith.truncf %282 : vector<256x128xf32> to vector<256x128xbf16>
    %c0_139 = arith.constant 0 : index
    %c0_140 = arith.constant 0 : index
    %c0_141 = arith.constant 0 : index
    %284 = vector.load %arg4[%c0_139, %c0_140, %c0_141] : memref<9x128x128xbf16, #tpu.memory_space<vmem>>, vector<1x128x128xbf16>
    %285 = vector.shape_cast %284 : vector<1x128x128xbf16> to vector<128x128xbf16>
    %cst_142 = arith.constant dense<0.000000e+00> : vector<256x128xf32>
    %286 = tpu.matmul %283, %285, %cst_142 {dimension_numbers = #tpu.dot_dimension_numbers<[1], [0], [0], [1], [0, 0, 1, 1], [], []>} : vector<256x128xbf16>, vector<128x128xbf16>, vector<256x128xf32> -> vector<256x128xf32>
    %287 = arith.addf %270, %286 : vector<256x128xf32>
    %c0_143 = arith.constant 0 : index
    %c0_144 = arith.constant 0 : index
    %288 = vector.load %arg5[%c0_143, %c0_144] : memref<1x128xf32, #tpu.memory_space<vmem>>, vector<1x128xf32>
    %289 = vector.broadcast %288 : vector<1x128xf32> to vector<256x128xf32>
    %290 = arith.addf %287, %289 : vector<256x128xf32>
    %291 = math.tanh %290 : vector<256x128xf32>
    %c0_145 = arith.constant 0 : index
    %c0_146 = arith.constant 0 : index
    %292 = vector.load %arg6[%c0_145, %c0_146] : memref<256x128xf32, #tpu.memory_space<vmem>>, vector<256x128xf32>
    tpu.vector_store %arg6[%c0_145, %c0_146], %291 {strides = array<i32>} : memref<256x128xf32, #tpu.memory_space<vmem>>, vector<256x128xf32>,
    %cst_147 = arith.constant 0.000000e+00 : f32
    %293 = vector.broadcast %cst_147 : f32 to vector<256x128xf32>
    %c24_148 = arith.constant 24 : index
    %c0_149 = arith.constant 0 : index
    %294 = vector.load %arg11[%c24_148, %c0_149] : memref<304x128xf32, #tpu.memory_space<vmem>>, vector<256x128xf32>
    %c0_i32_150 = arith.constant 0 : i32
    %295 = vector.broadcast %c0_i32_150 : i32 to vector<256x128xi32>
    %296 = arith.addi %0, %295 : vector<256x128xi32>
    %c256_i32_151 = arith.constant 256 : i32
    %297 = vector.broadcast %c256_i32_151 : i32 to vector<256x128xi32>
    %298 = arith.cmpi slt, %296, %297 : vector<256x128xi32>
    %c0_i32_152 = arith.constant 0 : i32
    %299 = vector.broadcast %c0_i32_152 : i32 to vector<256x128xi32>
    %300 = arith.addi %2, %299 : vector<256x128xi32>
    %c16_i32_153 = arith.constant 16 : i32
    %301 = vector.broadcast %c16_i32_153 : i32 to vector<256x128xi32>
    %302 = arith.cmpi slt, %300, %301 : vector<256x128xi32>
    %303 = arith.andi %298, %302 : vector<256x128xi1>
    %cst_154 = arith.constant 0.000000e+00 : f32
    %304 = vector.broadcast %cst_154 : f32 to vector<256x128xf32>
    %305 = arith.select %303, %294, %304 : vector<256x128xi1>, vector<256x128xf32>
    %306 = arith.truncf %305 : vector<256x128xf32> to vector<256x128xbf16>
    %c1_155 = arith.constant 1 : index
    %c0_156 = arith.constant 0 : index
    %c0_157 = arith.constant 0 : index
    %307 = vector.load %arg4[%c1_155, %c0_156, %c0_157] : memref<9x128x128xbf16, #tpu.memory_space<vmem>>, vector<1x128x128xbf16>
    %308 = vector.shape_cast %307 : vector<1x128x128xbf16> to vector<128x128xbf16>
    %cst_158 = arith.constant dense<0.000000e+00> : vector<256x128xf32>
    %309 = tpu.matmul %306, %308, %cst_158 {dimension_numbers = #tpu.dot_dimension_numbers<[1], [0], [0], [1], [0, 0, 1, 1], [], []>} : vector<256x128xbf16>, vector<128x128xbf16>, vector<256x128xf32> -> vector<256x128xf32>
    %310 = arith.addf %293, %309 : vector<256x128xf32>
    %c25_159 = arith.constant 25 : index
    %c0_160 = arith.constant 0 : index
    %311 = vector.load %arg11[%c25_159, %c0_160] : memref<304x128xf32, #tpu.memory_space<vmem>>, vector<256x128xf32>
    %c0_i32_161 = arith.constant 0 : i32
    %312 = vector.broadcast %c0_i32_161 : i32 to vector<256x128xi32>
    %313 = arith.addi %0, %312 : vector<256x128xi32>
    %c256_i32_162 = arith.constant 256 : i32
    %314 = vector.broadcast %c256_i32_162 : i32 to vector<256x128xi32>
    %315 = arith.cmpi slt, %313, %314 : vector<256x128xi32>
    %c1_i32_163 = arith.constant 1 : i32
    %316 = vector.broadcast %c1_i32_163 : i32 to vector<256x128xi32>
    %317 = arith.addi %2, %316 : vector<256x128xi32>
    %c16_i32_164 = arith.constant 16 : i32
    %318 = vector.broadcast %c16_i32_164 : i32 to vector<256x128xi32>
    %319 = arith.cmpi slt, %317, %318 : vector<256x128xi32>
    %320 = arith.andi %315, %319 : vector<256x128xi1>
    %cst_165 = arith.constant 0.000000e+00 : f32
    %321 = vector.broadcast %cst_165 : f32 to vector<256x128xf32>
    %322 = arith.select %320, %311, %321 : vector<256x128xi1>, vector<256x128xf32>
    %323 = arith.truncf %322 : vector<256x128xf32> to vector<256x128xbf16>
    %c2_166 = arith.constant 2 : index
    %c0_167 = arith.constant 0 : index
    %c0_168 = arith.constant 0 : index
    %324 = vector.load %arg4[%c2_166, %c0_167, %c0_168] : memref<9x128x128xbf16, #tpu.memory_space<vmem>>, vector<1x128x128xbf16>
    %325 = vector.shape_cast %324 : vector<1x128x128xbf16> to vector<128x128xbf16>
    %cst_169 = arith.constant dense<0.000000e+00> : vector<256x128xf32>
    %326 = tpu.matmul %323, %325, %cst_169 {dimension_numbers = #tpu.dot_dimension_numbers<[1], [0], [0], [1], [0, 0, 1, 1], [], []>} : vector<256x128xbf16>, vector<128x128xbf16>, vector<256x128xf32> -> vector<256x128xf32>
    %327 = arith.addf %310, %326 : vector<256x128xf32>
    %c0_170 = arith.constant 0 : index
    %c0_171 = arith.constant 0 : index
    %328 = vector.load %arg5[%c0_170, %c0_171] : memref<1x128xf32, #tpu.memory_space<vmem>>, vector<1x128xf32>
    %329 = vector.broadcast %328 : vector<1x128xf32> to vector<256x128xf32>
    %330 = arith.addf %327, %329 : vector<256x128xf32>
    %331 = math.tanh %330 : vector<256x128xf32>
    %c0_172 = arith.constant 0 : index
    %c0_173 = arith.constant 0 : index
    %332 = vector.load %arg7[%c0_172, %c0_173] : memref<256x128xf32, #tpu.memory_space<vmem>>, vector<256x128xf32>
    tpu.vector_store %arg7[%c0_172, %c0_173], %331 {strides = array<i32>} : memref<256x128xf32, #tpu.memory_space<vmem>>, vector<256x128xf32>,
    %cst_174 = arith.constant 0.000000e+00 : f32
    %333 = vector.broadcast %cst_174 : f32 to vector<256x128xf32>
    %c24_175 = arith.constant 24 : index
    %c0_176 = arith.constant 0 : index
    %334 = vector.load %arg11[%c24_175, %c0_176] : memref<304x128xf32, #tpu.memory_space<vmem>>, vector<256x128xf32>
    %c0_i32_177 = arith.constant 0 : i32
    %335 = vector.broadcast %c0_i32_177 : i32 to vector<256x128xi32>
    %336 = arith.addi %0, %335 : vector<256x128xi32>
    %c256_i32_178 = arith.constant 256 : i32
    %337 = vector.broadcast %c256_i32_178 : i32 to vector<256x128xi32>
    %338 = arith.cmpi slt, %336, %337 : vector<256x128xi32>
    %c0_i32_179 = arith.constant 0 : i32
    %339 = vector.broadcast %c0_i32_179 : i32 to vector<256x128xi32>
    %340 = arith.addi %2, %339 : vector<256x128xi32>
    %c16_i32_180 = arith.constant 16 : i32
    %341 = vector.broadcast %c16_i32_180 : i32 to vector<256x128xi32>
    %342 = arith.cmpi slt, %340, %341 : vector<256x128xi32>
    %343 = arith.andi %338, %342 : vector<256x128xi1>
    %cst_181 = arith.constant 0.000000e+00 : f32
    %344 = vector.broadcast %cst_181 : f32 to vector<256x128xf32>
    %345 = arith.select %343, %334, %344 : vector<256x128xi1>, vector<256x128xf32>
    %346 = arith.truncf %345 : vector<256x128xf32> to vector<256x128xbf16>
    %c3_182 = arith.constant 3 : index
    %c0_183 = arith.constant 0 : index
    %c0_184 = arith.constant 0 : index
    %347 = vector.load %arg4[%c3_182, %c0_183, %c0_184] : memref<9x128x128xbf16, #tpu.memory_space<vmem>>, vector<1x128x128xbf16>
    %348 = vector.shape_cast %347 : vector<1x128x128xbf16> to vector<128x128xbf16>
    %cst_185 = arith.constant dense<0.000000e+00> : vector<256x128xf32>
    %349 = tpu.matmul %346, %348, %cst_185 {dimension_numbers = #tpu.dot_dimension_numbers<[1], [0], [0], [1], [0, 0, 1, 1], [], []>} : vector<256x128xbf16>, vector<128x128xbf16>, vector<256x128xf32> -> vector<256x128xf32>
    %350 = arith.addf %333, %349 : vector<256x128xf32>
    %c40_186 = arith.constant 40 : index
    %c0_187 = arith.constant 0 : index
    %351 = vector.load %arg11[%c40_186, %c0_187] : memref<304x128xf32, #tpu.memory_space<vmem>>, vector<256x128xf32>
    %c16_i32_188 = arith.constant 16 : i32
    %352 = vector.broadcast %c16_i32_188 : i32 to vector<256x128xi32>
    %353 = arith.addi %0, %352 : vector<256x128xi32>
    %c256_i32_189 = arith.constant 256 : i32
    %354 = vector.broadcast %c256_i32_189 : i32 to vector<256x128xi32>
    %355 = arith.cmpi slt, %353, %354 : vector<256x128xi32>
    %c0_i32_190 = arith.constant 0 : i32
    %356 = vector.broadcast %c0_i32_190 : i32 to vector<256x128xi32>
    %357 = arith.addi %2, %356 : vector<256x128xi32>
    %c16_i32_191 = arith.constant 16 : i32
    %358 = vector.broadcast %c16_i32_191 : i32 to vector<256x128xi32>
    %359 = arith.cmpi slt, %357, %358 : vector<256x128xi32>
    %360 = arith.andi %355, %359 : vector<256x128xi1>
    %cst_192 = arith.constant 0.000000e+00 : f32
    %361 = vector.broadcast %cst_192 : f32 to vector<256x128xf32>
    %362 = arith.select %360, %351, %361 : vector<256x128xi1>, vector<256x128xf32>
    %363 = arith.truncf %362 : vector<256x128xf32> to vector<256x128xbf16>
    %c4_193 = arith.constant 4 : index
    %c0_194 = arith.constant 0 : index
    %c0_195 = arith.constant 0 : index
    %364 = vector.load %arg4[%c4_193, %c0_194, %c0_195] : memref<9x128x128xbf16, #tpu.memory_space<vmem>>, vector<1x128x128xbf16>
    %365 = vector.shape_cast %364 : vector<1x128x128xbf16> to vector<128x128xbf16>
    %cst_196 = arith.constant dense<0.000000e+00> : vector<256x128xf32>
    %366 = tpu.matmul %363, %365, %cst_196 {dimension_numbers = #tpu.dot_dimension_numbers<[1], [0], [0], [1], [0, 0, 1, 1], [], []>} : vector<256x128xbf16>, vector<128x128xbf16>, vector<256x128xf32> -> vector<256x128xf32>
    %367 = arith.addf %350, %366 : vector<256x128xf32>
    %c0_197 = arith.constant 0 : index
    %c0_198 = arith.constant 0 : index
    %368 = vector.load %arg5[%c0_197, %c0_198] : memref<1x128xf32, #tpu.memory_space<vmem>>, vector<1x128xf32>
    %369 = vector.broadcast %368 : vector<1x128xf32> to vector<256x128xf32>
    %370 = arith.addf %367, %369 : vector<256x128xf32>
    %371 = math.tanh %370 : vector<256x128xf32>
    %c0_199 = arith.constant 0 : index
    %c0_200 = arith.constant 0 : index
    %372 = vector.load %arg8[%c0_199, %c0_200] : memref<256x128xf32, #tpu.memory_space<vmem>>, vector<256x128xf32>
    tpu.vector_store %arg8[%c0_199, %c0_200], %371 {strides = array<i32>} : memref<256x128xf32, #tpu.memory_space<vmem>>, vector<256x128xf32>,
    %cst_201 = arith.constant 0.000000e+00 : f32
    %373 = vector.broadcast %cst_201 : f32 to vector<256x128xf32>
    %c24_202 = arith.constant 24 : index
    %c0_203 = arith.constant 0 : index
    %374 = vector.load %arg11[%c24_202, %c0_203] : memref<304x128xf32, #tpu.memory_space<vmem>>, vector<256x128xf32>
    %c0_i32_204 = arith.constant 0 : i32
    %375 = vector.broadcast %c0_i32_204 : i32 to vector<256x128xi32>
    %376 = arith.addi %0, %375 : vector<256x128xi32>
    %c256_i32_205 = arith.constant 256 : i32
    %377 = vector.broadcast %c256_i32_205 : i32 to vector<256x128xi32>
    %378 = arith.cmpi slt, %376, %377 : vector<256x128xi32>
    %c0_i32_206 = arith.constant 0 : i32
    %379 = vector.broadcast %c0_i32_206 : i32 to vector<256x128xi32>
    %380 = arith.addi %2, %379 : vector<256x128xi32>
    %c16_i32_207 = arith.constant 16 : i32
    %381 = vector.broadcast %c16_i32_207 : i32 to vector<256x128xi32>
    %382 = arith.cmpi slt, %380, %381 : vector<256x128xi32>
    %383 = arith.andi %378, %382 : vector<256x128xi1>
    %cst_208 = arith.constant 0.000000e+00 : f32
    %384 = vector.broadcast %cst_208 : f32 to vector<256x128xf32>
    %385 = arith.select %383, %374, %384 : vector<256x128xi1>, vector<256x128xf32>
    %386 = arith.truncf %385 : vector<256x128xf32> to vector<256x128xbf16>
    %c5_209 = arith.constant 5 : index
    %c0_210 = arith.constant 0 : index
    %c0_211 = arith.constant 0 : index
    %387 = vector.load %arg4[%c5_209, %c0_210, %c0_211] : memref<9x128x128xbf16, #tpu.memory_space<vmem>>, vector<1x128x128xbf16>
    %388 = vector.shape_cast %387 : vector<1x128x128xbf16> to vector<128x128xbf16>
    %cst_212 = arith.constant dense<0.000000e+00> : vector<256x128xf32>
    %389 = tpu.matmul %386, %388, %cst_212 {dimension_numbers = #tpu.dot_dimension_numbers<[1], [0], [0], [1], [0, 0, 1, 1], [], []>} : vector<256x128xbf16>, vector<128x128xbf16>, vector<256x128xf32> -> vector<256x128xf32>
    %390 = arith.addf %373, %389 : vector<256x128xf32>
    %c25_213 = arith.constant 25 : index
    %c0_214 = arith.constant 0 : index
    %391 = vector.load %arg11[%c25_213, %c0_214] : memref<304x128xf32, #tpu.memory_space<vmem>>, vector<256x128xf32>
    %c0_i32_215 = arith.constant 0 : i32
    %392 = vector.broadcast %c0_i32_215 : i32 to vector<256x128xi32>
    %393 = arith.addi %0, %392 : vector<256x128xi32>
    %c256_i32_216 = arith.constant 256 : i32
    %394 = vector.broadcast %c256_i32_216 : i32 to vector<256x128xi32>
    %395 = arith.cmpi slt, %393, %394 : vector<256x128xi32>
    %c1_i32_217 = arith.constant 1 : i32
    %396 = vector.broadcast %c1_i32_217 : i32 to vector<256x128xi32>
    %397 = arith.addi %2, %396 : vector<256x128xi32>
    %c16_i32_218 = arith.constant 16 : i32
    %398 = vector.broadcast %c16_i32_218 : i32 to vector<256x128xi32>
    %399 = arith.cmpi slt, %397, %398 : vector<256x128xi32>
    %400 = arith.andi %395, %399 : vector<256x128xi1>
    %cst_219 = arith.constant 0.000000e+00 : f32
    %401 = vector.broadcast %cst_219 : f32 to vector<256x128xf32>
    %402 = arith.select %400, %391, %401 : vector<256x128xi1>, vector<256x128xf32>
    %403 = arith.truncf %402 : vector<256x128xf32> to vector<256x128xbf16>
    %c6_220 = arith.constant 6 : index
    %c0_221 = arith.constant 0 : index
    %c0_222 = arith.constant 0 : index
    %404 = vector.load %arg4[%c6_220, %c0_221, %c0_222] : memref<9x128x128xbf16, #tpu.memory_space<vmem>>, vector<1x128x128xbf16>
    %405 = vector.shape_cast %404 : vector<1x128x128xbf16> to vector<128x128xbf16>
    %cst_223 = arith.constant dense<0.000000e+00> : vector<256x128xf32>
    %406 = tpu.matmul %403, %405, %cst_223 {dimension_numbers = #tpu.dot_dimension_numbers<[1], [0], [0], [1], [0, 0, 1, 1], [], []>} : vector<256x128xbf16>, vector<128x128xbf16>, vector<256x128xf32> -> vector<256x128xf32>
    %407 = arith.addf %390, %406 : vector<256x128xf32>
    %c40_224 = arith.constant 40 : index
    %c0_225 = arith.constant 0 : index
    %408 = vector.load %arg11[%c40_224, %c0_225] : memref<304x128xf32, #tpu.memory_space<vmem>>, vector<256x128xf32>
    %c16_i32_226 = arith.constant 16 : i32
    %409 = vector.broadcast %c16_i32_226 : i32 to vector<256x128xi32>
    %410 = arith.addi %0, %409 : vector<256x128xi32>
    %c256_i32_227 = arith.constant 256 : i32
    %411 = vector.broadcast %c256_i32_227 : i32 to vector<256x128xi32>
    %412 = arith.cmpi slt, %410, %411 : vector<256x128xi32>
    %c0_i32_228 = arith.constant 0 : i32
    %413 = vector.broadcast %c0_i32_228 : i32 to vector<256x128xi32>
    %414 = arith.addi %2, %413 : vector<256x128xi32>
    %c16_i32_229 = arith.constant 16 : i32
    %415 = vector.broadcast %c16_i32_229 : i32 to vector<256x128xi32>
    %416 = arith.cmpi slt, %414, %415 : vector<256x128xi32>
    %417 = arith.andi %412, %416 : vector<256x128xi1>
    %cst_230 = arith.constant 0.000000e+00 : f32
    %418 = vector.broadcast %cst_230 : f32 to vector<256x128xf32>
    %419 = arith.select %417, %408, %418 : vector<256x128xi1>, vector<256x128xf32>
    %420 = arith.truncf %419 : vector<256x128xf32> to vector<256x128xbf16>
    %c7_231 = arith.constant 7 : index
    %c0_232 = arith.constant 0 : index
    %c0_233 = arith.constant 0 : index
    %421 = vector.load %arg4[%c7_231, %c0_232, %c0_233] : memref<9x128x128xbf16, #tpu.memory_space<vmem>>, vector<1x128x128xbf16>
    %422 = vector.shape_cast %421 : vector<1x128x128xbf16> to vector<128x128xbf16>
    %cst_234 = arith.constant dense<0.000000e+00> : vector<256x128xf32>
    %423 = tpu.matmul %420, %422, %cst_234 {dimension_numbers = #tpu.dot_dimension_numbers<[1], [0], [0], [1], [0, 0, 1, 1], [], []>} : vector<256x128xbf16>, vector<128x128xbf16>, vector<256x128xf32> -> vector<256x128xf32>
    %424 = arith.addf %407, %423 : vector<256x128xf32>
    %c41_235 = arith.constant 41 : index
    %c0_236 = arith.constant 0 : index
    %425 = vector.load %arg11[%c41_235, %c0_236] : memref<304x128xf32, #tpu.memory_space<vmem>>, vector<256x128xf32>
    %c16_i32_237 = arith.constant 16 : i32
    %426 = vector.broadcast %c16_i32_237 : i32 to vector<256x128xi32>
    %427 = arith.addi %0, %426 : vector<256x128xi32>
    %c256_i32_238 = arith.constant 256 : i32
    %428 = vector.broadcast %c256_i32_238 : i32 to vector<256x128xi32>
    %429 = arith.cmpi slt, %427, %428 : vector<256x128xi32>
    %c1_i32_239 = arith.constant 1 : i32
    %430 = vector.broadcast %c1_i32_239 : i32 to vector<256x128xi32>
    %431 = arith.addi %2, %430 : vector<256x128xi32>
    %c16_i32_240 = arith.constant 16 : i32
    %432 = vector.broadcast %c16_i32_240 : i32 to vector<256x128xi32>
    %433 = arith.cmpi slt, %431, %432 : vector<256x128xi32>
    %434 = arith.andi %429, %433 : vector<256x128xi1>
    %cst_241 = arith.constant 0.000000e+00 : f32
    %435 = vector.broadcast %cst_241 : f32 to vector<256x128xf32>
    %436 = arith.select %434, %425, %435 : vector<256x128xi1>, vector<256x128xf32>
    %437 = arith.truncf %436 : vector<256x128xf32> to vector<256x128xbf16>
    %c8_242 = arith.constant 8 : index
    %c0_243 = arith.constant 0 : index
    %c0_244 = arith.constant 0 : index
    %438 = vector.load %arg4[%c8_242, %c0_243, %c0_244] : memref<9x128x128xbf16, #tpu.memory_space<vmem>>, vector<1x128x128xbf16>
    %439 = vector.shape_cast %438 : vector<1x128x128xbf16> to vector<128x128xbf16>
    %cst_245 = arith.constant dense<0.000000e+00> : vector<256x128xf32>
    %440 = tpu.matmul %437, %439, %cst_245 {dimension_numbers = #tpu.dot_dimension_numbers<[1], [0], [0], [1], [0, 0, 1, 1], [], []>} : vector<256x128xbf16>, vector<128x128xbf16>, vector<256x128xf32> -> vector<256x128xf32>
    %441 = arith.addf %424, %440 : vector<256x128xf32>
    %c0_246 = arith.constant 0 : index
    %c0_247 = arith.constant 0 : index
    %442 = vector.load %arg5[%c0_246, %c0_247] : memref<1x128xf32, #tpu.memory_space<vmem>>, vector<1x128xf32>
    %443 = vector.broadcast %442 : vector<1x128xf32> to vector<256x128xf32>
    %444 = arith.addf %441, %443 : vector<256x128xf32>
    %445 = math.tanh %444 : vector<256x128xf32>
    %c0_248 = arith.constant 0 : index
    %c0_249 = arith.constant 0 : index
    %446 = vector.load %arg9[%c0_248, %c0_249] : memref<256x128xf32, #tpu.memory_space<vmem>>, vector<256x128xf32>
    tpu.vector_store %arg9[%c0_248, %c0_249], %445 {strides = array<i32>} : memref<256x128xf32, #tpu.memory_space<vmem>>, vector<256x128xf32>,
    return
  }
  func.func @transform_0(%arg0: i32) -> (i32, i32) {
    %c0_i32 = arith.constant 0 : i32
    %c0_i32_0 = arith.constant 0 : i32
    return %arg0, %c0_i32 : i32, i32
  }
  func.func @transform_1(%arg0: i32) -> (i32, i32, i32) {
    %c0_i32 = arith.constant 0 : i32
    %c0_i32_0 = arith.constant 0 : i32
    %c0_i32_1 = arith.constant 0 : i32
    %c0_i32_2 = arith.constant 0 : i32
    return %c0_i32, %c0_i32_0, %c0_i32_1 : i32, i32, i32
  }
  func.func @transform_2(%arg0: i32) -> (i32, i32) {
    %c0_i32 = arith.constant 0 : i32
    %c0_i32_0 = arith.constant 0 : i32
    %c0_i32_1 = arith.constant 0 : i32
    return %c0_i32, %c0_i32_0 : i32, i32
  }
  func.func @transform_3(%arg0: i32) -> (i32, i32, i32) {
    %c0_i32 = arith.constant 0 : i32
    %c0_i32_0 = arith.constant 0 : i32
    %c0_i32_1 = arith.constant 0 : i32
    %c0_i32_2 = arith.constant 0 : i32
    return %c0_i32, %c0_i32_0, %c0_i32_1 : i32, i32, i32
  }
  func.func @transform_4(%arg0: i32) -> (i32, i32) {
    %c0_i32 = arith.constant 0 : i32
    %c0_i32_0 = arith.constant 0 : i32
    %c0_i32_1 = arith.constant 0 : i32
    return %c0_i32, %c0_i32_0 : i32, i32
  }
  func.func @transform_5(%arg0: i32) -> (i32, i32) {
    %c0_i32 = arith.constant 0 : i32
    %c0_i32_0 = arith.constant 0 : i32
    return %arg0, %c0_i32 : i32, i32
  }
  func.func @transform_6(%arg0: i32) -> (i32, i32) {
    %c0_i32 = arith.constant 0 : i32
    %c0_i32_0 = arith.constant 0 : i32
    return %arg0, %c0_i32 : i32, i32
  }
  func.func @transform_7(%arg0: i32) -> (i32, i32) {
    %c0_i32 = arith.constant 0 : i32
    %c0_i32_0 = arith.constant 0 : i32
    return %arg0, %c0_i32 : i32, i32
  }
  func.func @transform_8(%arg0: i32) -> (i32, i32) {
    %c0_i32 = arith.constant 0 : i32
    %c0_i32_0 = arith.constant 0 : i32
    return %arg0, %c0_i32 : i32, i32
  }
}

</mosaic_0001>

<bundles_post_ra>
// kernel: decoder_forward.3
= control target key start
LH: loop header
LB: loop body
LE: loop exit
PB: predicated region body
PF: predicated region fallthrough
CT: control target
= control target key end

     0   :  { %10 = vsyncpa [#allocation3], 0  ;;  %s2086_s0 = inlined_call_operand.vmem [shape: f32[2,16], index: 0, kind: input, shape index: {}]   ;;  %s2087_s1 = inlined_call_operand.hbm [shape: bf16[16,256], index: 1, kind: input, shape index: {}]   ;;  %s2088_s2 = inlined_call_operand.vmem [shape: f32[1,256], index: 2, kind: input, shape index: {}]   ;;  %s2089_s3 = inlined_call_operand.hbm [shape: bf16[256,1024], index: 3, kind: input, shape index: {}]   ;;  %s2090_s4 = inlined_call_operand.hbm [shape: f32[1,1024], index: 4, kind: input, shape index: {}]   ;;  %s2091_s5 = inlined_call_operand.vmem [shape: f32[2,1024], index: 5, kind: output, shape index: {}]  }
   0x1   :  { %11 = vsyncpa [#allocation5], 0  ;;  %s33_s20 = sshll.u32 %s2089_s3, 4  ;;  %s1990_s21 = smov [#allocation4]   ;;  %s34_s20 = int_to_ptr.hbm [resolvable:$true] %s33_s20 }
   0x2   :  { %s35_s22 = sshll.u32 %s1990_s21, 4  ;;  %s18_s25 = sshll.u32 %s2087_s1, 4  ;;  %s36_s22 = int_to_ptr.vmem [resolvable:$true] %s35_s22  ;;  %s19_s25 = int_to_ptr.hbm [resolvable:$true] %s18_s25 }
   0x3   :  { %s1991_s26 = smov 512   ;;  %s1992_s27 = smov 32  }
   0x4   :  { %41 = dma.hbm_to_vmem [thread:$0]  %s34_s20, 16384, %s36_s22, [#allocation5], %s1991_s26, %s1991_s26, %s1992_s27  }
   0x5   :  { %s1993_s28 = smov [#allocation2]   ;;  %s1994_s30 = smov 128  }
   0x6   :  { %s20_s29 = sshll.u32 %s1993_s28, 4  ;;  %s1995_s6 = smov 8   ;;  %s21_s29 = int_to_ptr.vmem [resolvable:$true] %s20_s29 }
   0x7   :  { %26 = dma.hbm_to_vmem [thread:$0]  %s19_s25, 256, %s21_s29, [#allocation3], %s1994_s30, %s1994_s30, %s1995_s6  }
   0x8   :  { %s47_s8 = sshll.u32 %s2090_s4, 4  ;;  %s1996_s9 = smov [#allocation6]   ;;  %s48_s8 = int_to_ptr.hbm [resolvable:$true] %s47_s8 }
   0x9   :  { %s49_s10 = sshll.u32 %s1996_s9, 4  ;;  %s50_s10 = int_to_ptr.vmem [resolvable:$true] %s49_s10 }
   0xa   :  { %52 = dma.hbm_to_vmem [thread:$0]  %s48_s8, 128, %s50_s10, [#allocation5]  }
   0xb   :  { %1986 = dma.done.wait [#allocation3], 256  }
   0xc   :  { %1987 = vsyncadd [#allocation3], 4294967040 }
   0xd   :  { %1988 = dma.done.wait [#allocation5], 16512  }
   0xe   :  { %1989 = vsyncadd [#allocation5], 4294950784  ;;  %vm86_vm0 = vcmask 130048   ;;  %v1237_v0 = vld [vmem:[#allocation2] sm:$0xf]  ;;  %vm1216_vm1 = vcmask 1041408  }
   0xf   :  { %v1758_v1 = vld [vmem:[#allocation2 + $0x4] sm:$0xf0]  ;;  %v1757_v2 = vld [vmem:[#allocation2 + $0x4] sm:$0xf]  ;;  %v1239_v4 = vld [vmem:[#allocation2 + $0x8] sm:$0xf0] }
  0x10   :  { %v1238_v3 = vor.u32 %v1758_v1, %v1237_v0  ;;  %v66_v5 = vld [vmem:[%s2086_s0] sm:$0x3]  ;;  %v1471_v6 = vld [vmem:[#allocation4 + $0x1c0] sm:$0xf]  ;;  %v1242_v7 = vor.u32 %v1757_v2, %v1239_v4  ;;  %v1815_v14 = vld [vmem:[#allocation4 + $0x1c4] sm:$0xf] }
  0x11   :  { %v67_v8 = vpack.c.bf16 %v66_v5, %v66_v5  ;;  %v1819_v9 = vld [vmem:[#allocation4 + $0x1dc] sm:$0xf0]  ;;  %v1473_v15 = vld [vmem:[#allocation4 + $0x1e0] sm:$0xf0]  ;;  %vm1218_vm2 = vcmask 1045508   ;;  %vm1220_vm3 = vcmask 1043456  }
  0x12   :  { %v1727_v10 = vld [vmem:[#allocation4 + $0x3c0] sm:$0xf]  ;;  %97 = vmatpush.bf16.msra.mxu0 %v1238_v3  ;;  %v1472_v12 = vor.u32 %v1819_v9, %v1471_v6  ;;  %v1879_v16 = vld [vmem:[#allocation4 + $0x3c4] sm:$0xf]  ;;  %110 = vmatpush.bf16.msra.mxu1 %v1242_v7  ;;  %v1476_v17 = vor.u32 %v1815_v14, %v1473_v15 }
  0x13   :  { %v1883_v11 = vld [vmem:[#allocation4 + $0x3dc] sm:$0xf0]  ;;  %v1729_v18 = vld [vmem:[#allocation4 + $0x3e0] sm:$0xf0] }
  0x14   :  { %v1728_v13 = vor.u32 %v1883_v11, %v1727_v10  ;;  %v1439_v19 = vld [vmem:[#allocation4 + $0x180] sm:$0xf]  ;;  %922 = vmatpush.bf16.msra.mxu2 %v1472_v12  ;;  %v1732_v21 = vor.u32 %v1879_v16, %v1729_v18  ;;  %v1807_v25 = vld [vmem:[#allocation4 + $0x184] sm:$0xf] }
  0x15   :  { %v1811_v20 = vld [vmem:[#allocation4 + $0x19c] sm:$0xf0]  ;;  %1243 = vmatmul.msk.bf16.vlgmr.msra.gmra.mxu0 %vm86_vm0, %v67_v8  ;;  %v1441_v27 = vld [vmem:[#allocation4 + $0x1a0] sm:$0xf0]  ;;  %1244 = vmatmul.msk.bf16.vlgmr.msra.gmra.mxu1 %vm86_vm0, %v67_v8 }
  0x16   :  { %935 = vmatpush.bf16.msra.mxu3 %v1728_v13  ;;  %v1440_v22 = vor.u32 %v1811_v20, %v1439_v19  ;;  %v1695_v23 = vld [vmem:[#allocation4 + $0x380] sm:$0xf]  ;;  %v1871_v28 = vld [vmem:[#allocation4 + $0x384] sm:$0xf]  ;;  %948 = vmatpush.bf16.msrb.mxu0 %v1476_v17  ;;  %v1444_v30 = vor.u32 %v1807_v25, %v1441_v27 }
  0x17   :  { %v1875_v24 = vld [vmem:[#allocation4 + $0x39c] sm:$0xf0]  ;;  %v1697_v29 = vld [vmem:[#allocation4 + $0x3a0] sm:$0xf0]  ;;  %961 = vmatpush.bf16.msrb.mxu1 %v1732_v21 }
  0x18   :  { %v1696_v26 = vor.u32 %v1875_v24, %v1695_v23  ;;  %v1407_v31 = vld [vmem:[#allocation4 + $0x140] sm:$0xf]  ;;  %v1700_v34 = vor.u32 %v1871_v28, %v1697_v29  ;;  %v1799_v36 = vld [vmem:[#allocation4 + $0x144] sm:$0xf]  ;;  %923 = vmatpush.bf16.msra.mxu2 %v1440_v22 }
  0x19   :  { %v1803_v32 = vld [vmem:[#allocation4 + $0x15c] sm:$0xf0]  ;;  %v1409_v37 = vld [vmem:[#allocation4 + $0x160] sm:$0xf0] }
  0x1a   :  { %v1663_v33 = vld [vmem:[#allocation4 + $0x340] sm:$0xf]  ;;  %936 = vmatpush.bf16.msra.mxu3 %v1696_v26  ;;  %v1408_v38 = vor.u32 %v1803_v32, %v1407_v31  ;;  %v1863_v40 = vld [vmem:[#allocation4 + $0x344] sm:$0xf]  ;;  %949 = vmatpush.bf16.msrb.mxu0 %v1444_v30  ;;  %v1412_v46 = vor.u32 %v1799_v36, %v1409_v37  ;;  %v1479_v30 = vld [vmem:[#allocation4 + $0x1c8] sm:$0xf] }
  0x1b   :  { %v1867_v35 = vld [vmem:[#allocation4 + $0x35c] sm:$0xf0]  ;;  %v1665_v41 = vld [vmem:[#allocation4 + $0x360] sm:$0xf0]  ;;  %962 = vmatpush.bf16.msrb.mxu1 %v1700_v34  ;;  %v1820_v32 = vld [vmem:[#allocation4 + $0x1e4] sm:$0xf0] }
  0x1c   :  { %v1664_v39 = vor.u32 %v1867_v35, %v1663_v33  ;;  %v1375_v42 = vld [vmem:[#allocation4 + $0x100] sm:$0xf]  ;;  %v1668_v47 = vor.u32 %v1863_v40, %v1665_v41  ;;  %v1791_v48 = vld [vmem:[#allocation4 + $0x104] sm:$0xf]  ;;  %924 = vmatpush.bf16.msra.mxu2 %v1408_v38  ;;  %v1735_v33 = vld [vmem:[#allocation4 + $0x3c8] sm:$0xf] }
  0x1d   :  { %v1795_v43 = vld [vmem:[#allocation4 + $0x11c] sm:$0xf0]  ;;  %v1377_v49 = vld [vmem:[#allocation4 + $0x120] sm:$0xf0]  ;;  %v1884_v34 = vld [vmem:[#allocation4 + $0x3e4] sm:$0xf0] }
  0x1e   :  { %v1631_v44 = vld [vmem:[#allocation4 + $0x300] sm:$0xf]  ;;  %937 = vmatpush.bf16.msra.mxu3 %v1664_v39  ;;  %v1376_v50 = vor.u32 %v1795_v43, %v1375_v42  ;;  %v1855_v52 = vld [vmem:[#allocation4 + $0x304] sm:$0xf]  ;;  %950 = vmatpush.bf16.msrb.mxu0 %v1412_v46  ;;  %v1380_v58 = vor.u32 %v1791_v48, %v1377_v49  ;;  %v1816_v42 = vld [vmem:[#allocation4 + $0x1cc] sm:$0xf] }
  0x1f   :  { %v1859_v45 = vld [vmem:[#allocation4 + $0x31c] sm:$0xf0]  ;;  %v1633_v53 = vld [vmem:[#allocation4 + $0x320] sm:$0xf0]  ;;  %963 = vmatpush.bf16.msrb.mxu1 %v1668_v47  ;;  %v1481_v43 = vld [vmem:[#allocation4 + $0x1e8] sm:$0xf0] }
  0x20   :  { %v1632_v51 = vor.u32 %v1859_v45, %v1631_v44  ;;  %v1343_v54 = vld [vmem:[#allocation4 + $0xc0] sm:$0xf]  ;;  %v1636_v59 = vor.u32 %v1855_v52, %v1633_v53  ;;  %v1783_v60 = vld [vmem:[#allocation4 + $0xc4] sm:$0xf]  ;;  %925 = vmatpush.bf16.msra.mxu2 %v1376_v50  ;;  %v1480_v44 = vor.u32 %v1820_v32, %v1479_v30  ;;  %v1736_v45 = vor.u32 %v1884_v34, %v1735_v33  ;;  %v1880_v46 = vld [vmem:[#allocation4 + $0x3cc] sm:$0xf] }
  0x21   :  { %v1787_v55 = vld [vmem:[#allocation4 + $0xdc] sm:$0xf0]  ;;  %v1345_v61 = vld [vmem:[#allocation4 + $0xe0] sm:$0xf0]  ;;  %v1737_v47 = vld [vmem:[#allocation4 + $0x3e8] sm:$0xf0]  ;;  %v1484_v50 = vor.u32 %v1816_v42, %v1481_v43 }
  0x22   :  { %v1599_v56 = vld [vmem:[#allocation4 + $0x2c0] sm:$0xf]  ;;  %938 = vmatpush.bf16.msra.mxu3 %v1632_v51  ;;  %v1344_v62 = vor.u32 %v1787_v55, %v1343_v54  ;;  %v1847_v0 = vld [vmem:[#allocation4 + $0x2c4] sm:$0xf]  ;;  %951 = vmatpush.bf16.msrb.mxu0 %v1380_v58  ;;  %v1348_v6 = vor.u32 %v1783_v60, %v1345_v61  ;;  %v1740_v51 = vor.u32 %v1880_v46, %v1737_v47  ;;  %v1447_v52 = vld [vmem:[#allocation4 + $0x188] sm:$0xf] }
  0x23   :  { %v1851_v57 = vld [vmem:[#allocation4 + $0x2dc] sm:$0xf0]  ;;  %v1601_v1 = vld [vmem:[#allocation4 + $0x2e0] sm:$0xf0]  ;;  %964 = vmatpush.bf16.msrb.mxu1 %v1636_v59  ;;  %v1812_v53 = vld [vmem:[#allocation4 + $0x1a4] sm:$0xf0] }
  0x24   :  { %v1600_v63 = vor.u32 %v1851_v57, %v1599_v56  ;;  %v1311_v2 = vld [vmem:[#allocation4 + $0x80] sm:$0xf]  ;;  %v1604_v7 = vor.u32 %v1847_v0, %v1601_v1  ;;  %v1775_v8 = vld [vmem:[#allocation4 + $0x84] sm:$0xf]  ;;  %926 = vmatpush.bf16.msra.mxu2 %v1344_v62  ;;  %v1703_v54 = vld [vmem:[#allocation4 + $0x388] sm:$0xf]  ;;  %v1448_v55 = vor.u32 %v1812_v53, %v1447_v52 }
  0x25   :  { %v1779_v3 = vld [vmem:[#allocation4 + $0x9c] sm:$0xf0]  ;;  %v1313_v9 = vld [vmem:[#allocation4 + $0xa0] sm:$0xf0]  ;;  %v1876_v56 = vld [vmem:[#allocation4 + $0x3a4] sm:$0xf0] }
  0x26   :  { %v1567_v4 = vld [vmem:[#allocation4 + $0x280] sm:$0xf]  ;;  %939 = vmatpush.bf16.msra.mxu3 %v1600_v63  ;;  %v1312_v10 = vor.u32 %v1779_v3, %v1311_v2  ;;  %v1839_v12 = vld [vmem:[#allocation4 + $0x284] sm:$0xf]  ;;  %952 = vmatpush.bf16.msrb.mxu0 %v1348_v6  ;;  %v1316_v18 = vor.u32 %v1775_v8, %v1313_v9  ;;  %v1808_v57 = vld [vmem:[#allocation4 + $0x18c] sm:$0xf]  ;;  %v1704_v58 = vor.u32 %v1876_v56, %v1703_v54 }
  0x27   :  { %v1843_v5 = vld [vmem:[#allocation4 + $0x29c] sm:$0xf0]  ;;  %v1569_v13 = vld [vmem:[#allocation4 + $0x2a0] sm:$0xf0]  ;;  %965 = vmatpush.bf16.msrb.mxu1 %v1604_v7  ;;  %v1449_v59 = vld [vmem:[#allocation4 + $0x1a8] sm:$0xf0] }
  0x28   :  { %v1568_v11 = vor.u32 %v1843_v5, %v1567_v4  ;;  %v1279_v14 = vld [vmem:[#allocation4 + $0x40] sm:$0xf]  ;;  %v1572_v19 = vor.u32 %v1839_v12, %v1569_v13  ;;  %v1767_v20 = vld [vmem:[#allocation4 + $0x44] sm:$0xf]  ;;  %927 = vmatpush.bf16.msra.mxu2 %v1312_v10  ;;  %v1872_v60 = vld [vmem:[#allocation4 + $0x38c] sm:$0xf]  ;;  %v1452_v62 = vor.u32 %v1808_v57, %v1449_v59 }
  0x29   :  { %v1771_v15 = vld [vmem:[#allocation4 + $0x5c] sm:$0xf0]  ;;  %v1281_v21 = vld [vmem:[#allocation4 + $0x60] sm:$0xf0]  ;;  %v1705_v61 = vld [vmem:[#allocation4 + $0x3a8] sm:$0xf0] }
  0x2a   :  { %v1535_v16 = vld [vmem:[#allocation4 + $0x240] sm:$0xf]  ;;  %v1831_v22 = vld [vmem:[#allocation4 + $0x244] sm:$0xf]  ;;  %940 = vmatpush.bf16.msra.mxu3 %v1568_v11  ;;  %v1280_v23 = vor.u32 %v1771_v15, %v1279_v14  ;;  %953 = vmatpush.bf16.msrb.mxu0 %v1316_v18  ;;  %v1284_v31 = vor.u32 %v1767_v20, %v1281_v21  ;;  %v1708_v63 = vor.u32 %v1872_v60, %v1705_v61  ;;  %v1415_v0 = vld [vmem:[#allocation4 + $0x148] sm:$0xf] }
  0x2b   :  { %v1835_v17 = vld [vmem:[#allocation4 + $0x25c] sm:$0xf0]  ;;  %v1537_v25 = vld [vmem:[#allocation4 + $0x260] sm:$0xf0]  ;;  %966 = vmatpush.bf16.msrb.mxu1 %v1572_v19  ;;  %v1804_v1 = vld [vmem:[#allocation4 + $0x164] sm:$0xf0] }
  0x2c   :  { %v1536_v24 = vor.u32 %v1835_v17, %v1535_v16  ;;  %v1247_v26 = vld [vmem:[#allocation4] sm:$0xf]  ;;  %v1540_v35 = vor.u32 %v1831_v22, %v1537_v25  ;;  %v1759_v36 = vld [vmem:[#allocation4 + $0x4] sm:$0xf]  ;;  %928 = vmatpush.bf16.msra.mxu2 %v1280_v23  ;;  %v1671_v2 = vld [vmem:[#allocation4 + $0x348] sm:$0xf]  ;;  %v1416_v3 = vor.u32 %v1804_v1, %v1415_v0 }
  0x2d   :  { %v1763_v27 = vld [vmem:[#allocation4 + $0x1c] sm:$0xf0]  ;;  %v1249_v37 = vld [vmem:[#allocation4 + $0x20] sm:$0xf0]  ;;  %v1868_v4 = vld [vmem:[#allocation4 + $0x364] sm:$0xf0] }
  0x2e   :  { %v1503_v28 = vld [vmem:[#allocation4 + $0x200] sm:$0xf]  ;;  %v1823_v38 = vld [vmem:[#allocation4 + $0x204] sm:$0xf]  ;;  %941 = vmatpush.bf16.msra.mxu3 %v1536_v24  ;;  %v1248_v39 = vor.u32 %v1763_v27, %v1247_v26  ;;  %954 = vmatpush.bf16.msrb.mxu0 %v1284_v31  ;;  %v1252_v48 = vor.u32 %v1759_v36, %v1249_v37  ;;  %v1800_v5 = vld [vmem:[#allocation4 + $0x14c] sm:$0xf]  ;;  %v1672_v7 = vor.u32 %v1868_v4, %v1671_v2 }
  0x2f   :  { %v1827_v29 = vld [vmem:[#allocation4 + $0x21c] sm:$0xf0]  ;;  %v1505_v41 = vld [vmem:[#allocation4 + $0x220] sm:$0xf0]  ;;  %967 = vmatpush.bf16.msrb.mxu1 %v1540_v35  ;;  %v1417_v6 = vld [vmem:[#allocation4 + $0x168] sm:$0xf0] }
  0x30   :  { %v1504_v40 = vor.u32 %v1827_v29, %v1503_v28  ;;  %v1508_v49 = vor.u32 %v1823_v38, %v1505_v41  ;;  %929 = vmatpush.bf16.msra.mxu2 %v1248_v39  ;;  %v1420_v8 = vor.u32 %v1800_v5, %v1417_v6  ;;  %v1864_v9 = vld [vmem:[#allocation4 + $0x34c] sm:$0xf]  ;;  %v1383_v12 = vld [vmem:[#allocation4 + $0x108] sm:$0xf] }
  0x31   :  { %v1673_v10 = vld [vmem:[#allocation4 + $0x368] sm:$0xf0]  ;;  %v1796_v13 = vld [vmem:[#allocation4 + $0x124] sm:$0xf0] }
  0x32   :  { %942 = vmatpush.bf16.msra.mxu3 %v1504_v40  ;;  %955 = vmatpush.bf16.msrb.mxu0 %v1252_v48  ;;  %v1676_v11 = vor.u32 %v1864_v9, %v1673_v10  ;;  %v1639_v14 = vld [vmem:[#allocation4 + $0x308] sm:$0xf]  ;;  %v1384_v15 = vor.u32 %v1796_v13, %v1383_v12  ;;  %v1792_v17 = vld [vmem:[#allocation4 + $0x10c] sm:$0xf] }
  0x33   :  { %968 = vmatpush.bf16.msrb.mxu1 %v1508_v49  ;;  %v1860_v16 = vld [vmem:[#allocation4 + $0x324] sm:$0xf0]  ;;  %v1385_v18 = vld [vmem:[#allocation4 + $0x128] sm:$0xf0] }
  0x34   :  { %974 = vmatpush.bf16.msrb.mxu2 %v1480_v44  ;;  %v1640_v19 = vor.u32 %v1860_v16, %v1639_v14  ;;  %v1388_v20 = vor.u32 %v1792_v17, %v1385_v18  ;;  %v1856_v21 = vld [vmem:[#allocation4 + $0x30c] sm:$0xf]  ;;  %v1351_v24 = vld [vmem:[#allocation4 + $0xc8] sm:$0xf] }
  0x35   :  { %v1641_v22 = vld [vmem:[#allocation4 + $0x328] sm:$0xf0]  ;;  %v1788_v25 = vld [vmem:[#allocation4 + $0xe4] sm:$0xf0] }
  0x36   :  { %987 = vmatpush.bf16.msrb.mxu3 %v1736_v45  ;;  %1000 = vmatpush.bf16.msra.mxu0 %v1484_v50  ;;  %v1644_v23 = vor.u32 %v1856_v21, %v1641_v22  ;;  %v1607_v26 = vld [vmem:[#allocation4 + $0x2c8] sm:$0xf]  ;;  %v1352_v27 = vor.u32 %v1788_v25, %v1351_v24  ;;  %v1784_v29 = vld [vmem:[#allocation4 + $0xcc] sm:$0xf] }
  0x37   :  { %1013 = vmatpush.bf16.msra.mxu1 %v1740_v51  ;;  %v1852_v28 = vld [vmem:[#allocation4 + $0x2e4] sm:$0xf0]  ;;  %v1353_v30 = vld [vmem:[#allocation4 + $0xe8] sm:$0xf0] }
  0x38   :  { %975 = vmatpush.bf16.msrb.mxu2 %v1448_v55  ;;  %v1608_v31 = vor.u32 %v1852_v28, %v1607_v26  ;;  %v1356_v32 = vor.u32 %v1784_v29, %v1353_v30  ;;  %v1848_v33 = vld [vmem:[#allocation4 + $0x2cc] sm:$0xf]  ;;  %v1319_v36 = vld [vmem:[#allocation4 + $0x88] sm:$0xf]  ;;  %v1487_v28 = vld [vmem:[#allocation4 + $0x1d0] sm:$0xf] }
  0x39   :  { %v1609_v34 = vld [vmem:[#allocation4 + $0x2e8] sm:$0xf0]  ;;  %v1780_v37 = vld [vmem:[#allocation4 + $0xa4] sm:$0xf0] }
  0x3a   :  { %988 = vmatpush.bf16.msrb.mxu3 %v1704_v58  ;;  %1001 = vmatpush.bf16.msra.mxu0 %v1452_v62  ;;  %v1612_v35 = vor.u32 %v1848_v33, %v1609_v34  ;;  %v1575_v38 = vld [vmem:[#allocation4 + $0x288] sm:$0xf]  ;;  %v1320_v39 = vor.u32 %v1780_v37, %v1319_v36  ;;  %v1776_v41 = vld [vmem:[#allocation4 + $0x8c] sm:$0xf]  ;;  %v1743_v33 = vld [vmem:[#allocation4 + $0x3d0] sm:$0xf] }
  0x3b   :  { %1014 = vmatpush.bf16.msra.mxu1 %v1708_v63  ;;  %v1844_v40 = vld [vmem:[#allocation4 + $0x2a4] sm:$0xf0]  ;;  %v1321_v42 = vld [vmem:[#allocation4 + $0xa8] sm:$0xf0]  ;;  %v1885_v36 = vld [vmem:[#allocation4 + $0x3ec] sm:$0xf0] }
  0x3c   :  { %976 = vmatpush.bf16.msrb.mxu2 %v1416_v3  ;;  %v1576_v43 = vor.u32 %v1844_v40, %v1575_v38  ;;  %v1324_v44 = vor.u32 %v1776_v41, %v1321_v42  ;;  %v1840_v45 = vld [vmem:[#allocation4 + $0x28c] sm:$0xf]  ;;  %v1287_v48 = vld [vmem:[#allocation4 + $0x48] sm:$0xf]  ;;  %v1817_v37 = vld [vmem:[#allocation4 + $0x1d4] sm:$0xf] }
  0x3d   :  { %v1577_v46 = vld [vmem:[#allocation4 + $0x2a8] sm:$0xf0]  ;;  %v1772_v49 = vld [vmem:[#allocation4 + $0x64] sm:$0xf0]  ;;  %v1881_v40 = vld [vmem:[#allocation4 + $0x3d4] sm:$0xf] }
  0x3e   :  { %989 = vmatpush.bf16.msrb.mxu3 %v1672_v7  ;;  %1002 = vmatpush.bf16.msra.mxu0 %v1420_v8  ;;  %v1580_v47 = vor.u32 %v1840_v45, %v1577_v46  ;;  %v1543_v50 = vld [vmem:[#allocation4 + $0x248] sm:$0xf]  ;;  %v1288_v51 = vor.u32 %v1772_v49, %v1287_v48  ;;  %v1768_v53 = vld [vmem:[#allocation4 + $0x4c] sm:$0xf]  ;;  %v70_v7 = vld [vmem:[%s2088_s2] sm:$0x3]  ;;  %v1744_v45 = vor.u32 %v1885_v36, %v1743_v33 }
  0x3f   :  { %1015 = vmatpush.bf16.msra.mxu1 %v1676_v11  ;;  %v1836_v52 = vld [vmem:[#allocation4 + $0x264] sm:$0xf0]  ;;  %v1289_v54 = vld [vmem:[#allocation4 + $0x68] sm:$0xf0]  ;;  %v72_v9 = vperm.slane %v70_v7, 0  ;;  %v73_v10 = vperm.slane %v70_v7, 1 }
  0x40   :  { %977 = vmatpush.bf16.msrb.mxu2 %v1384_v15  ;;  %v1544_v55 = vor.u32 %v1836_v52, %v1543_v50  ;;  %v1292_v56 = vor.u32 %v1768_v53, %v1289_v54  ;;  %v1832_v57 = vld [vmem:[#allocation4 + $0x24c] sm:$0xf]  ;;  %v1255_v60 = vld [vmem:[#allocation4 + $0x8] sm:$0xf]  ;;  %v1745_v41 = vld [vmem:[#allocation4 + $0x3f0] sm:$0xf0] }
  0x41   :  { %v1545_v58 = vld [vmem:[#allocation4 + $0x268] sm:$0xf0]  ;;  %v1764_v61 = vld [vmem:[#allocation4 + $0x24] sm:$0xf0]  ;;  %v1455_v46 = vld [vmem:[#allocation4 + $0x190] sm:$0xf]  ;;  %v1748_v50 = vor.u32 %v1881_v40, %v1745_v41 }
  0x42   :  { %990 = vmatpush.bf16.msrb.mxu3 %v1640_v19  ;;  %1003 = vmatpush.bf16.msra.mxu0 %v1388_v20  ;;  %v1548_v59 = vor.u32 %v1832_v57, %v1545_v58  ;;  %v1511_v62 = vld [vmem:[#allocation4 + $0x208] sm:$0xf]  ;;  %v1256_v63 = vor.u32 %v1764_v61, %v1255_v60  ;;  %v1760_v1 = vld [vmem:[#allocation4 + $0xc] sm:$0xf]  ;;  %v1877_v52 = vld [vmem:[#allocation4 + $0x3ac] sm:$0xf0] }
  0x43   :  { %1016 = vmatpush.bf16.msra.mxu1 %v1644_v23  ;;  %v1828_v0 = vld [vmem:[#allocation4 + $0x224] sm:$0xf0]  ;;  %v1257_v2 = vld [vmem:[#allocation4 + $0x28] sm:$0xf0]  ;;  %v1809_v53 = vld [vmem:[#allocation4 + $0x194] sm:$0xf] }
  0x44   :  { %978 = vmatpush.bf16.msrb.mxu2 %v1352_v27  ;;  %v1512_v3 = vor.u32 %v1828_v0, %v1511_v62  ;;  %v1260_v4 = vor.u32 %v1760_v1, %v1257_v2  ;;  %v1824_v5 = vld [vmem:[#allocation4 + $0x20c] sm:$0xf]  ;;  %v1457_v54 = vld [vmem:[#allocation4 + $0x1b0] sm:$0xf0]  ;;  %v1805_v60 = vld [vmem:[#allocation4 + $0x16c] sm:$0xf0] }
  0x45   :  { %v1513_v6 = vld [vmem:[#allocation4 + $0x228] sm:$0xf0]  ;;  %v1460_v61 = vor.u32 %v1809_v53, %v1457_v54  ;;  %v1869_v0 = vld [vmem:[#allocation4 + $0x36c] sm:$0xf0]  ;;  %v1801_v1 = vld [vmem:[#allocation4 + $0x154] sm:$0xf] }
  0x46   :  { %991 = vmatpush.bf16.msrb.mxu3 %v1608_v31  ;;  %1004 = vmatpush.bf16.msra.mxu0 %v1356_v32  ;;  %v1516_v8 = vor.u32 %v1824_v5, %v1513_v6  ;;  %v1821_v32 = vld [vmem:[#allocation4 + $0x1ec] sm:$0xf0]  ;;  %v1425_v2 = vld [vmem:[#allocation4 + $0x170] sm:$0xf0] }
  0x47   :  { %1017 = vmatpush.bf16.msra.mxu1 %v1612_v35  ;;  %v1391_v7 = vld [vmem:[#allocation4 + $0x110] sm:$0xf]  ;;  %v1585_v40 = vld [vmem:[#allocation4 + $0x2b0] sm:$0xf0] }
  0x48   :  { %979 = vmatpush.bf16.msrb.mxu2 %v1320_v39  ;;  %v1489_v39 = vld [vmem:[#allocation4 + $0x1f0] sm:$0xf0]  ;;  %v1845_v36 = vld [vmem:[#allocation4 + $0x2ac] sm:$0xf0] }
  0x49   :  { %v1492_v49 = vor.u32 %v1817_v37, %v1489_v39  ;;  %v1777_v37 = vld [vmem:[#allocation4 + $0x94] sm:$0xf] }
  0x4a   :  { %992 = vmatpush.bf16.msrb.mxu3 %v1576_v43  ;;  %1005 = vmatpush.bf16.msra.mxu0 %v1324_v44  ;;  %v1488_v44 = vor.u32 %v1821_v32, %v1487_v28  ;;  %v1617_v28 = vld [vmem:[#allocation4 + $0x2f0] sm:$0xf0]  ;;  %v1781_v32 = vld [vmem:[#allocation4 + $0xac] sm:$0xf0] }
  0x4b   :  { %1018 = vmatpush.bf16.msra.mxu1 %v1580_v47  ;;  %v1813_v47 = vld [vmem:[#allocation4 + $0x1ac] sm:$0xf0]  ;;  %v1841_v39 = vld [vmem:[#allocation4 + $0x294] sm:$0xf] }
  0x4c   :  { %980 = vmatpush.bf16.msrb.mxu2 %v1288_v51  ;;  %v1711_v51 = vld [vmem:[#allocation4 + $0x390] sm:$0xf]  ;;  %v1456_v57 = vor.u32 %v1813_v47, %v1455_v46  ;;  %v1588_v47 = vor.u32 %v1841_v39, %v1585_v40  ;;  %v1833_v53 = vld [vmem:[#allocation4 + $0x254] sm:$0xf] }
  0x4d   :  { %v1712_v58 = vor.u32 %v1877_v52, %v1711_v51  ;;  %v1769_v51 = vld [vmem:[#allocation4 + $0x54] sm:$0xf] }
  0x4e   :  { %993 = vmatpush.bf16.msrb.mxu3 %v1544_v55  ;;  %1006 = vmatpush.bf16.msra.mxu0 %v1292_v56  ;;  %v1873_v55 = vld [vmem:[#allocation4 + $0x394] sm:$0xf] }
  0x4f   :  { %1019 = vmatpush.bf16.msra.mxu1 %v1548_v59  ;;  %v1713_v56 = vld [vmem:[#allocation4 + $0x3b0] sm:$0xf0]  ;;  %v1423_v59 = vld [vmem:[#allocation4 + $0x150] sm:$0xf] }
  0x50   :  { %981 = vmatpush.bf16.msrb.mxu2 %v1256_v63  ;;  %v1716_v62 = vor.u32 %v1873_v55, %v1713_v56  ;;  %v1679_v63 = vld [vmem:[#allocation4 + $0x350] sm:$0xf]  ;;  %v1424_v5 = vor.u32 %v1805_v60, %v1423_v59  ;;  %v1297_v52 = vld [vmem:[#allocation4 + $0x70] sm:$0xf0] }
  0x51   :  { %v1680_v6 = vor.u32 %v1869_v0, %v1679_v63  ;;  %v1553_v54 = vld [vmem:[#allocation4 + $0x270] sm:$0xf0]  ;;  %v1263_v55 = vld [vmem:[#allocation4 + $0x10] sm:$0xf] }
  0x52   :  { %994 = vmatpush.bf16.msrb.mxu3 %v1512_v3  ;;  %1007 = vmatpush.bf16.msra.mxu0 %v1260_v4  ;;  %v1865_v3 = vld [vmem:[#allocation4 + $0x354] sm:$0xf]  ;;  %v1519_v59 = vld [vmem:[#allocation4 + $0x210] sm:$0xf] }
  0x53   :  { %1020 = vmatpush.bf16.msra.mxu1 %v1516_v8  ;;  %v1681_v4 = vld [vmem:[#allocation4 + $0x370] sm:$0xf0]  ;;  %v1797_v8 = vld [vmem:[#allocation4 + $0x12c] sm:$0xf0] }
  0x54   :  { %v1829_v60 = vld [vmem:[#allocation4 + $0x22c] sm:$0xf0]  ;;  %v1761_v63 = vld [vmem:[#allocation4 + $0x14] sm:$0xf] }
  0x55   :  { %v1265_v0 = vld [vmem:[#allocation4 + $0x30] sm:$0xf0] }
  0x92   :  { %v99_v11 = vpop.f32.mrf.mxu0  ;;  %v112_v13 = vpop.f32.mrf.mxu1 }
  0x93   :  { %v100_v12 = vadd.f32 %v99_v11, %v72_v9  ;;  %v113_v14 = vadd.f32 %v112_v13, %v73_v10  ;;  %v1428_v9 = vor.u32 %v1801_v1, %v1425_v2  ;;  %v1684_v10 = vor.u32 %v1865_v3, %v1681_v4  ;;  %v1647_v11 = vld [vmem:[#allocation4 + $0x310] sm:$0xf]  ;;  %v1793_v13 = vld [vmem:[#allocation4 + $0x114] sm:$0xf]  ;;  %v1495_v3 = vld [vmem:[#allocation4 + $0x1d8] sm:$0xf] }
  0x94   :  { %v1825_v1 = vld [vmem:[#allocation4 + $0x214] sm:$0xf]  ;;  %v1822_v4 = vld [vmem:[#allocation4 + $0x1f4] sm:$0xf0] }
  0x95   :  { %v118_v15 = vmul.f32 0.044715, %v100_v12  ;;  %v119_v16 = vmul.f32 0.044715, %v113_v14  ;;  %v116_v30 = vmul.f32 0.5, %v100_v12  ;;  %v117_v34 = vmul.f32 0.5, %v113_v14 }
  0x96   :  { %v1521_v2 = vld [vmem:[#allocation4 + $0x230] sm:$0xf0] }
  0x97   :  { %v120_v17 = vmul.f32 %v118_v15, %v100_v12  ;;  %v121_v18 = vmul.f32 %v119_v16, %v113_v14  ;;  %v1857_v15 = vld [vmem:[#allocation4 + $0x314] sm:$0xf] }
  0x98   :  { %v1649_v16 = vld [vmem:[#allocation4 + $0x330] sm:$0xf0] }
  0x99   :  { %v122_v19 = vmul.f32 %v120_v17, %v100_v12  ;;  %v123_v20 = vmul.f32 %v121_v18, %v113_v14  ;;  %v1392_v17 = vor.u32 %v1797_v8, %v1391_v7  ;;  %v1818_v7 = vld [vmem:[#allocation4 + $0x1dc] sm:$0xf] }
  0x9a   :  { %v101_v21 = vpop.f32.mrf.mxu0  ;;  %v114_v23 = vpop.f32.mrf.mxu1 }
  0x9b   :  { %v124_v22 = vadd.f32 %v122_v19, %v100_v12  ;;  %v125_v24 = vadd.f32 %v123_v20, %v113_v14  ;;  %v1861_v12 = vld [vmem:[#allocation4 + $0x32c] sm:$0xf0]  ;;  %v1393_v14 = vld [vmem:[#allocation4 + $0x130] sm:$0xf0] }
  0x9c   :  { %v1648_v18 = vor.u32 %v1861_v12, %v1647_v11  ;;  %v1359_v19 = vld [vmem:[#allocation4 + $0xd0] sm:$0xf]  ;;  %v1396_v21 = vor.u32 %v1793_v13, %v1393_v14  ;;  %v1882_v11 = vld [vmem:[#allocation4 + $0x3dc] sm:$0xf]  ;;  %v1268_v13 = vor.u32 %v1761_v63, %v1265_v0  ;;  %v1524_v14 = vor.u32 %v1825_v1, %v1521_v2 }
  0x9d   :  { %v126_v25 = vmul.f32 0.7978846, %v124_v22  ;;  %v127_v26 = vmul.f32 0.7978846, %v125_v24  ;;  %v1789_v20 = vld [vmem:[#allocation4 + $0xec] sm:$0xf0]  ;;  %v1652_v22 = vor.u32 %v1857_v15, %v1649_v16  ;;  %v1496_v15 = vor.u32 %v1822_v4, %v1495_v3 }
  0x9e   :  { %v1615_v23 = vld [vmem:[#allocation4 + $0x2d0] sm:$0xf]  ;;  %v1753_v12 = vld [vmem:[#allocation4 + $0x3f8] sm:$0xf0]  ;;  %v1335_v3 = vld [vmem:[#allocation4 + $0x98] sm:$0xf] }
  0x9f   :  { %1894 = vtanh.f32 %v126_v25  ;;  %v1853_v24 = vld [vmem:[#allocation4 + $0x2ec] sm:$0xf0]  ;;  %v1785_v25 = vld [vmem:[#allocation4 + $0xd4] sm:$0xf]  ;;  %v1850_v63 = vld [vmem:[#allocation4 + $0x2dc] sm:$0xf] }
  0xa0   :  { %1896 = vtanh.f32 %v127_v26  ;;  %v1361_v26 = vld [vmem:[#allocation4 + $0xf0] sm:$0xf0]  ;;  %v1625_v0 = vld [vmem:[#allocation4 + $0x2f8] sm:$0xf0]  ;;  %v1782_v4 = vld [vmem:[#allocation4 + $0xb4] sm:$0xf0] }
  0xa1   :  { %v1364_v33 = vor.u32 %v1785_v25, %v1361_v26  ;;  %v1874_v25 = vld [vmem:[#allocation4 + $0x39c] sm:$0xf] }
  0xa2   :  { %v1721_v26 = vld [vmem:[#allocation4 + $0x3b8] sm:$0xf0] }
  0xa5   :  { %v1895_v27 = vpop.eup %1894 }
  0xa6   :  { %v1897_v29 = vpop.eup %1896  ;;  %v130_v31 = vadd.f32 1.0, %v1895_v27  ;;  %v1849_v27 = vld [vmem:[#allocation4 + $0x2d4] sm:$0xf] }
  0xa7   :  { %v131_v35 = vadd.f32 1.0, %v1897_v29  ;;  %v1360_v29 = vor.u32 %v1789_v20, %v1359_v19  ;;  %v1756_v20 = vor.u32 %v1882_v11, %v1753_v12  ;;  %v1842_v11 = vld [vmem:[#allocation4 + $0x29c] sm:$0xf] }
  0xa8   :  { %v132_v38 = vmul.f32 %v130_v31, %v116_v30  ;;  %v1616_v30 = vor.u32 %v1853_v24, %v1615_v23  ;;  %v1327_v31 = vld [vmem:[#allocation4 + $0x90] sm:$0xf]  ;;  %v1810_v23 = vld [vmem:[#allocation4 + $0x19c] sm:$0xf] }
  0xa9   :  { %v133_v42 = vmul.f32 %v131_v35, %v117_v34  ;;  %v1620_v34 = vor.u32 %v1849_v27, %v1617_v28  ;;  %v1583_v35 = vld [vmem:[#allocation4 + $0x290] sm:$0xf]  ;;  %v1328_v41 = vor.u32 %v1781_v32, %v1327_v31  ;;  %v1465_v24 = vld [vmem:[#allocation4 + $0x1b8] sm:$0xf0]  ;;  %v1724_v32 = vor.u32 %v1874_v25, %v1721_v26 }
  0xaa   :  { %v2044_v43 = vpack.c.bf16 %v132_v38, %v132_v38  ;;  %v1329_v38 = vld [vmem:[#allocation4 + $0xb0] sm:$0xf0]  ;;  %v1468_v31 = vor.u32 %v1810_v23, %v1465_v24  ;;  %v1593_v12 = vld [vmem:[#allocation4 + $0x2b8] sm:$0xf0] }
  0xab   :  { %v2046_v48 = vpack.c.bf16 %v133_v42, %v133_v42  ;;  %v1584_v42 = vor.u32 %v1845_v36, %v1583_v35  ;;  %v1332_v46 = vor.u32 %v1777_v37, %v1329_v38  ;;  %v1802_v35 = vld [vmem:[#allocation4 + $0x15c] sm:$0xf] }
  0xac   :  { %930 = vmatmul.bf16.vlgmr.msra.gmra.mxu2 %v2044_v43  ;;  %956 = vmatmul.bf16.vlgmr.msrb.gmra.mxu0 %v2044_v43  ;;  %v1433_v36 = vld [vmem:[#allocation4 + $0x178] sm:$0xf0] }
  0xad   :  { %943 = vmatmul.bf16.vlgmr.msra.gmra.mxu3 %v2046_v48  ;;  %969 = vmatmul.bf16.vlgmr.msrb.gmra.mxu1 %v2046_v48  ;;  %v1866_v37 = vld [vmem:[#allocation4 + $0x35c] sm:$0xf] }
  0xae   :  { %1026 = vmatpush.bf16.msra.mxu2 %v1488_v44  ;;  %1039 = vmatpush.bf16.msra.mxu3 %v1744_v45  ;;  %v1295_v44 = vld [vmem:[#allocation4 + $0x50] sm:$0xf]  ;;  %v1689_v38 = vld [vmem:[#allocation4 + $0x378] sm:$0xf0] }
  0xaf   :  { %1052 = vmatpush.bf16.msrb.mxu0 %v1492_v49  ;;  %1065 = vmatpush.bf16.msrb.mxu1 %v1748_v50  ;;  %v1773_v45 = vld [vmem:[#allocation4 + $0x6c] sm:$0xf0]  ;;  %v1834_v23 = vld [vmem:[#allocation4 + $0x25c] sm:$0xf] }
  0xb0   :  { %v1551_v49 = vld [vmem:[#allocation4 + $0x250] sm:$0xf]  ;;  %v1296_v56 = vor.u32 %v1773_v45, %v1295_v44  ;;  %v1436_v44 = vor.u32 %v1802_v35, %v1433_v36  ;;  %v1692_v45 = vor.u32 %v1866_v37, %v1689_v38  ;;  %v1561_v24 = vld [vmem:[#allocation4 + $0x278] sm:$0xf0] }
  0xb1   :  { %v1837_v50 = vld [vmem:[#allocation4 + $0x26c] sm:$0xf0]  ;;  %v1826_v35 = vld [vmem:[#allocation4 + $0x21c] sm:$0xf] }
  0xb2   :  { %1027 = vmatpush.bf16.msra.mxu2 %v1456_v57  ;;  %1040 = vmatpush.bf16.msra.mxu3 %v1712_v58  ;;  %v1552_v57 = vor.u32 %v1837_v50, %v1551_v49  ;;  %v1765_v58 = vld [vmem:[#allocation4 + $0x2c] sm:$0xf0]  ;;  %v1794_v49 = vld [vmem:[#allocation4 + $0x11c] sm:$0xf] }
  0xb3   :  { %1053 = vmatpush.bf16.msrb.mxu0 %v1460_v61  ;;  %1066 = vmatpush.bf16.msrb.mxu1 %v1716_v62  ;;  %v1300_v61 = vor.u32 %v1769_v51, %v1297_v52  ;;  %v1556_v62 = vor.u32 %v1833_v53, %v1553_v54  ;;  %v1264_v8 = vor.u32 %v1765_v58, %v1263_v55  ;;  %v1401_v50 = vld [vmem:[#allocation4 + $0x138] sm:$0xf0]  ;;  %v1367_v55 = vld [vmem:[#allocation4 + $0xd8] sm:$0xf] }
  0xb4   :  { %v1858_v51 = vld [vmem:[#allocation4 + $0x31c] sm:$0xf] }
  0xb5   :  { %v1657_v52 = vld [vmem:[#allocation4 + $0x338] sm:$0xf0] }
  0xb6   :  { %1028 = vmatpush.bf16.msra.mxu2 %v1424_v5  ;;  %1041 = vmatpush.bf16.msra.mxu3 %v1680_v6  ;;  %v1751_v5 = vld [vmem:[#allocation4 + $0x3d8] sm:$0xf]  ;;  %v1660_v58 = vor.u32 %v1858_v51, %v1657_v52  ;;  %v1529_v36 = vld [vmem:[#allocation4 + $0x238] sm:$0xf0] }
  0xb7   :  { %1054 = vmatpush.bf16.msrb.mxu0 %v1428_v9  ;;  %1067 = vmatpush.bf16.msrb.mxu1 %v1684_v10  ;;  %v1886_v6 = vld [vmem:[#allocation4 + $0x3f4] sm:$0xf0]  ;;  %v1520_v9 = vor.u32 %v1829_v60, %v1519_v59  ;;  %v1497_v10 = vld [vmem:[#allocation4 + $0x1f8] sm:$0xf0] }
  0xb8   :  { %v1752_v16 = vor.u32 %v1886_v6, %v1751_v5  ;;  %v1500_v19 = vor.u32 %v1818_v7, %v1497_v10  ;;  %v1623_v59 = vld [vmem:[#allocation4 + $0x2d8] sm:$0xf]  ;;  %v1628_v6 = vor.u32 %v1850_v63, %v1625_v0  ;;  %v1337_v10 = vld [vmem:[#allocation4 + $0xb8] sm:$0xf0] }
  0xb9   :  { %v1854_v60 = vld [vmem:[#allocation4 + $0x2f4] sm:$0xf0] }
  0xba   :  { %1029 = vmatpush.bf16.msra.mxu2 %v1392_v17  ;;  %1042 = vmatpush.bf16.msra.mxu3 %v1648_v18  ;;  %v1463_v17 = vld [vmem:[#allocation4 + $0x198] sm:$0xf]  ;;  %v1624_v2 = vor.u32 %v1854_v60, %v1623_v59 }
  0xbb   :  { %1055 = vmatpush.bf16.msrb.mxu0 %v1396_v21  ;;  %1068 = vmatpush.bf16.msrb.mxu1 %v1652_v22  ;;  %v1814_v18 = vld [vmem:[#allocation4 + $0x1b4] sm:$0xf0] }
  0xbc   :  { %982 = vmatmul.bf16.vlgmr.msrb.gmra.mxu2 %v2044_v43  ;;  %1008 = vmatmul.bf16.vlgmr.msra.gmra.mxu0 %v2044_v43  ;;  %v1719_v21 = vld [vmem:[#allocation4 + $0x398] sm:$0xf]  ;;  %v1464_v27 = vor.u32 %v1814_v18, %v1463_v17  ;;  %v1596_v18 = vor.u32 %v1842_v11, %v1593_v12 }
  0xbd   :  { %995 = vmatmul.bf16.vlgmr.msrb.gmra.mxu3 %v2046_v48  ;;  %1021 = vmatmul.bf16.vlgmr.msra.gmra.mxu1 %v2046_v48  ;;  %v1878_v22 = vld [vmem:[#allocation4 + $0x3b4] sm:$0xf0] }
  0xbe   :  { %1030 = vmatpush.bf16.msra.mxu2 %v1360_v29  ;;  %1043 = vmatpush.bf16.msra.mxu3 %v1616_v30  ;;  %v1720_v28 = vor.u32 %v1878_v22, %v1719_v21  ;;  %v1431_v29 = vld [vmem:[#allocation4 + $0x158] sm:$0xf]  ;;  %v1770_v21 = vld [vmem:[#allocation4 + $0x5c] sm:$0xf] }
  0xbf   :  { %1056 = vmatpush.bf16.msrb.mxu0 %v1364_v33  ;;  %1069 = vmatpush.bf16.msrb.mxu1 %v1620_v34  ;;  %v1806_v30 = vld [vmem:[#allocation4 + $0x174] sm:$0xf0]  ;;  %v1305_v22 = vld [vmem:[#allocation4 + $0x78] sm:$0xf0] }
  0xc0   :  { %v1687_v33 = vld [vmem:[#allocation4 + $0x358] sm:$0xf]  ;;  %v1432_v39 = vor.u32 %v1806_v30, %v1431_v29  ;;  %v1308_v29 = vor.u32 %v1770_v21, %v1305_v22  ;;  %v1564_v30 = vor.u32 %v1834_v23, %v1561_v24 }
  0xc1   :  { %v1870_v34 = vld [vmem:[#allocation4 + $0x374] sm:$0xf0] }
  0xc2   :  { %1031 = vmatpush.bf16.msra.mxu2 %v1328_v41  ;;  %1044 = vmatpush.bf16.msra.mxu3 %v1584_v42  ;;  %v1688_v40 = vor.u32 %v1870_v34, %v1687_v33  ;;  %v1399_v41 = vld [vmem:[#allocation4 + $0x118] sm:$0xf]  ;;  %v1762_v33 = vld [vmem:[#allocation4 + $0x1c] sm:$0xf] }
  0xc3   :  { %1057 = vmatpush.bf16.msrb.mxu0 %v1332_v46  ;;  %1070 = vmatpush.bf16.msrb.mxu1 %v1588_v47  ;;  %v1798_v42 = vld [vmem:[#allocation4 + $0x134] sm:$0xf0]  ;;  %v1273_v34 = vld [vmem:[#allocation4 + $0x38] sm:$0xf0] }
  0xc4   :  { %v1655_v46 = vld [vmem:[#allocation4 + $0x318] sm:$0xf]  ;;  %v1400_v53 = vor.u32 %v1798_v42, %v1399_v41  ;;  %v2064_v41 = vld [vmem:[#allocation6] sm:$0xff] }
  0xc5   :  { %v1862_v47 = vld [vmem:[#allocation4 + $0x334] sm:$0xf0]  ;;  %v267_v42 = vperm.slane %v2064_v41, 1 }
  0xc6   :  { %1032 = vmatpush.bf16.msra.mxu2 %v1296_v56  ;;  %1045 = vmatpush.bf16.msra.mxu3 %v1552_v57  ;;  %v1656_v54 = vor.u32 %v1862_v47, %v1655_v46  ;;  %v1790_v56 = vld [vmem:[#allocation4 + $0xf4] sm:$0xf0]  ;;  %v1404_v57 = vor.u32 %v1794_v49, %v1401_v50  ;;  %v266_v47 = vperm.slane %v2064_v41, 0 }
  0xc7   :  { %1058 = vmatpush.bf16.msrb.mxu0 %v1300_v61  ;;  %1071 = vmatpush.bf16.msrb.mxu1 %v1556_v62  ;;  %v1786_v61 = vld [vmem:[#allocation4 + $0xdc] sm:$0xf]  ;;  %v1368_v1 = vor.u32 %v1790_v56, %v1367_v55  ;;  %v1591_v7 = vld [vmem:[#allocation4 + $0x298] sm:$0xf] }
  0xc8   :  { %v1369_v62 = vld [vmem:[#allocation4 + $0xf8] sm:$0xf0] }
  0xc9   :  { %v1372_v5 = vor.u32 %v1786_v61, %v1369_v62 }
  0xca   :  { %1033 = vmatpush.bf16.msra.mxu2 %v1264_v8  ;;  %1046 = vmatpush.bf16.msra.mxu3 %v1520_v9  ;;  %v1846_v8 = vld [vmem:[#allocation4 + $0x2b4] sm:$0xf0]  ;;  %v1778_v9 = vld [vmem:[#allocation4 + $0x9c] sm:$0xf] }
  0xcb   :  { %1059 = vmatpush.bf16.msrb.mxu0 %v1268_v13  ;;  %1072 = vmatpush.bf16.msrb.mxu1 %v1524_v14  ;;  %v1336_v13 = vor.u32 %v1782_v4, %v1335_v3  ;;  %v1592_v14 = vor.u32 %v1846_v8, %v1591_v7  ;;  %v1340_v17 = vor.u32 %v1778_v9, %v1337_v10 }
  0xcd   :  { %1034 = vmatmul.bf16.vlgmr.msra.gmra.mxu2 %v2044_v43  ;;  %1047 = vmatmul.bf16.vlgmr.msra.gmra.mxu3 %v2046_v48 }
  0xce   :  { %1078 = vmatpush.bf16.msrb.mxu2 %v1496_v15  ;;  %1091 = vmatpush.bf16.msrb.mxu3 %v1752_v16  ;;  %v1303_v15 = vld [vmem:[#allocation4 + $0x58] sm:$0xf] }
  0xcf   :  { %1104 = vmatpush.bf16.msra.mxu0 %v1500_v19  ;;  %1117 = vmatpush.bf16.msra.mxu1 %v1756_v20  ;;  %v1774_v16 = vld [vmem:[#allocation4 + $0x74] sm:$0xf0] }
  0xd0   :  { %1060 = vmatmul.bf16.vlgmr.msrb.gmra.mxu0 %v2044_v43  ;;  %1073 = vmatmul.bf16.vlgmr.msrb.gmra.mxu1 %v2046_v48  ;;  %v1559_v19 = vld [vmem:[#allocation4 + $0x258] sm:$0xf]  ;;  %v1304_v25 = vor.u32 %v1774_v16, %v1303_v15 }
  0xd1   :  { %v1838_v20 = vld [vmem:[#allocation4 + $0x274] sm:$0xf0] }
  0xd2   :  { %1079 = vmatpush.bf16.msrb.mxu2 %v1464_v27  ;;  %1092 = vmatpush.bf16.msrb.mxu3 %v1720_v28  ;;  %v1560_v26 = vor.u32 %v1838_v20, %v1559_v19  ;;  %v1271_v27 = vld [vmem:[#allocation4 + $0x18] sm:$0xf] }
  0xd3   :  { %1105 = vmatpush.bf16.msra.mxu0 %v1468_v31  ;;  %1118 = vmatpush.bf16.msra.mxu1 %v1724_v32  ;;  %v1766_v28 = vld [vmem:[#allocation4 + $0x34] sm:$0xf0] }
  0xd4   :  { %v1527_v31 = vld [vmem:[#allocation4 + $0x218] sm:$0xf]  ;;  %v1272_v37 = vor.u32 %v1766_v28, %v1271_v27 }
  0xd5   :  { %v1830_v32 = vld [vmem:[#allocation4 + $0x234] sm:$0xf0] }
  0xd6   :  { %1080 = vmatpush.bf16.msrb.mxu2 %v1432_v39  ;;  %1093 = vmatpush.bf16.msrb.mxu3 %v1688_v40  ;;  %v1528_v38 = vor.u32 %v1830_v32, %v1527_v31  ;;  %v1276_v39 = vor.u32 %v1762_v33, %v1273_v34  ;;  %v1532_v40 = vor.u32 %v1826_v35, %v1529_v36 }
  0xd7   :  { %1106 = vmatpush.bf16.msra.mxu0 %v1436_v44  ;;  %1119 = vmatpush.bf16.msra.mxu1 %v1692_v45 }
  0xda   :  { %1081 = vmatpush.bf16.msrb.mxu2 %v1400_v53  ;;  %1094 = vmatpush.bf16.msrb.mxu3 %v1656_v54 }
  0xdb   :  { %1107 = vmatpush.bf16.msra.mxu0 %v1404_v57  ;;  %1120 = vmatpush.bf16.msra.mxu1 %v1660_v58 }
  0xde   :  { %1082 = vmatpush.bf16.msrb.mxu2 %v1368_v1  ;;  %1095 = vmatpush.bf16.msrb.mxu3 %v1624_v2  ;;  %v268_v2 = vperm.slane %v2064_v41, 2 }
  0xdf   :  { %1108 = vmatpush.bf16.msra.mxu0 %v1372_v5  ;;  %1121 = vmatpush.bf16.msra.mxu1 %v1628_v6 }
  0xe2   :  { %1083 = vmatpush.bf16.msrb.mxu2 %v1336_v13  ;;  %1096 = vmatpush.bf16.msrb.mxu3 %v1592_v14 }
  0xe3   :  { %1109 = vmatpush.bf16.msra.mxu0 %v1340_v17  ;;  %1122 = vmatpush.bf16.msra.mxu1 %v1596_v18 }
  0xe6   :  { %1084 = vmatpush.bf16.msrb.mxu2 %v1304_v25  ;;  %1097 = vmatpush.bf16.msrb.mxu3 %v1560_v26 }
  0xe7   :  { %1110 = vmatpush.bf16.msra.mxu0 %v1308_v29  ;;  %1123 = vmatpush.bf16.msra.mxu1 %v1564_v30 }
  0xea   :  { %1085 = vmatpush.bf16.msrb.mxu2 %v1272_v37  ;;  %1098 = vmatpush.bf16.msrb.mxu3 %v1528_v38 }
  0xeb   :  { %1111 = vmatpush.bf16.msra.mxu0 %v1276_v39  ;;  %1124 = vmatpush.bf16.msra.mxu1 %v1532_v40 }
  0xed   :  { %1086 = vmatmul.bf16.vlgmr.msrb.gmra.mxu2 %v2044_v43  ;;  %1099 = vmatmul.bf16.vlgmr.msrb.gmra.mxu3 %v2046_v48 }
  0xee   :  { %1112 = vmatmul.bf16.vlgmr.msra.gmra.mxu0 %v2044_v43  ;;  %1125 = vmatmul.bf16.vlgmr.msra.gmra.mxu1 %v2046_v48  ;;  %v269_v48 = vperm.slane %v2064_v41, 3 }
 0x129   :  { %v957_v44 = vpop.f32.mrf.mxu0 }
 0x12a   :  { %v970_v45 = vpop.f32.mrf.mxu1  ;;  %v958_v46 = vadd.f32 %v957_v44, %v267_v42 }
 0x12c   :  { %v971_v49 = vadd.f32 %v970_v45, %v958_v46 }
 0x12e   :  { %v1139_v56 = vmul.f32 0.044715, %v971_v49  ;;  %v1131_v35 = vmul.f32 0.5, %v971_v49 }
 0x12f   :  { %v931_v50 = vpop.f32.mrf.mxu2 }
 0x130   :  { %v932_v51 = vadd.f32 %v931_v50, %v266_v47  ;;  %v944_v52 = vpop.f32.mrf.mxu3  ;;  %v1147_v57 = vmul.f32 %v1139_v56, %v971_v49 }
 0x131   :  { %v959_v53 = vpop.f32.mrf.mxu0 }
 0x132   :  { %v945_v54 = vadd.f32 %v944_v52, %v932_v51  ;;  %v972_v55 = vpop.f32.mrf.mxu1  ;;  %v1155_v0 = vmul.f32 %v1147_v57, %v971_v49  ;;  %v271_v52 = vperm.slane %v2064_v41, 5  ;;  %v270_v53 = vperm.slane %v2064_v41, 4 }
 0x134   :  { %v1138_v43 = vmul.f32 0.044715, %v945_v54  ;;  %v1163_v5 = vadd.f32 %v1155_v0, %v971_v49  ;;  %v1130_v39 = vmul.f32 0.5, %v945_v54 }
 0x136   :  { %v1146_v61 = vmul.f32 %v1138_v43, %v945_v54  ;;  %v1171_v15 = vmul.f32 0.7978846, %v1163_v5 }
 0x137   :  { %v933_v58 = vpop.f32.mrf.mxu2 }
 0x138   :  { %v946_v59 = vpop.f32.mrf.mxu3  ;;  %v1154_v3 = vmul.f32 %v1146_v61, %v945_v54  ;;  %1898 = vtanh.f32 %v1171_v15 }
 0x139   :  { %v1009_v60 = vpop.f32.mrf.mxu0 }
 0x13a   :  { %v1010_v62 = vadd.f32 %v1009_v60, %v269_v48  ;;  %v1022_v63 = vpop.f32.mrf.mxu1  ;;  %v1162_v11 = vadd.f32 %v1154_v3, %v945_v54 }
 0x13c   :  { %v1023_v1 = vadd.f32 %v1022_v63, %v1010_v62  ;;  %v1170_v18 = vmul.f32 0.7978846, %v1162_v11 }
 0x13e   :  { %v1141_v4 = vmul.f32 0.044715, %v1023_v1  ;;  %v1899_v28 = vpop.eup %1898  ;;  %v1133_v37 = vmul.f32 0.5, %v1023_v1 }
 0x13f   :  { %v983_v6 = vpop.f32.mrf.mxu2  ;;  %v1187_v31 = vadd.f32 1.0, %v1899_v28 }
 0x140   :  { %v1149_v7 = vmul.f32 %v1141_v4, %v1023_v1  ;;  %v984_v8 = vadd.f32 %v983_v6, %v268_v2  ;;  %v996_v9 = vpop.f32.mrf.mxu3 }
 0x141   :  { %v1011_v10 = vpop.f32.mrf.mxu0  ;;  %v1195_v44 = vmul.f32 %v1187_v31, %v1131_v35 }
 0x142   :  { %v1157_v12 = vmul.f32 %v1149_v7, %v1023_v1  ;;  %v997_v13 = vadd.f32 %v996_v9, %v984_v8  ;;  %v1024_v14 = vpop.f32.mrf.mxu1  ;;  %v272_v8 = vperm.slane %v2064_v41, 6 }
 0x143   :  { %v1210_v55 = vrot.slane %v1195_v44, 6 }
 0x144   :  { %v1165_v16 = vadd.f32 %v1157_v12, %v1023_v1  ;;  %v1140_v17 = vmul.f32 0.044715, %v997_v13  ;;  %v1132_v46 = vmul.f32 0.5, %v997_v13  ;;  %v273_v1 = vperm.slane %v2064_v41, 7 }
 0x146   :  { %v1173_v19 = vmul.f32 0.7978846, %v1165_v16  ;;  %v1148_v20 = vmul.f32 %v1140_v17, %v997_v13 }
 0x147   :  { %v985_v21 = vpop.f32.mrf.mxu2 }
 0x148   :  { %1900 = vtanh.f32 %v1173_v19  ;;  %v1156_v22 = vmul.f32 %v1148_v20, %v997_v13  ;;  %v998_v23 = vpop.f32.mrf.mxu3 }
 0x149   :  { %1902 = vtanh.f32 %v1170_v18 }
 0x14a   :  { %v1164_v24 = vadd.f32 %v1156_v22, %v997_v13 }
 0x14c   :  { %v1172_v25 = vmul.f32 0.7978846, %v1164_v24 }
 0x14d   :  { %v1061_v26 = vpop.f32.mrf.mxu0  ;;  %v1074_v27 = vpop.f32.mrf.mxu1 }
 0x14e   :  { %v1901_v29 = vpop.eup %1900  ;;  %1904 = vtanh.f32 %v1172_v25  ;;  %v1062_v58 = vadd.f32 %v1061_v26, %v271_v52 }
 0x14f   :  { %v1903_v30 = vpop.eup %1902  ;;  %v1189_v32 = vadd.f32 1.0, %v1901_v29 }
 0x150   :  { %v1035_v33 = vpop.f32.mrf.mxu2  ;;  %v1048_v34 = vpop.f32.mrf.mxu3  ;;  %v1186_v36 = vadd.f32 1.0, %v1903_v30  ;;  %v1075_v61 = vadd.f32 %v1074_v27, %v1062_v58 }
 0x151   :  { %v1197_v45 = vmul.f32 %v1189_v32, %v1133_v37  ;;  %v1036_v60 = vadd.f32 %v1035_v33, %v270_v53 }
 0x152   :  { %v1194_v50 = vmul.f32 %v1186_v36, %v1130_v39  ;;  %v1143_v63 = vmul.f32 0.044715, %v1075_v61  ;;  %v1135_v37 = vmul.f32 0.5, %v1075_v61 }
 0x153   :  { %v1212_v49 = vrot.slane %v1197_v45, 2  ;;  %v1049_v62 = vadd.f32 %v1048_v34, %v1036_v60 }
 0x154   :  { %v1905_v38 = vpop.eup %1904  ;;  %v1217_v48 = vsel %vm1216_vm1, %v1194_v50, %v1210_v55  ;;  %v1151_v2 = vmul.f32 %v1143_v63, %v1075_v61 }
 0x155   :  { %v1063_v40 = vpop.f32.mrf.mxu0  ;;  %v1076_v42 = vpop.f32.mrf.mxu1  ;;  %v1188_v47 = vadd.f32 1.0, %v1905_v38  ;;  %v1142_v0 = vmul.f32 0.044715, %v1049_v62 }
 0x156   :  { %v1159_v7 = vmul.f32 %v1151_v2, %v1075_v61  ;;  %v1134_v42 = vmul.f32 0.5, %v1049_v62 }
 0x157   :  { %v1196_v51 = vmul.f32 %v1188_v47, %v1132_v46  ;;  %v1150_v3 = vmul.f32 %v1142_v0, %v1049_v62 }
 0x158   :  { %v1037_v43 = vpop.f32.mrf.mxu2  ;;  %v1050_v54 = vpop.f32.mrf.mxu3  ;;  %v1167_v14 = vadd.f32 %v1159_v7, %v1075_v61 }
 0x159   :  { %v1211_v56 = vrot.slane %v1196_v51, 4  ;;  %v1158_v10 = vmul.f32 %v1150_v3, %v1049_v62 }
 0x15a   :  { %v1175_v22 = vmul.f32 0.7978846, %v1167_v14 }
 0x15b   :  { %v1219_v57 = vsel %vm1218_vm2, %v1211_v56, %v1212_v49  ;;  %v1166_v17 = vadd.f32 %v1158_v10, %v1049_v62 }
 0x15c   :  { %v1221_v59 = vsel %vm1220_vm3, %v1217_v48, %v1219_v57  ;;  %1906 = vtanh.f32 %v1175_v22 }
 0x15d   :  { %1227 = vst [vmem:[%s2091_s5] sm:$0xff] %v1221_v59  ;;  %v1174_v25 = vmul.f32 0.7978846, %v1166_v17 }
 0x162   :  { %v1907_v32 = vpop.eup %1906 }
 0x163   :  { %v1191_v35 = vadd.f32 1.0, %v1907_v32 }
 0x165   :  { %v1199_v44 = vmul.f32 %v1191_v35, %v1135_v37 }
 0x167   :  { %v1213_v52 = vrot.slane %v1199_v44, 6 }
 0x16b   :  { %v1113_v4 = vpop.f32.mrf.mxu0  ;;  %v1126_v5 = vpop.f32.mrf.mxu1 }
 0x16c   :  { %v1114_v6 = vadd.f32 %v1113_v4, %v273_v1 }
 0x16e   :  { %v1127_v9 = vadd.f32 %v1126_v5, %v1114_v6 }
 0x170   :  { %v1145_v11 = vmul.f32 0.044715, %v1127_v9  ;;  %v1087_v12 = vpop.f32.mrf.mxu2  ;;  %v1100_v13 = vpop.f32.mrf.mxu3  ;;  %v1137_v39 = vmul.f32 0.5, %v1127_v9 }
 0x171   :  { %v1088_v15 = vadd.f32 %v1087_v12, %v272_v8 }
 0x172   :  { %v1153_v16 = vmul.f32 %v1145_v11, %v1127_v9 }
 0x173   :  { %v1101_v18 = vadd.f32 %v1100_v13, %v1088_v15  ;;  %v1115_v19 = vpop.f32.mrf.mxu0  ;;  %v1128_v20 = vpop.f32.mrf.mxu1 }
 0x174   :  { %v1161_v21 = vmul.f32 %v1153_v16, %v1127_v9 }
 0x175   :  { %v1144_v23 = vmul.f32 0.044715, %v1101_v18  ;;  %v1136_v46 = vmul.f32 0.5, %v1101_v18 }
 0x176   :  { %v1169_v24 = vadd.f32 %v1161_v21, %v1127_v9 }
 0x177   :  { %v1152_v26 = vmul.f32 %v1144_v23, %v1101_v18 }
 0x178   :  { %v1177_v27 = vmul.f32 0.7978846, %v1169_v24  ;;  %v1089_v41 = vpop.f32.mrf.mxu2  ;;  %v1102_v28 = vpop.f32.mrf.mxu3 }
 0x179   :  { %v1160_v29 = vmul.f32 %v1152_v26, %v1101_v18 }
 0x17a   :  { %1908 = vtanh.f32 %v1177_v27 }
 0x17b   :  { %1910 = vtanh.f32 %v1174_v25  ;;  %v1168_v30 = vadd.f32 %v1160_v29, %v1101_v18 }
 0x17d   :  { %v1176_v31 = vmul.f32 0.7978846, %v1168_v30 }
 0x17f   :  { %1912 = vtanh.f32 %v1176_v31 }
 0x180   :  { %v1909_v33 = vpop.eup %1908 }
 0x181   :  { %v1911_v34 = vpop.eup %1910  ;;  %v1193_v36 = vadd.f32 1.0, %v1909_v33 }
 0x182   :  { %v1190_v38 = vadd.f32 1.0, %v1911_v34 }
 0x183   :  { %v1201_v45 = vmul.f32 %v1193_v36, %v1137_v39 }
 0x184   :  { %v1198_v50 = vmul.f32 %v1190_v38, %v1134_v42 }
 0x185   :  { %v1913_v40 = vpop.eup %1912  ;;  %v1215_v53 = vrot.slane %v1201_v45, 2 }
 0x186   :  { %v1192_v47 = vadd.f32 1.0, %v1913_v40  ;;  %v1222_v49 = vsel %vm1216_vm1, %v1198_v50, %v1213_v52 }
 0x188   :  { %v1200_v51 = vmul.f32 %v1192_v47, %v1136_v46 }
 0x18a   :  { %v1214_v55 = vrot.slane %v1200_v51, 4 }
 0x18c   :  { %v1223_v56 = vsel %vm1218_vm2, %v1214_v55, %v1215_v53 }
 0x18d   :  { %v1224_v43 = vsel %vm1220_vm3, %v1222_v49, %v1223_v56 }
 0x18e   :  { %1228 = vst [vmem:[%s2091_s5 + $0x8] sm:$0xff] %v1224_v43 }
 0x18f   :  { %1233 = vsyncpa [#allocation3], 1 }
 0x190   :  { %1234 = vsyncpa [#allocation5], 1 }

// kernel: decoder_forward.4
= control target key start
LH: loop header
LB: loop body
LE: loop exit
PB: predicated region body
PF: predicated region fallthrough
CT: control target
= control target key end

     0   :  { %14 = vsyncpa [#allocation5], 0  ;;  %s5372_s0 = inlined_call_operand.vmem [shape: f32[128,16], index: 0, kind: input, shape index: {}]   ;;  %s5373_s1 = inlined_call_operand.hbm [shape: bf16[9,128,128], index: 1, kind: input, shape index: {}]   ;;  %s5374_s2 = inlined_call_operand.vmem [shape: f32[1,128], index: 2, kind: input, shape index: {}]   ;;  %s5375_s3 = inlined_call_operand.hbm [shape: bf16[9,128,128], index: 3, kind: input, shape index: {}]   ;;  %s5376_s4 = inlined_call_operand.vmem [shape: f32[1,128], index: 4, kind: input, shape index: {}]   ;;  %s5377_s5 = inlined_call_operand.vmem [shape: f32[128,128], index: 5, kind: output, shape index: {0}]   ;;  %s5378_s6 = inlined_call_operand.vmem [shape: f32[128,128], index: 6, kind: output, shape index: {1}]   ;;  %s5379_s7 = inlined_call_operand.vmem [shape: f32[128,128], index: 7, kind: output, shape index: {2}]   ;;  %s5380_s8 = inlined_call_operand.vmem [shape: f32[128,128], index: 8, kind: output, shape index: {3}]  }
   0x1   :  { %15 = vsyncpa [#allocation7], 0  ;;  %s4622_s27 = smov 0  }
   0x2 LB: > { %s251_s30 = sshll.u32 %s5373_s1, 4  ;;  %s3512_s9 = sadd.s32 4294967295, %s4569_s27   ;;  %s4569_s27 = sphi %s4622_s27, %s21_s27   ;;  %s252_s30 = int_to_ptr.hbm [resolvable:$true] %s251_s30 }
   0x3   : > { %p3514_p0 = scmp.ge.s32.totalorder %s4569_s27, 1  ;;  %p240_p1 = scmp.lt.s32.totalorder %s4569_s27, 3 }
   0x4   : > { %p4633_p2 = scmp.eq.s32.totalorder %s3512_s9, 0  ;;  %s4571_s12 = smov [#allocation4]  }
   0x5   : > { %p4637_p3 = pnand %p3514_p0, %p240_p1  ;;  %s253_s13 = sshll.u32 %s4571_s12, 4  ;;  %s254_s13 = int_to_ptr.vmem [resolvable:$true] %s253_s13 }
   0x6   : > { %s268_s16 = sshll.u32 %s5375_s3, 4  ;;  %s4572_s17 = smov [#allocation6]   ;;  %s269_s16 = int_to_ptr.hbm [resolvable:$true] %s268_s16 }
   0x7   : > { %p4385_p4 = pneg %p4637_p3  ;;  %s270_s18 = sshll.u32 %s4572_s17, 4  ;;  %s271_s18 = int_to_ptr.vmem [resolvable:$true] %s270_s18 }
   0x8   : > { %s4573_s19 = smov 64   ;;  %s4574_s20 = smov 4  }
   0x9   : > { %p4386_p5 = pnand %p4633_p2, %p4385_p4  ;;  %298 = sbr.rel (%p4637_p3) target bundleno = 652 (0x28c), region = 40 }
   0xb   : > { %4388 = dma.hbm_to_vmem [thread:$0]  (!%p4386_p5), %s252_s30, 9216, %s254_s13, [#allocation5], %s4573_s19, %s4573_s19, %s4574_s20  }
   0xc   : > { %4391 = dma.hbm_to_vmem [thread:$0]  (!%p4386_p5), %s269_s16, 9216, %s271_s18, [#allocation7], %s4573_s19, %s4573_s19, %s4574_s20  }
   0xe   : > { %4560 = dma.done.wait (%p4633_p2), [#allocation5], 9216  }
   0xf   : > { %4562 = vsyncadd (%p4633_p2), [#allocation5], 4294958080 }
  0x10   : > { %4564 = dma.done.wait (%p4633_p2), [#allocation7], 9216  }
  0x11   : > { %4566 = vsyncadd (%p4633_p2), [#allocation7], 4294958080  ;;  %s3521_s21 = sshll.u32 %s3512_s9, 3  ;;  %v4575_v0 = vmov 0.0   ;;  %v4232_v1 = vld [vmem:[#allocation4 + $0x78] sm:$0xff]  ;;  %v4231_v3 = vld [vmem:[#allocation4 + $0x70] sm:$0xff]  ;;  %v383_v8 = vlaneseq }
  0x12   : > { %p354_p6 = scmp.lt.s32.totalorder %s3521_s21, 15  ;;  %401 = vst [vmem:[#allocation2 + $0x8] sm:$0xff] %v4575_v0  ;;  %v4224_v2 = vld [vmem:[#allocation4 + $0x38] sm:$0xff]  ;;  %4361 = vmatpush.bf16.msra.mxu2 %v4232_v1  ;;  %v4223_v4 = vld [vmem:[#allocation4 + $0x30] sm:$0xff]  ;;  %654 = vmatpush.bf16.msra.mxu0 %v4232_v1  ;;  %v4230_v5 = vld [vmem:[#allocation4 + $0x68] sm:$0xff]  ;;  %vm420_vm0 = vcmask 130048  }
  0x13   : > { %402 = vst [vmem:[#allocation2 + $0x10] sm:$0xff] %v4575_v0  ;;  %4369 = vmatpush.bf16.msra.mxu3 %v4224_v2  ;;  %731 = vmatpush.bf16.msra.mxu1 %v4224_v2  ;;  %v4222_v6 = vld [vmem:[#allocation4 + $0x28] sm:$0xff]  ;;  %v4229_v11 = vld [vmem:[#allocation4 + $0x60] sm:$0xff]  ;;  %v4683_v14 = vshrl.u32 %v383_v8, 7  ;;  %v4228_v17 = vld [vmem:[#allocation4 + $0x58] sm:$0xff]  ;;  %vm4576_vm5 = vmmov 1  }
  0x14   : > { %s5402_s21 = smov (!%p354_p6, %s3521_s21), 15  ;;  %403 = vst [vmem:[#allocation2 + $0x18] sm:$0xff] %v4575_v0  ;;  %v4221_v12 = vld [vmem:[#allocation4 + $0x20] sm:$0xff]  ;;  %v4220_v19 = vld [vmem:[#allocation4 + $0x18] sm:$0xff]  ;;  %v4227_v23 = vld [vmem:[#allocation4 + $0x50] sm:$0xff] }
  0x15   : > { %s4661_s22 = sshll.u32 %s5402_s21, 3  ;;  %404 = vst [vmem:[#allocation2 + $0x20] sm:$0xff] %v4575_v0  ;;  %v4692_v20 = vadd.s32 32, %v4683_v14  ;;  %v4695_v21 = vadd.s32 40, %v4683_v14  ;;  %v4699_v22 = vadd.s32 8, %v4683_v14  ;;  %v4219_v24 = vld [vmem:[#allocation4 + $0x10] sm:$0xff] }
  0x16   : > { %405 = vst [vmem:[#allocation2 + $0x28] sm:$0xff] %v4575_v0  ;;  %s4670_s25 = scalar_lea.vmem %s5372_s0, %s4661_s22  ;;  %4362 = vmatpush.bf16.msra.mxu2 %v4231_v3  ;;  %655 = vmatpush.bf16.msra.mxu0 %v4231_v3  ;;  %v4226_v28 = vld [vmem:[#allocation4 + $0x48] sm:$0xff]  ;;  %v4225_v33 = vld [vmem:[#allocation4 + $0x40] sm:$0xff]  ;;  %v4240_v41 = vld [vmem:[#allocation4 + $0xb8] sm:$0xff]  ;;  %v4746_v50 = vadd.s32 48, %v4683_v14  ;;  %v4749_v51 = vadd.s32 56, %v4683_v14  ;;  %s5170_s11 = scalar_lea.vmem %s5377_s5, %s4661_s22 }
  0x17   : > { %406 = vst [vmem:[#allocation2 + $0x30] sm:$0xff] %v4575_v0  ;;  %4370 = vmatpush.bf16.msra.mxu3 %v4223_v4  ;;  %732 = vmatpush.bf16.msra.mxu1 %v4223_v4  ;;  %v415_v7 = vld [vmem:[%s4670_s25 + $0x18] sm:$0xff]  ;;  %v416_v9 = vld [vmem:[%s4670_s25 + $0x20] sm:$0xff]  ;;  %v414_v10 = vld [vmem:[%s4670_s25 + $0x10] sm:$0xff]  ;;  %v396_v25 = vand.u32 7, %v4692_v20  ;;  %v397_v26 = vand.u32 7, %v4695_v21  ;;  %s5211_s16 = scalar_lea.vmem %s5378_s6, %s4661_s22  ;;  %s5320_s21 = scalar_lea.vmem %s5379_s7, %s4661_s22 }
  0x18   : > { %407 = vst [vmem:[#allocation2 + $0x38] sm:$0xff] %v4575_v0  ;;  %v412_v13 = vld [vmem:[%s4670_s25] sm:$0xff]  ;;  %v417_v15 = vld [vmem:[%s4670_s25 + $0x28] sm:$0xff]  ;;  %v418_v16 = vld [vmem:[%s4670_s25 + $0x30] sm:$0xff]  ;;  %v393_v27 = vand.u32 7, %v4699_v22  ;;  %v4752_v54 = vadd.s32 16, %v4683_v14  ;;  %s5354_s28 = scalar_lea.vmem %s5380_s8, %s4661_s22 }
  0x19   : > { %408 = vst [vmem:[#allocation2 + $0x40] sm:$0xff] %v4575_v0  ;;  %v413_v18 = vld [vmem:[%s4670_s25 + $0x8] sm:$0xff]  ;;  %v473_v30 = vadd.s32 4294967295, %v396_v25  ;;  %v474_v31 = vadd.s32 4294967295, %v397_v26  ;;  %v4217_v34 = vld [vmem:[#allocation4] sm:$0xff]  ;;  %v4248_v42 = vld [vmem:[#allocation4 + $0xf8] sm:$0xff] }
  0x1a   : > { %409 = vst [vmem:[#allocation2 + $0x48] sm:$0xff] %v4575_v0  ;;  %4363 = vmatpush.bf16.msra.mxu2 %v4230_v5  ;;  %656 = vmatpush.bf16.msra.mxu0 %v4230_v5  ;;  %v4218_v29 = vld [vmem:[#allocation4 + $0x8] sm:$0xff]  ;;  %v4711_v32 = vadd.s32 4294967295, %v393_v27  ;;  %v4256_v48 = vld [vmem:[#allocation4 + $0x138] sm:$0xff]  ;;  %v4239_v52 = vld [vmem:[#allocation4 + $0xb0] sm:$0xff]  ;;  %v4755_v55 = vadd.s32 24, %v4683_v14 }
  0x1b   : > { %410 = vst [vmem:[#allocation2 + $0x50] sm:$0xff] %v4575_v0  ;;  %4371 = vmatpush.bf16.msra.mxu3 %v4222_v6  ;;  %733 = vmatpush.bf16.msra.mxu1 %v4222_v6  ;;  %vm481_vm1 = vcmp.ge.s32.totalorder %v473_v30, 0  ;;  %vm482_vm2 = vcmp.ge.s32.totalorder %v474_v31, 0  ;;  %v4264_v49 = vld [vmem:[#allocation4 + $0x178] sm:$0xff]  ;;  %v4247_v53 = vld [vmem:[#allocation4 + $0xf0] sm:$0xff]  ;;  %v398_v57 = vand.u32 7, %v4746_v50 }
  0x1c   : > { %1896 = vst [vmem:[#allocation3 + $0x50] sm:$0xff] %v4575_v0  ;;  %vm478_vm3 = vcmp.ge.s32.totalorder %v4711_v32, 0  ;;  %vm4734_vm4 = vmpackc.low %vm482_vm2, %vm481_vm1  ;;  %v4255_v56 = vld [vmem:[#allocation4 + $0x130] sm:$0xff]  ;;  %v399_v58 = vand.u32 7, %v4749_v51  ;;  %v4238_v60 = vld [vmem:[#allocation4 + $0xa8] sm:$0xff]  ;;  %v394_v62 = vand.u32 7, %v4752_v54 }
  0x1d   : > { %424 = vst.msk [vmem:[#allocation2 + $0x28] sm:$0xff] %vm420_vm0, %v415_v7  ;;  %vm3595_vm6 = vmpackc.low %vm478_vm3, %vm4576_vm5  ;;  %v4263_v59 = vld [vmem:[#allocation4 + $0x170] sm:$0xff]  ;;  %v4246_v61 = vld [vmem:[#allocation4 + $0xe8] sm:$0xff]  ;;  %v395_v63 = vand.u32 7, %v4755_v55  ;;  %v4767_v2 = vadd.s32 4294967295, %v398_v57 }
  0x1e   : > { %425 = vst.msk [vmem:[#allocation2 + $0x30] sm:$0xff] %vm420_vm0, %v416_v9  ;;  %4364 = vmatpush.bf16.msra.mxu2 %v4229_v11  ;;  %657 = vmatpush.bf16.msra.mxu0 %v4229_v11  ;;  %v4254_v1 = vld [vmem:[#allocation4 + $0x128] sm:$0xff]  ;;  %v476_v3 = vadd.s32 4294967295, %v399_v58  ;;  %v4237_v5 = vld [vmem:[#allocation4 + $0xa0] sm:$0xff]  ;;  %v471_v7 = vadd.s32 4294967295, %v394_v62  ;;  %v4287_v32 = vld [vmem:[#allocation4 + $0x230] sm:$0xff] }
  0x1f   : > { %423 = vst.msk [vmem:[#allocation2 + $0x20] sm:$0xff] %vm420_vm0, %v414_v10  ;;  %4372 = vmatpush.bf16.msra.mxu3 %v4221_v12  ;;  %734 = vmatpush.bf16.msra.mxu1 %v4221_v12  ;;  %v4262_v4 = vld [vmem:[#allocation4 + $0x168] sm:$0xff]  ;;  %v4245_v6 = vld [vmem:[#allocation4 + $0xe0] sm:$0xff]  ;;  %v472_v8 = vadd.s32 4294967295, %v395_v63  ;;  %vm483_vm7 = vcmp.ge.s32.totalorder %v4767_v2, 0 }
  0x20   : > { %421 = vst.msk [vmem:[#allocation2 + $0x10] sm:$0xff] %vm420_vm0, %v412_v13  ;;  %v4253_v9 = vld [vmem:[#allocation4 + $0x120] sm:$0xff]  ;;  %vm484_vm8 = vcmp.ge.s32.totalorder %v476_v3, 0  ;;  %vm479_vm9 = vcmp.ge.s32.totalorder %v471_v7, 0 }
  0x21   : > { %426 = vst.msk [vmem:[#allocation2 + $0x38] sm:$0xff] %vm420_vm0, %v417_v15  ;;  %vm480_vm10 = vcmp.ge.s32.totalorder %v472_v8, 0  ;;  %vm4807_vm11 = vmpackc.low %vm484_vm8, %vm483_vm7  ;;  %v4249_v7 = vld [vmem:[#allocation4 + $0x100] sm:$0xff] }
  0x22   : > { %427 = vst.msk [vmem:[#allocation2 + $0x40] sm:$0xff] %vm420_vm0, %v418_v16  ;;  %4365 = vmatpush.bf16.msra.mxu2 %v4228_v17  ;;  %658 = vmatpush.bf16.msra.mxu0 %v4228_v17  ;;  %vm4819_vm12 = vmpackc.low %vm480_vm10, %vm479_vm9  ;;  %v4257_v22 = vld [vmem:[#allocation4 + $0x140] sm:$0xff] }
  0x23   : > { %422 = vst.msk [vmem:[#allocation2 + $0x18] sm:$0xff] %vm420_vm0, %v413_v18  ;;  %4373 = vmatpush.bf16.msra.mxu3 %v4220_v19  ;;  %735 = vmatpush.bf16.msra.mxu1 %v4220_v19  ;;  %v4261_v19 = vld [vmem:[#allocation4 + $0x160] sm:$0xff] }
  0x24   : > { %v4713_v35 = vld [vmem:[#allocation2 + $0x28] sm:$0xff] }
  0x25   : > { %v4715_v36 = vld [vmem:[#allocation2 + $0x30] sm:$0xff] }
  0x26   : > { %4366 = vmatpush.bf16.msra.mxu2 %v4227_v23  ;;  %659 = vmatpush.bf16.msra.mxu0 %v4227_v23  ;;  %v4717_v37 = vld [vmem:[#allocation2 + $0x27] sm:$0xff]  ;;  %v4719_v38 = vld [vmem:[#allocation2 + $0x2f] sm:$0xff]  ;;  %v4728_v43 = vpack.c.bf16 %v4715_v36, %v4713_v35  ;;  %v4236_v23 = vld [vmem:[#allocation4 + $0x98] sm:$0xff] }
  0x27   : > { %4374 = vmatpush.bf16.msra.mxu3 %v4219_v24  ;;  %736 = vmatpush.bf16.msra.mxu1 %v4219_v24  ;;  %v4721_v39 = vld [vmem:[#allocation2 + $0x10] sm:$0xff]  ;;  %v4732_v44 = vpack.c.bf16 %v4719_v38, %v4717_v37  ;;  %v4779_v12 = vld [vmem:[#allocation2 + $0x20] sm:$0xff]  ;;  %v4244_v24 = vld [vmem:[#allocation4 + $0xd8] sm:$0xff] }
  0x28   : > { %v4723_v40 = vld [vmem:[#allocation2 + $0xf] sm:$0xff]  ;;  %v585_v46 = vpack.c.bf16 %v4721_v39, %v4575_v0  ;;  %v4775_v10 = vld [vmem:[#allocation2 + $0x38] sm:$0xff] }
  0x29   : > { %v3596_v47 = vpack.c.bf16 %v4723_v40, %v4575_v0  ;;  %v4777_v11 = vld [vmem:[#allocation2 + $0x37] sm:$0xff]  ;;  %v4781_v13 = vld [vmem:[#allocation2 + $0x40] sm:$0xff] }
  0x2a   : > { %4367 = vmatpush.bf16.msra.mxu2 %v4226_v28  ;;  %660 = vmatpush.bf16.msra.mxu0 %v4226_v28  ;;  %v4783_v15 = vld [vmem:[#allocation2 + $0x3f] sm:$0xff]  ;;  %v4788_v17 = vld [vmem:[#allocation2 + $0x17] sm:$0xff]  ;;  %v772_v28 = vadd.s32 1, %v396_v25  ;;  %v4798_v30 = vpack.c.bf16 %v4781_v13, %v4775_v10 }
  0x2b   : > { %4375 = vmatpush.bf16.msra.mxu3 %v4218_v29  ;;  %737 = vmatpush.bf16.msra.mxu1 %v4218_v29  ;;  %v4785_v16 = vld [vmem:[#allocation2 + $0x18] sm:$0xff]  ;;  %v773_v29 = vadd.s32 1, %v397_v26  ;;  %v4802_v31 = vpack.c.bf16 %v4783_v15, %v4777_v11 }
  0x2c   : > { %v4790_v18 = vld [vmem:[#allocation2 + $0x1f] sm:$0xff]  ;;  %v4813_v20 = vpack.c.bf16 %v4779_v12, %v4785_v16  ;;  %vm796_vm13 = vcmp.lt.s32.totalorder %v772_v28, 8  ;;  %v4271_v28 = vld [vmem:[#allocation4 + $0x1b0] sm:$0xff] }
  0x2d   : > { %v4817_v21 = vpack.c.bf16 %v4790_v18, %v4788_v17  ;;  %v4252_v26 = vld [vmem:[#allocation4 + $0x118] sm:$0xff]  ;;  %vm797_vm14 = vcmp.lt.s32.totalorder %v773_v29, 8  ;;  %v4279_v29 = vld [vmem:[#allocation4 + $0x1f0] sm:$0xff]  ;;  %v3687_v54 = vpack.c.bf16 %v4717_v37, %v4790_v18  ;;  %v4266_v37 = vld [vmem:[#allocation4 + $0x188] sm:$0xff] }
  0x2e   : > { %4368 = vmatpush.bf16.msra.mxu2 %v4225_v33  ;;  %661 = vmatpush.bf16.msra.mxu0 %v4225_v33  ;;  %vm4833_vm15 = vmpackc.low %vm797_vm14, %vm796_vm13  ;;  %v1223_v8 = vld [vmem:[#allocation2 + $0x19] sm:$0xff]  ;;  %v4283_v18 = vld [vmem:[#allocation4 + $0x210] sm:$0xff] }
  0x2f   : > { %4376 = vmatpush.bf16.msra.mxu3 %v4217_v34  ;;  %738 = vmatpush.bf16.msra.mxu1 %v4217_v34  ;;  %v4260_v34 = vld [vmem:[#allocation4 + $0x158] sm:$0xff] }
  0x31   : > { %672 = vmatmul.bf16.vlgmr.msra.gmra.mxu2 %v4728_v43  ;;  %662 = vmatmul.bf16.vlgmr.msra.gmra.mxu0 %v585_v46  ;;  %v4251_v46 = vld [vmem:[#allocation4 + $0x110] sm:$0xff] }
  0x32   : > { %885 = vmatpush.bf16.msrb.mxu2 %v4240_v41  ;;  %3603 = vmatmul.msk.bf16.vlgmr.msra.gmra.mxu3 %vm4734_vm4, %v4732_v44  ;;  %v4235_v41 = vld [vmem:[#allocation4 + $0x90] sm:$0xff] }
  0x33   : > { %1047 = vmatpush.bf16.msrb.mxu3 %v4248_v42  ;;  %3597 = vmatmul.msk.bf16.vlgmr.msra.gmra.mxu1 %vm3595_vm6, %v3596_v47  ;;  %v4243_v42 = vld [vmem:[#allocation4 + $0xd0] sm:$0xff]  ;;  %v392_v47 = vand.u32 7, %v4683_v14  ;;  %v4233_v14 = vld [vmem:[#allocation4 + $0x80] sm:$0xff] }
  0x34   : > { %1185 = vmatpush.bf16.msrb.mxu0 %v4256_v48  ;;  %1323 = vmatpush.bf16.msrb.mxu1 %v4264_v49  ;;  %v4259_v48 = vld [vmem:[#allocation4 + $0x150] sm:$0xff]  ;;  %v4234_v49 = vld [vmem:[#allocation4 + $0x88] sm:$0xff] }
  0x35   : > { %v768_v3 = vadd.s32 1, %v392_v47 }
  0x36   : > { %886 = vmatpush.bf16.msrb.mxu2 %v4239_v52  ;;  %v4242_v52 = vld [vmem:[#allocation4 + $0xc8] sm:$0xff] }
  0x37   : > { %1048 = vmatpush.bf16.msrb.mxu3 %v4247_v53  ;;  %vm792_vm6 = vcmp.lt.s32.totalorder %v768_v3, 8  ;;  %v4273_v3 = vld [vmem:[#allocation4 + $0x1c0] sm:$0xff] }
  0x38   : > { %1186 = vmatpush.bf16.msrb.mxu0 %v4255_v56  ;;  %1324 = vmatpush.bf16.msrb.mxu1 %v4263_v59  ;;  %v769_v56 = vadd.s32 1, %v393_v27  ;;  %v4250_v59 = vld [vmem:[#allocation4 + $0x108] sm:$0xff]  ;;  %v4288_v27 = vld [vmem:[#allocation4 + $0x238] sm:$0xff] }
  0x3a   : > { %887 = vmatpush.bf16.msrb.mxu2 %v4238_v60  ;;  %v469_v60 = vadd.s32 4294967295, %v392_v47  ;;  %vm793_vm1 = vcmp.lt.s32.totalorder %v769_v56, 8  ;;  %v4285_v47 = vld [vmem:[#allocation4 + $0x220] sm:$0xff]  ;;  %v1225_v56 = vld [vmem:[#allocation2 + $0x29] sm:$0xff] }
  0x3b   : > { %1049 = vmatpush.bf16.msrb.mxu3 %v4246_v61  ;;  %v4258_v61 = vld [vmem:[#allocation4 + $0x148] sm:$0xff]  ;;  %vm3639_vm8 = vmpackc.low %vm793_vm1, %vm4576_vm5 }
  0x3c   : > { %1187 = vmatpush.bf16.msrb.mxu0 %v4254_v1  ;;  %1325 = vmatpush.bf16.msrb.mxu1 %v4262_v4  ;;  %v4241_v1 = vld [vmem:[#allocation4 + $0xc0] sm:$0xff]  ;;  %v4272_v4 = vld [vmem:[#allocation4 + $0x1b8] sm:$0xff]  ;;  %vm477_vm2 = vcmp.ge.s32.totalorder %v469_v60, 0  ;;  %vm4853_vm10 = vmpackc.low %vm793_vm1, %vm792_vm6 }
  0x3d   : > { %vm4846_vm9 = vmpackc.low %vm478_vm3, %vm477_vm2 }
  0x3e   : > { %888 = vmatpush.bf16.msrb.mxu2 %v4237_v5  ;;  %v4280_v5 = vld [vmem:[#allocation4 + $0x1f8] sm:$0xff] }
  0x3f   : > { %1050 = vmatpush.bf16.msrb.mxu3 %v4245_v6  ;;  %v761_v6 = vld [vmem:[#allocation2 + $0x11] sm:$0xff] }
  0x40   : > { %1188 = vmatpush.bf16.msrb.mxu0 %v4253_v9  ;;  %1326 = vmatpush.bf16.msrb.mxu1 %v4261_v19  ;;  %v3640_v9 = vpack.c.bf16 %v761_v6, %v4575_v0  ;;  %v3684_v19 = vpack.c.bf16 %v4788_v17, %v4723_v40  ;;  %v3760_v0 = vpack.c.bf16 %v1223_v8, %v761_v6  ;;  %v4286_v17 = vld [vmem:[#allocation4 + $0x228] sm:$0xff]  ;;  %v1227_v6 = vld [vmem:[#allocation2 + $0x39] sm:$0xff] }
  0x41   : > { %677 = vmatmul.bf16.gmra.mxu2 %v4798_v30  ;;  %667 = vmatmul.bf16.gmra.mxu0 %v4813_v20 }
  0x42   : > { %889 = vmatpush.bf16.msrb.mxu2 %v4236_v23  ;;  %3606 = vmatmul.msk.bf16.gmra.mxu3 %vm4807_vm11, %v4802_v31 }
  0x43   : > { %1051 = vmatpush.bf16.msrb.mxu3 %v4244_v24  ;;  %3600 = vmatmul.msk.bf16.gmra.mxu1 %vm4819_vm12, %v4817_v21  ;;  %v1116_v24 = vpack.c.bf16 %v4785_v16, %v4721_v39  ;;  %v4270_v39 = vld [vmem:[#allocation4 + $0x1a8] sm:$0xff] }
  0x44   : > { %1189 = vmatpush.bf16.msrb.mxu0 %v4252_v26  ;;  %1327 = vmatpush.bf16.msrb.mxu1 %v4260_v34  ;;  %v4278_v16 = vld [vmem:[#allocation4 + $0x1e8] sm:$0xff]  ;;  %v419_v26 = vld [vmem:[%s4670_s25 + $0x38] sm:$0xff]  ;;  %v4269_v34 = vld [vmem:[#allocation4 + $0x1a0] sm:$0xff] }
  0x45   : > { %428 = vst.msk [vmem:[#allocation2 + $0x48] sm:$0xff] %vm420_vm0, %v419_v26 }
  0x46   : > { %890 = vmatpush.bf16.msrb.mxu2 %v4235_v41  ;;  %v770_v41 = vadd.s32 1, %v394_v62  ;;  %v1117_v62 = vpack.c.bf16 %v4713_v35, %v4779_v12  ;;  %v4274_v35 = vld [vmem:[#allocation4 + $0x1c8] sm:$0xff] }
  0x47   : > { %1052 = vmatpush.bf16.msrb.mxu3 %v4243_v42  ;;  %v771_v42 = vadd.s32 1, %v395_v63  ;;  %v4267_v63 = vld [vmem:[#allocation4 + $0x190] sm:$0xff]  ;;  %v4282_v12 = vld [vmem:[#allocation4 + $0x208] sm:$0xff] }
  0x48   : > { %1190 = vmatpush.bf16.msrb.mxu0 %v4251_v46  ;;  %1328 = vmatpush.bf16.msrb.mxu1 %v4259_v48  ;;  %v4277_v46 = vld [vmem:[#allocation4 + $0x1e0] sm:$0xff]  ;;  %vm794_vm3 = vcmp.lt.s32.totalorder %v770_v41, 8 }
  0x49   : > { %v763_v48 = vld [vmem:[#allocation2 + $0x21] sm:$0xff]  ;;  %vm795_vm13 = vcmp.lt.s32.totalorder %v771_v42, 8 }
  0x4a   : > { %891 = vmatpush.bf16.msrb.mxu2 %v4234_v49  ;;  %v4268_v49 = vld [vmem:[#allocation4 + $0x198] sm:$0xff]  ;;  %v3643_v60 = vpack.c.bf16 %v763_v48, %v1223_v8  ;;  %vm4869_vm0 = vmpackc.low %vm795_vm13, %vm794_vm3 }
  0x4b   : > { %1053 = vmatpush.bf16.msrb.mxu3 %v4242_v52  ;;  %v4276_v52 = vld [vmem:[#allocation4 + $0x1d8] sm:$0xff] }
  0x4c   : > { %1191 = vmatpush.bf16.msrb.mxu0 %v4250_v59  ;;  %1329 = vmatpush.bf16.msrb.mxu1 %v4258_v61  ;;  %v4284_v59 = vld [vmem:[#allocation4 + $0x218] sm:$0xff]  ;;  %v3763_v61 = vpack.c.bf16 %v1225_v56, %v763_v48 }
  0x4e   : > { %892 = vmatpush.bf16.msrb.mxu2 %v4233_v14  ;;  %v4275_v14 = vld [vmem:[#allocation4 + $0x1d0] sm:$0xff] }
  0x4f   : > { %1054 = vmatpush.bf16.msrb.mxu3 %v4241_v1  ;;  %v4265_v1 = vld [vmem:[#allocation4 + $0x180] sm:$0xff] }
  0x50   : > { %1192 = vmatpush.bf16.msrb.mxu0 %v4249_v7  ;;  %1330 = vmatpush.bf16.msrb.mxu1 %v4257_v22  ;;  %v3690_v22 = vpack.c.bf16 %v4777_v11, %v4719_v38  ;;  %v775_v38 = vadd.s32 1, %v399_v58  ;;  %v767_v11 = vld [vmem:[#allocation2 + $0x41] sm:$0xff] }
  0x51   : > { %3641 = vmatmul.msk.bf16.vlgmr.msrb.gmra.mxu2 %vm3639_vm8, %v3640_v9  ;;  %v774_v9 = vadd.s32 1, %v398_v57 }
  0x52   : > { %1489 = vmatpush.bf16.msra.mxu2 %v4272_v4  ;;  %3685 = vmatmul.msk.bf16.vlgmr.msrb.gmra.mxu3 %vm4846_vm9, %v3684_v19  ;;  %v4281_v4 = vld [vmem:[#allocation4 + $0x200] sm:$0xff]  ;;  %vm799_vm1 = vcmp.lt.s32.totalorder %v775_v38, 8 }
  0x53   : > { %1627 = vmatpush.bf16.msra.mxu3 %v4280_v5  ;;  %1193 = vmatmul.bf16.vlgmr.msrb.gmra.mxu0 %v1116_v24  ;;  %v765_v5 = vld [vmem:[#allocation2 + $0x31] sm:$0xff]  ;;  %v929_v19 = vld [vmem:[#allocation2 + $0x47] sm:$0xff]  ;;  %vm798_vm14 = vcmp.lt.s32.totalorder %v774_v9, 8  ;;  %v3649_v24 = vpack.c.bf16 %v767_v11, %v1227_v6 }
  0x54   : > { %1765 = vmatpush.bf16.msra.mxu0 %v4288_v27  ;;  %3761 = vmatmul.msk.bf16.vlgmr.msrb.gmra.mxu1 %vm4853_vm10, %v3760_v0  ;;  %v3646_v7 = vpack.c.bf16 %v765_v5, %v1225_v56  ;;  %v1118_v27 = vpack.c.bf16 %v4775_v10, %v4715_v36  ;;  %v3766_v8 = vpack.c.bf16 %v1227_v6, %v765_v5  ;;  %v1091_v36 = vld [vmem:[#allocation2 + $0x48] sm:$0xff]  ;;  %vm4897_vm2 = vmpackc.low %vm799_vm1, %vm798_vm14  ;;  %v4303_v5 = vld [vmem:[#allocation6 + $0x70] sm:$0xff] }
  0x55   : > { %v1229_v10 = vld [vmem:[#allocation2 + $0x49] sm:$0xff]  ;;  %v1119_v50 = vpack.c.bf16 %v1091_v36, %v4781_v13 }
  0x56   : > { %1490 = vmatpush.bf16.msra.mxu2 %v4271_v28  ;;  %v3693_v28 = vpack.c.bf16 %v929_v19, %v4783_v15  ;;  %v3769_v57 = vpack.c.bf16 %v1229_v10, %v767_v11  ;;  %v3889_v45 = vpack.c.bf16 0.0, %v1229_v10  ;;  %v4301_v10 = vld [vmem:[#allocation6 + $0x60] sm:$0xff] }
  0x57   : > { %1628 = vmatpush.bf16.msra.mxu3 %v4279_v29 }
  0x58   : > { %1766 = vmatpush.bf16.msra.mxu0 %v4287_v32 }
  0x5a   : > { %1491 = vmatpush.bf16.msra.mxu2 %v4270_v39 }
  0x5b   : > { %1629 = vmatpush.bf16.msra.mxu3 %v4278_v16 }
  0x5c   : > { %1767 = vmatpush.bf16.msra.mxu0 %v4286_v17 }
  0x5e   : > { %1492 = vmatpush.bf16.msra.mxu2 %v4269_v34 }
  0x5f   : > { %1630 = vmatpush.bf16.msra.mxu3 %v4277_v46 }
  0x60   : > { %1768 = vmatpush.bf16.msra.mxu0 %v4285_v47 }
  0x61   : > { %3644 = vmatmul.msk.bf16.gmra.mxu2 %vm4869_vm0, %v3643_v60 }
  0x62   : > { %1493 = vmatpush.bf16.msra.mxu2 %v4268_v49  ;;  %3688 = vmatmul.msk.bf16.gmra.mxu3 %vm4819_vm12, %v3687_v54 }
  0x63   : > { %1631 = vmatpush.bf16.msra.mxu3 %v4276_v52  ;;  %1198 = vmatmul.bf16.gmra.mxu0 %v1117_v62 }
  0x64   : > { %1769 = vmatpush.bf16.msra.mxu0 %v4284_v59  ;;  %3764 = vmatmul.msk.bf16.gmra.mxu1 %vm4869_vm0, %v3763_v61  ;;  %v4296_v59 = vld [vmem:[#allocation6 + $0x38] sm:$0xff]  ;;  %v4295_v61 = vld [vmem:[#allocation6 + $0x30] sm:$0xff] }
  0x65   : > { %2002 = vmatpush.bf16.msra.mxu1 %v4296_v59  ;;  %v4299_v59 = vld [vmem:[#allocation6 + $0x50] sm:$0xff] }
  0x66   : > { %1494 = vmatpush.bf16.msra.mxu2 %v4267_v63 }
  0x67   : > { %1632 = vmatpush.bf16.msra.mxu3 %v4275_v14 }
  0x68   : > { %1770 = vmatpush.bf16.msra.mxu0 %v4283_v18 }
  0x69   : > { %2003 = vmatpush.bf16.msra.mxu1 %v4295_v61  ;;  %v4325_v61 = vld [vmem:[#allocation6 + $0x120] sm:$0xff] }
  0x6a   : > { %1495 = vmatpush.bf16.msra.mxu2 %v4266_v37 }
  0x6b   : > { %1633 = vmatpush.bf16.msra.mxu3 %v4274_v35 }
  0x6c   : > { %1771 = vmatpush.bf16.msra.mxu0 %v4282_v12  ;;  %v4304_v12 = vld [vmem:[#allocation6 + $0x78] sm:$0xff] }
  0x6e   : > { %1496 = vmatpush.bf16.msra.mxu2 %v4265_v1 }
  0x6f   : > { %1634 = vmatpush.bf16.msra.mxu3 %v4273_v3 }
  0x70   : > { %1772 = vmatpush.bf16.msra.mxu0 %v4281_v4 }
  0x71   : > { %3647 = vmatmul.msk.bf16.gmra.mxu2 %vm4833_vm15, %v3646_v7 }
  0x72   : > { %3691 = vmatmul.msk.bf16.gmra.mxu3 %vm4734_vm4, %v3690_v22  ;;  %v4302_v22 = vld [vmem:[#allocation6 + $0x68] sm:$0xff] }
  0x73   : > { %1203 = vmatmul.bf16.gmra.mxu0 %v1118_v27  ;;  %2318 = vmatpush.bf16.msrb.mxu3 %v4304_v12  ;;  %v4328_v27 = vld [vmem:[#allocation6 + $0x138] sm:$0xff] }
  0x74   : > { %3767 = vmatmul.msk.bf16.gmra.mxu1 %vm4833_vm15, %v3766_v8  ;;  %2562 = vmatpush.bf16.msrb.mxu0 %v4328_v27 }
  0x77   : > { %2319 = vmatpush.bf16.msrb.mxu3 %v4303_v5 }
  0x7b   : > { %2320 = vmatpush.bf16.msrb.mxu3 %v4302_v22 }
  0x7f   : > { %2321 = vmatpush.bf16.msrb.mxu3 %v4301_v10 }
  0x81   : > { %3650 = vmatmul.msk.bf16.gmra.mxu2 %vm4897_vm2, %v3649_v24 }
  0x82   : > { %3694 = vmatmul.msk.bf16.gmra.mxu3 %vm4807_vm11, %v3693_v28  ;;  %vm4941_vm11 = vmpackc.low %vm4576_vm5, %vm798_vm14 }
  0x83   : > { %1208 = vmatmul.bf16.gmra.mxu0 %v1119_v50 }
  0x84   : > { %3770 = vmatmul.msk.bf16.gmra.mxu1 %vm4897_vm2, %v3769_v57  ;;  %v4292_v57 = vld [vmem:[#allocation6 + $0x18] sm:$0xff] }
  0x91   : > { %3805 = vmatmul.msk.bf16.vlgmr.msra.gmra.mxu2 %vm4846_vm9, %v4817_v21  ;;  %v1561_v21 = vpack.c.bf16 0.0, %v1091_v36  ;;  %v4293_v36 = vld [vmem:[#allocation6 + $0x20] sm:$0xff] }
  0x92   : > { %1635 = vmatmul.bf16.vlgmr.msra.gmra.mxu3 %v4813_v20  ;;  %v3813_v20 = vpack.c.bf16 0.0, %v929_v19 }
  0x93   : > { %3881 = vmatmul.msk.bf16.vlgmr.msra.gmra.mxu0 %vm4853_vm10, %v3643_v60 }
  0xa1   : > { %3808 = vmatmul.msk.bf16.gmra.mxu2 %vm4819_vm12, %v4732_v44 }
  0xa2   : > { %1640 = vmatmul.bf16.gmra.mxu3 %v4728_v43 }
  0xa3   : > { %3884 = vmatmul.msk.bf16.gmra.mxu0 %vm4869_vm0, %v3646_v7  ;;  %v4294_v7 = vld [vmem:[#allocation6 + $0x28] sm:$0xff] }
  0xa4   : > { %2004 = vmatpush.bf16.msra.mxu1 %v4294_v7  ;;  %v4290_v7 = vld [vmem:[#allocation6 + $0x8] sm:$0xff] }
  0xa8   : > { %2005 = vmatpush.bf16.msra.mxu1 %v4293_v36  ;;  %v5006_v36 = vld [vmem:[%s5374_s2] ss:$0 sm:$0xff] }
  0xac   : > { %2006 = vmatpush.bf16.msra.mxu1 %v4292_v57  ;;  %v4289_v57 = vld [vmem:[#allocation6] sm:$0xff] }
  0xae   : > { %v663_v51 = vpop.f32.mrf.mxu0 }
  0xb0   : > { %v740_v41 = vpop.f32.mrf.mxu1 }
  0xb1   : > { %3811 = vmatmul.msk.bf16.gmra.mxu2 %vm4734_vm4, %v4802_v31  ;;  %vm3812_vm4 = vmpackc.low %vm4576_vm5, %vm483_vm7  ;;  %v741_v38 = vadd.f32 %v740_v41, %v663_v51  ;;  %v4291_v41 = vld [vmem:[#allocation6 + $0x10] sm:$0xff] }
  0xb2   : > { %1645 = vmatmul.bf16.gmra.mxu3 %v4798_v30  ;;  %2007 = vmatpush.bf16.msra.mxu1 %v4291_v41 }
  0xb3   : > { %3887 = vmatmul.msk.bf16.gmra.mxu0 %vm4833_vm15, %v3649_v24  ;;  %v4327_v24 = vld [vmem:[#allocation6 + $0x130] sm:$0xff] }
  0xb4   : > { %v673_v58 = vpop.f32.mrf.mxu2  ;;  %2563 = vmatpush.bf16.msrb.mxu0 %v4327_v24 }
  0xb5   : > { %v750_v13 = vpop.f32.mrf.mxu3 }
  0xb6   : > { %v4926_v15 = vadd.f32 %v750_v13, %v673_v58  ;;  %v4928_v44 = vpop.f32.mrf.mxu0  ;;  %v4312_v58 = vld [vmem:[#allocation6 + $0xb8] sm:$0xff]  ;;  %2008 = vmatpush.bf16.msra.mxu1 %v4290_v7  ;;  %v4307_v7 = vld [vmem:[#allocation6 + $0x90] sm:$0xff] }
  0xb7   : > { %v4300_v13 = vld [vmem:[#allocation6 + $0x58] sm:$0xff]  ;;  %2241 = vmatpush.bf16.msrb.mxu2 %v4312_v58 }
  0xb8   : > { %v742_v52 = vpop.f32.mrf.mxu1  ;;  %2322 = vmatpush.bf16.msrb.mxu3 %v4300_v13 }
  0xba   : > { %2009 = vmatpush.bf16.msra.mxu1 %v4289_v57 }
  0xbc   : > { %v4930_v43 = vpop.f32.mrf.mxu2  ;;  %2323 = vmatpush.bf16.msrb.mxu3 %v4299_v59 }
  0xbd   : > { %v4932_v33 = vpop.f32.mrf.mxu3 }
  0xbe   : > { %v4937_v30 = vpop.f32.mrf.mxu0 }
  0xc0   : > { %v4971_v62 = vpop.f32.mrf.mxu1 }
  0xc1   : > { %3814 = vmatmul.msk.bf16.gmra.mxu2 %vm3812_vm4, %v3813_v20 }
  0xc2   : > { %1650 = vmatmul.bf16.gmra.mxu3 %v1561_v21  ;;  %v4326_v21 = vld [vmem:[#allocation6 + $0x128] sm:$0xff] }
  0xc3   : > { %3890 = vmatmul.msk.bf16.gmra.mxu0 %vm4941_vm11, %v3889_v45  ;;  %v743_v45 = vadd.f32 %v742_v52, %v4928_v44  ;;  %v4310_v44 = vld [vmem:[#allocation6 + $0xa8] sm:$0xff] }
  0xc4   : > { %v678_v25 = vpop.f32.mrf.mxu2  ;;  %2564 = vmatpush.bf16.msrb.mxu0 %v4326_v21  ;;  %v4298_v52 = vld [vmem:[#allocation6 + $0x48] sm:$0xff] }
  0xc5   : > { %v755_v23 = vpop.f32.mrf.mxu3  ;;  %2324 = vmatpush.bf16.msrb.mxu3 %v4298_v52 }
  0xc6   : > { %v4947_v0 = vadd.f32 %v755_v23, %v678_v25  ;;  %v4949_v2 = vpop.f32.mrf.mxu0 }
  0xc8   : > { %v4981_v35 = vpop.f32.mrf.mxu1  ;;  %2565 = vmatpush.bf16.msrb.mxu0 %v4325_v61 }
  0xc9   : > { %v748_v41 = vadd.f32 %v4981_v35, %v4949_v2 }
  0xcc   : > { %v4951_v32 = vpop.f32.mrf.mxu2 }
  0xcd   : > { %v4953_v39 = vpop.f32.mrf.mxu3 }
  0xd0   : > { %v1194_v16 = vpop.f32.mrf.mxu0 }
  0xd1   : > { %v1332_v6 = vpop.f32.mrf.mxu1 }
  0xd4   : > { %v894_v17 = vpop.f32.mrf.mxu2 }
  0xd5   : > { %v1056_v26 = vpop.f32.mrf.mxu3  ;;  %v914_v11 = vadd.f32 %v894_v17, %v741_v38  ;;  %v4324_v38 = vld [vmem:[#allocation6 + $0x118] sm:$0xff] }
  0xd6   : > { %2566 = vmatpush.bf16.msrb.mxu0 %v4324_v38 }
  0xd7   : > { %v1076_v28 = vadd.f32 %v1056_v26, %v914_v11  ;;  %v4311_v26 = vld [vmem:[#allocation6 + $0xb0] sm:$0xff] }
  0xd8   : > { %v4955_v34 = vpop.f32.mrf.mxu0  ;;  %2242 = vmatpush.bf16.msrb.mxu2 %v4311_v26 }
  0xd9   : > { %v1334_v50 = vpop.f32.mrf.mxu1  ;;  %v1214_v25 = vadd.f32 %v1194_v16, %v1076_v28  ;;  %v746_v16 = vadd.f32 %v4971_v62, %v4937_v30  ;;  %v4309_v28 = vld [vmem:[#allocation6 + $0xa0] sm:$0xff]  ;;  %v4323_v62 = vld [vmem:[#allocation6 + $0x110] sm:$0xff] }
  0xda   : > { %v4297_v30 = vld [vmem:[#allocation6 + $0x40] sm:$0xff]  ;;  %2567 = vmatpush.bf16.msrb.mxu0 %v4323_v62 }
  0xdb   : > { %v1352_v12 = vadd.f32 %v1332_v6, %v1214_v25  ;;  %2325 = vmatpush.bf16.msrb.mxu3 %v4297_v30  ;;  %v4308_v25 = vld [vmem:[#allocation6 + $0x98] sm:$0xff] }
  0xdc   : > { %v896_v42 = vpop.f32.mrf.mxu2  ;;  %2243 = vmatpush.bf16.msrb.mxu2 %v4310_v44  ;;  %v4321_v44 = vld [vmem:[#allocation6 + $0x100] sm:$0xff] }
  0xdd   : > { %v4957_v46 = vpop.f32.mrf.mxu3  ;;  %v915_v23 = vadd.f32 %v896_v42, %v743_v45 }
  0xdf   : > { %v1077_v5 = vadd.f32 %v4957_v46, %v915_v23 }
  0xe0   : > { %v4959_v47 = vpop.f32.mrf.mxu0  ;;  %2244 = vmatpush.bf16.msrb.mxu2 %v4309_v28 }
  0xe1   : > { %v1337_v42 = vpop.f32.mrf.mxu1  ;;  %v1215_v46 = vadd.f32 %v4955_v34, %v1077_v5  ;;  %v4322_v34 = vld [vmem:[#allocation6 + $0x108] sm:$0xff] }
  0xe2   : > { %2568 = vmatpush.bf16.msrb.mxu0 %v4322_v34 }
  0xe3   : > { %v1353_v13 = vadd.f32 %v1334_v50, %v1215_v46 }
  0xe4   : > { %v4961_v48 = vpop.f32.mrf.mxu2  ;;  %2245 = vmatpush.bf16.msrb.mxu2 %v4308_v25 }
  0xe5   : > { %v4963_v49 = vpop.f32.mrf.mxu3  ;;  %v916_v6 = vadd.f32 %v4961_v48, %v746_v16  ;;  %v4306_v16 = vld [vmem:[#allocation6 + $0x88] sm:$0xff] }
  0xe6   : > { %2569 = vmatpush.bf16.msrb.mxu0 %v4321_v44 }
  0xe7   : > { %v1078_v21 = vadd.f32 %v4963_v49, %v916_v6 }
  0xe8   : > { %v4965_v56 = vpop.f32.mrf.mxu0  ;;  %2246 = vmatpush.bf16.msrb.mxu2 %v4307_v7 }
  0xe9   : > { %v1339_v50 = vpop.f32.mrf.mxu1 }
  0xec   : > { %v4967_v60 = vpop.f32.mrf.mxu2  ;;  %2247 = vmatpush.bf16.msrb.mxu2 %v4306_v16 }
  0xed   : > { %v4969_v54 = vpop.f32.mrf.mxu3  ;;  %v917_v61 = vadd.f32 %v4967_v60, %v748_v41 }
  0xef   : > { %v1079_v2 = vadd.f32 %v4969_v54, %v917_v61  ;;  %v4305_v54 = vld [vmem:[#allocation6 + $0x80] sm:$0xff] }
  0xf0   : > { %v4973_v63 = vpop.f32.mrf.mxu0  ;;  %2248 = vmatpush.bf16.msrb.mxu2 %v4305_v54 }
  0xf1   : > { %v1342_v30 = vpop.f32.mrf.mxu1 }
  0xf4   : > { %v4975_v14 = vpop.f32.mrf.mxu2 }
  0xf5   : > { %v4977_v37 = vpop.f32.mrf.mxu3 }
  0xf8   : > { %v4979_v18 = vpop.f32.mrf.mxu0 }
  0xfc   : > { %v4983_v1 = vpop.f32.mrf.mxu2 }
  0xfd   : > { %v4985_v3 = vpop.f32.mrf.mxu3 }
 0x100   : > { %v4987_v4 = vpop.f32.mrf.mxu0 }
 0x104   : > { %v4989_v8 = vpop.f32.mrf.mxu2 }
 0x105   : > { %v4991_v9 = vpop.f32.mrf.mxu3 }
 0x108   : > { %v4993_v19 = vpop.f32.mrf.mxu0 }
 0x10c   : > { %v4995_v20 = vpop.f32.mrf.mxu2 }
 0x10d   : > { %v4997_v51 = vpop.f32.mrf.mxu3 }
 0x110   : > { %v1774_v17 = vpop.f32.mrf.mxu0 }
 0x114   : > { %v1498_v22 = vpop.f32.mrf.mxu2 }
 0x115   : > { %v1636_v27 = vpop.f32.mrf.mxu3  ;;  %v1518_v11 = vadd.f32 %v1498_v22, %v1352_v12 }
 0x117   : > { %v1656_v10 = vadd.f32 %v1636_v27, %v1518_v11 }
 0x118   : > { %v1776_v24 = vpop.f32.mrf.mxu0 }
 0x119   : > { %v1794_v58 = vadd.f32 %v1774_v17, %v1656_v10  ;;  %v1216_v17 = vadd.f32 %v4959_v47, %v1078_v21  ;;  %v918_v10 = vadd.f32 %v4975_v14, %v4926_v15 }
 0x11b   : > { %v1806_v45 = vadd.f32 %v5006_v36, %v1794_v58  ;;  %v1354_v27 = vadd.f32 %v1337_v42, %v1216_v17 }
 0x11c   : > { %v1500_v23 = vpop.f32.mrf.mxu2 }
 0x11d   : > { %v1638_v48 = vpop.f32.mrf.mxu3  ;;  %v1822_v26 = vmul.f32 0.044715, %v1806_v45  ;;  %v1519_v59 = vadd.f32 %v1500_v23, %v1353_v13  ;;  %v1080_v13 = vadd.f32 %v4977_v37, %v918_v10  ;;  %v1814_v17 = vmul.f32 0.5, %v1806_v45 }
 0x11f   : > { %v1830_v12 = vmul.f32 %v1822_v26, %v1806_v45  ;;  %v1657_v49 = vadd.f32 %v1638_v48, %v1519_v59  ;;  %v1218_v59 = vadd.f32 %v4973_v63, %v1080_v13 }
 0x120   : > { %v1779_v5 = vpop.f32.mrf.mxu0 }
 0x121   : > { %v1838_v52 = vmul.f32 %v1830_v12, %v1806_v45  ;;  %v1795_v22 = vadd.f32 %v1776_v24, %v1657_v49  ;;  %v1217_v24 = vadd.f32 %v4965_v56, %v1079_v2  ;;  %v753_v56 = vadd.f32 %v4932_v33, %v4930_v43  ;;  %v1344_v33 = vpop.f32.mrf.mxu1 }
 0x123   : > { %v1846_v35 = vadd.f32 %v1838_v52, %v1806_v45  ;;  %v1807_v38 = vadd.f32 %v5006_v36, %v1795_v22  ;;  %v1355_v21 = vadd.f32 %v1339_v50, %v1217_v24  ;;  %v919_v12 = vadd.f32 %v4983_v1, %v753_v56 }
 0x124   : > { %v1503_v47 = vpop.f32.mrf.mxu2  ;;  %v1356_v52 = vadd.f32 %v1342_v30, %v1218_v59 }
 0x125   : > { %v1641_v11 = vpop.f32.mrf.mxu3  ;;  %v1854_v60 = vmul.f32 0.7978846, %v1846_v35  ;;  %v1823_v46 = vmul.f32 0.044715, %v1807_v38  ;;  %v1520_v6 = vadd.f32 %v1503_v47, %v1354_v27  ;;  %v1081_v43 = vadd.f32 %v4985_v3, %v919_v12 }
 0x126   : > { %v920_v47 = vadd.f32 %v4989_v8, %v4947_v0 }
 0x127   : > { %4415 = vtanh.f32 %v1854_v60  ;;  %v1831_v28 = vmul.f32 %v1823_v46, %v1807_v38  ;;  %v1658_v42 = vadd.f32 %v1641_v11, %v1520_v6  ;;  %v1815_v11 = vmul.f32 0.5, %v1807_v38 }
 0x128   : > { %v1781_v57 = vpop.f32.mrf.mxu0  ;;  %v1219_v46 = vadd.f32 %v4979_v18, %v1081_v43 }
 0x129   : > { %v1839_v62 = vmul.f32 %v1831_v28, %v1807_v38  ;;  %v1796_v58 = vadd.f32 %v1779_v5, %v1658_v42  ;;  %v1082_v42 = vadd.f32 %v4991_v9, %v920_v47  ;;  %v758_v9 = vadd.f32 %v4953_v39, %v4951_v32  ;;  %v4335_v32 = vld [vmem:[#allocation6 + $0x170] sm:$0xff] }
 0x12a   : > { %v1357_v54 = vadd.f32 %v1344_v33, %v1219_v46  ;;  %v4333_v46 = vld [vmem:[#allocation6 + $0x160] sm:$0xff] }
 0x12b   : > { %v1847_v25 = vadd.f32 %v1839_v62, %v1807_v38  ;;  %v1808_v34 = vadd.f32 %v5006_v36, %v1796_v58  ;;  %v4320_v38 = vld [vmem:[#allocation6 + $0xf8] sm:$0xff] }
 0x12c   : > { %v1505_v23 = vpop.f32.mrf.mxu2  ;;  %v4336_v58 = vld [vmem:[#allocation6 + $0x178] sm:$0xff]  ;;  %2639 = vmatpush.bf16.msrb.mxu1 %v4320_v38 }
 0x12d   : > { %v1643_v48 = vpop.f32.mrf.mxu3  ;;  %v4416_v15 = vpop.eup %4415  ;;  %v1855_v14 = vmul.f32 0.7978846, %v1847_v25  ;;  %v1824_v41 = vmul.f32 0.044715, %v1808_v34  ;;  %v1521_v26 = vadd.f32 %v1505_v23, %v1355_v21  ;;  %v1816_v56 = vmul.f32 0.5, %v1808_v34  ;;  %2959 = vmatpush.bf16.msra.mxu3 %v4336_v58 }
 0x12e   : > { %v1870_v61 = vadd.f32 1.0, %v4416_v15  ;;  %v1347_v15 = vpop.f32.mrf.mxu1 }
 0x12f   : > { %4417 = vtanh.f32 %v1855_v14  ;;  %v1832_v37 = vmul.f32 %v1824_v41, %v1808_v34  ;;  %v1659_v50 = vadd.f32 %v1643_v48, %v1521_v26  ;;  %v1220_v48 = vadd.f32 %v4987_v4, %v1082_v42  ;;  %v4316_v42 = vld [vmem:[#allocation6 + $0xd8] sm:$0xff] }
 0x130   : > { %v1878_v49 = vmul.f32 %v1870_v61, %v1814_v17  ;;  %v1784_v44 = vpop.f32.mrf.mxu0  ;;  %v921_v41 = vadd.f32 %v4995_v20, %v758_v9  ;;  %v4319_v17 = vld [vmem:[#allocation6 + $0xf0] sm:$0xff] }
 0x131   : > { %v1840_v5 = vmul.f32 %v1832_v37, %v1808_v34  ;;  %v1797_v7 = vadd.f32 %v1781_v57, %v1659_v50  ;;  %2640 = vmatpush.bf16.msrb.mxu1 %v4319_v17  ;;  %2960 = vmatpush.bf16.msra.mxu3 %v4335_v32  ;;  %v1358_v4 = vadd.f32 %v1347_v15, %v1220_v48  ;;  %v4343_v15 = vld [vmem:[#allocation6 + $0x1b0] sm:$0xff] }
 0x132   : > { %1898 = vst [vmem:[#allocation3 + $0x10] sm:$0xff] %v1878_v49 }
 0x133   : > { %v1848_v22 = vadd.f32 %v1840_v5, %v1808_v34  ;;  %v5029_v27 = vadd.f32 %v5006_v36, %v1797_v7  ;;  %v1083_v34 = vadd.f32 %v4997_v51, %v921_v41  ;;  %v4318_v7 = vld [vmem:[#allocation6 + $0xe8] sm:$0xff] }
 0x134   : > { %v1508_v63 = vpop.f32.mrf.mxu2 }
 0x135   : > { %v1646_v45 = vpop.f32.mrf.mxu3  ;;  %v4418_v2 = vpop.eup %4417  ;;  %v1856_v1 = vmul.f32 0.7978846, %v1848_v22  ;;  %v1825_v35 = vmul.f32 0.044715, %v5029_v27  ;;  %v1522_v16 = vadd.f32 %v1508_v63, %v1356_v52  ;;  %v4352_v52 = vld [vmem:[#allocation6 + $0x1f8] sm:$0xff]  ;;  %2641 = vmatpush.bf16.msrb.mxu1 %v4318_v7 }
 0x136   : > { %v1871_v60 = vadd.f32 1.0, %v4418_v2  ;;  %3073 = vmatpush.bf16.msra.mxu0 %v4352_v52  ;;  %v1349_v47 = vpop.f32.mrf.mxu1 }
 0x137   : > { %4419 = vtanh.f32 %v1856_v1  ;;  %v1833_v3 = vmul.f32 %v1825_v35, %v5029_v27  ;;  %v1660_v6 = vadd.f32 %v1646_v45, %v1522_v16  ;;  %v1817_v45 = vmul.f32 0.5, %v5029_v27 }
 0x138   : > { %v1879_v10 = vmul.f32 %v1871_v60, %v1815_v11  ;;  %v1786_v18 = vpop.f32.mrf.mxu0  ;;  %v1221_v1 = vadd.f32 %v4993_v19, %v1083_v34  ;;  %v4317_v60 = vld [vmem:[#allocation6 + $0xe0] sm:$0xff]  ;;  %v4314_v34 = vld [vmem:[#allocation6 + $0xc8] sm:$0xff] }
 0x139   : > { %v1841_v24 = vmul.f32 %v1833_v3, %v5029_v27  ;;  %v1798_v28 = vadd.f32 %v1784_v44, %v1660_v6  ;;  %v4334_v44 = vld [vmem:[#allocation6 + $0x168] sm:$0xff]  ;;  %v4351_v3 = vld [vmem:[#allocation6 + $0x1f0] sm:$0xff]  ;;  %2642 = vmatpush.bf16.msrb.mxu1 %v4317_v60  ;;  %v4329_v60 = vld [vmem:[#allocation6 + $0x140] sm:$0xff] }
 0x13a   : > { %1899 = vst [vmem:[#allocation3 + $0x18] sm:$0xff] %v1879_v10  ;;  %v5038_v57 = vpack.c.bf16 %v1879_v10, %v1878_v49  ;;  %2961 = vmatpush.bf16.msra.mxu3 %v4334_v44  ;;  %3074 = vmatpush.bf16.msra.mxu0 %v4351_v3  ;;  %v4330_v44 = vld [vmem:[#allocation6 + $0x148] sm:$0xff]  ;;  %v4340_v3 = vld [vmem:[#allocation6 + $0x198] sm:$0xff] }
 0x13b   : > { %v1849_v0 = vadd.f32 %v1841_v24, %v5029_v27  ;;  %v5042_v8 = vadd.f32 %v5006_v36, %v1798_v28 }
 0x13c   : > { %v1510_v30 = vpop.f32.mrf.mxu2  ;;  %2010 = vmatmul.bf16.vlgmr.msra.gmra.mxu1 %v5038_v57  ;;  %2326 = vmatmul.bf16.vlgmr.msrb.gmra.mxu3 %v5038_v57 }
 0x13d   : > { %v1648_v62 = vpop.f32.mrf.mxu3  ;;  %v4420_v13 = vpop.eup %4419  ;;  %v1857_v21 = vmul.f32 0.7978846, %v1849_v0  ;;  %v1826_v25 = vmul.f32 0.044715, %v5042_v8  ;;  %v1523_v23 = vadd.f32 %v1510_v30, %v1357_v54  ;;  %v1359_v54 = vadd.f32 %v1349_v47, %v1221_v1  ;;  %v4344_v30 = vld [vmem:[#allocation6 + $0x1b8] sm:$0xff]  ;;  %2643 = vmatpush.bf16.msrb.mxu1 %v4316_v42  ;;  %v4347_v47 = vld [vmem:[#allocation6 + $0x1d0] sm:$0xff] }
 0x13e   : > { %v1872_v14 = vadd.f32 1.0, %v4420_v13  ;;  %2962 = vmatpush.bf16.msra.mxu3 %v4333_v46  ;;  %2882 = vmatpush.bf16.msra.mxu2 %v4344_v30  ;;  %v4346_v42 = vld [vmem:[#allocation6 + $0x1c8] sm:$0xff] }
 0x13f   : > { %4421 = vtanh.f32 %v1857_v21  ;;  %v1834_v26 = vmul.f32 %v1826_v25, %v5042_v8  ;;  %v1661_v59 = vadd.f32 %v1648_v62, %v1523_v23  ;;  %v4315_v21 = vld [vmem:[#allocation6 + $0xd0] sm:$0xff]  ;;  %v1818_v25 = vmul.f32 0.5, %v5042_v8 }
 0x140   : > { %v1880_v61 = vmul.f32 %v1872_v14, %v1816_v56  ;;  %v1789_v2 = vpop.f32.mrf.mxu0  ;;  %v4332_v56 = vld [vmem:[#allocation6 + $0x158] sm:$0xff]  ;;  %v4350_v14 = vld [vmem:[#allocation6 + $0x1e8] sm:$0xff] }
 0x141   : > { %v1842_v39 = vmul.f32 %v1834_v26, %v5042_v8  ;;  %v1799_v12 = vadd.f32 %v1786_v18, %v1661_v59  ;;  %v2148_v27 = vld [vmem:[#allocation3 + $0x11] sm:$0xff]  ;;  %3075 = vmatpush.bf16.msra.mxu0 %v4350_v14  ;;  %2644 = vmatpush.bf16.msrb.mxu1 %v4315_v21 }
 0x142   : > { %1900 = vst [vmem:[#allocation3 + $0x20] sm:$0xff] %v1880_v61  ;;  %v5053_v37 = vpack.c.bf16 %v1880_v61, %v1879_v10  ;;  %2963 = vmatpush.bf16.msra.mxu3 %v4332_v56  ;;  %2883 = vmatpush.bf16.msra.mxu2 %v4343_v15 }
 0x143   : > { %v1850_v20 = vadd.f32 %v1842_v39, %v5042_v8  ;;  %v5058_v50 = vadd.f32 %v5006_v36, %v1799_v12  ;;  %v4349_v12 = vld [vmem:[#allocation6 + $0x1e0] sm:$0xff] }
 0x144   : > { %v1513_v49 = vpop.f32.mrf.mxu2  ;;  %2570 = vmatmul.bf16.vlgmr.msrb.gmra.mxu0 %v5053_v37 }
 0x145   : > { %v1651_v5 = vpop.f32.mrf.mxu3  ;;  %v4422_v43 = vpop.eup %4421  ;;  %v1858_v33 = vmul.f32 0.7978846, %v1850_v20  ;;  %v1827_v22 = vmul.f32 0.044715, %v5058_v50  ;;  %v1524_v63 = vadd.f32 %v1513_v49, %v1358_v4  ;;  %v4342_v20 = vld [vmem:[#allocation6 + $0x1a8] sm:$0xff]  ;;  %3076 = vmatpush.bf16.msra.mxu0 %v4349_v12  ;;  %2645 = vmatpush.bf16.msrb.mxu1 %v4314_v34  ;;  %v4357_v34 = vld [vmem:[#allocation6 + $0x220] sm:$0xff] }
 0x146   : > { %v1873_v51 = vadd.f32 1.0, %v4422_v43  ;;  %2884 = vmatpush.bf16.msra.mxu2 %v4342_v20  ;;  %v4356_v20 = vld [vmem:[#allocation6 + $0x218] sm:$0xff] }
 0x147   : > { %4423 = vtanh.f32 %v1858_v33  ;;  %v1835_v35 = vmul.f32 %v1827_v22, %v5058_v50  ;;  %v1662_v16 = vadd.f32 %v1651_v5, %v1524_v63  ;;  %v4348_v22 = vld [vmem:[#allocation6 + $0x1d8] sm:$0xff]  ;;  %v1819_v63 = vmul.f32 0.5, %v5058_v50 }
 0x148   : > { %v1881_v11 = vmul.f32 %v1873_v51, %v1817_v45  ;;  %v1791_v17 = vpop.f32.mrf.mxu0  ;;  %v4341_v51 = vld [vmem:[#allocation6 + $0x1a0] sm:$0xff] }
 0x149   : > { %v1843_v6 = vmul.f32 %v1835_v35, %v5058_v50  ;;  %v1800_v10 = vadd.f32 %v1789_v2, %v1662_v16  ;;  %v5066_v24 = vld [vmem:[#allocation3 + $0x19] sm:$0xff]  ;;  %3077 = vmatpush.bf16.msra.mxu0 %v4348_v22 }
 0x14a   : > { %1901 = vst [vmem:[#allocation3 + $0x28] sm:$0xff] %v1881_v11  ;;  %v5069_v28 = vpack.c.bf16 %v5066_v24, %v2148_v27  ;;  %v5071_v19 = vpack.c.bf16 %v1881_v11, %v1880_v61  ;;  %v4331_v61 = vld [vmem:[#allocation6 + $0x150] sm:$0xff]  ;;  %v4313_v35 = vld [vmem:[#allocation6 + $0xc0] sm:$0xff]  ;;  %2885 = vmatpush.bf16.msra.mxu2 %v4341_v51  ;;  %v4360_v27 = vld [vmem:[#allocation6 + $0x238] sm:$0xff] }
 0x14b   : > { %v1851_v0 = vadd.f32 %v1843_v6, %v5058_v50  ;;  %v5075_v18 = vadd.f32 %v5006_v36, %v1800_v10  ;;  %2964 = vmatpush.bf16.msra.mxu3 %v4331_v61  ;;  %2646 = vmatpush.bf16.msrb.mxu1 %v4313_v35 }
 0x14c   : > { %v1515_v38 = vpop.f32.mrf.mxu2  ;;  %3957 = vmatmul.msk.bf16.vlgmr.msrb.gmra.mxu2 %vm4853_vm10, %v5069_v28  ;;  %2015 = vmatmul.bf16.gmra.mxu1 %v5071_v19 }
 0x14d   : > { %v4424_v62 = vpop.eup %4423  ;;  %v1859_v58 = vmul.f32 0.7978846, %v1851_v0  ;;  %v1828_v13 = vmul.f32 0.044715, %v5075_v18  ;;  %v1525_v9 = vadd.f32 %v1515_v38, %v1359_v54  ;;  %2331 = vmatmul.bf16.gmra.mxu3 %v5071_v19  ;;  %v1653_v48 = vpop.f32.mrf.mxu3  ;;  %3078 = vmatpush.bf16.msra.mxu0 %v4347_v47  ;;  %v1820_v54 = vmul.f32 0.5, %v5075_v18  ;;  %v4339_v38 = vld [vmem:[#allocation6 + $0x190] sm:$0xff] }
 0x14e   : > { %v1874_v23 = vadd.f32 1.0, %v4424_v62  ;;  %2886 = vmatpush.bf16.msra.mxu2 %v4340_v3 }
 0x14f   : > { %4425 = vtanh.f32 %v1859_v58  ;;  %v1836_v41 = vmul.f32 %v1828_v13, %v5075_v18  ;;  %v1663_v26 = vadd.f32 %v1653_v48, %v1525_v9  ;;  %2965 = vmatpush.bf16.msra.mxu3 %v4330_v44  ;;  %3203 = vmatpush.bf16.msra.mxu1 %v4360_v27  ;;  %v4345_v58 = vld [vmem:[#allocation6 + $0x1c0] sm:$0xff]  ;;  %v4338_v9 = vld [vmem:[#allocation6 + $0x188] sm:$0xff] }
 0x150   : > { %v1882_v59 = vmul.f32 %v1874_v23, %v1818_v25  ;;  %v4337_v48 = vld [vmem:[#allocation6 + $0x180] sm:$0xff] }
 0x151   : > { %v1844_v32 = vmul.f32 %v1836_v41, %v5075_v18  ;;  %v1801_v39 = vadd.f32 %v1791_v17, %v1663_v26  ;;  %v5086_v8 = vld [vmem:[#allocation3 + $0x21] sm:$0xff]  ;;  %3079 = vmatpush.bf16.msra.mxu0 %v4346_v42  ;;  %v4359_v26 = vld [vmem:[#allocation6 + $0x230] sm:$0xff] }
 0x152   : > { %1902 = vst [vmem:[#allocation3 + $0x30] sm:$0xff] %v1882_v59  ;;  %v5088_v4 = vpack.c.bf16 %v1882_v59, %v1881_v11  ;;  %v4204_v49 = vpack.c.bf16 %v5086_v8, %v5066_v24  ;;  %2887 = vmatpush.bf16.msra.mxu2 %v4339_v38 }
 0x153   : > { %v1852_v5 = vadd.f32 %v1844_v32, %v5075_v18  ;;  %v1813_v7 = vadd.f32 %v5006_v36, %v1801_v39  ;;  %2966 = vmatpush.bf16.msra.mxu3 %v4329_v60  ;;  %3204 = vmatpush.bf16.msra.mxu1 %v4359_v26 }
 0x154   : > { %2575 = vmatmul.bf16.gmra.mxu0 %v5088_v4 }
 0x155   : > { %v4426_v52 = vpop.eup %4425  ;;  %v1860_v43 = vmul.f32 0.7978846, %v1852_v5  ;;  %v1829_v33 = vmul.f32 0.044715, %v1813_v7  ;;  %3080 = vmatpush.bf16.msra.mxu0 %v4345_v58  ;;  %v1821_v25 = vmul.f32 0.5, %v1813_v7  ;;  %v4355_v5 = vld [vmem:[#allocation6 + $0x210] sm:$0xff] }
 0x156   : > { %v1875_v45 = vadd.f32 1.0, %v4426_v52  ;;  %2888 = vmatpush.bf16.msra.mxu2 %v4338_v9 }
 0x157   : > { %4427 = vtanh.f32 %v1860_v43  ;;  %v1837_v2 = vmul.f32 %v1829_v33, %v1813_v7 }
 0x158   : > { %v1883_v1 = vmul.f32 %v1875_v45, %v1819_v63 }
 0x159   : > { %v1845_v36 = vmul.f32 %v1837_v2, %v1813_v7  ;;  %v5096_v16 = vld [vmem:[#allocation3 + $0x29] sm:$0xff] }
 0x15a   : > { %1903 = vst [vmem:[#allocation3 + $0x38] sm:$0xff] %v1883_v1  ;;  %v5100_v11 = vpack.c.bf16 %v5096_v16, %v5086_v8  ;;  %v5102_v50 = vpack.c.bf16 %v1883_v1, %v1882_v59  ;;  %2889 = vmatpush.bf16.msra.mxu2 %v4337_v48  ;;  %v4358_v59 = vld [vmem:[#allocation6 + $0x228] sm:$0xff] }
 0x15b   : > { %v1853_v46 = vadd.f32 %v1845_v36, %v1813_v7  ;;  %3205 = vmatpush.bf16.msra.mxu1 %v4358_v59  ;;  %v4354_v7 = vld [vmem:[#allocation6 + $0x208] sm:$0xff] }
 0x15c   : > { %3960 = vmatmul.msk.bf16.gmra.mxu2 %vm4869_vm0, %v5100_v11  ;;  %2020 = vmatmul.bf16.gmra.mxu1 %v5102_v50 }
 0x15d   : > { %v4428_v6 = vpop.eup %4427  ;;  %v1861_v10 = vmul.f32 0.7978846, %v1853_v46  ;;  %2336 = vmatmul.bf16.gmra.mxu3 %v5102_v50 }
 0x15e   : > { %v1876_v0 = vadd.f32 1.0, %v4428_v6 }
 0x15f   : > { %4429 = vtanh.f32 %v1861_v10  ;;  %3206 = vmatpush.bf16.msra.mxu1 %v4357_v34 }
 0x160   : > { %v1884_v30 = vmul.f32 %v1876_v0, %v1820_v54 }
 0x161   : > { %v5110_v62 = vld [vmem:[#allocation3 + $0x31] sm:$0xff] }
 0x162   : > { %1904 = vst [vmem:[#allocation3 + $0x40] sm:$0xff] %v1884_v30  ;;  %v2495_v13 = vpack.c.bf16 %v1884_v30, %v1883_v1  ;;  %v4207_v21 = vpack.c.bf16 %v5110_v62, %v5096_v16 }
 0x163   : > { %3207 = vmatpush.bf16.msra.mxu1 %v4356_v20 }
 0x164   : > { %2580 = vmatmul.bf16.gmra.mxu0 %v2495_v13 }
 0x165   : > { %v4430_v18 = vpop.eup %4429 }
 0x166   : > { %v1877_v23 = vadd.f32 1.0, %v4430_v18 }
 0x167   : > { %3208 = vmatpush.bf16.msra.mxu1 %v4355_v5 }
 0x168   : > { %v1885_v15 = vmul.f32 %v1877_v23, %v1821_v25 }
 0x169   : > { %v5114_v56 = vld [vmem:[#allocation3 + $0x39] sm:$0xff] }
 0x16a   : > { %1905 = vst [vmem:[#allocation3 + $0x48] sm:$0xff] %v1885_v15  ;;  %v3962_v14 = vpack.c.bf16 %v5114_v56, %v5110_v62  ;;  %v1933_v41 = vpack.c.bf16 %v1885_v15, %v1884_v30  ;;  %v2496_v61 = vpack.c.bf16 0.0, %v1885_v15 }
 0x16b   : > { %3209 = vmatpush.bf16.msra.mxu1 %v4354_v7 }
 0x16c   : > { %3963 = vmatmul.msk.bf16.gmra.mxu2 %vm4833_vm15, %v3962_v14  ;;  %2025 = vmatmul.bf16.gmra.mxu1 %v1933_v41 }
 0x16d   : > { %2341 = vmatmul.bf16.gmra.mxu3 %v1933_v41 }
 0x171   : > { %v5120_v17 = vld [vmem:[#allocation3 + $0x41] sm:$0xff]  ;;  %v5124_v39 = vld [vmem:[#allocation3 + $0x49] sm:$0xff] }
 0x172   : > { %v4210_v32 = vpack.c.bf16 %v5120_v17, %v5114_v56  ;;  %v3965_v12 = vpack.c.bf16 %v5124_v39, %v5120_v17 }
 0x174   : > { %2585 = vmatmul.bf16.gmra.mxu0 %v2496_v61 }
 0x17c   : > { %3966 = vmatmul.msk.bf16.gmra.mxu2 %vm4897_vm2, %v3965_v12  ;;  %2647 = vmatmul.bf16.vlgmr.msrb.gmra.mxu1 %v5038_v57 }
 0x17d   : > { %2967 = vmatmul.bf16.vlgmr.msra.gmra.mxu3 %v5038_v57  ;;  %v4353_v57 = vld [vmem:[#allocation6 + $0x200] sm:$0xff] }
 0x17e   : > { %3210 = vmatpush.bf16.msra.mxu1 %v4353_v57 }
 0x184   : > { %3081 = vmatmul.bf16.vlgmr.msra.gmra.mxu0 %v5053_v37  ;;  %v5149_v37 = vld [vmem:[%s5376_s4] ss:$0 sm:$0xff] }
 0x18c   : > { %4097 = vmatmul.msk.bf16.vlgmr.msra.gmra.mxu2 %vm4853_vm10, %v5069_v28  ;;  %2652 = vmatmul.bf16.gmra.mxu1 %v5071_v19 }
 0x18d   : > { %2972 = vmatmul.bf16.gmra.mxu3 %v5071_v19 }
 0x194   : > { %3086 = vmatmul.bf16.gmra.mxu0 %v5088_v4 }
 0x19c   : > { %4100 = vmatmul.msk.bf16.gmra.mxu2 %vm4869_vm0, %v5100_v11  ;;  %2657 = vmatmul.bf16.gmra.mxu1 %v5102_v50 }
 0x19d   : > { %2977 = vmatmul.bf16.gmra.mxu3 %v5102_v50  ;;  %v5175_v50 = vld [vmem:[%s5376_s4] ss:$0 sm:$0xff] }
 0x1a4   : > { %3091 = vmatmul.bf16.gmra.mxu0 %v2495_v13 }
 0x1ac   : > { %4103 = vmatmul.msk.bf16.gmra.mxu2 %vm4833_vm15, %v3962_v14  ;;  %2662 = vmatmul.bf16.gmra.mxu1 %v1933_v41 }
 0x1ad   : > { %2982 = vmatmul.bf16.gmra.mxu3 %v1933_v41 }
 0x1b4   : > { %3096 = vmatmul.bf16.gmra.mxu0 %v2496_v61 }
 0x1b9   : > { %v2011_v28 = vpop.f32.mrf.mxu1 }
 0x1ba   : > { %v2012_v19 = vadd.f32 %v5149_v37, %v2011_v28 }
 0x1bc   : > { %4106 = vmatmul.msk.bf16.gmra.mxu2 %vm4897_vm2, %v3965_v12  ;;  %v2039_v4 = vmul.f32 0.044715, %v2012_v19  ;;  %4205 = vmatmul.msk.bf16.vlgmr.msra.gmra.mxu1 %vm4853_vm10, %v4204_v49  ;;  %v2031_v47 = vmul.f32 0.5, %v2012_v19 }
 0x1be   : > { %v2047_v44 = vmul.f32 %v2039_v4, %v2012_v19 }
 0x1bf   : > { %v2327_v43 = vpop.f32.mrf.mxu3 }
 0x1c0   : > { %v2055_v52 = vmul.f32 %v2047_v44, %v2012_v19 }
 0x1c1   : > { %v2013_v33 = vpop.f32.mrf.mxu1  ;;  %v5181_v15 = vpop.f32.mrf.mxu0 }
 0x1c2   : > { %v2063_v22 = vadd.f32 %v2055_v52, %v2012_v19  ;;  %v2014_v63 = vadd.f32 %v5149_v37, %v2013_v33 }
 0x1c4   : > { %v2071_v45 = vmul.f32 0.7978846, %v2063_v22  ;;  %v2040_v51 = vmul.f32 0.044715, %v2014_v63  ;;  %v2032_v30 = vmul.f32 0.5, %v2014_v63 }
 0x1c6   : > { %4431 = vtanh.f32 %v2071_v45  ;;  %v2048_v29 = vmul.f32 %v2040_v51, %v2014_v63 }
 0x1c7   : > { %v2329_v8 = vpop.f32.mrf.mxu3 }
 0x1c8   : > { %v2056_v2 = vmul.f32 %v2048_v29, %v2014_v63 }
 0x1c9   : > { %v2016_v1 = vpop.f32.mrf.mxu1  ;;  %v5202_v51 = vpop.f32.mrf.mxu0 }
 0x1ca   : > { %v2064_v35 = vadd.f32 %v2056_v2, %v2014_v63  ;;  %v2017_v24 = vadd.f32 %v5149_v37, %v2016_v1 }
 0x1cc   : > { %v4432_v40 = vpop.eup %4431  ;;  %v2072_v49 = vmul.f32 0.7978846, %v2064_v35  ;;  %v2041_v36 = vmul.f32 0.044715, %v2017_v24  ;;  %4208 = vmatmul.msk.bf16.gmra.mxu1 %vm4869_vm0, %v4207_v21  ;;  %v2033_v7 = vmul.f32 0.5, %v2017_v24 }
 0x1cd   : > { %v2087_v11 = vadd.f32 1.0, %v4432_v40 }
 0x1ce   : > { %4433 = vtanh.f32 %v2072_v49  ;;  %v2049_v60 = vmul.f32 %v2041_v36, %v2017_v24 }
 0x1cf   : > { %v2095_v46 = vmul.f32 %v2087_v11, %v2031_v47  ;;  %v2250_v16 = vpop.f32.mrf.mxu2 }
 0x1d0   : > { %v2328_v3 = vadd.f32 %v2327_v43, %v2250_v16  ;;  %v2057_v55 = vmul.f32 %v2049_v60, %v2017_v24  ;;  %v2332_v58 = vpop.f32.mrf.mxu3 }
 0x1d1   : > { %2103 = vst [vmem:[%s5170_s11] sm:$0xff] %v2095_v46  ;;  %v2018_v6 = vpop.f32.mrf.mxu1 }
 0x1d2   : > { %v2351_v10 = vadd.f32 %v5175_v50, %v2328_v3  ;;  %v2065_v27 = vadd.f32 %v2057_v55, %v2017_v24  ;;  %v2019_v42 = vadd.f32 %v5149_v37, %v2018_v6 }
 0x1d4   : > { %v4434_v54 = vpop.eup %4433  ;;  %v2367_v0 = vmul.f32 0.044715, %v2351_v10  ;;  %v2073_v38 = vmul.f32 0.7978846, %v2065_v27  ;;  %v2042_v13 = vmul.f32 0.044715, %v2019_v42 }
 0x1d5   : > { %v2088_v62 = vadd.f32 1.0, %v4434_v54  ;;  %v2034_v47 = vmul.f32 0.5, %v2019_v42 }
 0x1d6   : > { %v2375_v9 = vmul.f32 %v2367_v0, %v2351_v10  ;;  %4435 = vtanh.f32 %v2073_v38  ;;  %v2050_v25 = vmul.f32 %v2042_v13, %v2019_v42 }
 0x1d7   : > { %v2096_v21 = vmul.f32 %v2088_v62, %v2032_v30  ;;  %v2252_v18 = vpop.f32.mrf.mxu2  ;;  %v4213_v62 = vpack.c.bf16 0.0, %v5124_v39 }
 0x1d8   : > { %v2383_v23 = vmul.f32 %v2375_v9, %v2351_v10  ;;  %v2330_v48 = vadd.f32 %v2329_v8, %v2252_v18  ;;  %v2058_v14 = vmul.f32 %v2050_v25, %v2019_v42  ;;  %v2334_v43 = vpop.f32.mrf.mxu3  ;;  %v2359_v8 = vmul.f32 0.5, %v2351_v10 }
 0x1d9   : > { %2104 = vst [vmem:[%s5170_s11 + $0x8] sm:$0xff] %v2096_v21  ;;  %v2021_v41 = vpop.f32.mrf.mxu1 }
 0x1da   : > { %v2391_v26 = vadd.f32 %v2383_v23, %v2351_v10  ;;  %v2352_v59 = vadd.f32 %v5175_v50, %v2330_v48  ;;  %v5185_v61 = vadd.f32 %v5149_v37, %v2021_v41  ;;  %v2066_v12 = vadd.f32 %v2058_v14, %v2019_v42  ;;  %v5231_v48 = vpop.f32.mrf.mxu0 }
 0x1dc   : > { %v4436_v34 = vpop.eup %4435  ;;  %v2399_v20 = vmul.f32 0.7978846, %v2391_v26  ;;  %v2368_v5 = vmul.f32 0.044715, %v2352_v59  ;;  %4211 = vmatmul.msk.bf16.gmra.mxu1 %vm4833_vm15, %v4210_v32  ;;  %v2074_v28 = vmul.f32 0.7978846, %v2066_v12 }
 0x1dd   : > { %v2089_v57 = vadd.f32 1.0, %v4436_v34  ;;  %v2043_v19 = vmul.f32 0.044715, %v5185_v61  ;;  %v2360_v25 = vmul.f32 0.5, %v2352_v59  ;;  %v2035_v39 = vmul.f32 0.5, %v5185_v61 }
 0x1de   : > { %4437 = vtanh.f32 %v2399_v20  ;;  %v2376_v4 = vmul.f32 %v2368_v5, %v2352_v59 }
 0x1df   : > { %v2097_v44 = vmul.f32 %v2089_v57, %v2033_v7  ;;  %4439 = vtanh.f32 %v2074_v28  ;;  %v2255_v52 = vpop.f32.mrf.mxu2  ;;  %v2051_v33 = vmul.f32 %v2043_v19, %v5185_v61 }
 0x1e0   : > { %v2384_v22 = vmul.f32 %v2376_v4, %v2352_v59  ;;  %v2333_v63 = vadd.f32 %v2332_v58, %v2255_v52  ;;  %v2337_v27 = vpop.f32.mrf.mxu3 }
 0x1e1   : > { %2105 = vst [vmem:[%s5170_s11 + $0x10] sm:$0xff] %v2097_v44  ;;  %v2059_v53 = vmul.f32 %v2051_v33, %v5185_v61  ;;  %v2023_v56 = vpop.f32.mrf.mxu1 }
 0x1e2   : > { %v2392_v17 = vadd.f32 %v2384_v22, %v2352_v59  ;;  %v5197_v32 = vadd.f32 %v5175_v50, %v2333_v63  ;;  %v5200_v45 = vadd.f32 %v5149_v37, %v2023_v56 }
 0x1e3   : > { %v2067_v29 = vadd.f32 %v2059_v53, %v5185_v61 }
 0x1e4   : > { %v4438_v2 = vpop.eup %4437  ;;  %v2400_v1 = vmul.f32 0.7978846, %v2392_v17  ;;  %v2369_v35 = vmul.f32 0.044715, %v5197_v32  ;;  %v2044_v36 = vmul.f32 0.044715, %v5200_v45 }
 0x1e5   : > { %v4440_v24 = vpop.eup %4439  ;;  %v2415_v40 = vadd.f32 1.0, %v4438_v2  ;;  %v2075_v49 = vmul.f32 0.7978846, %v2067_v29  ;;  %v2361_v53 = vmul.f32 0.5, %v5197_v32 }
 0x1e6   : > { %4441 = vtanh.f32 %v2400_v1  ;;  %v2090_v11 = vadd.f32 1.0, %v4440_v24  ;;  %v2377_v60 = vmul.f32 %v2369_v35, %v5197_v32  ;;  %v2052_v3 = vmul.f32 %v2044_v36, %v5200_v45  ;;  %v5254_v24 = vpop.f32.mrf.mxu0 }
 0x1e7   : > { %v2423_v46 = vmul.f32 %v2415_v40, %v2359_v8  ;;  %4443 = vtanh.f32 %v2075_v49  ;;  %v2257_v16 = vpop.f32.mrf.mxu2 }
 0x1e8   : > { %v2098_v55 = vmul.f32 %v2090_v11, %v2034_v47  ;;  %v2385_v6 = vmul.f32 %v2377_v60, %v5197_v32  ;;  %v2335_v10 = vadd.f32 %v2334_v43, %v2257_v16  ;;  %v2060_v54 = vmul.f32 %v2052_v3, %v5200_v45  ;;  %v2339_v44 = vpop.f32.mrf.mxu3  ;;  %v5261_v47 = vld [vmem:[%s5376_s4] ss:$0 sm:$0xff] }
 0x1e9   : > { %2431 = vst [vmem:[%s5211_s16] sm:$0xff] %v2423_v46  ;;  %v2026_v0 = vpop.f32.mrf.mxu1 }
 0x1ea   : > { %2106 = vst [vmem:[%s5170_s11 + $0x18] sm:$0xff] %v2098_v55  ;;  %v2393_v42 = vadd.f32 %v2385_v6, %v5197_v32  ;;  %v5221_v38 = vadd.f32 %v5175_v50, %v2335_v10  ;;  %v5224_v30 = vadd.f32 %v5149_v37, %v2026_v0  ;;  %v2068_v58 = vadd.f32 %v2060_v54, %v5200_v45 }
 0x1ec   : > { %v4442_v13 = vpop.eup %4441  ;;  %v2401_v9 = vmul.f32 0.7978846, %v2393_v42  ;;  %v2370_v21 = vmul.f32 0.044715, %v5221_v38  ;;  %4214 = vmatmul.msk.bf16.gmra.mxu1 %vm4941_vm11, %v4213_v62  ;;  %v2076_v14 = vmul.f32 0.7978846, %v2068_v58 }
 0x1ed   : > { %v4444_v18 = vpop.eup %4443  ;;  %v2416_v23 = vadd.f32 1.0, %v4442_v13  ;;  %v2045_v41 = vmul.f32 0.044715, %v5224_v30  ;;  %v2362_v0 = vmul.f32 0.5, %v5221_v38 }
 0x1ee   : > { %4445 = vtanh.f32 %v2401_v9  ;;  %v2091_v26 = vadd.f32 1.0, %v4444_v18  ;;  %v2378_v12 = vmul.f32 %v2370_v21, %v5221_v38 }
 0x1ef   : > { %v2424_v34 = vmul.f32 %v2416_v23, %v2360_v25  ;;  %4447 = vtanh.f32 %v2076_v14  ;;  %v2260_v31 = vpop.f32.mrf.mxu2  ;;  %v2053_v20 = vmul.f32 %v2045_v41, %v5224_v30 }
 0x1f0   : > { %v2099_v59 = vmul.f32 %v2091_v26, %v2035_v39  ;;  %v2386_v5 = vmul.f32 %v2378_v12, %v5221_v38  ;;  %v2338_v7 = vadd.f32 %v2337_v27, %v2260_v31  ;;  %v2342_v62 = vpop.f32.mrf.mxu3 }
 0x1f1   : > { %2432 = vst [vmem:[%s5211_s16 + $0x8] sm:$0xff] %v2424_v34  ;;  %v2061_v57 = vmul.f32 %v2053_v20, %v5224_v30  ;;  %v2028_v28 = vpop.f32.mrf.mxu1 }
 0x1f2   : > { %2107 = vst [vmem:[%s5170_s11 + $0x20] sm:$0xff] %v2099_v59  ;;  %v2394_v19 = vadd.f32 %v2386_v5, %v5221_v38  ;;  %v5243_v61 = vadd.f32 %v5175_v50, %v2338_v7  ;;  %v5246_v4 = vadd.f32 %v5149_v37, %v2028_v28  ;;  %v2036_v37 = vmul.f32 0.5, %v5200_v45  ;;  %v5282_v38 = vpop.f32.mrf.mxu0 }
 0x1f3   : > { %v2069_v52 = vadd.f32 %v2061_v57, %v5224_v30 }
 0x1f4   : > { %v4446_v43 = vpop.eup %4445  ;;  %v2402_v33 = vmul.f32 0.7978846, %v2394_v19  ;;  %v2371_v22 = vmul.f32 0.044715, %v5243_v61  ;;  %v2046_v29 = vmul.f32 0.044715, %v5246_v4 }
 0x1f5   : > { %v4448_v63 = vpop.eup %4447  ;;  %v2417_v56 = vadd.f32 1.0, %v4446_v43  ;;  %v2077_v17 = vmul.f32 0.7978846, %v2069_v52  ;;  %v2363_v28 = vmul.f32 0.5, %v5243_v61 }
 0x1f6   : > { %4449 = vtanh.f32 %v2402_v33  ;;  %v2092_v2 = vadd.f32 1.0, %v4448_v63  ;;  %v2379_v1 = vmul.f32 %v2371_v22, %v5243_v61  ;;  %v2054_v40 = vmul.f32 %v2046_v29, %v5246_v4 }
 0x1f7   : > { %v2425_v35 = vmul.f32 %v2417_v56, %v2361_v53  ;;  %4451 = vtanh.f32 %v2077_v17  ;;  %v2262_v8 = vpop.f32.mrf.mxu2 }
 0x1f8   : > { %v2100_v32 = vmul.f32 %v2092_v2, %v2036_v37  ;;  %v2387_v49 = vmul.f32 %v2379_v1, %v5243_v61  ;;  %v2340_v36 = vadd.f32 %v2339_v44, %v2262_v8  ;;  %v2062_v45 = vmul.f32 %v2054_v40, %v5246_v4  ;;  %v2344_v22 = vpop.f32.mrf.mxu3 }
 0x1f9   : > { %2433 = vst [vmem:[%s5211_s16 + $0x10] sm:$0xff] %v2425_v35  ;;  %v2648_v11 = vpop.f32.mrf.mxu1 }
 0x1fa   : > { %2108 = vst [vmem:[%s5170_s11 + $0x28] sm:$0xff] %v2100_v32  ;;  %v2395_v60 = vadd.f32 %v2387_v49, %v5243_v61  ;;  %v5268_v46 = vadd.f32 %v5175_v50, %v2340_v36  ;;  %v2649_v16 = vadd.f32 %v2648_v11, %v5181_v15  ;;  %v2070_v3 = vadd.f32 %v2062_v45, %v5246_v4  ;;  %v5308_v8 = vpop.f32.mrf.mxu0 }
 0x1fb   : > { %v2037_v15 = vmul.f32 0.5, %v5224_v30 }
 0x1fc   : > { %v4450_v55 = vpop.eup %4449  ;;  %v2403_v6 = vmul.f32 0.7978846, %v2395_v60  ;;  %v2372_v10 = vmul.f32 0.044715, %v5268_v46  ;;  %v5274_v27 = vadd.f32 %v5261_v47, %v2649_v16  ;;  %v2078_v58 = vmul.f32 0.7978846, %v2070_v3 }
 0x1fd   : > { %v4452_v54 = vpop.eup %4451  ;;  %v2418_v42 = vadd.f32 1.0, %v4450_v55  ;;  %v2364_v11 = vmul.f32 0.5, %v5268_v46 }
 0x1fe   : > { %4453 = vtanh.f32 %v2403_v6  ;;  %v2093_v13 = vadd.f32 1.0, %v4452_v54  ;;  %v2380_v9 = vmul.f32 %v2372_v10, %v5268_v46  ;;  %v2688_v25 = vmul.f32 0.044715, %v5274_v27 }
 0x1ff   : > { %v2426_v21 = vmul.f32 %v2418_v42, %v2362_v0  ;;  %4455 = vtanh.f32 %v2078_v58  ;;  %v2265_v18 = vpop.f32.mrf.mxu2  ;;  %v2680_v10 = vmul.f32 0.5, %v5274_v27 }
 0x200   : > { %v2101_v23 = vmul.f32 %v2093_v13, %v2037_v15  ;;  %v2388_v14 = vmul.f32 %v2380_v9, %v5268_v46  ;;  %v2343_v41 = vadd.f32 %v2342_v62, %v2265_v18  ;;  %v2696_v39 = vmul.f32 %v2688_v25, %v5274_v27 }
 0x201   : > { %2434 = vst [vmem:[%s5211_s16 + $0x18] sm:$0xff] %v2426_v21  ;;  %v2650_v26 = vpop.f32.mrf.mxu1 }
 0x202   : > { %2109 = vst [vmem:[%s5170_s11 + $0x30] sm:$0xff] %v2101_v23  ;;  %v2396_v30 = vadd.f32 %v2388_v14, %v5268_v46  ;;  %v5288_v12 = vadd.f32 %v5175_v50, %v2343_v41  ;;  %v2651_v34 = vadd.f32 %v2650_v26, %v5202_v51  ;;  %v2704_v31 = vmul.f32 %v2696_v39, %v5274_v27  ;;  %v2586_v25 = vpop.f32.mrf.mxu0 }
 0x203   : > { %v2038_v51 = vmul.f32 0.5, %v5246_v4 }
 0x204   : > { %v4454_v20 = vpop.eup %4453  ;;  %v2404_v59 = vmul.f32 0.7978846, %v2396_v30  ;;  %v2373_v5 = vmul.f32 0.044715, %v5288_v12  ;;  %v5294_v7 = vadd.f32 %v5261_v47, %v2651_v34  ;;  %v2712_v44 = vadd.f32 %v2704_v31, %v5274_v27 }
 0x205   : > { %v4456_v57 = vpop.eup %4455  ;;  %v2419_v19 = vadd.f32 1.0, %v4454_v20  ;;  %v2365_v23 = vmul.f32 0.5, %v5288_v12 }
 0x206   : > { %4457 = vtanh.f32 %v2404_v59  ;;  %v2094_v52 = vadd.f32 1.0, %v4456_v57  ;;  %v2381_v43 = vmul.f32 %v2373_v5, %v5288_v12  ;;  %v2720_v63 = vmul.f32 0.7978846, %v2712_v44 }
 0x207   : > { %v2427_v33 = vmul.f32 %v2419_v19, %v2363_v28  ;;  %v2267_v53 = vpop.f32.mrf.mxu2  ;;  %v2689_v56 = vmul.f32 0.044715, %v5294_v7  ;;  %v2681_v34 = vmul.f32 0.5, %v5294_v7 }
 0x208   : > { %v2102_v17 = vmul.f32 %v2094_v52, %v2038_v51  ;;  %v2389_v29 = vmul.f32 %v2381_v43, %v5288_v12  ;;  %v2345_v61 = vadd.f32 %v2344_v22, %v2267_v53  ;;  %4459 = vtanh.f32 %v2720_v63 }
 0x209   : > { %2435 = vst [vmem:[%s5211_s16 + $0x20] sm:$0xff] %v2427_v33  ;;  %v2697_v37 = vmul.f32 %v2689_v56, %v5294_v7  ;;  %v2653_v2 = vpop.f32.mrf.mxu1 }
 0x20a   : > { %2110 = vst [vmem:[%s5170_s11 + $0x38] sm:$0xff] %v2102_v17  ;;  %v2397_v4 = vadd.f32 %v2389_v29, %v5288_v12  ;;  %v2358_v1 = vadd.f32 %v5175_v50, %v2345_v61  ;;  %v2654_v35 = vadd.f32 %v2653_v2, %v5231_v48  ;;  %v2588_v33 = vpop.f32.mrf.mxu0 }
 0x20b   : > { %v2705_v40 = vmul.f32 %v2697_v37, %v5294_v7 }
 0x20c   : > { %v4458_v32 = vpop.eup %4457  ;;  %v2405_v49 = vmul.f32 0.7978846, %v2397_v4  ;;  %v2374_v36 = vmul.f32 0.044715, %v2358_v1  ;;  %v2674_v45 = vadd.f32 %v5261_v47, %v2654_v35  ;;  %v2366_v44 = vmul.f32 0.5, %v2358_v1 }
 0x20d   : > { %v2420_v60 = vadd.f32 1.0, %v4458_v32  ;;  %v2713_v16 = vadd.f32 %v2705_v40, %v5294_v7 }
 0x20e   : > { %4461 = vtanh.f32 %v2405_v49  ;;  %v2382_v50 = vmul.f32 %v2374_v36, %v2358_v1  ;;  %v2690_v3 = vmul.f32 0.044715, %v2674_v45  ;;  %v4460_v48 = vpop.eup %4459  ;;  %v2682_v63 = vmul.f32 0.5, %v2674_v45 }
 0x20f   : > { %v2428_v55 = vmul.f32 %v2420_v60, %v2364_v11  ;;  %v2721_v6 = vmul.f32 0.7978846, %v2713_v16  ;;  %v2736_v54 = vadd.f32 1.0, %v4460_v48  ;;  %v2891_v37 = vpop.f32.mrf.mxu2 }
 0x210   : > { %v2390_v0 = vmul.f32 %v2382_v50, %v2358_v1  ;;  %v2698_v42 = vmul.f32 %v2690_v3, %v2674_v45 }
 0x211   : > { %2436 = vst [vmem:[%s5211_s16 + $0x28] sm:$0xff] %v2428_v55  ;;  %4463 = vtanh.f32 %v2721_v6  ;;  %v2655_v46 = vpop.f32.mrf.mxu1  ;;  %v2744_v62 = vmul.f32 %v2736_v54, %v2680_v10 }
 0x212   : > { %v2398_v58 = vadd.f32 %v2390_v0, %v2358_v1  ;;  %v2706_v15 = vmul.f32 %v2698_v42, %v2674_v45  ;;  %v2656_v13 = vadd.f32 %v2655_v46, %v5254_v24  ;;  %v2968_v1 = vpop.f32.mrf.mxu3  ;;  %v3082_v11 = vpop.f32.mrf.mxu0 }
 0x213   : > { %2752 = vst [vmem:[%s5320_s21] sm:$0xff] %v2744_v62 }
 0x214   : > { %v4462_v9 = vpop.eup %4461  ;;  %v2406_v27 = vmul.f32 0.7978846, %v2398_v58  ;;  %v2714_v21 = vadd.f32 %v2706_v15, %v2674_v45  ;;  %v2675_v18 = vadd.f32 %v5261_v47, %v2656_v13 }
 0x215   : > { %v2421_v14 = vadd.f32 1.0, %v4462_v9 }
 0x216   : > { %4465 = vtanh.f32 %v2406_v27  ;;  %v2722_v41 = vmul.f32 0.7978846, %v2714_v21  ;;  %v2691_v39 = vmul.f32 0.044715, %v2675_v18  ;;  %v2683_v49 = vmul.f32 0.5, %v2675_v18 }
 0x217   : > { %v4464_v26 = vpop.eup %4463  ;;  %v2429_v30 = vmul.f32 %v2421_v14, %v2365_v23  ;;  %v2893_v55 = vpop.f32.mrf.mxu2  ;;  %v2969_v21 = vadd.f32 %v2968_v1, %v2891_v37 }
 0x218   : > { %v2737_v24 = vadd.f32 1.0, %v4464_v26  ;;  %4467 = vtanh.f32 %v2722_v41  ;;  %v2699_v31 = vmul.f32 %v2691_v39, %v2675_v18 }
 0x219   : > { %2437 = vst [vmem:[%s5211_s16 + $0x30] sm:$0xff] %v2429_v30  ;;  %v2658_v20 = vpop.f32.mrf.mxu1 }
 0x21a   : > { %v2745_v59 = vmul.f32 %v2737_v24, %v2681_v34  ;;  %v2707_v5 = vmul.f32 %v2699_v31, %v2675_v18  ;;  %v2659_v57 = vadd.f32 %v2658_v20, %v5282_v38  ;;  %v2970_v0 = vpop.f32.mrf.mxu3  ;;  %v3084_v27 = vpop.f32.mrf.mxu0  ;;  %v3102_v24 = vadd.f32 %v3082_v11, %v2969_v21  ;;  %v5342_v31 = vld [vmem:[%s5376_s4] ss:$0 sm:$0xff] }
 0x21c   : > { %v4466_v12 = vpop.eup %4465  ;;  %2753 = vst [vmem:[%s5320_s21 + $0x8] sm:$0xff] %v2745_v59  ;;  %v2715_v28 = vadd.f32 %v2707_v5, %v2675_v18  ;;  %v2676_v19 = vadd.f32 %v5261_v47, %v2659_v57 }
 0x21d   : > { %v2422_v51 = vadd.f32 1.0, %v4466_v12  ;;  %v2971_v12 = vadd.f32 %v2970_v0, %v2893_v55 }
 0x21e   : > { %v4468_v52 = vpop.eup %4467  ;;  %v2723_v7 = vmul.f32 0.7978846, %v2715_v28  ;;  %v2692_v43 = vmul.f32 0.044715, %v2676_v19  ;;  %v2684_v42 = vmul.f32 0.5, %v2676_v19 }
 0x21f   : > { %v2430_v22 = vmul.f32 %v2422_v51, %v2366_v44  ;;  %v2738_v53 = vadd.f32 1.0, %v4468_v52  ;;  %v2896_v39 = vpop.f32.mrf.mxu2 }
 0x220   : > { %4469 = vtanh.f32 %v2723_v7  ;;  %v2700_v56 = vmul.f32 %v2692_v43, %v2676_v19 }
 0x221   : > { %2438 = vst [vmem:[%s5211_s16 + $0x38] sm:$0xff] %v2430_v22  ;;  %v2746_v38 = vmul.f32 %v2738_v53, %v2682_v63  ;;  %v2660_v17 = vpop.f32.mrf.mxu1  ;;  %v3103_v63 = vadd.f32 %v3084_v27, %v2971_v12 }
 0x222   : > { %v2708_v29 = vmul.f32 %v2700_v56, %v2676_v19  ;;  %v2661_v61 = vadd.f32 %v2660_v17, %v5308_v8  ;;  %v2973_v20 = vpop.f32.mrf.mxu3  ;;  %v3087_v44 = vpop.f32.mrf.mxu0 }
 0x223   : > { %2754 = vst [vmem:[%s5320_s21 + $0x10] sm:$0xff] %v2746_v38  ;;  %v2974_v37 = vadd.f32 %v2973_v20, %v2896_v39 }
 0x224   : > { %v2716_v2 = vadd.f32 %v2708_v29, %v2676_v19  ;;  %v2677_v4 = vadd.f32 %v5261_v47, %v2661_v61 }
 0x225   : > { %v3104_v11 = vadd.f32 %v3087_v44, %v2974_v37 }
 0x226   : > { %v4470_v35 = vpop.eup %4469  ;;  %v2724_v40 = vmul.f32 0.7978846, %v2716_v2  ;;  %v2693_v32 = vmul.f32 0.044715, %v2677_v4  ;;  %v2685_v26 = vmul.f32 0.5, %v2677_v4 }
 0x227   : > { %v2739_v36 = vadd.f32 1.0, %v4470_v35  ;;  %v2898_v53 = vpop.f32.mrf.mxu2 }
 0x228   : > { %4471 = vtanh.f32 %v2724_v40  ;;  %v2701_v45 = vmul.f32 %v2693_v32, %v2677_v4 }
 0x229   : > { %v2747_v60 = vmul.f32 %v2739_v36, %v2683_v49  ;;  %v2663_v16 = vpop.f32.mrf.mxu1 }
 0x22a   : > { %v2709_v50 = vmul.f32 %v2701_v45, %v2677_v4  ;;  %v2664_v3 = vadd.f32 %v2663_v16, %v2586_v25  ;;  %v2975_v61 = vpop.f32.mrf.mxu3  ;;  %v3089_v32 = vpop.f32.mrf.mxu0 }
 0x22b   : > { %2755 = vst [vmem:[%s5320_s21 + $0x18] sm:$0xff] %v2747_v60 }
 0x22c   : > { %v2717_v8 = vadd.f32 %v2709_v50, %v2677_v4  ;;  %v2678_v48 = vadd.f32 %v5261_v47, %v2664_v3 }
 0x22e   : > { %v4472_v6 = vpop.eup %4471  ;;  %v2725_v10 = vmul.f32 0.7978846, %v2717_v8  ;;  %v2694_v54 = vmul.f32 0.044715, %v2678_v48  ;;  %v2686_v43 = vmul.f32 0.5, %v2678_v48 }
 0x22f   : > { %v2740_v46 = vadd.f32 1.0, %v4472_v6  ;;  %v2901_v8 = vpop.f32.mrf.mxu2 }
 0x230   : > { %4473 = vtanh.f32 %v2725_v10  ;;  %v2702_v62 = vmul.f32 %v2694_v54, %v2678_v48 }
 0x231   : > { %v2748_v58 = vmul.f32 %v2740_v46, %v2684_v42  ;;  %v2665_v15 = vpop.f32.mrf.mxu1 }
 0x232   : > { %v2710_v13 = vmul.f32 %v2702_v62, %v2678_v48  ;;  %v2666_v9 = vadd.f32 %v2665_v15, %v2588_v33  ;;  %v2978_v10 = vpop.f32.mrf.mxu3 }
 0x233   : > { %2756 = vst [vmem:[%s5320_s21 + $0x20] sm:$0xff] %v2748_v58 }
 0x234   : > { %v2718_v18 = vadd.f32 %v2710_v13, %v2678_v48  ;;  %v2679_v25 = vadd.f32 %v5261_v47, %v2666_v9  ;;  %v2976_v48 = vadd.f32 %v2975_v61, %v2898_v53  ;;  %v3092_v13 = vpop.f32.mrf.mxu0 }
 0x236   : > { %v4474_v23 = vpop.eup %4473  ;;  %v2726_v14 = vmul.f32 0.7978846, %v2718_v18  ;;  %v2695_v41 = vmul.f32 0.044715, %v2679_v25  ;;  %v2687_v49 = vmul.f32 0.5, %v2679_v25  ;;  %v3105_v15 = vadd.f32 %v3089_v32, %v2976_v48 }
 0x237   : > { %v2741_v30 = vadd.f32 1.0, %v4474_v23 }
 0x238   : > { %4475 = vtanh.f32 %v2726_v14  ;;  %v2703_v34 = vmul.f32 %v2695_v41, %v2679_v25  ;;  %v2903_v41 = vpop.f32.mrf.mxu2 }
 0x239   : > { %v2749_v59 = vmul.f32 %v2741_v30, %v2685_v26  ;;  %v3212_v5 = vpop.f32.mrf.mxu1 }
 0x23a   : > { %v2711_v57 = vmul.f32 %v2703_v34, %v2679_v25  ;;  %v3232_v47 = vadd.f32 %v3212_v5, %v3102_v24  ;;  %v2980_v34 = vpop.f32.mrf.mxu3 }
 0x23b   : > { %2757 = vst [vmem:[%s5320_s21 + $0x28] sm:$0xff] %v2749_v59  ;;  %v2981_v44 = vadd.f32 %v2980_v34, %v2903_v41 }
 0x23c   : > { %v2719_v28 = vadd.f32 %v2711_v57, %v2679_v25  ;;  %v3244_v19 = vadd.f32 %v5342_v31, %v3232_v47  ;;  %v2979_v25 = vadd.f32 %v2978_v10, %v2901_v8 }
 0x23e   : > { %v4476_v51 = vpop.eup %4475  ;;  %v2727_v52 = vmul.f32 0.7978846, %v2719_v28  ;;  %v3260_v7 = vmul.f32 0.044715, %v3244_v19  ;;  %v3252_v46 = vmul.f32 0.5, %v3244_v19  ;;  %v3106_v5 = vadd.f32 %v3092_v13, %v2979_v25 }
 0x23f   : > { %v2742_v33 = vadd.f32 1.0, %v4476_v51 }
 0x240   : > { %4477 = vtanh.f32 %v2727_v52  ;;  %v3268_v22 = vmul.f32 %v3260_v7, %v3244_v19 }
 0x241   : > { %v2750_v56 = vmul.f32 %v2742_v33, %v2686_v43  ;;  %v3214_v38 = vpop.f32.mrf.mxu1 }
 0x242   : > { %v3276_v17 = vmul.f32 %v3268_v22, %v3244_v19  ;;  %v3233_v29 = vadd.f32 %v3214_v38, %v3103_v63  ;;  %v2906_v22 = vpop.f32.mrf.mxu2 }
 0x243   : > { %2758 = vst [vmem:[%s5320_s21 + $0x30] sm:$0xff] %v2750_v56 }
 0x244   : > { %v3284_v2 = vadd.f32 %v3276_v17, %v3244_v19  ;;  %v3245_v4 = vadd.f32 %v5342_v31, %v3233_v29  ;;  %v3094_v19 = vpop.f32.mrf.mxu0  ;;  %v2983_v17 = vpop.f32.mrf.mxu3 }
 0x245   : > { %v3107_v38 = vadd.f32 %v3094_v19, %v2981_v44 }
 0x246   : > { %v4478_v1 = vpop.eup %4477  ;;  %v3292_v35 = vmul.f32 0.7978846, %v3284_v2  ;;  %v3261_v40 = vmul.f32 0.044715, %v3245_v4  ;;  %v3253_v24 = vmul.f32 0.5, %v3245_v4 }
 0x247   : > { %v2743_v36 = vadd.f32 1.0, %v4478_v1 }
 0x248   : > { %4479 = vtanh.f32 %v3292_v35  ;;  %v3269_v45 = vmul.f32 %v3261_v40, %v3245_v4 }
 0x249   : > { %v2751_v60 = vmul.f32 %v2743_v36, %v2687_v49  ;;  %v3217_v16 = vpop.f32.mrf.mxu1 }
 0x24a   : > { %v3277_v50 = vmul.f32 %v3269_v45, %v3245_v4  ;;  %v3234_v3 = vadd.f32 %v3217_v16, %v3104_v11 }
 0x24b   : > { %2759 = vst [vmem:[%s5320_s21 + $0x38] sm:$0xff] %v2751_v60 }
 0x24c   : > { %v3285_v55 = vadd.f32 %v3277_v50, %v3245_v4  ;;  %v3246_v6 = vadd.f32 %v5342_v31, %v3234_v3  ;;  %v2984_v4 = vadd.f32 %v2983_v17, %v2906_v22  ;;  %v3097_v40 = vpop.f32.mrf.mxu0  ;;  %v2908_v50 = vpop.f32.mrf.mxu2 }
 0x24e   : > { %v4480_v54 = vpop.eup %4479  ;;  %v3293_v0 = vmul.f32 0.7978846, %v3285_v55  ;;  %v3262_v42 = vmul.f32 0.044715, %v3246_v6  ;;  %v3254_v63 = vmul.f32 0.5, %v3246_v6  ;;  %v3108_v16 = vadd.f32 %v3097_v40, %v2984_v4 }
 0x24f   : > { %v3308_v62 = vadd.f32 1.0, %v4480_v54 }
 0x250   : > { %4481 = vtanh.f32 %v3293_v0  ;;  %v3270_v58 = vmul.f32 %v3262_v42, %v3246_v6 }
 0x251   : > { %v3316_v9 = vmul.f32 %v3308_v62, %v3252_v46  ;;  %v3219_v27 = vpop.f32.mrf.mxu1 }
 0x252   : > { %v3278_v21 = vmul.f32 %v3270_v58, %v3246_v6  ;;  %v3235_v18 = vadd.f32 %v3219_v27, %v3105_v15 }
 0x253   : > { %3324 = vst [vmem:[%s5354_s28] sm:$0xff] %v3316_v9 }
 0x254   : > { %v3286_v23 = vadd.f32 %v3278_v21, %v3246_v6  ;;  %v3247_v14 = vadd.f32 %v5342_v31, %v3235_v18  ;;  %v2985_v6 = vpop.f32.mrf.mxu3  ;;  %v3099_v58 = vpop.f32.mrf.mxu0 }
 0x255   : > { %v2986_v10 = vadd.f32 %v2985_v6, %v2908_v50 }
 0x256   : > { %v4482_v39 = vpop.eup %4481  ;;  %v3294_v26 = vmul.f32 0.7978846, %v3286_v23  ;;  %v3263_v30 = vmul.f32 0.044715, %v3247_v14  ;;  %v3255_v45 = vmul.f32 0.5, %v3247_v14 }
 0x257   : > { %v3309_v20 = vadd.f32 1.0, %v4482_v39  ;;  %v3109_v27 = vadd.f32 %v3099_v58, %v2986_v10 }
 0x258   : > { %4483 = vtanh.f32 %v3294_v26  ;;  %v3271_v59 = vmul.f32 %v3263_v30, %v3247_v14 }
 0x259   : > { %v3317_v57 = vmul.f32 %v3309_v20, %v3253_v24  ;;  %v3222_v47 = vpop.f32.mrf.mxu1 }
 0x25a   : > { %v3279_v12 = vmul.f32 %v3271_v59, %v3247_v14  ;;  %v3236_v28 = vadd.f32 %v3222_v47, %v3106_v5 }
 0x25b   : > { %3325 = vst [vmem:[%s5354_s28 + $0x8] sm:$0xff] %v3317_v57 }
 0x25c   : > { %v3287_v51 = vadd.f32 %v3279_v12, %v3247_v14  ;;  %v3248_v52 = vadd.f32 %v5342_v31, %v3236_v28 }
 0x25e   : > { %v4484_v7 = vpop.eup %4483  ;;  %v3295_v43 = vmul.f32 0.7978846, %v3287_v51  ;;  %v3264_v33 = vmul.f32 0.044715, %v3248_v52  ;;  %v3256_v15 = vmul.f32 0.5, %v3248_v52 }
 0x25f   : > { %v3310_v53 = vadd.f32 1.0, %v4484_v7 }
 0x260   : > { %4485 = vtanh.f32 %v3295_v43  ;;  %v3272_v56 = vmul.f32 %v3264_v33, %v3248_v52 }
 0x261   : > { %v3318_v29 = vmul.f32 %v3310_v53, %v3254_v63  ;;  %v3224_v61 = vpop.f32.mrf.mxu1 }
 0x262   : > { %v3280_v37 = vmul.f32 %v3272_v56, %v3248_v52  ;;  %v3237_v2 = vadd.f32 %v3224_v61, %v3107_v38 }
 0x263   : > { %3326 = vst [vmem:[%s5354_s28 + $0x10] sm:$0xff] %v3318_v29 }
 0x264   : > { %v3288_v1 = vadd.f32 %v3280_v37, %v3248_v52  ;;  %v3249_v35 = vadd.f32 %v5342_v31, %v3237_v2 }
 0x266   : > { %v4486_v32 = vpop.eup %4485  ;;  %v3296_v49 = vmul.f32 0.7978846, %v3288_v1  ;;  %v3265_v36 = vmul.f32 0.044715, %v3249_v35  ;;  %v3257_v34 = vmul.f32 0.5, %v3249_v35 }
 0x267   : > { %v3311_v11 = vadd.f32 1.0, %v4486_v32 }
 0x268   : > { %4487 = vtanh.f32 %v3296_v49  ;;  %v3273_v60 = vmul.f32 %v3265_v36, %v3249_v35 }
 0x269   : > { %v3319_v3 = vmul.f32 %v3311_v11, %v3255_v45  ;;  %v3227_v8 = vpop.f32.mrf.mxu1 }
 0x26a   : > { %v3281_v48 = vmul.f32 %v3273_v60, %v3249_v35  ;;  %v3238_v55 = vadd.f32 %v3227_v8, %v3108_v16 }
 0x26b   : > { %3327 = vst [vmem:[%s5354_s28 + $0x18] sm:$0xff] %v3319_v3 }
 0x26c   : > { %v3289_v54 = vadd.f32 %v3281_v48, %v3249_v35  ;;  %v3250_v0 = vadd.f32 %v5342_v31, %v3238_v55 }
 0x26e   : > { %v4488_v42 = vpop.eup %4487  ;;  %v3297_v46 = vmul.f32 0.7978846, %v3289_v54  ;;  %v3266_v62 = vmul.f32 0.044715, %v3250_v0  ;;  %v3258_v28 = vmul.f32 0.5, %v3250_v0 }
 0x26f   : > { %v3312_v13 = vadd.f32 1.0, %v4488_v42 }
 0x270   : > { %4489 = vtanh.f32 %v3297_v46  ;;  %v3274_v9 = vmul.f32 %v3266_v62, %v3250_v0 }
 0x271   : > { %v3320_v21 = vmul.f32 %v3312_v13, %v3256_v15  ;;  %v3229_v18 = vpop.f32.mrf.mxu1 }
 0x272   : > { %v3282_v25 = vmul.f32 %v3274_v9, %v3250_v0  ;;  %v3239_v23 = vadd.f32 %v3229_v18, %v3109_v27 }
 0x273   : > { %3328 = vst [vmem:[%s5354_s28 + $0x20] sm:$0xff] %v3320_v21 }
 0x274   : > { %v3290_v14 = vadd.f32 %v3282_v25, %v3250_v0  ;;  %v3251_v41 = vadd.f32 %v5342_v31, %v3239_v23 }
 0x276   : > { %v4490_v39 = vpop.eup %4489  ;;  %v3298_v26 = vmul.f32 0.7978846, %v3290_v14  ;;  %v3267_v30 = vmul.f32 0.044715, %v3251_v41  ;;  %v3259_v51 = vmul.f32 0.5, %v3251_v41 }
 0x277   : > { %v3313_v24 = vadd.f32 1.0, %v4490_v39 }
 0x278   : > { %4491 = vtanh.f32 %v3298_v26  ;;  %v3275_v20 = vmul.f32 %v3267_v30, %v3251_v41 }
 0x279   : > { %v3321_v59 = vmul.f32 %v3313_v24, %v3257_v34 }
 0x27a   : > { %v3283_v5 = vmul.f32 %v3275_v20, %v3251_v41 }
 0x27b   : > { %3329 = vst [vmem:[%s5354_s28 + $0x28] sm:$0xff] %v3321_v59 }
 0x27c   : > { %v3291_v57 = vadd.f32 %v3283_v5, %v3251_v41 }
 0x27e   : > { %v4492_v47 = vpop.eup %4491  ;;  %v3299_v12 = vmul.f32 0.7978846, %v3291_v57 }
 0x27f   : > { %v3314_v19 = vadd.f32 1.0, %v4492_v47 }
 0x280   : > { %4493 = vtanh.f32 %v3299_v12 }
 0x281   : > { %v3322_v44 = vmul.f32 %v3314_v19, %v3258_v28 }
 0x283   : > { %3330 = vst [vmem:[%s5354_s28 + $0x30] sm:$0xff] %v3322_v44 }
 0x286   : > { %v4494_v31 = vpop.eup %4493 }
 0x287   : > { %v3315_v52 = vadd.f32 1.0, %v4494_v31 }
 0x289   : > { %v3323_v7 = vmul.f32 %v3315_v52, %v3259_v51 }
 0x28b   : > { %3331 = vst [vmem:[%s5354_s28 + $0x38] sm:$0xff] %v3323_v7 }
 0x28c PF: > { %s21_s27 = sadd.s32 1, %s4569_s27  }
 0x28d   : > { %p18_p7 = scmp.ge.s32.totalorder %s21_s27, 4  }
 0x28f   :  { %20 = sbr.rel (!%p18_p7) target bundleno = 2 (0x2), region = 131 }
 0x294   :  { %3405 = vsyncpa [#allocation5], 1 }
 0x295   :  { %3407 = vsyncpa [#allocation5 + $0x1], 1 }
 0x296   :  { %3408 = vsyncpa [#allocation7], 1 }

// kernel: decoder_forward.5
= control target key start
LH: loop header
LB: loop body
LE: loop exit
PB: predicated region body
PF: predicated region fallthrough
CT: control target
= control target key end

     0   :  { %s9033_s27 = smov 0   ;;  %s11169_s0 = inlined_call_operand.vmem [shape: f32[512,128], index: 0, kind: input, shape index: {}]   ;;  %s11170_s1 = inlined_call_operand.vmem [shape: bf16[9,128,128], index: 1, kind: input, shape index: {}]   ;;  %s11171_s2 = inlined_call_operand.vmem [shape: f32[1,128], index: 2, kind: input, shape index: {}]   ;;  %s11172_s3 = inlined_call_operand.vmem [shape: bf16[9,128,128], index: 3, kind: input, shape index: {}]   ;;  %s11173_s4 = inlined_call_operand.vmem [shape: f32[1,128], index: 4, kind: input, shape index: {}]   ;;  %s11174_s5 = inlined_call_operand.vmem [shape: f32[512,128], index: 5, kind: output, shape index: {0}]   ;;  %s11175_s6 = inlined_call_operand.vmem [shape: f32[512,128], index: 6, kind: output, shape index: {1}]   ;;  %s11176_s7 = inlined_call_operand.vmem [shape: f32[512,128], index: 7, kind: output, shape index: {2}]   ;;  %s11177_s8 = inlined_call_operand.vmem [shape: f32[512,128], index: 8, kind: output, shape index: {3}]  }
   0x1 LB: > { %s7212_s28 = sadd.s32 4294967295, %s8983_s27   ;;  %p7216_p0 = scmp.ge.s32.totalorder %s8983_s27, 1  ;;  %s8983_s27 = sphi %s9033_s27, %s19_s27  }
   0x2   : > { %p270_p1 = scmp.lt.s32.totalorder %s8983_s27, 3 }
   0x4   : > { %p271_p2 = pnand %p7216_p0, %p270_p1 }
   0x6   : > { %274 = sbr.rel (%p271_p2) target bundleno = 1496 (0x5d8), region = 40 }
   0xb   : > { %v8493_v0 = vld [vmem:[%s11170_s1 + $0x78] sm:$0xff]  ;;  %s7217_s11 = sshll.u32 %s7212_s28, 5  ;;  %v8492_v2 = vld [vmem:[%s11170_s1 + $0x70] sm:$0xff]  ;;  %v8985_v4 = vmov 0.0   ;;  %v8491_v5 = vld [vmem:[%s11170_s1 + $0x68] sm:$0xff]  ;;  %v349_v9 = vlaneseq  ;;  %vm8986_vm1 = vmmov 1  }
   0xc   : > { %v8485_v1 = vld [vmem:[%s11170_s1 + $0x38] sm:$0xff]  ;;  %p320_p3 = scmp.lt.s32.totalorder %s7217_s11, 63  ;;  %1173 = vmatpush.bf16.msra.mxu0 %v8493_v0  ;;  %8622 = vmatpush.bf16.msra.mxu2 %v8493_v0  ;;  %v8484_v3 = vld [vmem:[%s11170_s1 + $0x30] sm:$0xff]  ;;  %416 = vst [vmem:[#allocation2 + $0x10] sm:$0xff] %v8985_v4  ;;  %v8483_v6 = vld [vmem:[%s11170_s1 + $0x28] sm:$0xff]  ;;  %v11244_v39 = vmov 0 }
   0xd   : > { %8630 = vmatpush.bf16.msra.mxu3 %v8485_v1  ;;  %1310 = vmatpush.bf16.msra.mxu1 %v8485_v1  ;;  %449 = vst [vmem:[#allocation2 + $0x118] sm:$0xff] %v8985_v4  ;;  %v8490_v10 = vld [vmem:[%s11170_s1 + $0x60] sm:$0xff]  ;;  %v9081_v12 = vshrl.u32 %v349_v9, 7  ;;  %v8489_v14 = vld [vmem:[%s11170_s1 + $0x58] sm:$0xff]  ;;  %v8488_v21 = vld [vmem:[%s11170_s1 + $0x50] sm:$0xff]  ;;  %v11195_v45 = vmov 0.0|0.0  }
   0xe   : > { %s11412_s11 = smov (!%p320_p3, %s7217_s11), 63  ;;  %v8482_v11 = vld [vmem:[%s11170_s1 + $0x20] sm:$0xff]  ;;  %4384 = vst [vmem:[#allocation3 + $0x118] sm:$0xff] %v8985_v4  ;;  %v8481_v16 = vld [vmem:[%s11170_s1 + $0x18] sm:$0xff]  ;;  %v8480_v22 = vld [vmem:[%s11170_s1 + $0x10] sm:$0xff] }
   0xf   : > { %s9053_s16 = sshll.u32 %s11412_s11, 3  ;;  %v366_v18 = vadd.s32 128, %v9081_v12  ;;  %v8487_v26 = vld [vmem:[%s11170_s1 + $0x48] sm:$0xff]  ;;  %v8486_v31 = vld [vmem:[%s11170_s1 + $0x40] sm:$0xff]  ;;  %v8501_v35 = vld [vmem:[%s11170_s1 + $0xb8] sm:$0xff]  ;;  %v368_v41 = vadd.s32 144, %v9081_v12 }
  0x10   : > { %1174 = vmatpush.bf16.msra.mxu0 %v8492_v2  ;;  %8623 = vmatpush.bf16.msra.mxu2 %v8492_v2  ;;  %s9062_s21 = scalar_lea.vmem %s11169_s0, %s9053_s16  ;;  %v8479_v27 = vld [vmem:[%s11170_s1 + $0x8] sm:$0xff]  ;;  %v8478_v32 = vld [vmem:[%s11170_s1] sm:$0xff]  ;;  %v8509_v36 = vld [vmem:[%s11170_s1 + $0xf8] sm:$0xff]  ;;  %v352_v43 = vadd.s32 16, %v9081_v12  ;;  %v370_v4 = vadd.s32 160, %v9081_v12  ;;  %s10322_s23 = scalar_lea.vmem %s11174_s5, %s9053_s16 }
  0x11   : > { %8631 = vmatpush.bf16.msra.mxu3 %v8484_v3  ;;  %1311 = vmatpush.bf16.msra.mxu1 %v8484_v3  ;;  %v9068_v7 = vld [vmem:[%s9062_s21 + $0x70] sm:$0xff]  ;;  %v9071_v8 = vld [vmem:[%s9062_s21 + $0x78] sm:$0xff]  ;;  %v9084_v13 = vld [vmem:[%s9062_s21 + $0x68] sm:$0xff]  ;;  %v398_v25 = vand.u32 15, %v366_v18  ;;  %v400_v46 = vand.u32 15, %v368_v41  ;;  %s10516_s14 = scalar_lea.vmem %s11175_s6, %s9053_s16  ;;  %s11075_s19 = scalar_lea.vmem %s11177_s8, %s9053_s16 }
  0x12   : > { %498 = vst [vmem:[#allocation2 + $0x88] sm:$0xff] %v9068_v7  ;;  %v9090_v15 = vld [vmem:[%s9062_s21] sm:$0xff]  ;;  %v9096_v17 = vld [vmem:[%s9062_s21 + $0x8] sm:$0xff]  ;;  %v9116_v23 = vld [vmem:[%s9062_s21 + $0x10] sm:$0xff]  ;;  %v1100_v37 = vpack.c.bf16 %v9071_v8, %v9068_v7  ;;  %v384_v50 = vand.u32 15, %v352_v43  ;;  %v402_v9 = vand.u32 15, %v370_v4 }
  0x13   : > { %499 = vst [vmem:[#allocation2 + $0x90] sm:$0xff] %v9071_v8  ;;  %v9101_v19 = vld [vmem:[%s9062_s21 + $0x80] sm:$0xff]  ;;  %v9105_v20 = vld [vmem:[%s9062_s21 + $0x88] sm:$0xff]  ;;  %v9119_v24 = vld [vmem:[%s9062_s21 + $0x18] sm:$0xff]  ;;  %v692_v30 = vadd.s32 4294967295, %v398_v25  ;;  %v694_v53 = vadd.s32 4294967295, %v400_v46  ;;  %v9202_v62 = vpack.c.bf16 %v9096_v17, %v9090_v15 }
  0x14   : > { %1175 = vmatpush.bf16.msra.mxu0 %v8491_v5  ;;  %8624 = vmatpush.bf16.msra.mxu2 %v8491_v5  ;;  %497 = vst [vmem:[#allocation2 + $0x80] sm:$0xff] %v9084_v13  ;;  %v9131_v28 = vld [vmem:[%s9062_s21 + $0x90] sm:$0xff]  ;;  %v9134_v29 = vld [vmem:[%s9062_s21 + $0x98] sm:$0xff]  ;;  %v9176_v48 = vld [vmem:[%s9062_s21 + $0x20] sm:$0xff]  ;;  %v678_v57 = vadd.s32 4294967295, %v384_v50  ;;  %v1101_v63 = vpack.c.bf16 %v9105_v20, %v9101_v19  ;;  %v354_v5 = vadd.s32 32, %v9081_v12  ;;  %v9253_v25 = vpack.c.bf16 %v9119_v24, %v9116_v23 }
  0x15   : > { %8632 = vmatpush.bf16.msra.mxu3 %v8483_v6  ;;  %1312 = vmatpush.bf16.msra.mxu1 %v8483_v6  ;;  %484 = vst [vmem:[#allocation2 + $0x18] sm:$0xff] %v9090_v15  ;;  %vm724_vm0 = vcmp.ge.s32.totalorder %v692_v30, 0  ;;  %v8517_v40 = vld [vmem:[%s11170_s1 + $0x138] sm:$0xff]  ;;  %v8500_v42 = vld [vmem:[%s11170_s1 + $0xb0] sm:$0xff]  ;;  %v9179_v49 = vld [vmem:[%s9062_s21 + $0x28] sm:$0xff]  ;;  %vm726_vm3 = vcmp.ge.s32.totalorder %v694_v53, 0 }
  0x16   : > { %485 = vst [vmem:[#allocation2 + $0x20] sm:$0xff] %v9096_v17  ;;  %vm9153_vm2 = vmpackc.low %vm8986_vm1, %vm724_vm0  ;;  %v8508_v44 = vld [vmem:[%s11170_s1 + $0xf0] sm:$0xff]  ;;  %v8499_v51 = vld [vmem:[%s11170_s1 + $0xa8] sm:$0xff]  ;;  %vm710_vm4 = vcmp.ge.s32.totalorder %v678_v57, 0  ;;  %v696_v15 = vadd.s32 4294967295, %v402_v9  ;;  %v9304_v50 = vpack.c.bf16 %v9179_v49, %v9176_v48 }
  0x17   : > { %500 = vst [vmem:[#allocation2 + $0x98] sm:$0xff] %v9101_v19  ;;  %v11245_v39 = vsel %vm9153_vm2, 4294967295, %v11244_v39  ;;  %v8516_v47 = vld [vmem:[%s11170_s1 + $0x130] sm:$0xff]  ;;  %v8507_v52 = vld [vmem:[%s11170_s1 + $0xe8] sm:$0xff]  ;;  %v9193_v55 = vld [vmem:[%s9062_s21 + $0xa0] sm:$0xff] }
  0x18   : > { %1176 = vmatpush.bf16.msra.mxu0 %v8490_v10  ;;  %8625 = vmatpush.bf16.msra.mxu2 %v8490_v10  ;;  %501 = vst [vmem:[#allocation2 + $0xa0] sm:$0xff] %v9105_v20  ;;  %v8515_v54 = vld [vmem:[%s11170_s1 + $0x128] sm:$0xff]  ;;  %vm9207_vm5 = vmpackc.low %vm8986_vm1, %vm726_vm3  ;;  %v8498_v6 = vld [vmem:[%s11170_s1 + $0xa0] sm:$0xff]  ;;  %vm728_vm7 = vcmp.ge.s32.totalorder %v696_v15, 0 }
  0x19   : > { %8633 = vmatpush.bf16.msra.mxu3 %v8482_v11  ;;  %1313 = vmatpush.bf16.msra.mxu1 %v8482_v11  ;;  %486 = vst [vmem:[#allocation2 + $0x28] sm:$0xff] %v9116_v23  ;;  %v9196_v56 = vld [vmem:[%s9062_s21 + $0xa8] sm:$0xff]  ;;  %vm9214_vm6 = vmpackc.low %vm8986_vm1, %vm710_vm4  ;;  %v8506_v7 = vld [vmem:[%s11170_s1 + $0xe0] sm:$0xff]  ;;  %v372_v23 = vadd.s32 176, %v9081_v12 }
  0x1a   : > { %487 = vst [vmem:[#allocation2 + $0x30] sm:$0xff] %v9119_v24  ;;  %v533_v34 = vld [vmem:[#allocation2 + $0x8f] sm:$0xff]  ;;  %v8514_v8 = vld [vmem:[%s11170_s1 + $0x120] sm:$0xff]  ;;  %v9239_v11 = vld [vmem:[%s9062_s21 + $0x38] sm:$0xff]  ;;  %v356_v24 = vadd.s32 48, %v9081_v12 }
  0x1b   : > { %502 = vst [vmem:[#allocation2 + $0xa8] sm:$0xff] %v9131_v28  ;;  %v532_v33 = vld [vmem:[#allocation2 + $0x87] sm:$0xff]  ;;  %v9236_v10 = vld [vmem:[%s9062_s21 + $0x30] sm:$0xff]  ;;  %v9247_v17 = vld [vmem:[%s9062_s21 + $0xb8] sm:$0xff] }
  0x1c   : > { %1177 = vmatpush.bf16.msra.mxu0 %v8489_v14  ;;  %8626 = vmatpush.bf16.msra.mxu2 %v8489_v14  ;;  %503 = vst [vmem:[#allocation2 + $0xb0] sm:$0xff] %v9134_v29  ;;  %v7329_v38 = vpack.c.bf16 %v533_v34, %v532_v33  ;;  %v518_v58 = vld [vmem:[#allocation2 + $0x17] sm:$0xff]  ;;  %v386_v14 = vand.u32 15, %v354_v5  ;;  %vm9258_vm9 = vmpackc.low %vm8986_vm1, %vm728_vm7  ;;  %v404_v34 = vand.u32 15, %v372_v23  ;;  %v9298_v41 = vld [vmem:[%s9062_s21 + $0xc8] sm:$0xff]  ;;  %v9355_v15 = vpack.c.bf16 %v9239_v11, %v9236_v10 }
  0x1d   : > { %8634 = vmatpush.bf16.msra.mxu3 %v8481_v16  ;;  %1314 = vmatpush.bf16.msra.mxu1 %v8481_v16  ;;  %11246 = vst [vmem:[#allocation4_spill] sm:$0xff] %v11245_v39  ;;  %v519_v61 = vld [vmem:[#allocation2 + $0x1f] sm:$0xff]  ;;  %v9244_v16 = vld [vmem:[%s9062_s21 + $0xb0] sm:$0xff] }
  0x1e   : > { %488 = vst [vmem:[#allocation2 + $0x38] sm:$0xff] %v9176_v48  ;;  %v534_v59 = vld [vmem:[#allocation2 + $0x97] sm:$0xff]  ;;  %v9211_v2 = vpack.c.bf16 %v519_v61, %v518_v58  ;;  %v680_v18 = vadd.s32 4294967295, %v386_v14  ;;  %v374_v48 = vadd.s32 192, %v9081_v12 }
  0x1f   : > { %489 = vst [vmem:[#allocation2 + $0x40] sm:$0xff] %v9179_v49  ;;  %v535_v60 = vld [vmem:[#allocation2 + $0x9f] sm:$0xff]  ;;  %v358_v49 = vadd.s32 64, %v9081_v12  ;;  %v8512_v58 = vld [vmem:[%s11170_s1 + $0x110] sm:$0xff] }
  0x20   : > { %1178 = vmatpush.bf16.msra.mxu0 %v8488_v21  ;;  %8627 = vmatpush.bf16.msra.mxu2 %v8488_v21  ;;  %504 = vst [vmem:[#allocation2 + $0xb8] sm:$0xff] %v9193_v55  ;;  %v7332_v1 = vpack.c.bf16 %v535_v60, %v534_v59  ;;  %v520_v21 = vld [vmem:[#allocation2 + $0x27] sm:$0xff]  ;;  %vm712_vm8 = vcmp.ge.s32.totalorder %v680_v18, 0  ;;  %v8513_v33 = vld [vmem:[%s11170_s1 + $0x118] sm:$0xff]  ;;  %v406_v59 = vand.u32 15, %v374_v48  ;;  %v9338_v60 = vld [vmem:[%s9062_s21 + $0x50] sm:$0xff]  ;;  %v1104_v18 = vpack.c.bf16 %v9247_v17, %v9244_v16 }
  0x21   : > { %8635 = vmatpush.bf16.msra.mxu3 %v8480_v22  ;;  %1315 = vmatpush.bf16.msra.mxu1 %v8480_v22  ;;  %505 = vst [vmem:[#allocation2 + $0xc0] sm:$0xff] %v9196_v56  ;;  %v521_v22 = vld [vmem:[#allocation2 + $0x2f] sm:$0xff]  ;;  %vm9265_vm10 = vmpackc.low %vm8986_vm1, %vm712_vm8  ;;  %v9341_v61 = vld [vmem:[%s9062_s21 + $0x58] sm:$0xff] }
  0x22   : > { %490 = vst [vmem:[#allocation2 + $0x48] sm:$0xff] %v9236_v10  ;;  %v536_v19 = vld [vmem:[#allocation2 + $0xa7] sm:$0xff]  ;;  %v9346_v4 = vld [vmem:[%s9062_s21 + $0xd0] sm:$0xff]  ;;  %v9349_v5 = vld [vmem:[%s9062_s21 + $0xd8] sm:$0xff]  ;;  %v376_v10 = vadd.s32 208, %v9081_v12 }
  0x23   : > { %491 = vst [vmem:[#allocation2 + $0x50] sm:$0xff] %v9239_v11  ;;  %v537_v20 = vld [vmem:[#allocation2 + $0xaf] sm:$0xff]  ;;  %v360_v11 = vadd.s32 80, %v9081_v12  ;;  %v8525_v23 = vld [vmem:[%s11170_s1 + $0x178] sm:$0xff] }
  0x24   : > { %1179 = vmatpush.bf16.msra.mxu0 %v8487_v26  ;;  %8628 = vmatpush.bf16.msra.mxu2 %v8487_v26  ;;  %506 = vst [vmem:[#allocation2 + $0xc8] sm:$0xff] %v9244_v16  ;;  %v1102_v26 = vpack.c.bf16 %v9134_v29, %v9131_v28  ;;  %v7335_v30 = vpack.c.bf16 %v537_v20, %v536_v19  ;;  %v8497_v28 = vld [vmem:[%s11170_s1 + $0x98] sm:$0xff]  ;;  %v11259_v19 = vmov 0  ;;  %v8495_v16 = vld [vmem:[%s11170_s1 + $0x88] sm:$0xff] }
  0x25   : > { %8636 = vmatpush.bf16.msra.mxu3 %v8479_v27  ;;  %1316 = vmatpush.bf16.msra.mxu1 %v8479_v27  ;;  %507 = vst [vmem:[#allocation2 + $0xd0] sm:$0xff] %v9247_v17  ;;  %v8505_v29 = vld [vmem:[%s11170_s1 + $0xd8] sm:$0xff]  ;;  %v8503_v17 = vld [vmem:[%s11170_s1 + $0xc8] sm:$0xff] }
  0x26   : > { %509 = vst [vmem:[#allocation2 + $0xe0] sm:$0xff] %v9298_v41  ;;  %v522_v46 = vld [vmem:[#allocation2 + $0x37] sm:$0xff]  ;;  %v2269_v39 = vld [vmem:[#allocation2 + $0xa8] sm:$0xff] }
  0x27   : > { %v538_v43 = vld [vmem:[#allocation2 + $0xb7] sm:$0xff]  ;;  %494 = vst [vmem:[#allocation2 + $0x68] sm:$0xff] %v9338_v60 }
  0x28   : > { %1180 = vmatpush.bf16.msra.mxu0 %v8486_v31  ;;  %8629 = vmatpush.bf16.msra.mxu2 %v8486_v31  ;;  %v9262_v31 = vpack.c.bf16 %v521_v22, %v520_v21  ;;  %495 = vst [vmem:[#allocation2 + $0x70] sm:$0xff] %v9341_v61  ;;  %v3706_v22 = vld [vmem:[#allocation2 + $0x81] sm:$0xff] }
  0x29   : > { %8637 = vmatpush.bf16.msra.mxu3 %v8478_v32  ;;  %1317 = vmatpush.bf16.msra.mxu1 %v8478_v32  ;;  %510 = vst [vmem:[#allocation2 + $0xe8] sm:$0xff] %v9346_v4  ;;  %v524_v9 = vld [vmem:[#allocation2 + $0x47] sm:$0xff] }
  0x2a   : > { %511 = vst [vmem:[#allocation2 + $0xf0] sm:$0xff] %v9349_v5  ;;  %v525_v14 = vld [vmem:[#allocation2 + $0x4f] sm:$0xff] }
  0x2b   : > { %1181 = vmatmul.bf16.vlgmr.msra.gmra.mxu0 %v11195_v45  ;;  %1221 = vmatmul.bf16.vlgmr.msra.gmra.mxu2 %v1100_v37  ;;  %v388_v37 = vand.u32 15, %v356_v24  ;;  %v9364_v21 = vpack.c.bf16 %v525_v14, %v524_v9  ;;  %v9392_v24 = vld [vmem:[%s9062_s21 + $0x60] sm:$0xff] }
  0x2c   : > { %1704 = vmatpush.bf16.msrb.mxu2 %v8501_v35  ;;  %7330 = vmatmul.msk.bf16.vlgmr.msra.gmra.mxu3 %vm9153_vm2, %v7329_v38  ;;  %v9287_v35 = vld [vmem:[%s9062_s21 + $0x40] sm:$0xff]  ;;  %v698_v38 = vadd.s32 4294967295, %v404_v34  ;;  %496 = vst [vmem:[#allocation2 + $0x78] sm:$0xff] %v9392_v24  ;;  %v9399_v34 = vld [vmem:[%s9062_s21 + $0xe8] sm:$0xff] }
  0x2d   : > { %2130 = vmatpush.bf16.msrb.mxu3 %v8509_v36  ;;  %1318 = vmatmul.bf16.vlgmr.msra.gmra.mxu1 %v11195_v45  ;;  %v9290_v36 = vld [vmem:[%s9062_s21 + $0x48] sm:$0xff]  ;;  %492 = vst [vmem:[#allocation2 + $0x58] sm:$0xff] %v9287_v35 }
  0x2e   : > { %2460 = vmatpush.bf16.msrb.mxu0 %v8517_v40  ;;  %493 = vst [vmem:[#allocation2 + $0x60] sm:$0xff] %v9290_v36  ;;  %v9295_v40 = vld [vmem:[%s9062_s21 + $0xc0] sm:$0xff]  ;;  %vm730_vm11 = vcmp.ge.s32.totalorder %v698_v38, 0  ;;  %2790 = vmatpush.bf16.msrb.mxu1 %v8525_v23  ;;  %v8541_v23 = vld [vmem:[%s11170_s1 + $0x1f8] sm:$0xff] }
  0x2f   : > { %508 = vst [vmem:[#allocation2 + $0xd8] sm:$0xff] %v9295_v40  ;;  %vm9309_vm13 = vmpackc.low %vm8986_vm1, %vm730_vm11 }
  0x30   : > { %1705 = vmatpush.bf16.msrb.mxu2 %v8500_v42  ;;  %v682_v42 = vadd.s32 4294967295, %v388_v37  ;;  %513 = vst [vmem:[#allocation2 + $0x100] sm:$0xff] %v9399_v34 }
  0x31   : > { %2131 = vmatpush.bf16.msrb.mxu3 %v8508_v44  ;;  %v539_v44 = vld [vmem:[#allocation2 + $0xbf] sm:$0xff]  ;;  %v545_v9 = vld [vmem:[#allocation2 + $0xef] sm:$0xff] }
  0x32   : > { %2461 = vmatpush.bf16.msrb.mxu0 %v8516_v47  ;;  %v523_v47 = vld [vmem:[#allocation2 + $0x3f] sm:$0xff]  ;;  %vm714_vm12 = vcmp.ge.s32.totalorder %v682_v42, 0  ;;  %v7338_v53 = vpack.c.bf16 %v539_v44, %v538_v43 }
  0x33   : > { %vm9316_vm14 = vmpackc.low %vm8986_vm1, %vm714_vm12 }
  0x34   : > { %1706 = vmatpush.bf16.msrb.mxu2 %v8499_v51  ;;  %v1103_v51 = vpack.c.bf16 %v9196_v56, %v9193_v55  ;;  %v8496_v55 = vld [vmem:[%s11170_s1 + $0x90] sm:$0xff] }
  0x35   : > { %2132 = vmatpush.bf16.msrb.mxu3 %v8507_v52  ;;  %v11255_v52 = vmov 0  ;;  %v8504_v56 = vld [vmem:[%s11170_s1 + $0xd0] sm:$0xff]  ;;  %v527_v44 = vld [vmem:[#allocation2 + $0x5f] sm:$0xff]  ;;  %v528_v14 = vld [vmem:[#allocation2 + $0x67] sm:$0xff] }
  0x36   : > { %2462 = vmatpush.bf16.msrb.mxu0 %v8515_v54  ;;  %v11256_v52 = vsel %vm9309_vm13, 4294967295, %v11255_v52  ;;  %v9313_v54 = vpack.c.bf16 %v523_v47, %v522_v46  ;;  %v542_v38 = vld [vmem:[#allocation2 + $0xd7] sm:$0xff]  ;;  %v543_v42 = vld [vmem:[#allocation2 + $0xdf] sm:$0xff]  ;;  %v9405_v46 = vpack.c.bf16 %v9290_v36, %v9287_v35  ;;  %v1105_v47 = vpack.c.bf16 %v9298_v41, %v9295_v40 }
  0x37   : > { %v526_v43 = vld [vmem:[#allocation2 + $0x57] sm:$0xff]  ;;  %v362_v35 = vadd.s32 96, %v9081_v12  ;;  %v8494_v40 = vld [vmem:[%s11170_s1 + $0x80] sm:$0xff] }
  0x38   : > { %1707 = vmatpush.bf16.msrb.mxu2 %v8498_v6  ;;  %v9414_v48 = vpack.c.bf16 %v527_v44, %v526_v43  ;;  %v8524_v36 = vld [vmem:[%s11170_s1 + $0x170] sm:$0xff]  ;;  %v8502_v41 = vld [vmem:[%s11170_s1 + $0xc0] sm:$0xff]  ;;  %v8549_v44 = vld [vmem:[%s11170_s1 + $0x238] sm:$0xff] }
  0x39   : > { %2133 = vmatpush.bf16.msrb.mxu3 %v8506_v7  ;;  %v540_v7 = vld [vmem:[#allocation2 + $0xc7] sm:$0xff]  ;;  %2791 = vmatpush.bf16.msrb.mxu1 %v8524_v36  ;;  %v1099_v36 = vpack.c.bf16 %v9084_v13, %v9392_v24  ;;  %v382_v13 = vand.u32 15, %v9081_v12 }
  0x3a   : > { %2463 = vmatpush.bf16.msrb.mxu0 %v8514_v8  ;;  %v541_v8 = vld [vmem:[#allocation2 + $0xcf] sm:$0xff]  ;;  %v8518_v43 = vld [vmem:[%s11170_s1 + $0x140] sm:$0xff] }
  0x3b   : > { %1186 = vmatmul.bf16.gmra.mxu0 %v9202_v62  ;;  %1226 = vmatmul.bf16.gmra.mxu2 %v1101_v63  ;;  %v390_v63 = vand.u32 15, %v358_v49  ;;  %v7341_v20 = vpack.c.bf16 %v541_v8, %v540_v7  ;;  %v11266_v49 = vmov 0  ;;  %v544_v8 = vld [vmem:[#allocation2 + $0xe7] sm:$0xff] }
  0x3c   : > { %7333 = vmatmul.msk.bf16.gmra.mxu3 %vm9207_vm5, %v7332_v1  ;;  %1708 = vmatpush.bf16.msrb.mxu2 %v8497_v28  ;;  %v700_v1 = vadd.s32 4294967295, %v406_v59  ;;  %v392_v28 = vand.u32 15, %v360_v11  ;;  %v394_v59 = vand.u32 15, %v362_v35  ;;  %v8521_v11 = vld [vmem:[%s11170_s1 + $0x158] sm:$0xff]  ;;  %v3702_v32 = vld [vmem:[#allocation2 + $0x61] sm:$0xff] }
  0x3d   : > { %7309 = vmatmul.msk.bf16.gmra.mxu1 %vm9214_vm6, %v9211_v2  ;;  %2134 = vmatpush.bf16.msrb.mxu3 %v8505_v29  ;;  %v684_v6 = vadd.s32 4294967295, %v390_v63  ;;  %v8510_v63 = vld [vmem:[%s11170_s1 + $0x100] sm:$0xff] }
  0x3e   : > { %2464 = vmatpush.bf16.msrb.mxu0 %v8513_v33  ;;  %vm732_vm15 = vcmp.ge.s32.totalorder %v700_v1, 0  ;;  %v9396_v33 = vld [vmem:[%s9062_s21 + $0xe0] sm:$0xff]  ;;  %v686_v37 = vadd.s32 4294967295, %v392_v28  ;;  %v688_v7 = vadd.s32 4294967295, %v394_v59  ;;  %v11276_v59 = vmov 0 }
  0x3f   : > { %vm716_vm0 = vcmp.ge.s32.totalorder %v684_v6, 0  ;;  %vm9360_vm3 = vmpackc.low %vm8986_vm1, %vm732_vm15  ;;  %512 = vst [vmem:[#allocation2 + $0xf8] sm:$0xff] %v9396_v33  ;;  %v8522_v6 = vld [vmem:[%s11170_s1 + $0x160] sm:$0xff] }
  0x40   : > { %1709 = vmatpush.bf16.msrb.mxu2 %v8496_v55  ;;  %v11260_v19 = vsel %vm9360_vm3, 4294967295, %v11259_v19  ;;  %vm9367_vm4 = vmpackc.low %vm8986_vm1, %vm716_vm0  ;;  %vm718_vm8 = vcmp.ge.s32.totalorder %v686_v37, 0  ;;  %v378_v55 = vadd.s32 224, %v9081_v12  ;;  %vm720_vm0 = vcmp.ge.s32.totalorder %v688_v7, 0  ;;  %v8519_v37 = vld [vmem:[%s11170_s1 + $0x148] sm:$0xff]  ;;  %v531_v35 = vld [vmem:[#allocation2 + $0x7f] sm:$0xff] }
  0x41   : > { %2135 = vmatpush.bf16.msrb.mxu3 %v8504_v56  ;;  %11261 = vst [vmem:[#allocation5_spill] sm:$0xff] %v11260_v19  ;;  %vm9417_vm12 = vmpackc.low %vm8986_vm1, %vm718_vm8  ;;  %v2582_v7 = vld [vmem:[#allocation2 + $0x21] sm:$0xff] }
  0x42   : > { %2465 = vmatpush.bf16.msrb.mxu0 %v8512_v58  ;;  %v11267_v49 = vsel %vm9417_vm12, 4294967295, %v11266_v49  ;;  %v410_v56 = vand.u32 15, %v378_v55  ;;  %v8523_v58 = vld [vmem:[%s11170_s1 + $0x168] sm:$0xff]  ;;  %vm9464_vm8 = vmpackc.low %vm8986_vm1, %vm720_vm0  ;;  %v530_v55 = vld [vmem:[#allocation2 + $0x77] sm:$0xff] }
  0x43   : > { %11268 = vst [vmem:[#allocation6_spill] sm:$0xff] %v11267_v49  ;;  %2792 = vmatpush.bf16.msrb.mxu1 %v8523_v58  ;;  %v9503_v58 = vpack.c.bf16 %v531_v35, %v530_v55  ;;  %v11283_v35 = vmov 0 }
  0x44   : > { %1710 = vmatpush.bf16.msrb.mxu2 %v8495_v16  ;;  %v704_v1 = vadd.s32 4294967295, %v410_v56  ;;  %v11269_v16 = vmov 0 }
  0x45   : > { %2136 = vmatpush.bf16.msrb.mxu3 %v8503_v17  ;;  %v7347_v17 = vpack.c.bf16 %v545_v9, %v544_v8  ;;  %v3698_v9 = vld [vmem:[#allocation2 + $0x41] sm:$0xff] }
  0x46   : > { %vm736_vm15 = vcmp.ge.s32.totalorder %v704_v1, 0 }
  0x47   : > { %2793 = vmatpush.bf16.msrb.mxu1 %v8522_v6  ;;  %v2581_v6 = vld [vmem:[#allocation2 + $0x19] sm:$0xff] }
  0x48   : > { %1711 = vmatpush.bf16.msrb.mxu2 %v8494_v40  ;;  %v1107_v40 = vpack.c.bf16 %v9399_v34, %v9396_v33  ;;  %v676_v34 = vadd.s32 4294967295, %v382_v13 }
  0x49   : > { %2137 = vmatpush.bf16.msrb.mxu3 %v8502_v41  ;;  %v11274_v41 = vmov 0 }
  0x4b   : > { %1191 = vmatmul.bf16.gmra.mxu0 %v9253_v25  ;;  %1231 = vmatmul.bf16.gmra.mxu2 %v1102_v26  ;;  %v8511_v26 = vld [vmem:[%s11170_s1 + $0x108] sm:$0xff] }
  0x4c   : > { %7336 = vmatmul.msk.bf16.gmra.mxu3 %vm9258_vm9, %v7335_v30  ;;  %v408_v30 = vand.u32 15, %v376_v10  ;;  %2466 = vmatpush.bf16.msrb.mxu0 %v8511_v26  ;;  %v1106_v10 = vpack.c.bf16 %v9349_v5, %v9346_v4  ;;  %v8520_v4 = vld [vmem:[%s11170_s1 + $0x150] sm:$0xff]  ;;  %v8533_v5 = vld [vmem:[%s11170_s1 + $0x1b8] sm:$0xff] }
  0x4d   : > { %7312 = vmatmul.msk.bf16.gmra.mxu1 %vm9265_vm10, %v9262_v31  ;;  %3244 = vmatpush.bf16.msra.mxu2 %v8533_v5 }
  0x4e   : > { %v702_v29 = vadd.s32 4294967295, %v408_v30  ;;  %v11271_v30 = vmov 0  ;;  %2794 = vmatpush.bf16.msrb.mxu1 %v8521_v11  ;;  %3574 = vmatpush.bf16.msra.mxu3 %v8541_v23  ;;  %v353_v11 = vadd.s32 24, %v9081_v12 }
  0x4f   : > { %v11272_v30 = vsel %vm9464_vm8, 4294967295, %v11271_v30 }
  0x50   : > { %vm734_vm7 = vcmp.ge.s32.totalorder %v702_v29, 0  ;;  %2467 = vmatpush.bf16.msrb.mxu0 %v8510_v63  ;;  %11273 = vst [vmem:[#allocation7_spill] sm:$0xff] %v11272_v30  ;;  %v351_v63 = vadd.s32 8, %v9081_v12  ;;  %v2595_v30 = vld [vmem:[#allocation2 + $0x89] sm:$0xff] }
  0x51   : > { %vm9410_vm11 = vmpackc.low %vm8986_vm1, %vm734_vm7 }
  0x52   : > { %vm9457_vm7 = vmpackc.low %vm8986_vm1, %vm736_vm15  ;;  %2795 = vmatpush.bf16.msrb.mxu1 %v8520_v4  ;;  %v383_v33 = vand.u32 15, %v351_v63  ;;  %v385_v4 = vand.u32 15, %v353_v11 }
  0x53   : > { %v11270_v16 = vsel %vm9457_vm7, 4294967295, %v11269_v16 }
  0x54   : > { %3904 = vmatpush.bf16.msra.mxu0 %v8549_v44  ;;  %v1432_v1 = vadd.s32 1, %v383_v33 }
  0x56   : > { %2796 = vmatpush.bf16.msrb.mxu1 %v8519_v37 }
  0x5a   : > { %2797 = vmatpush.bf16.msrb.mxu1 %v8518_v43  ;;  %v2584_v43 = vld [vmem:[#allocation2 + $0x31] sm:$0xff] }
  0x5b   : > { %1196 = vmatmul.bf16.gmra.mxu0 %v9304_v50  ;;  %1236 = vmatmul.bf16.gmra.mxu2 %v1103_v51  ;;  %v11264_v51 = vmov 0 }
  0x5c   : > { %7339 = vmatmul.msk.bf16.gmra.mxu3 %vm9309_vm13, %v7338_v53  ;;  %v11265_v51 = vsel %vm9410_vm11, 4294967295, %v11264_v51  ;;  %v7344_v53 = vpack.c.bf16 %v543_v42, %v542_v38 }
  0x5d   : > { %7315 = vmatmul.msk.bf16.gmra.mxu1 %vm9316_vm14, %v9313_v54 }
  0x6b   : > { %1201 = vmatmul.bf16.gmra.mxu0 %v9355_v15  ;;  %1241 = vmatmul.bf16.gmra.mxu2 %v1104_v18  ;;  %v529_v18 = vld [vmem:[#allocation2 + $0x6f] sm:$0xff] }
  0x6c   : > { %7342 = vmatmul.msk.bf16.gmra.mxu3 %vm9360_vm3, %v7341_v20  ;;  %v9449_v20 = vpack.c.bf16 %v9341_v61, %v9338_v60  ;;  %v9461_v26 = vpack.c.bf16 %v529_v18, %v528_v14  ;;  %v380_v60 = vadd.s32 240, %v9081_v12  ;;  %v364_v61 = vadd.s32 112, %v9081_v12 }
  0x6d   : > { %7318 = vmatmul.msk.bf16.gmra.mxu1 %vm9367_vm4, %v9364_v21  ;;  %v7638_v14 = vpack.c.bf16 %v2582_v7, %v2581_v6 }
  0x6e   : > { %v412_v28 = vand.u32 15, %v380_v60  ;;  %v396_v29 = vand.u32 15, %v364_v61  ;;  %v8532_v60 = vld [vmem:[%s11170_s1 + $0x1b0] sm:$0xff] }
  0x6f   : > { %v8540_v61 = vld [vmem:[%s11170_s1 + $0x1f0] sm:$0xff]  ;;  %3245 = vmatpush.bf16.msra.mxu2 %v8532_v60 }
  0x70   : > { %v706_v38 = vadd.s32 4294967295, %v412_v28  ;;  %v690_v42 = vadd.s32 4294967295, %v396_v29  ;;  %3575 = vmatpush.bf16.msra.mxu3 %v8540_v61  ;;  %v1434_v29 = vadd.s32 1, %v385_v4  ;;  %v11285_v4 = vmov 0 }
  0x72   : > { %vm738_vm15 = vcmp.ge.s32.totalorder %v706_v38, 0  ;;  %vm722_vm0 = vcmp.ge.s32.totalorder %v690_v42, 0  ;;  %v8548_v38 = vld [vmem:[%s11170_s1 + $0x230] sm:$0xff] }
  0x73   : > { %3905 = vmatpush.bf16.msra.mxu0 %v8548_v38  ;;  %v2583_v42 = vld [vmem:[#allocation2 + $0x29] sm:$0xff] }
  0x74   : > { %v8539_v38 = vld [vmem:[%s11170_s1 + $0x1e8] sm:$0xff] }
  0x75   : > { %3576 = vmatpush.bf16.msra.mxu3 %v8539_v38 }
  0x7b   : > { %1206 = vmatmul.bf16.gmra.mxu0 %v9405_v46  ;;  %1246 = vmatmul.bf16.gmra.mxu2 %v1105_v47  ;;  %v546_v47 = vld [vmem:[#allocation2 + $0xf7] sm:$0xff] }
  0x7c   : > { %7345 = vmatmul.msk.bf16.gmra.mxu3 %vm9410_vm11, %v7344_v53  ;;  %v547_v53 = vld [vmem:[#allocation2 + $0xff] sm:$0xff]  ;;  %vm9506_vm11 = vmpackc.low %vm8986_vm1, %vm722_vm0  ;;  %vm1528_vm0 = vcmp.lt.s32.totalorder %v1432_v1, 16 }
  0x7d   : > { %7321 = vmatmul.msk.bf16.gmra.mxu1 %vm9417_vm12, %v9414_v48  ;;  %v7350_v56 = vpack.c.bf16 %v547_v53, %v546_v47  ;;  %v11277_v59 = vsel %vm9506_vm11, 4294967295, %v11276_v59 }
  0x7e   : > { %11278 = vst [vmem:[#allocation8_spill] sm:$0xff] %v11277_v59 }
  0x8b   : > { %1211 = vmatmul.bf16.gmra.mxu0 %v9449_v20  ;;  %1251 = vmatmul.bf16.gmra.mxu2 %v1106_v10 }
  0x8c   : > { %7348 = vmatmul.msk.bf16.gmra.mxu3 %vm9457_vm7, %v7347_v17  ;;  %vm9499_vm7 = vmpackc.low %vm8986_vm1, %vm738_vm15  ;;  %vm708_vm15 = vcmp.ge.s32.totalorder %v676_v34, 0 }
  0x8d   : > { %7324 = vmatmul.msk.bf16.gmra.mxu1 %vm9464_vm8, %v9461_v26  ;;  %v11275_v41 = vsel %vm9499_vm7, 4294967295, %v11274_v41  ;;  %vm9518_vm3 = vmpackc.low %vm8986_vm1, %vm708_vm15  ;;  %vm1530_vm15 = vcmp.lt.s32.totalorder %v1434_v29, 16  ;;  %v8531_v29 = vld [vmem:[%s11170_s1 + $0x1a8] sm:$0xff] }
  0x8e   : > { %3246 = vmatpush.bf16.msra.mxu2 %v8531_v29 }
  0x9b   : > { %1216 = vmatmul.bf16.gmra.mxu0 %v1099_v36  ;;  %1256 = vmatmul.bf16.gmra.mxu2 %v1107_v40  ;;  %v7641_v36 = vpack.c.bf16 %v2584_v43, %v2583_v42 }
  0x9c   : > { %7351 = vmatmul.msk.bf16.gmra.mxu3 %vm9499_vm7, %v7350_v56  ;;  %vm9523_vm7 = vmpackc.low %vm1528_vm0, %vm8986_vm1  ;;  %v355_v56 = vadd.s32 40, %v9081_v12 }
  0x9d   : > { %7327 = vmatmul.msk.bf16.gmra.mxu1 %vm9506_vm11, %v9503_v58  ;;  %vm9553_vm0 = vmpackc.low %vm1530_vm15, %vm8986_vm1 }
  0x9e   : > { %v11284_v35 = vsel %vm9553_vm0, 4294967295, %v11283_v35  ;;  %v387_v13 = vand.u32 15, %v355_v56  ;;  %v2587_v56 = vld [vmem:[#allocation2 + $0x49] sm:$0xff] }
  0xa8   : > { %v1182_v8 = vpop.f32.mrf.mxu0 }
  0xaa   : > { %v1319_v18 = vpop.f32.mrf.mxu1 }
  0xab   : > { %v9528_v17 = vadd.f32 %v1319_v18, %v1182_v8  ;;  %1712 = vmatmul.bf16.vlgmr.msrb.gmra.mxu2 %v11195_v45  ;;  %2468 = vmatmul.bf16.vlgmr.msrb.gmra.mxu0 %v9202_v62  ;;  %v1436_v8 = vadd.s32 1, %v387_v13  ;;  %v2588_v13 = vld [vmem:[#allocation2 + $0x51] sm:$0xff]  ;;  %v2265_v45 = vld [vmem:[#allocation2 + $0x88] sm:$0xff] }
  0xac   : > { %7495 = vmatmul.msk.bf16.vlgmr.msrb.gmra.mxu3 %vm9518_vm3, %v9211_v2 }
  0xad   : > { %7639 = vmatmul.msk.bf16.vlgmr.msrb.gmra.mxu1 %vm9523_vm7, %v7638_v14  ;;  %vm1532_vm15 = vcmp.lt.s32.totalorder %v1436_v8, 16  ;;  %v11287_v8 = vmov 0 }
  0xae   : > { %v1222_v5 = vpop.f32.mrf.mxu2 }
  0xaf   : > { %v1359_v62 = vpop.f32.mrf.mxu3 }
  0xb0   : > { %v9543_v23 = vadd.f32 %v1359_v62, %v1222_v5  ;;  %v1184_v28 = vpop.f32.mrf.mxu0 }
  0xb2   : > { %v1321_v2 = vpop.f32.mrf.mxu1 }
  0xb3   : > { %v9545_v37 = vadd.f32 %v1321_v2, %v1184_v28  ;;  %v357_v28 = vadd.s32 56, %v9081_v12 }
  0xb5   : > { %v389_v42 = vand.u32 15, %v357_v28 }
  0xb6   : > { %v1224_v44 = vpop.f32.mrf.mxu2 }
  0xb7   : > { %v1361_v47 = vpop.f32.mrf.mxu3 }
  0xb8   : > { %v9550_v53 = vadd.f32 %v1361_v47, %v1224_v44  ;;  %v1187_v55 = vpop.f32.mrf.mxu0 }
  0xba   : > { %v1324_v40 = vpop.f32.mrf.mxu1 }
  0xbb   : > { %v9558_v63 = vadd.f32 %v1324_v40, %v1187_v55  ;;  %7402 = vmatmul.msk.bf16.gmra.mxu2 %vm9553_vm0, %v7638_v14  ;;  %2473 = vmatmul.bf16.gmra.mxu0 %v9253_v25  ;;  %v2585_v14 = vld [vmem:[#allocation2 + $0x39] sm:$0xff]  ;;  %v2586_v25 = vld [vmem:[#allocation2 + $0x41] sm:$0xff]  ;;  %v1438_v55 = vadd.s32 1, %v389_v42 }
  0xbc   : > { %7498 = vmatmul.msk.bf16.gmra.mxu3 %vm9214_vm6, %v9262_v31  ;;  %v7644_v5 = vpack.c.bf16 %v2586_v25, %v2585_v14  ;;  %v8547_v40 = vld [vmem:[%s11170_s1 + $0x228] sm:$0xff]  ;;  %v7647_v14 = vpack.c.bf16 %v2588_v13, %v2587_v56 }
  0xbd   : > { %7642 = vmatmul.msk.bf16.gmra.mxu1 %vm9553_vm0, %v7641_v36  ;;  %vm9575_vm0 = vmpackc.low %vm1532_vm15, %vm8986_vm1  ;;  %3906 = vmatpush.bf16.msra.mxu0 %v8547_v40  ;;  %vm1534_vm15 = vcmp.lt.s32.totalorder %v1438_v55, 16  ;;  %v11289_v40 = vmov 0 }
  0xbe   : > { %v1227_v33 = vpop.f32.mrf.mxu2  ;;  %v11286_v4 = vsel %vm9575_vm0, 4294967295, %v11285_v4 }
  0xbf   : > { %v1364_v34 = vpop.f32.mrf.mxu3 }
  0xc0   : > { %v9568_v1 = vadd.f32 %v1364_v34, %v1227_v33  ;;  %v1189_v6 = vpop.f32.mrf.mxu0 }
  0xc2   : > { %v1326_v7 = vpop.f32.mrf.mxu1 }
  0xc3   : > { %v9570_v18 = vadd.f32 %v1326_v7, %v1189_v6 }
  0xc6   : > { %v1229_v11 = vpop.f32.mrf.mxu2 }
  0xc7   : > { %v1366_v60 = vpop.f32.mrf.mxu3 }
  0xc8   : > { %v9572_v61 = vadd.f32 %v1366_v60, %v1229_v11  ;;  %v1192_v31 = vpop.f32.mrf.mxu0  ;;  %v359_v11 = vadd.s32 72, %v9081_v12 }
  0xca   : > { %v1329_v62 = vpop.f32.mrf.mxu1 }
  0xcb   : > { %v9580_v2 = vadd.f32 %v1329_v62, %v1192_v31  ;;  %7405 = vmatmul.msk.bf16.gmra.mxu2 %vm9575_vm0, %v7641_v36  ;;  %2478 = vmatmul.bf16.gmra.mxu0 %v9304_v50  ;;  %v391_v31 = vand.u32 15, %v359_v11 }
  0xcc   : > { %7501 = vmatmul.msk.bf16.gmra.mxu3 %vm9265_vm10, %v9313_v54 }
  0xcd   : > { %7645 = vmatmul.msk.bf16.gmra.mxu1 %vm9575_vm0, %v7644_v5  ;;  %vm9606_vm0 = vmpackc.low %vm1534_vm15, %vm8986_vm1 }
  0xce   : > { %v1232_v43 = vpop.f32.mrf.mxu2  ;;  %v11288_v8 = vsel %vm9606_vm0, 4294967295, %v11287_v8 }
  0xcf   : > { %v1369_v50 = vpop.f32.mrf.mxu3 }
  0xd0   : > { %v9596_v44 = vadd.f32 %v1369_v50, %v1232_v43  ;;  %v1194_v47 = vpop.f32.mrf.mxu0  ;;  %v1440_v43 = vadd.s32 1, %v391_v31 }
  0xd2   : > { %v1331_v54 = vpop.f32.mrf.mxu1  ;;  %vm1536_vm15 = vcmp.lt.s32.totalorder %v1440_v43, 16  ;;  %v2591_v43 = vld [vmem:[#allocation2 + $0x69] sm:$0xff] }
  0xd3   : > { %v9598_v36 = vadd.f32 %v1331_v54, %v1194_v47 }
  0xd6   : > { %v1234_v33 = vpop.f32.mrf.mxu2 }
  0xd7   : > { %v1371_v34 = vpop.f32.mrf.mxu3 }
  0xd8   : > { %v9603_v6 = vadd.f32 %v1371_v34, %v1234_v33  ;;  %v1197_v7 = vpop.f32.mrf.mxu0  ;;  %v361_v33 = vadd.s32 88, %v9081_v12 }
  0xda   : > { %v1334_v25 = vpop.f32.mrf.mxu1  ;;  %v393_v11 = vand.u32 15, %v361_v33 }
  0xdb   : > { %v9611_v60 = vadd.f32 %v1334_v25, %v1197_v7  ;;  %7408 = vmatmul.msk.bf16.gmra.mxu2 %vm9606_vm0, %v7644_v5  ;;  %2483 = vmatmul.bf16.gmra.mxu0 %v9355_v15  ;;  %v2589_v5 = vld [vmem:[#allocation2 + $0x59] sm:$0xff]  ;;  %v2590_v15 = vld [vmem:[#allocation2 + $0x61] sm:$0xff] }
  0xdc   : > { %7504 = vmatmul.msk.bf16.gmra.mxu3 %vm9316_vm14, %v9364_v21  ;;  %v7650_v56 = vpack.c.bf16 %v2590_v15, %v2589_v5  ;;  %v8530_v7 = vld [vmem:[%s11170_s1 + $0x1a0] sm:$0xff]  ;;  %v2592_v5 = vld [vmem:[#allocation2 + $0x71] sm:$0xff] }
  0xdd   : > { %7648 = vmatmul.msk.bf16.gmra.mxu1 %vm9606_vm0, %v7647_v14  ;;  %vm9628_vm0 = vmpackc.low %vm1536_vm15, %vm8986_vm1  ;;  %v8538_v25 = vld [vmem:[%s11170_s1 + $0x1e0] sm:$0xff]  ;;  %3247 = vmatpush.bf16.msra.mxu2 %v8530_v7  ;;  %v7653_v33 = vpack.c.bf16 %v2592_v5, %v2591_v43 }
  0xde   : > { %v1237_v62 = vpop.f32.mrf.mxu2  ;;  %v11290_v40 = vsel %vm9628_vm0, 4294967295, %v11289_v40  ;;  %3577 = vmatpush.bf16.msra.mxu3 %v8538_v25  ;;  %v363_v25 = vadd.s32 104, %v9081_v12 }
  0xdf   : > { %v1374_v28 = vpop.f32.mrf.mxu3  ;;  %11291 = vst [vmem:[#allocation9_spill] sm:$0xff] %v11290_v40 }
  0xe0   : > { %v9621_v29 = vadd.f32 %v1374_v28, %v1237_v62  ;;  %v1199_v38 = vpop.f32.mrf.mxu0  ;;  %v1442_v28 = vadd.s32 1, %v393_v11 }
  0xe2   : > { %v1336_v42 = vpop.f32.mrf.mxu1  ;;  %vm1538_vm15 = vcmp.lt.s32.totalorder %v1442_v28, 16 }
  0xe3   : > { %v9623_v50 = vadd.f32 %v1336_v42, %v1199_v38  ;;  %v8546_v42 = vld [vmem:[%s11170_s1 + $0x220] sm:$0xff] }
  0xe4   : > { %3907 = vmatpush.bf16.msra.mxu0 %v8546_v42 }
  0xe6   : > { %v1239_v47 = vpop.f32.mrf.mxu2 }
  0xe7   : > { %v1376_v54 = vpop.f32.mrf.mxu3 }
  0xe8   : > { %v9625_v55 = vadd.f32 %v1376_v54, %v1239_v47  ;;  %v1202_v21 = vpop.f32.mrf.mxu0 }
  0xea   : > { %v1339_v13 = vpop.f32.mrf.mxu1 }
  0xeb   : > { %v9633_v34 = vadd.f32 %v1339_v13, %v1202_v21  ;;  %7411 = vmatmul.msk.bf16.gmra.mxu2 %vm9628_vm0, %v7647_v14  ;;  %2488 = vmatmul.bf16.gmra.mxu0 %v9405_v46  ;;  %v11293_v13 = vmov 0 }
  0xec   : > { %7507 = vmatmul.msk.bf16.gmra.mxu3 %vm9367_vm4, %v9414_v48 }
  0xed   : > { %7651 = vmatmul.msk.bf16.gmra.mxu1 %vm9628_vm0, %v7650_v56  ;;  %vm9659_vm0 = vmpackc.low %vm1538_vm15, %vm8986_vm1 }
  0xee   : > { %v1242_v31 = vpop.f32.mrf.mxu2  ;;  %v11294_v13 = vsel %vm9659_vm0, 4294967295, %v11293_v13 }
  0xef   : > { %v1379_v46 = vpop.f32.mrf.mxu3  ;;  %11295 = vst [vmem:[#allocation11_spill] sm:$0xff] %v11294_v13 }
  0xf0   : > { %v9649_v14 = vadd.f32 %v1379_v46, %v1242_v31  ;;  %v1204_v62 = vpop.f32.mrf.mxu0  ;;  %v395_v31 = vand.u32 15, %v363_v25 }
  0xf2   : > { %v1341_v48 = vpop.f32.mrf.mxu1  ;;  %v1444_v43 = vadd.s32 1, %v395_v31 }
  0xf3   : > { %v9651_v38 = vadd.f32 %v1341_v48, %v1204_v62 }
  0xf4   : > { %vm1540_vm15 = vcmp.lt.s32.totalorder %v1444_v43, 16  ;;  %v8537_v43 = vld [vmem:[%s11170_s1 + $0x1d8] sm:$0xff] }
  0xf5   : > { %3578 = vmatpush.bf16.msra.mxu3 %v8537_v43 }
  0xf6   : > { %v1244_v15 = vpop.f32.mrf.mxu2 }
  0xf7   : > { %v1381_v47 = vpop.f32.mrf.mxu3 }
  0xf8   : > { %v9656_v54 = vadd.f32 %v1381_v47, %v1244_v15  ;;  %v1207_v21 = vpop.f32.mrf.mxu0  ;;  %v2594_v15 = vld [vmem:[#allocation2 + $0x81] sm:$0xff] }
  0xfa   : > { %11292 = vst [vmem:[#allocation10_spill] sm:$0xff] %v9656_v54  ;;  %v1344_v7 = vpop.f32.mrf.mxu1  ;;  %v2600_v54 = vld [vmem:[#allocation2 + $0xb1] sm:$0xff] }
  0xfb   : > { %v9664_v11 = vadd.f32 %v1344_v7, %v1207_v21  ;;  %7414 = vmatmul.msk.bf16.gmra.mxu2 %vm9659_vm0, %v7650_v56  ;;  %2493 = vmatmul.bf16.gmra.mxu0 %v9449_v20  ;;  %v2264_v56 = vld [vmem:[#allocation2 + $0x80] sm:$0xff] }
  0xfc   : > { %7510 = vmatmul.msk.bf16.gmra.mxu3 %vm9417_vm12, %v9461_v26  ;;  %v2593_v20 = vld [vmem:[#allocation2 + $0x79] sm:$0xff]  ;;  %v2385_v26 = vpack.c.bf16 %v2264_v56, %v9392_v24 }
  0xfd   : > { %7654 = vmatmul.msk.bf16.gmra.mxu1 %vm9659_vm0, %v7653_v33  ;;  %vm9682_vm0 = vmpackc.low %vm1540_vm15, %vm8986_vm1  ;;  %v8529_v24 = vld [vmem:[%s11170_s1 + $0x198] sm:$0xff] }
  0xfe   : > { %v1247_v46 = vpop.f32.mrf.mxu2  ;;  %3248 = vmatpush.bf16.msra.mxu2 %v8529_v24 }
  0xff   : > { %v1384_v62 = vpop.f32.mrf.mxu3 }
 0x100   : > { %v9674_v48 = vadd.f32 %v1384_v62, %v1247_v46  ;;  %v1209_v28 = vpop.f32.mrf.mxu0  ;;  %v11298_v46 = vmov 0  ;;  %v7656_v62 = vpack.c.bf16 %v2594_v15, %v2593_v20 }
 0x101   : > { %v11299_v46 = vsel %vm9682_vm0, 4294967295, %v11298_v46 }
 0x102   : > { %11296 = vst [vmem:[#allocation12_spill] sm:$0xff] %v9674_v48  ;;  %v1346_v42 = vpop.f32.mrf.mxu1  ;;  %v367_v48 = vadd.s32 136, %v9081_v12 }
 0x103   : > { %v9676_v5 = vadd.f32 %v1346_v42, %v1209_v28  ;;  %11300 = vst [vmem:[#allocation14_spill] sm:$0xff] %v11299_v46  ;;  %v365_v28 = vadd.s32 120, %v9081_v12  ;;  %v2266_v46 = vld [vmem:[#allocation2 + $0x90] sm:$0xff] }
 0x105   : > { %v397_v56 = vand.u32 15, %v365_v28  ;;  %v8545_v28 = vld [vmem:[%s11170_s1 + $0x218] sm:$0xff] }
 0x106   : > { %v1249_v47 = vpop.f32.mrf.mxu2  ;;  %3908 = vmatpush.bf16.msra.mxu0 %v8545_v28 }
 0x107   : > { %v1386_v21 = vpop.f32.mrf.mxu3 }
 0x108   : > { %v9679_v7 = vadd.f32 %v1386_v21, %v1249_v47  ;;  %v1212_v25 = vpop.f32.mrf.mxu0  ;;  %v1446_v21 = vadd.s32 1, %v397_v56 }
 0x10a   : > { %11297 = vst [vmem:[#allocation13_spill] sm:$0xff] %v9679_v7  ;;  %v1349_v31 = vpop.f32.mrf.mxu1  ;;  %vm1542_vm15 = vcmp.lt.s32.totalorder %v1446_v21, 16  ;;  %v2596_v7 = vld [vmem:[#allocation2 + $0x91] sm:$0xff] }
 0x10b   : > { %v9687_v42 = vadd.f32 %v1349_v31, %v1212_v25  ;;  %7417 = vmatmul.msk.bf16.gmra.mxu2 %vm9682_vm0, %v7653_v33  ;;  %2498 = vmatmul.bf16.gmra.mxu0 %v2385_v26  ;;  %v1839_v25 = vld [vmem:[#allocation2 + $0x87] sm:$0xff]  ;;  %v1840_v31 = vld [vmem:[#allocation2 + $0x8f] sm:$0xff]  ;;  %v7659_v21 = vpack.c.bf16 %v2596_v7, %v2595_v30 }
 0x10c   : > { %7513 = vmatmul.msk.bf16.gmra.mxu3 %vm9464_vm8, %v9503_v58 }
 0x10d   : > { %7657 = vmatmul.msk.bf16.gmra.mxu1 %vm9682_vm0, %v7656_v62  ;;  %vm9712_vm0 = vmpackc.low %vm1542_vm15, %vm8986_vm1 }
 0x10e   : > { %v1252_v20 = vpop.f32.mrf.mxu2 }
 0x10f   : > { %v1389_v33 = vpop.f32.mrf.mxu3 }
 0x110   : > { %v9702_v15 = vadd.f32 %v1389_v33, %v1252_v20  ;;  %v1214_v47 = vpop.f32.mrf.mxu0  ;;  %v2386_v20 = vpack.c.bf16 %v2266_v46, %v2265_v45  ;;  %v399_v45 = vand.u32 15, %v367_v48 }
 0x112   : > { %11301 = vst [vmem:[#allocation15_spill] sm:$0xff] %v9702_v15  ;;  %v1351_v58 = vpop.f32.mrf.mxu1 }
 0x113   : > { %v9704_v26 = vadd.f32 %v1351_v58, %v1214_v47  ;;  %v11303_v47 = vmov 0  ;;  %v7515_v58 = vpack.c.bf16 %v1840_v31, %v1839_v25  ;;  %v1448_v31 = vadd.s32 1, %v399_v45 }
 0x114   : > { %v11304_v47 = vsel %vm9712_vm0, 4294967295, %v11303_v47 }
 0x115   : > { %11305 = vst [vmem:[#allocation17_spill] sm:$0xff] %v11304_v47  ;;  %vm1544_vm15 = vcmp.lt.s32.totalorder %v1448_v31, 16  ;;  %v8536_v31 = vld [vmem:[%s11170_s1 + $0x1d0] sm:$0xff] }
 0x116   : > { %v1254_v24 = vpop.f32.mrf.mxu2  ;;  %3579 = vmatpush.bf16.msra.mxu3 %v8536_v31 }
 0x117   : > { %v1391_v43 = vpop.f32.mrf.mxu3 }
 0x118   : > { %v9709_v33 = vadd.f32 %v1391_v43, %v1254_v24  ;;  %v1217_v56 = vpop.f32.mrf.mxu0  ;;  %v1841_v24 = vld [vmem:[#allocation2 + $0x97] sm:$0xff] }
 0x119   : > { %v2267_v43 = vld [vmem:[#allocation2 + $0x98] sm:$0xff] }
 0x11a   : > { %11302 = vst [vmem:[#allocation16_spill] sm:$0xff] %v9709_v33  ;;  %v1354_v15 = vpop.f32.mrf.mxu1 }
 0x11b   : > { %v9717_v13 = vadd.f32 %v1354_v15, %v1217_v56  ;;  %7420 = vmatmul.msk.bf16.gmra.mxu2 %vm9712_vm0, %v7656_v62  ;;  %2503 = vmatmul.bf16.gmra.mxu0 %v2386_v20  ;;  %v2268_v62 = vld [vmem:[#allocation2 + $0xa0] sm:$0xff] }
 0x11c   : > { %7516 = vmatmul.msk.bf16.gmra.mxu3 %vm9506_vm11, %v7515_v58  ;;  %v1842_v20 = vld [vmem:[#allocation2 + $0x9f] sm:$0xff]  ;;  %v2387_v33 = vpack.c.bf16 %v2268_v62, %v2267_v43 }
 0x11d   : > { %7660 = vmatmul.msk.bf16.gmra.mxu1 %vm9712_vm0, %v7659_v21  ;;  %v2597_v56 = vld [vmem:[#allocation2 + $0x99] sm:$0xff]  ;;  %v2598_v58 = vld [vmem:[#allocation2 + $0xa1] sm:$0xff]  ;;  %vm9732_vm0 = vmpackc.low %vm1544_vm15, %vm8986_vm1  ;;  %v7518_v45 = vpack.c.bf16 %v1842_v20, %v1841_v24 }
 0x11e   : > { %v1257_v46 = vpop.f32.mrf.mxu2 }
 0x11f   : > { %v1394_v28 = vpop.f32.mrf.mxu3 }
 0x120   : > { %v9725_v25 = vadd.f32 %v1394_v28, %v1257_v46  ;;  %v1219_v30 = vpop.f32.mrf.mxu0  ;;  %v11308_v46 = vmov 0  ;;  %v7662_v28 = vpack.c.bf16 %v2598_v58, %v2597_v56 }
 0x121   : > { %v11309_v46 = vsel %vm9732_vm0, 4294967295, %v11308_v46 }
 0x122   : > { %11306 = vst [vmem:[#allocation18_spill] sm:$0xff] %v9725_v25  ;;  %v1356_v7 = vpop.f32.mrf.mxu1  ;;  %v2599_v25 = vld [vmem:[#allocation2 + $0xa9] sm:$0xff] }
 0x123   : > { %v9727_v15 = vadd.f32 %v1356_v7, %v1219_v30  ;;  %11310 = vst [vmem:[#allocation20_spill] sm:$0xff] %v11309_v46  ;;  %v369_v7 = vadd.s32 152, %v9081_v12  ;;  %v1844_v46 = vld [vmem:[#allocation2 + $0xaf] sm:$0xff] }
 0x126   : > { %v1259_v59 = vpop.f32.mrf.mxu2 }
 0x127   : > { %v1396_v47 = vpop.f32.mrf.mxu3 }
 0x128   : > { %v9729_v48 = vadd.f32 %v1396_v47, %v1259_v59  ;;  %v2469_v49 = vpop.f32.mrf.mxu0  ;;  %v8528_v59 = vld [vmem:[%s11170_s1 + $0x190] sm:$0xff]  ;;  %v401_v47 = vand.u32 15, %v369_v7 }
 0x129   : > { %3249 = vmatpush.bf16.msra.mxu2 %v8528_v59 }
 0x12a   : > { %11307 = vst [vmem:[#allocation19_spill] sm:$0xff] %v9729_v48  ;;  %v2799_v30 = vpop.f32.mrf.mxu1  ;;  %v1450_v20 = vadd.s32 1, %v401_v47  ;;  %v2270_v48 = vld [vmem:[#allocation2 + $0xb0] sm:$0xff] }
 0x12b   : > { %7423 = vmatmul.msk.bf16.gmra.mxu2 %vm9732_vm0, %v7659_v21  ;;  %2508 = vmatmul.bf16.gmra.mxu0 %v2387_v33  ;;  %v2388_v47 = vpack.c.bf16 %v2270_v48, %v2269_v39 }
 0x12c   : > { %7519 = vmatmul.msk.bf16.gmra.mxu3 %vm9153_vm2, %v7518_v45  ;;  %v1843_v45 = vld [vmem:[#allocation2 + $0xa7] sm:$0xff]  ;;  %vm1546_vm15 = vcmp.lt.s32.totalorder %v1450_v20, 16 }
 0x12d   : > { %7663 = vmatmul.msk.bf16.gmra.mxu1 %vm9732_vm0, %v7662_v28  ;;  %vm9757_vm0 = vmpackc.low %vm1546_vm15, %vm8986_vm1 }
 0x12e   : > { %v1713_v24 = vpop.f32.mrf.mxu2 }
 0x12f   : > { %v1793_v21 = vadd.f32 %v1713_v24, %v9528_v17  ;;  %v2139_v33 = vpop.f32.mrf.mxu3  ;;  %v8544_v17 = vld [vmem:[%s11170_s1 + $0x210] sm:$0xff] }
 0x130   : > { %v2471_v43 = vpop.f32.mrf.mxu0  ;;  %3909 = vmatpush.bf16.msra.mxu0 %v8544_v17 }
 0x131   : > { %v2219_v62 = vadd.f32 %v2139_v33, %v1793_v21  ;;  %v11311_v21 = vmov 0  ;;  %v7665_v33 = vpack.c.bf16 %v2600_v54, %v2599_v25 }
 0x132   : > { %v2801_v56 = vpop.f32.mrf.mxu1  ;;  %v11312_v21 = vsel %vm9757_vm0, 4294967295, %v11311_v21 }
 0x133   : > { %v2549_v58 = vadd.f32 %v2469_v49, %v2219_v62  ;;  %11313 = vst [vmem:[#allocation21_spill] sm:$0xff] %v11312_v21  ;;  %v11314_v21 = vmov 0 }
 0x135   : > { %v9750_v7 = vadd.f32 %v2799_v30, %v2549_v58  ;;  %v7521_v30 = vpack.c.bf16 %v1844_v46, %v1843_v45  ;;  %v371_v58 = vadd.s32 168, %v9081_v12 }
 0x136   : > { %v1715_v59 = vpop.f32.mrf.mxu2 }
 0x137   : > { %v1794_v31 = vadd.f32 %v1715_v59, %v9545_v37  ;;  %v2141_v24 = vpop.f32.mrf.mxu3  ;;  %v403_v48 = vand.u32 15, %v371_v58  ;;  %v2601_v58 = vld [vmem:[#allocation2 + $0xb9] sm:$0xff] }
 0x138   : > { %v2474_v49 = vpop.f32.mrf.mxu0 }
 0x139   : > { %v2220_v62 = vadd.f32 %v2141_v24, %v1794_v31  ;;  %v1452_v59 = vadd.s32 1, %v403_v48  ;;  %v1845_v24 = vld [vmem:[#allocation2 + $0xb7] sm:$0xff] }
 0x13a   : > { %v2804_v20 = vpop.f32.mrf.mxu1 }
 0x13b   : > { %7426 = vmatmul.msk.bf16.gmra.mxu2 %vm9757_vm0, %v7662_v28  ;;  %2513 = vmatmul.bf16.gmra.mxu0 %v2388_v47  ;;  %v2550_v37 = vadd.f32 %v2471_v43, %v2220_v62  ;;  %v8557_v28 = vld [vmem:[%s11172_s3 + $0x38] sm:$0xff]  ;;  %vm1548_vm15 = vcmp.lt.s32.totalorder %v1452_v59, 16  ;;  %v373_v59 = vadd.s32 184, %v9081_v12 }
 0x13c   : > { %7522 = vmatmul.msk.bf16.gmra.mxu3 %vm9207_vm5, %v7521_v30  ;;  %4599 = vmatpush.bf16.msra.mxu1 %v8557_v28  ;;  %v2271_v47 = vld [vmem:[#allocation2 + $0xb8] sm:$0xff]  ;;  %v2272_v30 = vld [vmem:[#allocation2 + $0xc0] sm:$0xff] }
 0x13d   : > { %7666 = vmatmul.msk.bf16.gmra.mxu1 %vm9757_vm0, %v7665_v33  ;;  %v9768_v39 = vadd.f32 %v2801_v56, %v2550_v37  ;;  %v1846_v62 = vld [vmem:[#allocation2 + $0xbf] sm:$0xff]  ;;  %vm9778_vm0 = vmpackc.low %vm1548_vm15, %vm8986_vm1 }
 0x13e   : > { %v1718_v46 = vpop.f32.mrf.mxu2  ;;  %v11315_v21 = vsel %vm9778_vm0, 4294967295, %v11314_v21 }
 0x13f   : > { %v1795_v54 = vadd.f32 %v1718_v46, %v9558_v63  ;;  %v2144_v25 = vpop.f32.mrf.mxu3  ;;  %v2602_v63 = vld [vmem:[#allocation2 + $0xc1] sm:$0xff]  ;;  %11316 = vst [vmem:[#allocation22_spill] sm:$0xff] %v11315_v21  ;;  %v2604_v21 = vld [vmem:[#allocation2 + $0xd1] sm:$0xff] }
 0x140   : > { %v2476_v45 = vpop.f32.mrf.mxu0 }
 0x141   : > { %v2221_v17 = vadd.f32 %v2144_v25, %v1795_v54  ;;  %v2389_v54 = vpack.c.bf16 %v2272_v30, %v2271_v47  ;;  %v405_v47 = vand.u32 15, %v373_v59  ;;  %v8535_v30 = vld [vmem:[%s11170_s1 + $0x1c8] sm:$0xff] }
 0x142   : > { %v2806_v31 = vpop.f32.mrf.mxu1  ;;  %3580 = vmatpush.bf16.msra.mxu3 %v8535_v30 }
 0x143   : > { %v2551_v43 = vadd.f32 %v2474_v49, %v2221_v17  ;;  %v7524_v49 = vpack.c.bf16 %v1846_v62, %v1845_v24  ;;  %v7668_v17 = vpack.c.bf16 %v2602_v63, %v2601_v58 }
 0x145   : > { %v9774_v56 = vadd.f32 %v2804_v20, %v2551_v43 }
 0x146   : > { %v1720_v37 = vpop.f32.mrf.mxu2 }
 0x147   : > { %v1796_v46 = vadd.f32 %v1720_v37, %v9570_v18  ;;  %v2146_v48 = vpop.f32.mrf.mxu3  ;;  %v8527_v18 = vld [vmem:[%s11170_s1 + $0x188] sm:$0xff]  ;;  %v1454_v37 = vadd.s32 1, %v405_v47 }
 0x148   : > { %v2479_v25 = vpop.f32.mrf.mxu0  ;;  %3250 = vmatpush.bf16.msra.mxu2 %v8527_v18 }
 0x149   : > { %v2222_v28 = vadd.f32 %v2146_v48, %v1796_v46  ;;  %vm1550_vm15 = vcmp.lt.s32.totalorder %v1454_v37, 16 }
 0x14a   : > { %v2809_v20 = vpop.f32.mrf.mxu1 }
 0x14b   : > { %7429 = vmatmul.msk.bf16.gmra.mxu2 %vm9778_vm0, %v7665_v33  ;;  %2518 = vmatmul.bf16.gmra.mxu0 %v2389_v54  ;;  %v2552_v43 = vadd.f32 %v2476_v45, %v2222_v28  ;;  %v1847_v54 = vld [vmem:[#allocation2 + $0xc7] sm:$0xff]  ;;  %v2274_v28 = vld [vmem:[#allocation2 + $0xd0] sm:$0xff] }
 0x14c   : > { %7525 = vmatmul.msk.bf16.gmra.mxu3 %vm9258_vm9, %v7524_v49  ;;  %v1848_v49 = vld [vmem:[#allocation2 + $0xcf] sm:$0xff] }
 0x14d   : > { %7669 = vmatmul.msk.bf16.gmra.mxu1 %vm9778_vm0, %v7668_v17  ;;  %v9792_v24 = vadd.f32 %v2806_v31, %v2552_v43  ;;  %v2273_v31 = vld [vmem:[#allocation2 + $0xc8] sm:$0xff]  ;;  %vm9805_vm0 = vmpackc.low %vm1550_vm15, %vm8986_vm1 }
 0x14e   : > { %v1723_v33 = vpop.f32.mrf.mxu2  ;;  %v2603_v43 = vld [vmem:[#allocation2 + $0xc9] sm:$0xff]  ;;  %v2390_v47 = vpack.c.bf16 %v2274_v28, %v2273_v31 }
 0x14f   : > { %v1797_v45 = vadd.f32 %v1723_v33, %v9580_v2  ;;  %v2149_v62 = vpop.f32.mrf.mxu3  ;;  %v8543_v2 = vld [vmem:[%s11170_s1 + $0x208] sm:$0xff] }
 0x150   : > { %v2481_v58 = vpop.f32.mrf.mxu0  ;;  %3910 = vmatpush.bf16.msra.mxu0 %v8543_v2 }
 0x151   : > { %v2223_v63 = vadd.f32 %v2149_v62, %v1797_v45  ;;  %v11317_v45 = vmov 0  ;;  %v7671_v62 = vpack.c.bf16 %v2604_v21, %v2603_v43 }
 0x152   : > { %v2811_v46 = vpop.f32.mrf.mxu1  ;;  %v11318_v45 = vsel %vm9805_vm0, 4294967295, %v11317_v45 }
 0x153   : > { %v2553_v48 = vadd.f32 %v2479_v25, %v2223_v63 }
 0x155   : > { %v9798_v59 = vadd.f32 %v2809_v20, %v2553_v48  ;;  %v7527_v20 = vpack.c.bf16 %v1848_v49, %v1847_v54  ;;  %v375_v48 = vadd.s32 200, %v9081_v12 }
 0x156   : > { %v1725_v18 = vpop.f32.mrf.mxu2 }
 0x157   : > { %v1798_v30 = vadd.f32 %v1725_v18, %v9598_v36  ;;  %v2151_v33 = vpop.f32.mrf.mxu3  ;;  %v407_v28 = vand.u32 15, %v375_v48  ;;  %v2605_v48 = vld [vmem:[#allocation2 + $0xd9] sm:$0xff] }
 0x158   : > { %v2484_v25 = vpop.f32.mrf.mxu0 }
 0x159   : > { %v2224_v63 = vadd.f32 %v2151_v33, %v1798_v30  ;;  %v1456_v18 = vadd.s32 1, %v407_v28  ;;  %v1849_v33 = vld [vmem:[#allocation2 + $0xd7] sm:$0xff] }
 0x15a   : > { %v2814_v37 = vpop.f32.mrf.mxu1 }
 0x15b   : > { %7432 = vmatmul.msk.bf16.gmra.mxu2 %vm9805_vm0, %v7668_v17  ;;  %2523 = vmatmul.bf16.gmra.mxu0 %v2390_v47  ;;  %v2554_v36 = vadd.f32 %v2481_v58, %v2224_v63  ;;  %v8556_v17 = vld [vmem:[%s11172_s3 + $0x30] sm:$0xff]  ;;  %v2275_v47 = vld [vmem:[#allocation2 + $0xd8] sm:$0xff]  ;;  %vm1552_vm15 = vcmp.lt.s32.totalorder %v1456_v18, 16  ;;  %v377_v18 = vadd.s32 216, %v9081_v12 }
 0x15c   : > { %7528 = vmatmul.msk.bf16.gmra.mxu3 %vm9309_vm13, %v7527_v20  ;;  %4600 = vmatpush.bf16.msra.mxu1 %v8556_v17  ;;  %v2276_v20 = vld [vmem:[#allocation2 + $0xe0] sm:$0xff]  ;;  %vm11322_vm13 = vnez %v11260_v19  ;;  %v379_v19 = vadd.s32 232, %v9081_v12 }
 0x15d   : > { %7672 = vmatmul.msk.bf16.gmra.mxu1 %vm9805_vm0, %v7671_v62  ;;  %v9816_v31 = vadd.f32 %v2811_v46, %v2554_v36  ;;  %v1850_v63 = vld [vmem:[#allocation2 + $0xdf] sm:$0xff]  ;;  %vm9826_vm0 = vmpackc.low %vm1552_vm15, %vm8986_vm1 }
 0x15e   : > { %v1728_v54 = vpop.f32.mrf.mxu2 }
 0x15f   : > { %v1799_v21 = vadd.f32 %v1728_v54, %v9611_v60  ;;  %v2154_v49 = vpop.f32.mrf.mxu3  ;;  %v2606_v60 = vld [vmem:[#allocation2 + $0xe1] sm:$0xff] }
 0x160   : > { %v2486_v43 = vpop.f32.mrf.mxu0  ;;  %v7674_v17 = vpack.c.bf16 %v2606_v60, %v2605_v48 }
 0x161   : > { %v2225_v2 = vadd.f32 %v2154_v49, %v1799_v21  ;;  %v2391_v21 = vpack.c.bf16 %v2276_v20, %v2275_v47  ;;  %v409_v20 = vand.u32 15, %v377_v18  ;;  %v1852_v18 = vld [vmem:[#allocation2 + $0xef] sm:$0xff] }
 0x162   : > { %v2816_v30 = vpop.f32.mrf.mxu1 }
 0x163   : > { %v2555_v58 = vadd.f32 %v2484_v25, %v2225_v2  ;;  %v11319_v25 = vmov 0  ;;  %v7530_v2 = vpack.c.bf16 %v1850_v63, %v1849_v33  ;;  %v8526_v33 = vld [vmem:[%s11170_s1 + $0x180] sm:$0xff]  ;;  %v9846_v63 = vld [vmem:[%s9062_s21 + $0xf0] sm:$0xff] }
 0x164   : > { %v11320_v25 = vsel %vm9826_vm0, 4294967295, %v11319_v25  ;;  %3251 = vmatpush.bf16.msra.mxu2 %v8526_v33  ;;  %514 = vst [vmem:[#allocation2 + $0x108] sm:$0xff] %v9846_v63  ;;  %v2278_v33 = vld [vmem:[#allocation2 + $0xf0] sm:$0xff] }
 0x165   : > { %v9822_v46 = vadd.f32 %v2814_v37, %v2555_v58  ;;  %11321 = vst [vmem:[#allocation23_spill] sm:$0xff] %v11320_v25 }
 0x166   : > { %v1730_v36 = vpop.f32.mrf.mxu2 }
 0x167   : > { %v1800_v54 = vadd.f32 %v1730_v36, %v9623_v50  ;;  %v2156_v28 = vpop.f32.mrf.mxu3 }
 0x168   : > { %v2489_v49 = vpop.f32.mrf.mxu0 }
 0x169   : > { %v2226_v37 = vadd.f32 %v2156_v28, %v1800_v54  ;;  %v1458_v28 = vadd.s32 1, %v409_v20  ;;  %v8542_v20 = vld [vmem:[%s11170_s1 + $0x200] sm:$0xff] }
 0x16a   : > { %v2819_v58 = vpop.f32.mrf.mxu1  ;;  %3911 = vmatpush.bf16.msra.mxu0 %v8542_v20 }
 0x16b   : > { %7435 = vmatmul.msk.bf16.gmra.mxu2 %vm9826_vm0, %v7671_v62  ;;  %2528 = vmatmul.bf16.gmra.mxu0 %v2391_v21  ;;  %v2556_v50 = vadd.f32 %v2486_v43, %v2226_v37  ;;  %v8534_v62 = vld [vmem:[%s11170_s1 + $0x1c0] sm:$0xff]  ;;  %v9853_v21 = vld [vmem:[%s9062_s21 + $0xf8] sm:$0xff]  ;;  %vm1554_vm15 = vcmp.lt.s32.totalorder %v1458_v28, 16  ;;  %s10804_s21 = scalar_lea.vmem %s11176_s7, %s9053_s16 }
 0x16c   : > { %7531 = vmatmul.msk.bf16.gmra.mxu3 %vm11322_vm13, %v7530_v2  ;;  %515 = vst [vmem:[#allocation2 + $0x110] sm:$0xff] %v9853_v21  ;;  %v1851_v37 = vld [vmem:[#allocation2 + $0xe7] sm:$0xff]  ;;  %vm11328_vm13 = vnez %v11265_v51 }
 0x16d   : > { %7675 = vmatmul.msk.bf16.gmra.mxu1 %vm9826_vm0, %v7674_v17  ;;  %v9840_v47 = vadd.f32 %v2816_v30, %v2556_v50  ;;  %3581 = vmatpush.bf16.msra.mxu3 %v8534_v62  ;;  %v2277_v50 = vld [vmem:[#allocation2 + $0xe8] sm:$0xff]  ;;  %vm9863_vm0 = vmpackc.low %vm1554_vm15, %vm8986_vm1 }
 0x16e   : > { %v1733_v43 = vpop.f32.mrf.mxu2 }
 0x16f   : > { %v1801_v48 = vadd.f32 %v1733_v43, %v9633_v34  ;;  %v2159_v60 = vpop.f32.mrf.mxu3  ;;  %v2607_v34 = vld [vmem:[#allocation2 + $0xe9] sm:$0xff]  ;;  %v2608_v43 = vld [vmem:[#allocation2 + $0xf1] sm:$0xff] }
 0x170   : > { %v2491_v36 = vpop.f32.mrf.mxu0  ;;  %v7677_v28 = vpack.c.bf16 %v2608_v43, %v2607_v34 }
 0x171   : > { %v2227_v54 = vadd.f32 %v2159_v60, %v1801_v48 }
 0x172   : > { %v9850_v30 = vpop.f32.mrf.mxu1 }
 0x173   : > { %11323 = vst [vmem:[#allocation24_spill] sm:$0xff] %v9850_v30  ;;  %v2557_v2 = vadd.f32 %v2489_v49, %v2227_v54  ;;  %v2392_v30 = vpack.c.bf16 %v2278_v33, %v2277_v50  ;;  %v11325_v54 = vmov 0  ;;  %v411_v50 = vand.u32 15, %v379_v19  ;;  %v1854_v19 = vld [vmem:[#allocation2 + $0xff] sm:$0xff] }
 0x174   : > { %v11326_v54 = vsel %vm9863_vm0, 4294967295, %v11325_v54 }
 0x175   : > { %v9856_v25 = vadd.f32 %v2819_v58, %v2557_v2  ;;  %11327 = vst [vmem:[#allocation26_spill] sm:$0xff] %v11326_v54  ;;  %v7533_v58 = vpack.c.bf16 %v1852_v18, %v1851_v37  ;;  %v1460_v20 = vadd.s32 1, %v411_v50  ;;  %v11330_v54 = vmov 0 }
 0x176   : > { %v1735_v62 = vpop.f32.mrf.mxu2 }
 0x177   : > { %11324 = vst [vmem:[#allocation25_spill] sm:$0xff] %v9856_v25  ;;  %v1802_v48 = vadd.f32 %v1735_v62, %v9651_v38  ;;  %v2161_v60 = vpop.f32.mrf.mxu3  ;;  %vm1556_vm15 = vcmp.lt.s32.totalorder %v1460_v20, 16  ;;  %v381_v20 = vadd.s32 248, %v9081_v12 }
 0x178   : > { %v2494_v49 = vpop.f32.mrf.mxu0 }
 0x179   : > { %v2228_v2 = vadd.f32 %v2161_v60, %v1802_v48  ;;  %v2279_v48 = vld [vmem:[#allocation2 + $0xf8] sm:$0xff]  ;;  %v2280_v60 = vld [vmem:[#allocation2 + $0x100] sm:$0xff] }
 0x17a   : > { %v2824_v25 = vpop.f32.mrf.mxu1 }
 0x17b   : > { %7438 = vmatmul.msk.bf16.gmra.mxu2 %vm9863_vm0, %v7674_v17  ;;  %2533 = vmatmul.bf16.gmra.mxu0 %v2392_v30  ;;  %v9870_v38 = vadd.f32 %v2491_v36, %v2228_v2  ;;  %v8555_v17 = vld [vmem:[%s11172_s3 + $0x28] sm:$0xff]  ;;  %v1853_v30 = vld [vmem:[#allocation2 + $0xf7] sm:$0xff] }
 0x17c   : > { %7534 = vmatmul.msk.bf16.gmra.mxu3 %vm11328_vm13, %v7533_v58  ;;  %4601 = vmatpush.bf16.msra.mxu1 %v8555_v17  ;;  %v2610_v2 = vld [vmem:[#allocation2 + $0x101] sm:$0xff]  ;;  %vm11332_vm13 = vnez %v11270_v16 }
 0x17d   : > { %7678 = vmatmul.msk.bf16.gmra.mxu1 %vm9863_vm0, %v7677_v28  ;;  %vm9886_vm0 = vmpackc.low %vm1556_vm15, %vm8986_vm1 }
 0x17e   : > { %v1738_v33 = vpop.f32.mrf.mxu2  ;;  %v11331_v54 = vsel %vm9886_vm0, 4294967295, %v11330_v54 }
 0x17f   : > { %v1803_v37 = vadd.f32 %v1738_v33, %v9664_v11  ;;  %v2164_v18 = vpop.f32.mrf.mxu3  ;;  %v2609_v11 = vld [vmem:[#allocation2 + $0xf9] sm:$0xff] }
 0x180   : > { %v2496_v34 = vpop.f32.mrf.mxu0 }
 0x181   : > { %v2229_v43 = vadd.f32 %v2164_v18, %v1803_v37  ;;  %v2393_v18 = vpack.c.bf16 %v2280_v60, %v2279_v48 }
 0x182   : > { %v9877_v62 = vpop.f32.mrf.mxu1 }
 0x183   : > { %11329 = vst [vmem:[#allocation27_spill] sm:$0xff] %v9877_v62  ;;  %v2559_v36 = vadd.f32 %v2494_v49, %v2229_v43  ;;  %v7536_v49 = vpack.c.bf16 %v1854_v19, %v1853_v30  ;;  %v7680_v43 = vpack.c.bf16 %v2610_v2, %v2609_v11 }
 0x185   : > { %v9882_v58 = vadd.f32 %v2824_v25, %v2559_v36 }
 0x186   : > { %v1740_v33 = vpop.f32.mrf.mxu2 }
 0x187   : > { %v1804_v50 = vadd.f32 %v1740_v33, %v9676_v5  ;;  %v2166_v37 = vpop.f32.mrf.mxu3  ;;  %v413_v5 = vand.u32 15, %v381_v20  ;;  %v1855_v33 = vld [vmem:[#allocation2 + $0x107] sm:$0xff] }
 0x188   : > { %v2499_v62 = vpop.f32.mrf.mxu0 }
 0x189   : > { %v2230_v17 = vadd.f32 %v2166_v37, %v1804_v50  ;;  %v1462_v12 = vadd.s32 1, %v413_v5  ;;  %v1856_v50 = vld [vmem:[#allocation2 + $0x10f] sm:$0xff]  ;;  %v11333_v5 = vmov 0 }
 0x18a   : > { %v2829_v25 = vpop.f32.mrf.mxu1  ;;  %v2611_v37 = vld [vmem:[#allocation2 + $0x109] sm:$0xff] }
 0x18b   : > { %7441 = vmatmul.msk.bf16.gmra.mxu2 %vm9886_vm0, %v7677_v28  ;;  %2538 = vmatmul.bf16.gmra.mxu0 %v2393_v18  ;;  %v9893_v36 = vadd.f32 %v2496_v34, %v2230_v17  ;;  %vm1558_vm15 = vcmp.lt.s32.totalorder %v1462_v12, 16  ;;  %v2612_v18 = vld [vmem:[#allocation2 + $0x111] sm:$0xff] }
 0x18c   : > { %7537 = vmatmul.msk.bf16.gmra.mxu3 %vm11332_vm13, %v7536_v49  ;;  %vm11336_vm13 = vnez %v11275_v41  ;;  %v2912_v41 = vld [vmem:[#allocation2 + $0x2f] sm:$0xff] }
 0x18d   : > { %7681 = vmatmul.msk.bf16.gmra.mxu1 %vm9886_vm0, %v7680_v43  ;;  %vm9908_vm0 = vmpackc.low %vm1558_vm15, %vm8986_vm1  ;;  %vm11337_vm1 = vnez %v11284_v35 }
 0x18e   : > { %v1743_v48 = vpop.f32.mrf.mxu2  ;;  %v11334_v5 = vsel %vm9908_vm0, 4294967295, %v11333_v5 }
 0x18f   : > { %v1805_v30 = vadd.f32 %v1743_v48, %v9687_v42  ;;  %v2169_v60 = vpop.f32.mrf.mxu3  ;;  %v2394_v42 = vpack.c.bf16 %v9853_v21, %v9846_v63  ;;  %11335 = vst [vmem:[#allocation28_spill] sm:$0xff] %v11334_v5 }
 0x190   : > { %v2501_v19 = vpop.f32.mrf.mxu0 }
 0x191   : > { %v2231_v11 = vadd.f32 %v2169_v60, %v1805_v30 }
 0x192   : > { %v9900_v2 = vpop.f32.mrf.mxu1 }
 0x193   : > { %v2561_v28 = vadd.f32 %v2499_v62, %v2231_v11  ;;  %v7539_v62 = vpack.c.bf16 %v1856_v50, %v1855_v33  ;;  %v2911_v50 = vld [vmem:[#allocation2 + $0x27] sm:$0xff] }
 0x195   : > { %v9902_v34 = vadd.f32 %v2829_v25, %v2561_v28  ;;  %v7683_v25 = vpack.c.bf16 %v2612_v18, %v2611_v37  ;;  %v3695_v37 = vld [vmem:[#allocation2 + $0x29] sm:$0xff]  ;;  %v3696_v18 = vld [vmem:[#allocation2 + $0x31] sm:$0xff] }
 0x196   : > { %v1745_v49 = vpop.f32.mrf.mxu2 }
 0x197   : > { %v1806_v17 = vadd.f32 %v1745_v49, %v9704_v26  ;;  %v2171_v20 = vpop.f32.mrf.mxu3 }
 0x198   : > { %v2504_v48 = vpop.f32.mrf.mxu0 }
 0x199   : > { %v2232_v30 = vadd.f32 %v2171_v20, %v1806_v17  ;;  %v3365_v17 = vld [vmem:[#allocation2 + $0x28] sm:$0xff]  ;;  %v3366_v20 = vld [vmem:[#allocation2 + $0x30] sm:$0xff] }
 0x19a   : > { %v2834_v60 = vpop.f32.mrf.mxu1 }
 0x19b   : > { %7444 = vmatmul.msk.bf16.gmra.mxu2 %vm9908_vm0, %v7680_v43  ;;  %2543 = vmatmul.bf16.gmra.mxu0 %v2394_v42  ;;  %v9914_v11 = vadd.f32 %v2501_v19, %v2232_v30  ;;  %v8554_v43 = vld [vmem:[%s11172_s3 + $0x20] sm:$0xff]  ;;  %v7875_v30 = vpack.c.bf16 %v3696_v18, %v3695_v37  ;;  %v2913_v37 = vld [vmem:[#allocation2 + $0x37] sm:$0xff] }
 0x19c   : > { %7540 = vmatmul.msk.bf16.gmra.mxu3 %vm11336_vm13, %v7539_v62  ;;  %4602 = vmatpush.bf16.msra.mxu1 %v8554_v43  ;;  %v2914_v18 = vld [vmem:[#allocation2 + $0x3f] sm:$0xff]  ;;  %vm11340_vm13 = vnez %v11290_v40 }
 0x19d   : > { %7684 = vmatmul.msk.bf16.gmra.mxu1 %vm9908_vm0, %v7683_v25  ;;  %v7734_v25 = vpack.c.bf16 %v2912_v41, %v2911_v50  ;;  %vm11388_vm0 = vnez %v11331_v54 }
 0x19e   : > { %v1748_v26 = vpop.f32.mrf.mxu2 }
 0x19f   : > { %v1807_v63 = vadd.f32 %v1748_v26, %v9717_v13  ;;  %v2174_v21 = vpop.f32.mrf.mxu3 }
 0x1a0   : > { %v2506_v12 = vpop.f32.mrf.mxu0 }
 0x1a1   : > { %v2233_v28 = vadd.f32 %v2174_v21, %v1807_v63  ;;  %v3493_v63 = vpack.c.bf16 %v3366_v20, %v3365_v17  ;;  %v3697_v17 = vld [vmem:[#allocation2 + $0x39] sm:$0xff] }
 0x1a2   : > { %v9921_v33 = vpop.f32.mrf.mxu1 }
 0x1a3   : > { %v2563_v19 = vadd.f32 %v2504_v48, %v2233_v28 }
 0x1a5   : > { %v9926_v49 = vadd.f32 %v2834_v60, %v2563_v19 }
 0x1a6   : > { %v1750_v13 = vpop.f32.mrf.mxu2 }
 0x1a7   : > { %v1808_v42 = vadd.f32 %v1750_v13, %v9727_v15  ;;  %v2176_v62 = vpop.f32.mrf.mxu3  ;;  %v3367_v13 = vld [vmem:[#allocation2 + $0x38] sm:$0xff] }
 0x1a8   : > { %v2509_v26 = vpop.f32.mrf.mxu0 }
 0x1a9   : > { %v2234_v21 = vadd.f32 %v2176_v62, %v1808_v42  ;;  %v3368_v42 = vld [vmem:[#allocation2 + $0x40] sm:$0xff] }
 0x1aa   : > { %v2839_v5 = vpop.f32.mrf.mxu1 }
 0x1ab   : > { %7735 = vmatmul.msk.bf16.vlgmr.msra.gmra.mxu2 %vm9518_vm3, %v7734_v25  ;;  %7876 = vmatmul.msk.bf16.vlgmr.msra.gmra.mxu0 %vm9523_vm7, %v7875_v30  ;;  %v9933_v48 = vadd.f32 %v2506_v12, %v2234_v21  ;;  %v7737_v30 = vpack.c.bf16 %v2914_v18, %v2913_v37  ;;  %v3494_v21 = vpack.c.bf16 %v3368_v42, %v3367_v13  ;;  %v8553_v18 = vld [vmem:[%s11172_s3 + $0x18] sm:$0xff]  ;;  %v3699_v13 = vld [vmem:[#allocation2 + $0x49] sm:$0xff] }
 0x1ac   : > { %3582 = vmatmul.bf16.vlgmr.msra.gmra.mxu3 %v3493_v63  ;;  %4603 = vmatpush.bf16.msra.mxu1 %v8553_v18 }
 0x1ae   : > { %v1753_v60 = vpop.f32.mrf.mxu2 }
 0x1af   : > { %v1809_v28 = vadd.f32 %v1753_v60, %v9543_v23  ;;  %v2179_v15 = vpop.f32.mrf.mxu3  ;;  %v7878_v23 = vpack.c.bf16 %v3698_v9, %v3697_v17  ;;  %v2915_v17 = vld [vmem:[#allocation2 + $0x47] sm:$0xff]  ;;  %v2916_v9 = vld [vmem:[#allocation2 + $0x4f] sm:$0xff] }
 0x1b0   : > { %v2511_v43 = vpop.f32.mrf.mxu0 }
 0x1b1   : > { %v2235_v19 = vadd.f32 %v2179_v15, %v1809_v28 }
 0x1b2   : > { %v9936_v50 = vpop.f32.mrf.mxu1 }
 0x1b3   : > { %v2565_v41 = vadd.f32 %v2509_v26, %v2235_v19 }
 0x1b5   : > { %v9938_v20 = vadd.f32 %v2839_v5, %v2565_v41 }
 0x1b6   : > { %v1755_v12 = vpop.f32.mrf.mxu2 }
 0x1b7   : > { %v1810_v62 = vadd.f32 %v1755_v12, %v9550_v53  ;;  %v2181_v25 = vpop.f32.mrf.mxu3  ;;  %v3369_v12 = vld [vmem:[#allocation2 + $0x48] sm:$0xff] }
 0x1b8   : > { %v2514_v63 = vpop.f32.mrf.mxu0 }
 0x1b9   : > { %v2236_v60 = vadd.f32 %v2181_v25, %v1810_v62  ;;  %v3370_v62 = vld [vmem:[#allocation2 + $0x50] sm:$0xff] }
 0x1ba   : > { %v2844_v28 = vpop.f32.mrf.mxu1 }
 0x1bb   : > { %7738 = vmatmul.msk.bf16.gmra.mxu2 %vm9214_vm6, %v7737_v30  ;;  %7879 = vmatmul.msk.bf16.gmra.mxu0 %vm11337_vm1, %v7878_v23  ;;  %v9945_v5 = vadd.f32 %v2511_v43, %v2236_v60  ;;  %v3700_v43 = vld [vmem:[#allocation2 + $0x51] sm:$0xff]  ;;  %v7740_v23 = vpack.c.bf16 %v2916_v9, %v2915_v17  ;;  %vm11338_vm6 = vnez %v11286_v4 }
 0x1bc   : > { %3587 = vmatmul.bf16.gmra.mxu3 %v3494_v21  ;;  %v7881_v21 = vpack.c.bf16 %v3700_v43, %v3699_v13  ;;  %v2917_v13 = vld [vmem:[#allocation2 + $0x57] sm:$0xff]  ;;  %v2918_v43 = vld [vmem:[#allocation2 + $0x5f] sm:$0xff] }
 0x1be   : > { %v1758_v26 = vpop.f32.mrf.mxu2 }
 0x1bf   : > { %v1811_v15 = vadd.f32 %v1758_v26, %v9568_v1  ;;  %v2184_v53 = vpop.f32.mrf.mxu3  ;;  %v3495_v26 = vpack.c.bf16 %v3370_v62, %v3369_v12  ;;  %v3701_v12 = vld [vmem:[#allocation2 + $0x59] sm:$0xff] }
 0x1c0   : > { %v2516_v19 = vpop.f32.mrf.mxu0 }
 0x1c1   : > { %v2237_v41 = vadd.f32 %v2184_v53, %v1811_v15 }
 0x1c2   : > { %v9948_v37 = vpop.f32.mrf.mxu1 }
 0x1c3   : > { %v2567_v3 = vadd.f32 %v2514_v63, %v2237_v41 }
 0x1c5   : > { %v9953_v42 = vadd.f32 %v2844_v28, %v2567_v3 }
 0x1c6   : > { %v1760_v1 = vpop.f32.mrf.mxu2 }
 0x1c7   : > { %v1812_v25 = vadd.f32 %v1760_v1, %v9572_v61  ;;  %v2186_v30 = vpop.f32.mrf.mxu3  ;;  %v3371_v1 = vld [vmem:[#allocation2 + $0x58] sm:$0xff] }
 0x1c8   : > { %v2519_v60 = vpop.f32.mrf.mxu0 }
 0x1c9   : > { %v2238_v15 = vadd.f32 %v2186_v30, %v1812_v25  ;;  %v3372_v25 = vld [vmem:[#allocation2 + $0x60] sm:$0xff] }
 0x1ca   : > { %v2849_v53 = vpop.f32.mrf.mxu1 }
 0x1cb   : > { %7741 = vmatmul.msk.bf16.gmra.mxu2 %vm9265_vm10, %v7740_v23  ;;  %7882 = vmatmul.msk.bf16.gmra.mxu0 %vm11338_vm6, %v7881_v21  ;;  %v9960_v63 = vadd.f32 %v2516_v19, %v2238_v15  ;;  %v7743_v21 = vpack.c.bf16 %v2918_v43, %v2917_v13  ;;  %v3496_v15 = vpack.c.bf16 %v3372_v25, %v3371_v1  ;;  %v8552_v43 = vld [vmem:[%s11172_s3 + $0x10] sm:$0xff] }
 0x1cc   : > { %3592 = vmatmul.bf16.gmra.mxu3 %v3495_v26  ;;  %vm11339_vm10 = vnez %v11288_v8  ;;  %4604 = vmatpush.bf16.msra.mxu1 %v8552_v43  ;;  %v3703_v1 = vld [vmem:[#allocation2 + $0x69] sm:$0xff] }
 0x1ce   : > { %v1763_v28 = vpop.f32.mrf.mxu2 }
 0x1cf   : > { %v1813_v41 = vadd.f32 %v1763_v28, %v9596_v44  ;;  %v2189_v61 = vpop.f32.mrf.mxu3  ;;  %v7884_v44 = vpack.c.bf16 %v3702_v32, %v3701_v12  ;;  %v2919_v12 = vld [vmem:[#allocation2 + $0x67] sm:$0xff]  ;;  %v2920_v32 = vld [vmem:[#allocation2 + $0x6f] sm:$0xff] }
 0x1d0   : > { %v2521_v18 = vpop.f32.mrf.mxu0 }
 0x1d1   : > { %v2239_v3 = vadd.f32 %v2189_v61, %v1813_v41 }
 0x1d2   : > { %v9963_v17 = vpop.f32.mrf.mxu1 }
 0x1d3   : > { %v2569_v9 = vadd.f32 %v2519_v60, %v2239_v3 }
 0x1d5   : > { %v9965_v62 = vadd.f32 %v2849_v53, %v2569_v9 }
 0x1d6   : > { %v1765_v19 = vpop.f32.mrf.mxu2 }
 0x1d7   : > { %v1814_v30 = vadd.f32 %v1765_v19, %v9603_v6  ;;  %v2191_v23 = vpop.f32.mrf.mxu3  ;;  %v3373_v19 = vld [vmem:[#allocation2 + $0x68] sm:$0xff] }
 0x1d8   : > { %v2524_v26 = vpop.f32.mrf.mxu0 }
 0x1d9   : > { %v2240_v28 = vadd.f32 %v2191_v23, %v1814_v30  ;;  %v3374_v30 = vld [vmem:[#allocation2 + $0x70] sm:$0xff] }
 0x1da   : > { %v2854_v41 = vpop.f32.mrf.mxu1 }
 0x1db   : > { %7744 = vmatmul.msk.bf16.gmra.mxu2 %vm9316_vm14, %v7743_v21  ;;  %7885 = vmatmul.msk.bf16.gmra.mxu0 %vm11339_vm10, %v7884_v44  ;;  %v9972_v60 = vadd.f32 %v2521_v18, %v2240_v28  ;;  %v3704_v18 = vld [vmem:[#allocation2 + $0x71] sm:$0xff]  ;;  %v7746_v44 = vpack.c.bf16 %v2920_v32, %v2919_v12 }
 0x1dc   : > { %3597 = vmatmul.bf16.gmra.mxu3 %v3496_v15  ;;  %v7887_v15 = vpack.c.bf16 %v3704_v18, %v3703_v1  ;;  %v2921_v1 = vld [vmem:[#allocation2 + $0x77] sm:$0xff]  ;;  %v2922_v18 = vld [vmem:[#allocation2 + $0x7f] sm:$0xff] }
 0x1de   : > { %v1768_v53 = vpop.f32.mrf.mxu2 }
 0x1df   : > { %v1815_v61 = vadd.f32 %v1768_v53, %v9621_v29  ;;  %v2194_v6 = vpop.f32.mrf.mxu3  ;;  %v3497_v53 = vpack.c.bf16 %v3374_v30, %v3373_v19  ;;  %v3705_v19 = vld [vmem:[#allocation2 + $0x79] sm:$0xff] }
 0x1e0   : > { %v2526_v3 = vpop.f32.mrf.mxu0 }
 0x1e1   : > { %v2241_v9 = vadd.f32 %v2194_v6, %v1815_v61 }
 0x1e2   : > { %v9975_v13 = vpop.f32.mrf.mxu1 }
 0x1e3   : > { %v2571_v57 = vadd.f32 %v2524_v26, %v2241_v9 }
 0x1e5   : > { %v9980_v25 = vadd.f32 %v2854_v41, %v2571_v57 }
 0x1e6   : > { %v1770_v29 = vpop.f32.mrf.mxu2 }
 0x1e7   : > { %v1816_v23 = vadd.f32 %v1770_v29, %v9625_v55  ;;  %v2196_v21 = vpop.f32.mrf.mxu3  ;;  %v3375_v29 = vld [vmem:[#allocation2 + $0x78] sm:$0xff] }
 0x1e8   : > { %v2529_v28 = vpop.f32.mrf.mxu0 }
 0x1e9   : > { %v2242_v61 = vadd.f32 %v2196_v21, %v1816_v23  ;;  %v3376_v23 = vld [vmem:[#allocation2 + $0x80] sm:$0xff]  ;;  %v11343_v21 = vld [vmem:[#allocation10_spill] sm:$0xff] }
 0x1ea   : > { %v2859_v6 = vpop.f32.mrf.mxu1 }
 0x1eb   : > { %7747 = vmatmul.msk.bf16.gmra.mxu2 %vm9367_vm4, %v7746_v44  ;;  %7888 = vmatmul.msk.bf16.gmra.mxu0 %vm11340_vm13, %v7887_v15  ;;  %v9987_v26 = vadd.f32 %v2526_v3, %v2242_v61 }
 0x1ec   : > { %3602 = vmatmul.bf16.gmra.mxu3 %v3497_v53  ;;  %v7749_v53 = vpack.c.bf16 %v2922_v18, %v2921_v1  ;;  %v8551_v18 = vld [vmem:[%s11172_s3 + $0x8] sm:$0xff] }
 0x1ed   : > { %4605 = vmatpush.bf16.msra.mxu1 %v8551_v18  ;;  %v11353_v18 = vld [vmem:[#allocation14_spill] sm:$0xff] }
 0x1ee   : > { %v1773_v41 = vpop.f32.mrf.mxu2  ;;  %vm11354_vm3 = vnez %v11353_v18 }
 0x1ef   : > { %v1817_v9 = vadd.f32 %v1773_v41, %v9649_v14  ;;  %v2199_v55 = vpop.f32.mrf.mxu3  ;;  %v7890_v14 = vpack.c.bf16 %v3706_v22, %v3705_v19  ;;  %v3498_v41 = vpack.c.bf16 %v3376_v23, %v3375_v29  ;;  %v2923_v22 = vld [vmem:[#allocation2 + $0x87] sm:$0xff]  ;;  %v3708_v23 = vld [vmem:[#allocation2 + $0x91] sm:$0xff] }
 0x1f0   : > { %v2531_v43 = vpop.f32.mrf.mxu0  ;;  %v3707_v29 = vld [vmem:[#allocation2 + $0x89] sm:$0xff] }
 0x1f1   : > { %v2243_v57 = vadd.f32 %v2199_v55, %v1817_v9 }
 0x1f2   : > { %v9990_v12 = vpop.f32.mrf.mxu1 }
 0x1f3   : > { %11341 = vst [vmem:[#allocation29_spill] sm:$0xff] %v9990_v12  ;;  %v2573_v32 = vadd.f32 %v2529_v28, %v2243_v57  ;;  %v11345_v28 = vld [vmem:[#allocation11_spill] sm:$0xff]  ;;  %v2924_v12 = vld [vmem:[#allocation2 + $0x8f] sm:$0xff] }
 0x1f4   : > { %vm11346_vm14 = vnez %v11345_v28 }
 0x1f5   : > { %v9992_v30 = vadd.f32 %v2859_v6, %v2573_v32  ;;  %v11348_v32 = vld [vmem:[#allocation12_spill] sm:$0xff] }
 0x1f6   : > { %v1775_v3 = vpop.f32.mrf.mxu2 }
 0x1f7   : > { %11342 = vst [vmem:[#allocation30_spill] sm:$0xff] %v9992_v30  ;;  %v1818_v44 = vadd.f32 %v1775_v3, %v11343_v21  ;;  %v2201_v15 = vpop.f32.mrf.mxu3 }
 0x1f8   : > { %v2534_v61 = vpop.f32.mrf.mxu0 }
 0x1f9   : > { %v2244_v9 = vadd.f32 %v2201_v15, %v1818_v44  ;;  %v3377_v15 = vld [vmem:[#allocation2 + $0x88] sm:$0xff] }
 0x1fa   : > { %v2864_v55 = vpop.f32.mrf.mxu1 }
 0x1fb   : > { %7750 = vmatmul.msk.bf16.gmra.mxu2 %vm9417_vm12, %v7749_v53  ;;  %7891 = vmatmul.msk.bf16.gmra.mxu0 %vm11346_vm14, %v7890_v14  ;;  %v9999_v6 = vadd.f32 %v2531_v43, %v2244_v9  ;;  %v3378_v53 = vld [vmem:[#allocation2 + $0x90] sm:$0xff]  ;;  %vm11376_vm12 = vnez %v11318_v45 }
 0x1fc   : > { %3607 = vmatmul.bf16.gmra.mxu3 %v3498_v41  ;;  %v11351_v41 = vld [vmem:[#allocation13_spill] sm:$0xff]  ;;  %v3499_v28 = vpack.c.bf16 %v3378_v53, %v3377_v15  ;;  %v3709_v15 = vld [vmem:[#allocation2 + $0x99] sm:$0xff] }
 0x1fd   : > { %11347 = vst [vmem:[#allocation10_spill] sm:$0xff] %v9999_v6  ;;  %v3710_v53 = vld [vmem:[#allocation2 + $0xa1] sm:$0xff] }
 0x1fe   : > { %v1778_v57 = vpop.f32.mrf.mxu2  ;;  %v7896_v18 = vpack.c.bf16 %v3710_v53, %v3709_v15 }
 0x1ff   : > { %v1819_v30 = vadd.f32 %v1778_v57, %v11348_v32  ;;  %v2204_v3 = vpop.f32.mrf.mxu3  ;;  %v7752_v57 = vpack.c.bf16 %v2924_v12, %v2923_v22  ;;  %v7893_v32 = vpack.c.bf16 %v3708_v23, %v3707_v29  ;;  %v2925_v29 = vld [vmem:[#allocation2 + $0x97] sm:$0xff]  ;;  %v2926_v23 = vld [vmem:[#allocation2 + $0x9f] sm:$0xff] }
 0x200   : > { %v2536_v21 = vpop.f32.mrf.mxu0 }
 0x201   : > { %v2245_v1 = vadd.f32 %v2204_v3, %v1819_v30 }
 0x202   : > { %v10005_v44 = vpop.f32.mrf.mxu1 }
 0x203   : > { %v2575_v19 = vadd.f32 %v2534_v61, %v2245_v1  ;;  %11349 = vst [vmem:[#allocation6_spill] sm:$0xff] %v10005_v44  ;;  %v7755_v1 = vpack.c.bf16 %v2926_v23, %v2925_v29 }
 0x205   : > { %v10007_v43 = vadd.f32 %v2864_v55, %v2575_v19 }
 0x206   : > { %v1780_v14 = vpop.f32.mrf.mxu2 }
 0x207   : > { %11350 = vst [vmem:[#allocation12_spill] sm:$0xff] %v10007_v43  ;;  %v1820_v9 = vadd.f32 %v1780_v14, %v11351_v41  ;;  %v2206_v30 = vpop.f32.mrf.mxu3  ;;  %v11356_v43 = vld [vmem:[#allocation15_spill] sm:$0xff] }
 0x208   : > { %v2539_v3 = vpop.f32.mrf.mxu0 }
 0x209   : > { %v2246_v61 = vadd.f32 %v2206_v30, %v1820_v9  ;;  %v3379_v30 = vld [vmem:[#allocation2 + $0x98] sm:$0xff] }
 0x20a   : > { %v2869_v19 = vpop.f32.mrf.mxu1 }
 0x20b   : > { %7753 = vmatmul.msk.bf16.gmra.mxu2 %vm9464_vm8, %v7752_v57  ;;  %7894 = vmatmul.msk.bf16.gmra.mxu0 %vm11354_vm3, %v7893_v32  ;;  %v10014_v44 = vadd.f32 %v2536_v21, %v2246_v61  ;;  %v3380_v57 = vld [vmem:[#allocation2 + $0xa0] sm:$0xff] }
 0x20c   : > { %3612 = vmatmul.bf16.gmra.mxu3 %v3499_v28  ;;  %v11358_v21 = vld [vmem:[#allocation16_spill] sm:$0xff] }
 0x20d   : > { %11355 = vst [vmem:[#allocation13_spill] sm:$0xff] %v10014_v44 }
 0x20e   : > { %v1783_v55 = vpop.f32.mrf.mxu2 }
 0x20f   : > { %v1821_v6 = vadd.f32 %v1783_v55, %v11356_v43  ;;  %v2209_v14 = vpop.f32.mrf.mxu3  ;;  %v3500_v43 = vpack.c.bf16 %v3380_v57, %v3379_v30  ;;  %v2927_v30 = vld [vmem:[#allocation2 + $0xa7] sm:$0xff]  ;;  %v2928_v57 = vld [vmem:[#allocation2 + $0xaf] sm:$0xff] }
 0x210   : > { %v2541_v41 = vpop.f32.mrf.mxu0 }
 0x211   : > { %v2247_v22 = vadd.f32 %v2209_v14, %v1821_v6  ;;  %v11361_v14 = vld [vmem:[#allocation17_spill] sm:$0xff] }
 0x212   : > { %v10020_v55 = vpop.f32.mrf.mxu1  ;;  %vm11362_vm4 = vnez %v11361_v14  ;;  %v3382_v14 = vld [vmem:[#allocation2 + $0xb0] sm:$0xff] }
 0x213   : > { %v2577_v12 = vadd.f32 %v2539_v3, %v2247_v22  ;;  %11359 = vst [vmem:[#allocation15_spill] sm:$0xff] %v10020_v55  ;;  %v7758_v55 = vpack.c.bf16 %v2928_v57, %v2927_v30  ;;  %v3714_v57 = vld [vmem:[#allocation2 + $0xc1] sm:$0xff] }
 0x215   : > { %v10017_v9 = vadd.f32 %v2869_v19, %v2577_v12  ;;  %v11364_v12 = vld [vmem:[#allocation18_spill] sm:$0xff] }
 0x216   : > { %v1785_v32 = vpop.f32.mrf.mxu2 }
 0x217   : > { %11357 = vst [vmem:[#allocation7_spill] sm:$0xff] %v10017_v9  ;;  %v1822_v61 = vadd.f32 %v1785_v32, %v11358_v21  ;;  %v2211_v28 = vpop.f32.mrf.mxu3 }
 0x218   : > { %v2544_v44 = vpop.f32.mrf.mxu0 }
 0x219   : > { %v2248_v6 = vadd.f32 %v2211_v28, %v1822_v61  ;;  %v3711_v61 = vld [vmem:[#allocation2 + $0xa9] sm:$0xff]  ;;  %v3712_v28 = vld [vmem:[#allocation2 + $0xb1] sm:$0xff] }
 0x21a   : > { %v2874_v15 = vpop.f32.mrf.mxu1 }
 0x21b   : > { %7756 = vmatmul.msk.bf16.gmra.mxu2 %vm9506_vm11, %v7755_v1  ;;  %7897 = vmatmul.msk.bf16.gmra.mxu0 %vm11362_vm4, %v7896_v18  ;;  %v10026_v19 = vadd.f32 %v2541_v41, %v2248_v6  ;;  %v3381_v1 = vld [vmem:[#allocation2 + $0xa8] sm:$0xff]  ;;  %v11366_v41 = vld [vmem:[#allocation19_spill] sm:$0xff] }
 0x21c   : > { %3617 = vmatmul.bf16.gmra.mxu3 %v3500_v43 }
 0x21d   : > { %11363 = vst [vmem:[#allocation16_spill] sm:$0xff] %v10026_v19  ;;  %v7899_v19 = vpack.c.bf16 %v3712_v28, %v3711_v61  ;;  %v3383_v61 = vld [vmem:[#allocation2 + $0xb8] sm:$0xff]  ;;  %v3384_v28 = vld [vmem:[#allocation2 + $0xc0] sm:$0xff] }
 0x21e   : > { %v1788_v22 = vpop.f32.mrf.mxu2 }
 0x21f   : > { %v1823_v32 = vadd.f32 %v1788_v22, %v11364_v12  ;;  %v2214_v21 = vpop.f32.mrf.mxu3  ;;  %v3501_v12 = vpack.c.bf16 %v3382_v14, %v3381_v1  ;;  %v10042_v14 = vld [vmem:[%s11171_s2] ss:$0 sm:$0xff] }
 0x220   : > { %v2546_v29 = vpop.f32.mrf.mxu0 }
 0x221   : > { %v2249_v23 = vadd.f32 %v2214_v21, %v1823_v32 }
 0x223   : > { %v2579_v53 = vadd.f32 %v2544_v44, %v2249_v23  ;;  %v11368_v44 = vld [vmem:[#allocation20_spill] sm:$0xff] }
 0x224   : > { %vm11369_vm11 = vnez %v11368_v44 }
 0x225   : > { %v10029_v3 = vadd.f32 %v2874_v15, %v2579_v53 }
 0x226   : > { %v1790_v18 = vpop.f32.mrf.mxu2 }
 0x227   : > { %11365 = vst [vmem:[#allocation8_spill] sm:$0xff] %v10029_v3  ;;  %v1824_v6 = vadd.f32 %v1790_v18, %v11366_v41  ;;  %v2216_v43 = vpop.f32.mrf.mxu3 }
 0x228   : > { %v3913_v22 = vpop.f32.mrf.mxu0 }
 0x229   : > { %v2250_v9 = vadd.f32 %v2216_v43, %v1824_v6 }
 0x22b   : > { %7759 = vmatmul.msk.bf16.gmra.mxu2 %vm9153_vm2, %v7758_v55  ;;  %7900 = vmatmul.msk.bf16.gmra.mxu0 %vm11369_vm11, %v7899_v19  ;;  %v10036_v21 = vadd.f32 %v2546_v29, %v2250_v9  ;;  %v8550_v55 = vld [vmem:[%s11172_s3] sm:$0xff]  ;;  %v2929_v19 = vld [vmem:[#allocation2 + $0xb7] sm:$0xff] }
 0x22c   : > { %3622 = vmatmul.bf16.gmra.mxu3 %v3501_v12  ;;  %v2930_v9 = vld [vmem:[#allocation2 + $0xbf] sm:$0xff]  ;;  %4606 = vmatpush.bf16.msra.mxu1 %v8550_v55  ;;  %v11371_v55 = vld [vmem:[#allocation21_spill] sm:$0xff] }
 0x22d   : > { %11370 = vst [vmem:[#allocation18_spill] sm:$0xff] %v10036_v21  ;;  %v3713_v29 = vld [vmem:[#allocation2 + $0xb9] sm:$0xff]  ;;  %v7761_v32 = vpack.c.bf16 %v2930_v9, %v2929_v19  ;;  %vm11372_vm2 = vnez %v11371_v55 }
 0x22e   : > { %v3253_v23 = vpop.f32.mrf.mxu2 }
 0x22f   : > { %v3333_v15 = vadd.f32 %v3253_v23, %v9750_v7  ;;  %v3583_v53 = vpop.f32.mrf.mxu3  ;;  %v7902_v23 = vpack.c.bf16 %v3714_v57, %v3713_v29 }
 0x230   : > { %v3915_v18 = vpop.f32.mrf.mxu0 }
 0x231   : > { %v3663_v41 = vadd.f32 %v3583_v53, %v3333_v15  ;;  %v3502_v53 = vpack.c.bf16 %v3384_v28, %v3383_v61  ;;  %v2931_v28 = vld [vmem:[#allocation2 + $0xc7] sm:$0xff] }
 0x233   : > { %v3993_v30 = vadd.f32 %v3913_v22, %v3663_v41 }
 0x235   : > { %v4029_v7 = vadd.f32 %v10042_v14, %v3993_v30 }
 0x236   : > { %v3255_v1 = vpop.f32.mrf.mxu2 }
 0x237   : > { %v4093_v6 = vmul.f32 0.044715, %v4029_v7  ;;  %v3334_v43 = vadd.f32 %v3255_v1, %v9768_v39  ;;  %v3585_v12 = vpop.f32.mrf.mxu3 }
 0x238   : > { %v3918_v15 = vpop.f32.mrf.mxu0 }
 0x239   : > { %v4125_v44 = vmul.f32 %v4093_v6, %v4029_v7  ;;  %v3664_v22 = vadd.f32 %v3585_v12, %v3334_v43  ;;  %v2932_v6 = vld [vmem:[#allocation2 + $0xcf] sm:$0xff] }
 0x23a   : > { %v3715_v43 = vld [vmem:[#allocation2 + $0xc9] sm:$0xff]  ;;  %v3716_v12 = vld [vmem:[#allocation2 + $0xd1] sm:$0xff] }
 0x23b   : > { %v4157_v41 = vmul.f32 %v4125_v44, %v4029_v7  ;;  %v3994_v21 = vadd.f32 %v3915_v18, %v3664_v22  ;;  %7762 = vmatmul.msk.bf16.gmra.mxu2 %vm9207_vm5, %v7761_v32  ;;  %7903 = vmatmul.msk.bf16.gmra.mxu0 %vm11372_vm2, %v7902_v23 }
 0x23c   : > { %3627 = vmatmul.bf16.gmra.mxu3 %v3502_v53  ;;  %v3386_v53 = vld [vmem:[#allocation2 + $0xd0] sm:$0xff] }
 0x23d   : > { %v4189_v30 = vadd.f32 %v4157_v41, %v4029_v7  ;;  %v4030_v3 = vadd.f32 %v10042_v14, %v3994_v21  ;;  %v3385_v21 = vld [vmem:[#allocation2 + $0xc8] sm:$0xff]  ;;  %v7764_v41 = vpack.c.bf16 %v2932_v6, %v2931_v28  ;;  %v11373_v6 = vld [vmem:[#allocation22_spill] sm:$0xff] }
 0x23e   : > { %v3258_v39 = vpop.f32.mrf.mxu2  ;;  %vm11374_vm5 = vnez %v11373_v6 }
 0x23f   : > { %v4221_v1 = vmul.f32 0.7978846, %v4189_v30  ;;  %v4094_v19 = vmul.f32 0.044715, %v4030_v3  ;;  %v3335_v9 = vadd.f32 %v3258_v39, %v9774_v56  ;;  %v3588_v29 = vpop.f32.mrf.mxu3 }
 0x240   : > { %v3920_v57 = vpop.f32.mrf.mxu0 }
 0x241   : > { %8654 = vtanh.f32 %v4221_v1  ;;  %v4126_v44 = vmul.f32 %v4094_v19, %v4030_v3  ;;  %v3665_v18 = vadd.f32 %v3588_v29, %v3335_v9  ;;  %v4061_v9 = vmul.f32 0.5, %v4029_v7  ;;  %v8565_v7 = vld [vmem:[%s11172_s3 + $0x78] sm:$0xff] }
 0x242   : > { %5163 = vmatpush.bf16.msrb.mxu3 %v8565_v7  ;;  %v3388_v7 = vld [vmem:[#allocation2 + $0xe0] sm:$0xff] }
 0x243   : > { %v4158_v61 = vmul.f32 %v4126_v44, %v4030_v3  ;;  %v3995_v0 = vadd.f32 %v3918_v15, %v3665_v18  ;;  %v7905_v15 = vpack.c.bf16 %v3716_v12, %v3715_v43  ;;  %v3503_v18 = vpack.c.bf16 %v3386_v53, %v3385_v21 }
 0x245   : > { %v4190_v32 = vadd.f32 %v4158_v61, %v4030_v3  ;;  %v10056_v23 = vadd.f32 %v10042_v14, %v3995_v0 }
 0x246   : > { %v3260_v22 = vpop.f32.mrf.mxu2 }
 0x247   : > { %v8655_v56 = vpop.eup %8654  ;;  %v4222_v30 = vmul.f32 0.7978846, %v4190_v32  ;;  %v4095_v39 = vmul.f32 0.044715, %v10056_v23  ;;  %v3336_v1 = vadd.f32 %v3260_v22, %v9792_v24  ;;  %v3590_v19 = vpop.f32.mrf.mxu3  ;;  %v8573_v24 = vld [vmem:[%s11172_s3 + $0xb8] sm:$0xff] }
 0x248   : > { %v4285_v29 = vadd.f32 1.0, %v8655_v56  ;;  %v3923_v44 = vpop.f32.mrf.mxu0  ;;  %5026 = vmatpush.bf16.msrb.mxu2 %v8573_v24  ;;  %v3387_v24 = vld [vmem:[#allocation2 + $0xd8] sm:$0xff] }
 0x249   : > { %8656 = vtanh.f32 %v4222_v30  ;;  %v4127_v61 = vmul.f32 %v4095_v39, %v10056_v23  ;;  %v3666_v0 = vadd.f32 %v3590_v19, %v3336_v1 }
 0x24a   : > { %v4317_v55 = vmul.f32 %v4285_v29, %v4061_v9  ;;  %v2933_v9 = vld [vmem:[#allocation2 + $0xd7] sm:$0xff]  ;;  %v2934_v29 = vld [vmem:[#allocation2 + $0xdf] sm:$0xff] }
 0x24b   : > { %v4159_v40 = vmul.f32 %v4127_v61, %v10056_v23  ;;  %v3996_v28 = vadd.f32 %v3920_v57, %v3666_v0  ;;  %7765 = vmatmul.msk.bf16.gmra.mxu2 %vm9258_vm9, %v7764_v41  ;;  %7906 = vmatmul.msk.bf16.gmra.mxu0 %vm11374_vm5, %v7905_v15  ;;  %v4062_v41 = vmul.f32 0.5, %v4030_v3  ;;  %v3718_v61 = vld [vmem:[#allocation2 + $0xe1] sm:$0xff]  ;;  %v8589_v0 = vld [vmem:[%s11172_s3 + $0x138] sm:$0xff]  ;;  %vm11375_vm9 = vnez %v11256_v52 }
 0x24c   : > { %4387 = vst [vmem:[#allocation3 + $0x18] sm:$0xff] %v4317_v55  ;;  %3632 = vmatmul.bf16.gmra.mxu3 %v3503_v18  ;;  %v3717_v18 = vld [vmem:[#allocation2 + $0xd9] sm:$0xff]  ;;  %5596 = vmatpush.bf16.msrb.mxu0 %v8589_v0 }
 0x24d   : > { %v4191_v43 = vadd.f32 %v4159_v40, %v10056_v23  ;;  %v4032_v57 = vadd.f32 %v10042_v14, %v3996_v28 }
 0x24e   : > { %v3263_v12 = vpop.f32.mrf.mxu2 }
 0x24f   : > { %v8657_v27 = vpop.eup %8656  ;;  %v4223_v32 = vmul.f32 0.7978846, %v4191_v43  ;;  %v4096_v21 = vmul.f32 0.044715, %v4032_v57  ;;  %v3337_v53 = vadd.f32 %v3263_v12, %v9798_v59  ;;  %v3593_v22 = vpop.f32.mrf.mxu3  ;;  %v7767_v12 = vpack.c.bf16 %v2934_v29, %v2933_v9 }
 0x250   : > { %v4286_v56 = vadd.f32 1.0, %v8657_v27  ;;  %v3925_v30 = vpop.f32.mrf.mxu0 }
 0x251   : > { %8658 = vtanh.f32 %v4223_v32  ;;  %v4128_v39 = vmul.f32 %v4096_v21, %v4032_v57  ;;  %v3667_v1 = vadd.f32 %v3593_v22, %v3337_v53  ;;  %v4063_v22 = vmul.f32 0.5, %v10056_v23 }
 0x252   : > { %v4318_v19 = vmul.f32 %v4286_v56, %v4062_v41 }
 0x253   : > { %v4160_v15 = vmul.f32 %v4128_v39, %v4032_v57  ;;  %v3997_v40 = vadd.f32 %v3923_v44, %v3667_v1  ;;  %v3504_v39 = vpack.c.bf16 %v3388_v7, %v3387_v24  ;;  %v4064_v24 = vmul.f32 0.5, %v4032_v57 }
 0x254   : > { %4388 = vst [vmem:[#allocation3 + $0x20] sm:$0xff] %v4318_v19  ;;  %v10078_v59 = vpack.c.bf16 %v4318_v19, %v4317_v55  ;;  %v7908_v55 = vpack.c.bf16 %v3718_v61, %v3717_v18 }
 0x255   : > { %v4192_v3 = vadd.f32 %v4160_v15, %v4032_v57  ;;  %v10081_v28 = vadd.f32 %v10042_v14, %v3997_v40  ;;  %v3389_v57 = vld [vmem:[#allocation2 + $0xe8] sm:$0xff] }
 0x256   : > { %v3265_v43 = vpop.f32.mrf.mxu2  ;;  %4607 = vmatmul.bf16.vlgmr.msra.gmra.mxu1 %v10078_v59 }
 0x257   : > { %v8659_v44 = vpop.eup %8658  ;;  %v4224_v27 = vmul.f32 0.7978846, %v4192_v3  ;;  %v4097_v32 = vmul.f32 0.044715, %v10081_v28  ;;  %v3338_v21 = vadd.f32 %v3265_v43, %v9816_v31  ;;  %v3595_v53 = vpop.f32.mrf.mxu3  ;;  %v8581_v31 = vld [vmem:[%s11172_s3 + $0xf8] sm:$0xff] }
 0x258   : > { %v4287_v41 = vadd.f32 1.0, %v8659_v44  ;;  %v3928_v56 = vpop.f32.mrf.mxu0  ;;  %5733 = vmatpush.bf16.msrb.mxu1 %v8581_v31 }
 0x259   : > { %8660 = vtanh.f32 %v4224_v27  ;;  %v4129_v1 = vmul.f32 %v4097_v32, %v10081_v28  ;;  %v3668_v19 = vadd.f32 %v3595_v53, %v3338_v21  ;;  %v2935_v53 = vld [vmem:[#allocation2 + $0xe7] sm:$0xff] }
 0x25a   : > { %v4319_v15 = vmul.f32 %v4287_v41, %v4063_v22  ;;  %v3719_v22 = vld [vmem:[#allocation2 + $0xe9] sm:$0xff]  ;;  %v3720_v41 = vld [vmem:[#allocation2 + $0xf1] sm:$0xff] }
 0x25b   : > { %v4161_v40 = vmul.f32 %v4129_v1, %v10081_v28  ;;  %v3998_v9 = vadd.f32 %v3925_v30, %v3668_v19  ;;  %7768 = vmatmul.msk.bf16.gmra.mxu2 %vm11375_vm9, %v7767_v12  ;;  %7909 = vmatmul.msk.bf16.gmra.mxu0 %vm11376_vm12, %v7908_v55  ;;  %v2936_v55 = vld [vmem:[#allocation2 + $0xef] sm:$0xff]  ;;  %vm11383_vm9 = vnez %v11265_v51 }
 0x25c   : > { %4389 = vst [vmem:[#allocation3 + $0x28] sm:$0xff] %v4319_v15  ;;  %3637 = vmatmul.bf16.gmra.mxu3 %v3504_v39  ;;  %v3390_v19 = vld [vmem:[#allocation2 + $0xf0] sm:$0xff] }
 0x25d   : > { %v4193_v23 = vadd.f32 %v4161_v40, %v10081_v28  ;;  %v4034_v29 = vadd.f32 %v10042_v14, %v3998_v9  ;;  %v7770_v9 = vpack.c.bf16 %v2936_v55, %v2935_v53  ;;  %v8580_v51 = vld [vmem:[%s11172_s3 + $0xf0] sm:$0xff] }
 0x25e   : > { %v3268_v18 = vpop.f32.mrf.mxu2  ;;  %5734 = vmatpush.bf16.msrb.mxu1 %v8580_v51 }
 0x25f   : > { %v8661_v61 = vpop.eup %8660  ;;  %v4225_v30 = vmul.f32 0.7978846, %v4193_v23  ;;  %v4098_v0 = vmul.f32 0.044715, %v4034_v29  ;;  %v3339_v52 = vadd.f32 %v3268_v18, %v9822_v46  ;;  %v3598_v3 = vpop.f32.mrf.mxu3 }
 0x260   : > { %v4288_v7 = vadd.f32 1.0, %v8661_v61  ;;  %v3930_v43 = vpop.f32.mrf.mxu0 }
 0x261   : > { %8662 = vtanh.f32 %v4225_v30  ;;  %v4130_v12 = vmul.f32 %v4098_v0, %v4034_v29  ;;  %v3669_v44 = vadd.f32 %v3598_v3, %v3339_v52  ;;  %v7911_v30 = vpack.c.bf16 %v3720_v41, %v3719_v22 }
 0x262   : > { %v4320_v27 = vmul.f32 %v4288_v7, %v4064_v24  ;;  %v3505_v3 = vpack.c.bf16 %v3390_v19, %v3389_v57  ;;  %v11381_v57 = vld [vmem:[#allocation25_spill] sm:$0xff] }
 0x263   : > { %v4162_v32 = vmul.f32 %v4130_v12, %v4034_v29  ;;  %v3999_v21 = vadd.f32 %v3928_v56, %v3669_v44 }
 0x264   : > { %4390 = vst [vmem:[#allocation3 + $0x30] sm:$0xff] %v4320_v27  ;;  %v10099_v39 = vpack.c.bf16 %v4320_v27, %v4319_v15  ;;  %v4065_v15 = vmul.f32 0.5, %v10081_v28  ;;  %v8564_v28 = vld [vmem:[%s11172_s3 + $0x70] sm:$0xff] }
 0x265   : > { %v4194_v1 = vadd.f32 %v4162_v32, %v4034_v29  ;;  %v10102_v46 = vadd.f32 %v10042_v14, %v3999_v21  ;;  %v11377_v32 = vld [vmem:[#allocation5_spill] sm:$0xff]  ;;  %v11379_v21 = vld [vmem:[#allocation23_spill] sm:$0xff]  ;;  %5164 = vmatpush.bf16.msrb.mxu3 %v8564_v28  ;;  %v11382_v28 = vld [vmem:[#allocation24_spill] sm:$0xff] }
 0x266   : > { %v3270_v40 = vpop.f32.mrf.mxu2  ;;  %4612 = vmatmul.bf16.gmra.mxu1 %v10099_v39  ;;  %vm11378_vm8 = vnez %v11377_v32  ;;  %vm11380_vm15 = vnez %v11379_v21  ;;  %v3722_v32 = vld [vmem:[#allocation2 + $0x101] sm:$0xff] }
 0x267   : > { %v8663_v31 = vpop.eup %8662  ;;  %v4226_v23 = vmul.f32 0.7978846, %v4194_v1  ;;  %v4099_v56 = vmul.f32 0.044715, %v10102_v46  ;;  %v3340_v18 = vadd.f32 %v3270_v40, %v9840_v47  ;;  %v3600_v61 = vpop.f32.mrf.mxu3  ;;  %v8572_v47 = vld [vmem:[%s11172_s3 + $0xb0] sm:$0xff] }
 0x268   : > { %v4289_v0 = vadd.f32 1.0, %v8663_v31  ;;  %v3933_v52 = vpop.f32.mrf.mxu0  ;;  %5027 = vmatpush.bf16.msrb.mxu2 %v8572_v47  ;;  %v4066_v31 = vmul.f32 0.5, %v4034_v29  ;;  %v8563_v29 = vld [vmem:[%s11172_s3 + $0x68] sm:$0xff] }
 0x269   : > { %8664 = vtanh.f32 %v4226_v23  ;;  %v4131_v24 = vmul.f32 %v4099_v56, %v10102_v46  ;;  %v3670_v7 = vadd.f32 %v3600_v61, %v3340_v18  ;;  %5165 = vmatpush.bf16.msrb.mxu3 %v8563_v29 }
 0x26a   : > { %v4321_v12 = vmul.f32 %v4289_v0, %v4065_v15  ;;  %v2937_v15 = vld [vmem:[#allocation2 + $0xf7] sm:$0xff]  ;;  %v2938_v0 = vld [vmem:[#allocation2 + $0xff] sm:$0xff] }
 0x26b   : > { %v4163_v44 = vmul.f32 %v4131_v24, %v10102_v46  ;;  %v4000_v27 = vadd.f32 %v3930_v43, %v3670_v7  ;;  %7771 = vmatmul.msk.bf16.gmra.mxu2 %vm11378_vm8, %v7770_v9  ;;  %7912 = vmatmul.msk.bf16.gmra.mxu0 %vm11380_vm15, %v7911_v30  ;;  %v8588_v9 = vld [vmem:[%s11172_s3 + $0x130] sm:$0xff]  ;;  %v8571_v7 = vld [vmem:[%s11172_s3 + $0xa8] sm:$0xff] }
 0x26c   : > { %4391 = vst [vmem:[#allocation3 + $0x38] sm:$0xff] %v4321_v12  ;;  %3642 = vmatmul.bf16.gmra.mxu3 %v3505_v3  ;;  %5597 = vmatpush.bf16.msrb.mxu0 %v8588_v9 }
 0x26d   : > { %v4195_v53 = vadd.f32 %v4163_v44, %v10102_v46  ;;  %v10122_v43 = vadd.f32 %v10042_v14, %v4000_v27  ;;  %v8587_v44 = vld [vmem:[%s11172_s3 + $0x128] sm:$0xff]  ;;  %v3721_v27 = vld [vmem:[#allocation2 + $0xf9] sm:$0xff]  ;;  %5028 = vmatpush.bf16.msrb.mxu2 %v8571_v7 }
 0x26e   : > { %v3273_v55 = vpop.f32.mrf.mxu2 }
 0x26f   : > { %v8665_v22 = vpop.eup %8664  ;;  %v4227_v41 = vmul.f32 0.7978846, %v4195_v53  ;;  %v4100_v1 = vmul.f32 0.044715, %v10122_v43  ;;  %v3341_v19 = vadd.f32 %v3273_v55, %v11381_v57  ;;  %v3603_v40 = vpop.f32.mrf.mxu3  ;;  %v7773_v57 = vpack.c.bf16 %v2938_v0, %v2937_v15  ;;  %v8562_v15 = vld [vmem:[%s11172_s3 + $0x60] sm:$0xff] }
 0x270   : > { %v4290_v23 = vadd.f32 1.0, %v8665_v22  ;;  %v3935_v56 = vpop.f32.mrf.mxu0  ;;  %v3391_v22 = vld [vmem:[#allocation2 + $0xf8] sm:$0xff]  ;;  %5598 = vmatpush.bf16.msrb.mxu0 %v8587_v44  ;;  %v8586_v0 = vld [vmem:[%s11172_s3 + $0x120] sm:$0xff]  ;;  %5166 = vmatpush.bf16.msrb.mxu3 %v8562_v15 }
 0x271   : > { %8666 = vtanh.f32 %v4227_v41  ;;  %v4132_v18 = vmul.f32 %v4100_v1, %v10122_v43  ;;  %v3671_v61 = vadd.f32 %v3603_v40, %v3341_v19  ;;  %v3392_v41 = vld [vmem:[#allocation2 + $0x100] sm:$0xff] }
 0x272   : > { %v4322_v30 = vmul.f32 %v4290_v23, %v4066_v31  ;;  %v7914_v31 = vpack.c.bf16 %v3722_v32, %v3721_v27  ;;  %v8570_v23 = vld [vmem:[%s11172_s3 + $0xa0] sm:$0xff]  ;;  %v11384_v27 = vld [vmem:[#allocation26_spill] sm:$0xff]  ;;  %v8569_v32 = vld [vmem:[%s11172_s3 + $0x98] sm:$0xff] }
 0x273   : > { %v4164_v3 = vmul.f32 %v4132_v18, %v10122_v43  ;;  %v4001_v24 = vadd.f32 %v3933_v52, %v3671_v61  ;;  %v2888_v52 = vadd.f32 %v11382_v28, %v9870_v38  ;;  %v4067_v18 = vmul.f32 0.5, %v10102_v46  ;;  %5029 = vmatpush.bf16.msrb.mxu2 %v8570_v23  ;;  %v8561_v28 = vld [vmem:[%s11172_s3 + $0x58] sm:$0xff]  ;;  %v8560_v23 = vld [vmem:[%s11172_s3 + $0x50] sm:$0xff]  ;;  %v2939_v15 = vld [vmem:[#allocation2 + $0x107] sm:$0xff] }
 0x274   : > { %4392 = vst [vmem:[#allocation3 + $0x40] sm:$0xff] %v4322_v30  ;;  %v10140_v47 = vpack.c.bf16 %v4322_v30, %v4321_v12  ;;  %5599 = vmatpush.bf16.msrb.mxu0 %v8586_v0  ;;  %vm11385_vm8 = vnez %v11384_v27  ;;  %5167 = vmatpush.bf16.msrb.mxu3 %v8561_v28  ;;  %v2940_v0 = vld [vmem:[#allocation2 + $0x10f] sm:$0xff] }
 0x275   : > { %v4196_v53 = vadd.f32 %v4164_v3, %v10122_v43  ;;  %v10146_v55 = vadd.f32 %v10042_v14, %v4001_v24  ;;  %v3506_v3 = vpack.c.bf16 %v3392_v41, %v3391_v22  ;;  %v3724_v28 = vld [vmem:[#allocation2 + $0x111] sm:$0xff] }
 0x276   : > { %v3275_v1 = vpop.f32.mrf.mxu2  ;;  %4617 = vmatmul.bf16.gmra.mxu1 %v10140_v47 }
 0x277   : > { %v8667_v19 = vpop.eup %8666  ;;  %v4228_v12 = vmul.f32 0.7978846, %v4196_v53  ;;  %v4101_v40 = vmul.f32 0.044715, %v10146_v55  ;;  %v3342_v9 = vadd.f32 %v3275_v1, %v2888_v52  ;;  %v3605_v38 = vpop.f32.mrf.mxu3  ;;  %v8585_v52 = vld [vmem:[%s11172_s3 + $0x118] sm:$0xff]  ;;  %5030 = vmatpush.bf16.msrb.mxu2 %v8569_v32  ;;  %v3723_v32 = vld [vmem:[#allocation2 + $0x109] sm:$0xff] }
 0x278   : > { %v4291_v61 = vadd.f32 1.0, %v8667_v19  ;;  %v3938_v30 = vpop.f32.mrf.mxu0  ;;  %5600 = vmatpush.bf16.msrb.mxu0 %v8585_v52  ;;  %5168 = vmatpush.bf16.msrb.mxu3 %v8560_v23  ;;  %v8566_v23 = vld [vmem:[%s11172_s3 + $0x80] sm:$0xff] }
 0x279   : > { %8668 = vtanh.f32 %v4228_v12  ;;  %v4133_v24 = vmul.f32 %v4101_v40, %v10146_v55  ;;  %v3672_v7 = vadd.f32 %v3605_v38, %v3342_v9  ;;  %v8568_v40 = vld [vmem:[%s11172_s3 + $0x90] sm:$0xff]  ;;  %v4068_v9 = vmul.f32 0.5, %v10122_v43 }
 0x27a   : > { %v4323_v29 = vmul.f32 %v4291_v61, %v4067_v18  ;;  %v8584_v18 = vld [vmem:[%s11172_s3 + $0x110] sm:$0xff] }
 0x27b   : > { %v4165_v46 = vmul.f32 %v4133_v24, %v10146_v55  ;;  %v4002_v44 = vadd.f32 %v3935_v56, %v3672_v7  ;;  %7774 = vmatmul.msk.bf16.gmra.mxu2 %vm11383_vm9, %v7773_v57  ;;  %7915 = vmatmul.msk.bf16.gmra.mxu0 %vm11385_vm8, %v7914_v31  ;;  %v8567_v7 = vld [vmem:[%s11172_s3 + $0x88] sm:$0xff]  ;;  %vm11387_vm9 = vnez %v11270_v16 }
 0x27c   : > { %4393 = vst [vmem:[#allocation3 + $0x48] sm:$0xff] %v4323_v29  ;;  %3647 = vmatmul.bf16.gmra.mxu3 %v3506_v3  ;;  %5031 = vmatpush.bf16.msrb.mxu2 %v8568_v40 }
 0x27d   : > { %v4197_v56 = vadd.f32 %v4165_v46, %v10146_v55  ;;  %v10180_v53 = vadd.f32 %v10042_v14, %v4002_v44  ;;  %5601 = vmatpush.bf16.msrb.mxu0 %v8584_v18  ;;  %v8559_v46 = vld [vmem:[%s11172_s3 + $0x48] sm:$0xff]  ;;  %v4069_v18 = vmul.f32 0.5, %v10146_v55 }
 0x27e   : > { %v3278_v22 = vpop.f32.mrf.mxu2  ;;  %v8583_v44 = vld [vmem:[%s11172_s3 + $0x108] sm:$0xff]  ;;  %5169 = vmatpush.bf16.msrb.mxu3 %v8559_v46 }
 0x27f   : > { %v8669_v41 = vpop.eup %8668  ;;  %v4229_v1 = vmul.f32 0.7978846, %v4197_v56  ;;  %v4102_v57 = vmul.f32 0.044715, %v10180_v53  ;;  %v3343_v19 = vadd.f32 %v3278_v22, %v9882_v58  ;;  %v3608_v12 = vpop.f32.mrf.mxu3  ;;  %v4070_v16 = vmul.f32 0.5, %v10180_v53 }
 0x280   : > { %v4292_v38 = vadd.f32 1.0, %v8669_v41  ;;  %v3940_v31 = vpop.f32.mrf.mxu0  ;;  %v3393_v41 = vld [vmem:[#allocation2 + $0x108] sm:$0xff]  ;;  %5032 = vmatpush.bf16.msrb.mxu2 %v8567_v7 }
 0x281   : > { %8670 = vtanh.f32 %v4229_v1  ;;  %v4134_v58 = vmul.f32 %v4102_v57, %v10180_v53  ;;  %v3673_v61 = vadd.f32 %v3608_v12, %v3343_v19  ;;  %v3394_v1 = vld [vmem:[#allocation2 + $0x110] sm:$0xff]  ;;  %v7776_v19 = vpack.c.bf16 %v2940_v0, %v2939_v15  ;;  %5602 = vmatpush.bf16.msrb.mxu0 %v8583_v44  ;;  %v8558_v15 = vld [vmem:[%s11172_s3 + $0x40] sm:$0xff] }
 0x282   : > { %v4324_v3 = vmul.f32 %v4292_v38, %v4068_v9  ;;  %v8582_v0 = vld [vmem:[%s11172_s3 + $0x100] sm:$0xff]  ;;  %5170 = vmatpush.bf16.msrb.mxu3 %v8558_v15 }
 0x283   : > { %v4166_v43 = vmul.f32 %v4134_v58, %v10180_v53  ;;  %v4003_v24 = vadd.f32 %v3938_v30, %v3673_v61  ;;  %v11386_v30 = vld [vmem:[#allocation27_spill] sm:$0xff] }
 0x284   : > { %4394 = vst [vmem:[#allocation3 + $0x50] sm:$0xff] %v4324_v3  ;;  %v10205_v52 = vpack.c.bf16 %v4324_v3, %v4323_v29  ;;  %v2890_v51 = vadd.f32 %v11386_v30, %v9893_v36  ;;  %v7917_v36 = vpack.c.bf16 %v3724_v28, %v3723_v32  ;;  %v3507_v3 = vpack.c.bf16 %v3394_v1, %v3393_v41 }
 0x285   : > { %v4198_v56 = vadd.f32 %v4166_v43, %v10180_v53  ;;  %v10211_v22 = vadd.f32 %v10042_v14, %v4003_v24  ;;  %5033 = vmatpush.bf16.msrb.mxu2 %v8566_v23  ;;  %5603 = vmatpush.bf16.msrb.mxu0 %v8582_v0 }
 0x286   : > { %v3280_v57 = vpop.f32.mrf.mxu2  ;;  %4622 = vmatmul.bf16.gmra.mxu1 %v10205_v52 }
 0x287   : > { %v8671_v12 = vpop.eup %8670  ;;  %v4230_v40 = vmul.f32 0.7978846, %v4198_v56  ;;  %v4103_v29 = vmul.f32 0.044715, %v10211_v22  ;;  %v3344_v9 = vadd.f32 %v3280_v57, %v2890_v51  ;;  %v3610_v38 = vpop.f32.mrf.mxu3 }
 0x288   : > { %v4293_v58 = vadd.f32 1.0, %v8671_v12  ;;  %v3943_v61 = vpop.f32.mrf.mxu0 }
 0x289   : > { %8672 = vtanh.f32 %v4230_v40  ;;  %v4135_v43 = vmul.f32 %v4103_v29, %v10211_v22  ;;  %v3674_v24 = vadd.f32 %v3610_v38, %v3344_v9 }
 0x28a   : > { %v4325_v7 = vmul.f32 %v4293_v58, %v4069_v18 }
 0x28b   : > { %v4167_v55 = vmul.f32 %v4135_v43, %v10211_v22  ;;  %v4004_v46 = vadd.f32 %v3940_v31, %v3674_v24  ;;  %7777 = vmatmul.msk.bf16.gmra.mxu2 %vm11387_vm9, %v7776_v19  ;;  %7918 = vmatmul.msk.bf16.gmra.mxu0 %vm11388_vm0, %v7917_v36  ;;  %v2892_v36 = vadd.f32 %v9900_v2, %v9914_v11  ;;  %v4071_v43 = vmul.f32 0.5, %v10211_v22 }
 0x28c   : > { %4395 = vst [vmem:[#allocation3 + $0x58] sm:$0xff] %v4325_v7  ;;  %3652 = vmatmul.bf16.gmra.mxu3 %v3507_v3 }
 0x28d   : > { %v4199_v44 = vadd.f32 %v4167_v55, %v10211_v22  ;;  %v4040_v32 = vadd.f32 %v10042_v14, %v4004_v46 }
 0x28e   : > { %v3283_v28 = vpop.f32.mrf.mxu2 }
 0x28f   : > { %v8673_v30 = vpop.eup %8672  ;;  %v4231_v51 = vmul.f32 0.7978846, %v4199_v44  ;;  %v4104_v56 = vmul.f32 0.044715, %v4040_v32  ;;  %v3345_v41 = vadd.f32 %v3283_v28, %v9902_v34  ;;  %v3613_v31 = vpop.f32.mrf.mxu3  ;;  %v11389_v44 = vmov 0.0|0.0   ;;  %v8579_v28 = vld [vmem:[%s11172_s3 + $0xe8] sm:$0xff] }
 0x290   : > { %v4294_v1 = vadd.f32 1.0, %v8673_v30  ;;  %v3945_v57 = vpop.f32.mrf.mxu0  ;;  %5735 = vmatpush.bf16.msrb.mxu1 %v8579_v28 }
 0x291   : > { %8674 = vtanh.f32 %v4231_v51  ;;  %v4136_v19 = vmul.f32 %v4104_v56, %v4040_v32  ;;  %v3675_v12 = vadd.f32 %v3613_v31, %v3345_v41 }
 0x292   : > { %v4326_v40 = vmul.f32 %v4294_v1, %v4070_v16 }
 0x293   : > { %v4168_v29 = vmul.f32 %v4136_v19, %v4040_v32  ;;  %v4005_v9 = vadd.f32 %v3943_v61, %v3675_v12 }
 0x294   : > { %4396 = vst [vmem:[#allocation3 + $0x60] sm:$0xff] %v4326_v40  ;;  %v10235_v38 = vpack.c.bf16 %v4326_v40, %v4325_v7 }
 0x295   : > { %v4200_v23 = vadd.f32 %v4168_v29, %v4040_v32  ;;  %v4041_v34 = vadd.f32 %v10042_v14, %v4005_v9 }
 0x296   : > { %v3285_v18 = vpop.f32.mrf.mxu2  ;;  %4627 = vmatmul.bf16.gmra.mxu1 %v10235_v38 }
 0x297   : > { %v8675_v53 = vpop.eup %8674  ;;  %v4232_v58 = vmul.f32 0.7978846, %v4200_v23  ;;  %v4105_v3 = vmul.f32 0.044715, %v4041_v34  ;;  %v3346_v15 = vadd.f32 %v3285_v18, %v2892_v36  ;;  %v3615_v0 = vpop.f32.mrf.mxu3 }
 0x298   : > { %v4295_v61 = vadd.f32 1.0, %v8675_v53  ;;  %v3948_v24 = vpop.f32.mrf.mxu0  ;;  %v2894_v53 = vadd.f32 %v9921_v33, %v9933_v48 }
 0x299   : > { %8676 = vtanh.f32 %v4232_v58  ;;  %v4137_v7 = vmul.f32 %v4105_v3, %v4041_v34  ;;  %v3676_v55 = vadd.f32 %v3615_v0, %v3346_v15  ;;  %v4850_v15 = vld [vmem:[#allocation3 + $0x21] sm:$0xff] }
 0x29a   : > { %v4327_v46 = vmul.f32 %v4295_v61, %v4071_v43 }
 0x29b   : > { %v4169_v2 = vmul.f32 %v4137_v7, %v4041_v34  ;;  %v4006_v11 = vadd.f32 %v3945_v57, %v3676_v55  ;;  %3327 = vmatmul.bf16.gmra.mxu2 %v11389_v44  ;;  %3987 = vmatmul.bf16.gmra.mxu0 %v11389_v44  ;;  %v4072_v57 = vmul.f32 0.5, %v4040_v32  ;;  %v4073_v55 = vmul.f32 0.5, %v4041_v34 }
 0x29c   : > { %4397 = vst [vmem:[#allocation3 + $0x68] sm:$0xff] %v4327_v46  ;;  %3657 = vmatmul.bf16.gmra.mxu3 %v11389_v44 }
 0x29d   : > { %v4201_v22 = vadd.f32 %v4169_v2, %v4041_v34  ;;  %v4042_v30 = vadd.f32 %v10042_v14, %v4006_v11 }
 0x29e   : > { %v3288_v51 = vpop.f32.mrf.mxu2 }
 0x29f   : > { %v8677_v56 = vpop.eup %8676  ;;  %v4233_v41 = vmul.f32 0.7978846, %v4201_v22  ;;  %v4106_v31 = vmul.f32 0.044715, %v4042_v30  ;;  %v3347_v16 = vadd.f32 %v3288_v51, %v9926_v49  ;;  %v3618_v1 = vpop.f32.mrf.mxu3 }
 0x2a0   : > { %v4296_v19 = vadd.f32 1.0, %v8677_v56  ;;  %v3950_v12 = vpop.f32.mrf.mxu0 }
 0x2a1   : > { %8678 = vtanh.f32 %v4233_v41  ;;  %v4138_v40 = vmul.f32 %v4106_v31, %v4042_v30  ;;  %v3677_v29 = vadd.f32 %v3618_v1, %v3347_v16 }
 0x2a2   : > { %v4328_v9 = vmul.f32 %v4296_v19, %v4072_v57 }
 0x2a3   : > { %v4170_v36 = vmul.f32 %v4138_v40, %v4042_v30  ;;  %v4007_v23 = vadd.f32 %v3948_v24, %v3677_v29  ;;  %v4074_v40 = vmul.f32 0.5, %v4042_v30 }
 0x2a4   : > { %4398 = vst [vmem:[#allocation3 + $0x70] sm:$0xff] %v4328_v9  ;;  %v10250_v18 = vpack.c.bf16 %v4328_v9, %v4327_v46  ;;  %v4849_v46 = vld [vmem:[#allocation3 + $0x19] sm:$0xff] }
 0x2a5   : > { %v4202_v58 = vadd.f32 %v4170_v36, %v4042_v30  ;;  %v4043_v3 = vadd.f32 %v10042_v14, %v4007_v23  ;;  %v8016_v33 = vpack.c.bf16 %v4850_v15, %v4849_v46 }
 0x2a6   : > { %v3290_v49 = vpop.f32.mrf.mxu2  ;;  %4632 = vmatmul.bf16.gmra.mxu1 %v10250_v18 }
 0x2a7   : > { %v8679_v32 = vpop.eup %8678  ;;  %v4234_v0 = vmul.f32 0.7978846, %v4202_v58  ;;  %v4107_v43 = vmul.f32 0.044715, %v4043_v3  ;;  %v3348_v61 = vadd.f32 %v3290_v49, %v2894_v53  ;;  %v3620_v7 = vpop.f32.mrf.mxu3  ;;  %v2896_v49 = vadd.f32 %v9936_v50, %v9945_v5 }
 0x2a8   : > { %v4297_v24 = vadd.f32 1.0, %v8679_v32  ;;  %v3953_v2 = vpop.f32.mrf.mxu0 }
 0x2a9   : > { %8680 = vtanh.f32 %v4234_v0  ;;  %v4139_v11 = vmul.f32 %v4107_v43, %v4043_v3  ;;  %v3678_v28 = vadd.f32 %v3620_v7, %v3348_v61  ;;  %v4852_v0 = vld [vmem:[#allocation3 + $0x31] sm:$0xff] }
 0x2aa   : > { %v4329_v48 = vmul.f32 %v4297_v24, %v4073_v55  ;;  %v4075_v24 = vmul.f32 0.5, %v4043_v3 }
 0x2ab   : > { %v4171_v22 = vmul.f32 %v4139_v11, %v4043_v3  ;;  %v4008_v51 = vadd.f32 %v3950_v12, %v3678_v28  ;;  %8017 = vmatmul.msk.bf16.vlgmr.msrb.gmra.mxu2 %vm9523_vm7, %v8016_v33  ;;  %5604 = vmatmul.bf16.vlgmr.msrb.gmra.mxu0 %v10099_v39  ;;  %v4851_v11 = vld [vmem:[#allocation3 + $0x29] sm:$0xff] }
 0x2ac   : > { %4399 = vst [vmem:[#allocation3 + $0x78] sm:$0xff] %v4329_v48  ;;  %5171 = vmatmul.bf16.vlgmr.msrb.gmra.mxu3 %v10078_v59  ;;  %v8019_v50 = vpack.c.bf16 %v4852_v0, %v4851_v11  ;;  %v4853_v11 = vld [vmem:[#allocation3 + $0x39] sm:$0xff] }
 0x2ad   : > { %v4203_v56 = vadd.f32 %v4171_v22, %v4043_v3  ;;  %v4044_v34 = vadd.f32 %v10042_v14, %v4008_v51  ;;  %v8578_v3 = vld [vmem:[%s11172_s3 + $0xe0] sm:$0xff] }
 0x2ae   : > { %v3293_v41 = vpop.f32.mrf.mxu2  ;;  %5736 = vmatpush.bf16.msrb.mxu1 %v8578_v3 }
 0x2af   : > { %v8681_v31 = vpop.eup %8680  ;;  %v4235_v16 = vmul.f32 0.7978846, %v4203_v56  ;;  %v4108_v1 = vmul.f32 0.044715, %v4044_v34  ;;  %v3349_v57 = vadd.f32 %v3293_v41, %v9938_v20  ;;  %v3623_v19 = vpop.f32.mrf.mxu3 }
 0x2b0   : > { %v4298_v12 = vadd.f32 1.0, %v8681_v31  ;;  %v3955_v29 = vpop.f32.mrf.mxu0 }
 0x2b1   : > { %8682 = vtanh.f32 %v4235_v16  ;;  %v4140_v9 = vmul.f32 %v4108_v1, %v4044_v34  ;;  %v3679_v36 = vadd.f32 %v3623_v19, %v3349_v57 }
 0x2b2   : > { %v4330_v23 = vmul.f32 %v4298_v12, %v4074_v40  ;;  %v4076_v40 = vmul.f32 0.5, %v4044_v34 }
 0x2b3   : > { %v4172_v53 = vmul.f32 %v4140_v9, %v4044_v34  ;;  %v4009_v58 = vadd.f32 %v3953_v2, %v3679_v36 }
 0x2b4   : > { %4400 = vst [vmem:[#allocation3 + $0x80] sm:$0xff] %v4330_v23  ;;  %v10262_v59 = vpack.c.bf16 %v4330_v23, %v4329_v48 }
 0x2b5   : > { %v4204_v15 = vadd.f32 %v4172_v53, %v4044_v34  ;;  %v4045_v32 = vadd.f32 %v10042_v14, %v4009_v58 }
 0x2b6   : > { %v3295_v20 = vpop.f32.mrf.mxu2  ;;  %4637 = vmatmul.bf16.gmra.mxu1 %v10262_v59 }
 0x2b7   : > { %v8683_v30 = vpop.eup %8682  ;;  %v4236_v43 = vmul.f32 0.7978846, %v4204_v15  ;;  %v4109_v61 = vmul.f32 0.044715, %v4045_v32  ;;  %v3350_v7 = vadd.f32 %v3295_v20, %v2896_v49  ;;  %v3625_v55 = vpop.f32.mrf.mxu3  ;;  %v2898_v15 = vadd.f32 %v9948_v37, %v9960_v63 }
 0x2b8   : > { %v4299_v2 = vadd.f32 1.0, %v8683_v30  ;;  %v3958_v46 = vpop.f32.mrf.mxu0  ;;  %v4854_v30 = vld [vmem:[#allocation3 + $0x41] sm:$0xff] }
 0x2b9   : > { %8684 = vtanh.f32 %v4236_v43  ;;  %v4141_v28 = vmul.f32 %v4109_v61, %v4045_v32  ;;  %v3680_v33 = vadd.f32 %v3625_v55, %v3350_v7  ;;  %v8022_v37 = vpack.c.bf16 %v4854_v30, %v4853_v11 }
 0x2ba   : > { %v4331_v5 = vmul.f32 %v4299_v2, %v4075_v24  ;;  %v4077_v24 = vmul.f32 0.5, %v4045_v32 }
 0x2bb   : > { %v4173_v48 = vmul.f32 %v4141_v28, %v4045_v32  ;;  %v4010_v22 = vadd.f32 %v3955_v29, %v3680_v33  ;;  %8020 = vmatmul.msk.bf16.gmra.mxu2 %vm11337_vm1, %v8019_v50  ;;  %5609 = vmatmul.bf16.gmra.mxu0 %v10140_v47  ;;  %v10283_v50 = vpop.f32.mrf.mxu1 }
 0x2bc   : > { %4401 = vst [vmem:[#allocation3 + $0x88] sm:$0xff] %v4331_v5  ;;  %5176 = vmatmul.bf16.gmra.mxu3 %v10099_v39 }
 0x2bd   : > { %v4205_v51 = vadd.f32 %v4173_v48, %v4045_v32  ;;  %v4046_v56 = vadd.f32 %v10042_v14, %v4010_v22 }
 0x2be   : > { %v3298_v41 = vpop.f32.mrf.mxu2 }
 0x2bf   : > { %v8685_v31 = vpop.eup %8684  ;;  %v4237_v16 = vmul.f32 0.7978846, %v4205_v51  ;;  %v4110_v1 = vmul.f32 0.044715, %v4046_v56  ;;  %v3351_v57 = vadd.f32 %v3298_v41, %v9953_v42  ;;  %v3628_v19 = vpop.f32.mrf.mxu3 }
 0x2c0   : > { %v4300_v12 = vadd.f32 1.0, %v8685_v31  ;;  %v3960_v29 = vpop.f32.mrf.mxu0 }
 0x2c1   : > { %8686 = vtanh.f32 %v4237_v16  ;;  %v4142_v9 = vmul.f32 %v4110_v1, %v4046_v56  ;;  %v3681_v36 = vadd.f32 %v3628_v19, %v3351_v57  ;;  %v4078_v57 = vmul.f32 0.5, %v4046_v56 }
 0x2c2   : > { %v4332_v23 = vmul.f32 %v4300_v12, %v4076_v40  ;;  %v10297_v12 = vld [vmem:[%s11173_s4] ss:$0 sm:$0xff] }
 0x2c3   : > { %v4174_v53 = vmul.f32 %v4142_v9, %v4046_v56  ;;  %v4011_v58 = vadd.f32 %v3958_v46, %v3681_v36 }
 0x2c4   : > { %4402 = vst [vmem:[#allocation3 + $0x90] sm:$0xff] %v4332_v23  ;;  %v10277_v49 = vpack.c.bf16 %v4332_v23, %v4331_v5 }
 0x2c5   : > { %v4206_v20 = vadd.f32 %v4174_v53, %v4046_v56  ;;  %v4047_v0 = vadd.f32 %v10042_v14, %v4011_v58  ;;  %v2900_v58 = vadd.f32 %v9963_v17, %v9972_v60 }
 0x2c6   : > { %v3300_v42 = vpop.f32.mrf.mxu2  ;;  %4642 = vmatmul.bf16.gmra.mxu1 %v10277_v49 }
 0x2c7   : > { %v8687_v34 = vpop.eup %8686  ;;  %v4238_v43 = vmul.f32 0.7978846, %v4206_v20  ;;  %v4111_v61 = vmul.f32 0.044715, %v4047_v0  ;;  %v3352_v7 = vadd.f32 %v3300_v42, %v2898_v15  ;;  %v3630_v55 = vpop.f32.mrf.mxu3  ;;  %v10310_v20 = vld [vmem:[%s11171_s2] ss:$0 sm:$0xff] }
 0x2c8   : > { %v4301_v2 = vadd.f32 1.0, %v8687_v34  ;;  %v3963_v46 = vpop.f32.mrf.mxu0  ;;  %v4856_v34 = vld [vmem:[#allocation3 + $0x51] sm:$0xff] }
 0x2c9   : > { %8688 = vtanh.f32 %v4238_v43  ;;  %v4143_v28 = vmul.f32 %v4111_v61, %v4047_v0  ;;  %v3682_v33 = vadd.f32 %v3630_v55, %v3352_v7  ;;  %v4079_v55 = vmul.f32 0.5, %v4047_v0 }
 0x2ca   : > { %v4333_v63 = vmul.f32 %v4301_v2, %v4077_v24 }
 0x2cb   : > { %v4175_v5 = vmul.f32 %v4143_v28, %v4047_v0  ;;  %v4012_v48 = vadd.f32 %v3960_v29, %v3682_v33  ;;  %8023 = vmatmul.msk.bf16.gmra.mxu2 %vm11338_vm6, %v8022_v37  ;;  %5614 = vmatmul.bf16.gmra.mxu0 %v10205_v52 }
 0x2cc   : > { %4403 = vst [vmem:[#allocation3 + $0x98] sm:$0xff] %v4333_v63  ;;  %5181 = vmatmul.bf16.gmra.mxu3 %v10140_v47 }
 0x2cd   : > { %v4207_v32 = vadd.f32 %v4175_v5, %v4047_v0  ;;  %v10290_v22 = vadd.f32 %v10042_v14, %v4012_v48 }
 0x2ce   : > { %v3303_v3 = vpop.f32.mrf.mxu2 }
 0x2cf   : > { %v8689_v51 = vpop.eup %8688  ;;  %v4239_v41 = vmul.f32 0.7978846, %v4207_v32  ;;  %v4112_v31 = vmul.f32 0.044715, %v10290_v22  ;;  %v3353_v16 = vadd.f32 %v3303_v3, %v9965_v62  ;;  %v3633_v1 = vpop.f32.mrf.mxu3  ;;  %v8577_v32 = vld [vmem:[%s11172_s3 + $0xd8] sm:$0xff] }
 0x2d0   : > { %v4302_v19 = vadd.f32 1.0, %v8689_v51  ;;  %v3965_v40 = vpop.f32.mrf.mxu0  ;;  %5737 = vmatpush.bf16.msrb.mxu1 %v8577_v32 }
 0x2d1   : > { %8690 = vtanh.f32 %v4239_v41  ;;  %v4144_v14 = vmul.f32 %v4112_v31, %v10290_v22  ;;  %v3683_v29 = vadd.f32 %v3633_v1, %v3353_v16 }
 0x2d2   : > { %v4334_v9 = vmul.f32 %v4302_v19, %v4078_v57 }
 0x2d3   : > { %v4176_v36 = vmul.f32 %v4144_v14, %v10290_v22  ;;  %v4013_v23 = vadd.f32 %v3963_v46, %v3683_v29  ;;  %v4608_v53 = vpop.f32.mrf.mxu1  ;;  %v4855_v46 = vld [vmem:[#allocation3 + $0x49] sm:$0xff]  ;;  %v4080_v14 = vmul.f32 0.5, %v10290_v22 }
 0x2d4   : > { %4404 = vst [vmem:[#allocation3 + $0xa0] sm:$0xff] %v4334_v9  ;;  %v4609_v62 = vadd.f32 %v10297_v12, %v4608_v53  ;;  %v10302_v56 = vpack.c.bf16 %v4334_v9, %v4333_v63  ;;  %v8025_v33 = vpack.c.bf16 %v4856_v34, %v4855_v46 }
 0x2d5   : > { %v4208_v15 = vadd.f32 %v4176_v36, %v10290_v22  ;;  %v10313_v42 = vadd.f32 %v10310_v20, %v4013_v23  ;;  %v2902_v22 = vadd.f32 %v9975_v13, %v9987_v26 }
 0x2d6   : > { %v3305_v30 = vpop.f32.mrf.mxu2  ;;  %8692 = vtanh.f32 %v4609_v62  ;;  %4647 = vmatmul.bf16.gmra.mxu1 %v10302_v56 }
 0x2d7   : > { %v8691_v43 = vpop.eup %8690  ;;  %v4240_v61 = vmul.f32 0.7978846, %v4208_v15  ;;  %v4113_v17 = vmul.f32 0.044715, %v10313_v42  ;;  %v3354_v60 = vadd.f32 %v3305_v30, %v2900_v58  ;;  %v3635_v7 = vpop.f32.mrf.mxu3 }
 0x2d8   : > { %v4303_v24 = vadd.f32 1.0, %v8691_v43  ;;  %v3968_v2 = vpop.f32.mrf.mxu0 }
 0x2d9   : > { %8694 = vtanh.f32 %v4240_v61  ;;  %v4145_v11 = vmul.f32 %v4113_v17, %v10313_v42  ;;  %v3684_v28 = vadd.f32 %v3635_v7, %v3354_v60  ;;  %v4858_v60 = vld [vmem:[#allocation3 + $0x61] sm:$0xff] }
 0x2da   : > { %v4335_v37 = vmul.f32 %v4303_v24, %v4079_v55 }
 0x2db   : > { %v4177_v63 = vmul.f32 %v4145_v11, %v10313_v42  ;;  %v4014_v5 = vadd.f32 %v3965_v40, %v3684_v28  ;;  %8026 = vmatmul.msk.bf16.gmra.mxu2 %vm11339_vm10, %v8025_v33  ;;  %5619 = vmatmul.bf16.gmra.mxu0 %v10235_v38  ;;  %v4610_v0 = vpop.f32.mrf.mxu1  ;;  %v4081_v11 = vmul.f32 0.5, %v10313_v42  ;;  %v4857_v28 = vld [vmem:[#allocation3 + $0x59] sm:$0xff] }
 0x2dc   : > { %v8693_v48 = vpop.eup %8692  ;;  %4405 = vst [vmem:[#allocation3 + $0xa8] sm:$0xff] %v4335_v37  ;;  %5186 = vmatmul.bf16.gmra.mxu3 %v10205_v52  ;;  %v4611_v3 = vadd.f32 %v10297_v12, %v4610_v0 }
 0x2dd   : > { %v4209_v51 = vadd.f32 %v4177_v63, %v10313_v42  ;;  %v10335_v41 = vadd.f32 %v10310_v20, %v4014_v5  ;;  %4720 = vst [vmem:[%s10322_s23] sm:$0xff] %v8693_v48  ;;  %v8028_v63 = vpack.c.bf16 %v4858_v60, %v4857_v28 }
 0x2de   : > { %v3308_v31 = vpop.f32.mrf.mxu2  ;;  %8696 = vtanh.f32 %v4611_v3 }
 0x2df   : > { %v8695_v16 = vpop.eup %8694  ;;  %v4241_v1 = vmul.f32 0.7978846, %v4209_v51  ;;  %v4114_v57 = vmul.f32 0.044715, %v10335_v41  ;;  %v3355_v19 = vadd.f32 %v3308_v31, %v9980_v25  ;;  %v3638_v40 = vpop.f32.mrf.mxu3 }
 0x2e0   : > { %v4304_v29 = vadd.f32 1.0, %v8695_v16  ;;  %v3970_v9 = vpop.f32.mrf.mxu0 }
 0x2e1   : > { %8698 = vtanh.f32 %v4241_v1  ;;  %v4146_v36 = vmul.f32 %v4114_v57, %v10335_v41  ;;  %v3685_v23 = vadd.f32 %v3638_v40, %v3355_v19 }
 0x2e2   : > { %v4336_v53 = vmul.f32 %v4304_v29, %v4080_v14  ;;  %v11391_v14 = vld [vmem:[#allocation30_spill] sm:$0xff] }
 0x2e3   : > { %v4178_v62 = vmul.f32 %v4146_v36, %v10335_v41  ;;  %v4015_v58 = vadd.f32 %v3968_v2, %v3685_v23  ;;  %v4613_v15 = vpop.f32.mrf.mxu1  ;;  %v4082_v36 = vmul.f32 0.5, %v10335_v41 }
 0x2e4   : > { %v8697_v30 = vpop.eup %8696  ;;  %4406 = vst [vmem:[#allocation3 + $0xb0] sm:$0xff] %v4336_v53  ;;  %v4614_v34 = vadd.f32 %v10297_v12, %v4613_v15  ;;  %v10344_v25 = vpack.c.bf16 %v4336_v53, %v4335_v37 }
 0x2e5   : > { %v4210_v43 = vadd.f32 %v4178_v62, %v10335_v41  ;;  %v10350_v61 = vadd.f32 %v10310_v20, %v4015_v58  ;;  %4721 = vst [vmem:[%s10322_s23 + $0x8] sm:$0xff] %v8697_v30  ;;  %v11393_v41 = vld [vmem:[#allocation29_spill] sm:$0xff] }
 0x2e6   : > { %v3310_v17 = vpop.f32.mrf.mxu2  ;;  %8700 = vtanh.f32 %v4614_v34  ;;  %4652 = vmatmul.bf16.gmra.mxu1 %v10344_v25 }
 0x2e7   : > { %v8699_v7 = vpop.eup %8698  ;;  %v4242_v55 = vmul.f32 0.7978846, %v4210_v43  ;;  %v4115_v24 = vmul.f32 0.044715, %v10350_v61  ;;  %v3356_v2 = vadd.f32 %v3310_v17, %v2902_v22  ;;  %v3640_v46 = vpop.f32.mrf.mxu3 }
 0x2e8   : > { %v4305_v13 = vadd.f32 1.0, %v8699_v7  ;;  %v3973_v26 = vpop.f32.mrf.mxu0  ;;  %v11392_v7 = vld [vmem:[#allocation10_spill] sm:$0xff] }
 0x2e9   : > { %8702 = vtanh.f32 %v4242_v55  ;;  %v4147_v33 = vmul.f32 %v4115_v24, %v10350_v61  ;;  %v3686_v37 = vadd.f32 %v3640_v46, %v3356_v2  ;;  %v2904_v55 = vadd.f32 %v11393_v41, %v11392_v7 }
 0x2ea   : > { %v4337_v5 = vmul.f32 %v4305_v13, %v4081_v11  ;;  %v4860_v11 = vld [vmem:[#allocation3 + $0x71] sm:$0xff] }
 0x2eb   : > { %v4179_v0 = vmul.f32 %v4147_v33, %v10350_v61  ;;  %v4016_v48 = vadd.f32 %v3970_v9, %v3686_v37  ;;  %8029 = vmatmul.msk.bf16.gmra.mxu2 %vm11340_vm13, %v8028_v63  ;;  %5624 = vmatmul.bf16.gmra.mxu0 %v10250_v18  ;;  %v4615_v3 = vpop.f32.mrf.mxu1  ;;  %v4083_v63 = vmul.f32 0.5, %v10350_v61 }
 0x2ec   : > { %v8701_v42 = vpop.eup %8700  ;;  %4407 = vst [vmem:[#allocation3 + $0xb8] sm:$0xff] %v4337_v5  ;;  %5191 = vmatmul.bf16.gmra.mxu3 %v10235_v38  ;;  %v4616_v51 = vadd.f32 %v10297_v12, %v4615_v3 }
 0x2ed   : > { %v4211_v31 = vadd.f32 %v4179_v0, %v10350_v61  ;;  %v10365_v16 = vadd.f32 %v10310_v20, %v4016_v48  ;;  %4722 = vst [vmem:[%s10322_s23 + $0x10] sm:$0xff] %v8701_v42  ;;  %v4859_v48 = vld [vmem:[#allocation3 + $0x69] sm:$0xff] }
 0x2ee   : > { %v3313_v1 = vpop.f32.mrf.mxu2  ;;  %8704 = vtanh.f32 %v4616_v51  ;;  %v8031_v51 = vpack.c.bf16 %v4860_v11, %v4859_v48 }
 0x2ef   : > { %v8703_v57 = vpop.eup %8702  ;;  %v4243_v19 = vmul.f32 0.7978846, %v4211_v31  ;;  %v4116_v40 = vmul.f32 0.044715, %v10365_v16  ;;  %v3357_v29 = vadd.f32 %v3313_v1, %v11391_v14  ;;  %v3643_v9 = vpop.f32.mrf.mxu3  ;;  %v8576_v14 = vld [vmem:[%s11172_s3 + $0xd0] sm:$0xff] }
 0x2f0   : > { %v4306_v23 = vadd.f32 1.0, %v8703_v57  ;;  %v3975_v53 = vpop.f32.mrf.mxu0  ;;  %5738 = vmatpush.bf16.msrb.mxu1 %v8576_v14  ;;  %v4861_v14 = vld [vmem:[#allocation3 + $0x79] sm:$0xff] }
 0x2f1   : > { %8706 = vtanh.f32 %v4243_v19  ;;  %v4148_v62 = vmul.f32 %v4116_v40, %v10365_v16  ;;  %v3687_v58 = vadd.f32 %v3643_v9, %v3357_v29 }
 0x2f2   : > { %v4338_v15 = vmul.f32 %v4306_v23, %v4082_v36 }
 0x2f3   : > { %v4180_v30 = vmul.f32 %v4148_v62, %v10365_v16  ;;  %v4017_v34 = vadd.f32 %v3973_v26, %v3687_v58  ;;  %v4618_v22 = vpop.f32.mrf.mxu1 }
 0x2f4   : > { %v8705_v43 = vpop.eup %8704  ;;  %4408 = vst [vmem:[#allocation3 + $0xc0] sm:$0xff] %v4338_v15  ;;  %v4619_v17 = vadd.f32 %v10297_v12, %v4618_v22  ;;  %v10374_v60 = vpack.c.bf16 %v4338_v15, %v4337_v5  ;;  %v11395_v15 = vld [vmem:[#allocation12_spill] sm:$0xff]  ;;  %v4084_v22 = vmul.f32 0.5, %v10365_v16 }
 0x2f5   : > { %v4212_v24 = vadd.f32 %v4180_v30, %v10365_v16  ;;  %v10380_v2 = vadd.f32 %v10310_v20, %v4017_v34  ;;  %4723 = vst [vmem:[%s10322_s23 + $0x18] sm:$0xff] %v8705_v43  ;;  %v11397_v16 = vld [vmem:[#allocation6_spill] sm:$0xff] }
 0x2f6   : > { %v3315_v46 = vpop.f32.mrf.mxu2  ;;  %8708 = vtanh.f32 %v4619_v17  ;;  %4657 = vmatmul.bf16.gmra.mxu1 %v10374_v60 }
 0x2f7   : > { %v8707_v13 = vpop.eup %8706  ;;  %v4244_v26 = vmul.f32 0.7978846, %v4212_v24  ;;  %v4117_v28 = vmul.f32 0.044715, %v10380_v2  ;;  %v3358_v33 = vadd.f32 %v3315_v46, %v2904_v55  ;;  %v3645_v37 = vpop.f32.mrf.mxu3 }
 0x2f8   : > { %v4307_v5 = vadd.f32 1.0, %v8707_v13  ;;  %v3978_v0 = vpop.f32.mrf.mxu0 }
 0x2f9   : > { %8710 = vtanh.f32 %v4244_v26  ;;  %v4149_v3 = vmul.f32 %v4117_v28, %v10380_v2  ;;  %v3688_v42 = vadd.f32 %v3645_v37, %v3358_v33  ;;  %v11396_v33 = vld [vmem:[#allocation13_spill] sm:$0xff] }
 0x2fa   : > { %v4339_v31 = vmul.f32 %v4307_v5, %v4083_v63  ;;  %v2906_v37 = vadd.f32 %v11397_v16, %v11396_v33 }
 0x2fb   : > { %v4181_v1 = vmul.f32 %v4149_v3, %v10380_v2  ;;  %v4018_v57 = vadd.f32 %v3975_v53, %v3688_v42  ;;  %8032 = vmatmul.msk.bf16.gmra.mxu2 %vm11346_vm14, %v8031_v51  ;;  %5629 = vmatmul.bf16.gmra.mxu0 %v10262_v59  ;;  %v4620_v40 = vpop.f32.mrf.mxu1  ;;  %v4862_v3 = vld [vmem:[#allocation3 + $0x81] sm:$0xff] }
 0x2fc   : > { %v8709_v61 = vpop.eup %8708  ;;  %4409 = vst [vmem:[#allocation3 + $0xc8] sm:$0xff] %v4339_v31  ;;  %5196 = vmatmul.bf16.gmra.mxu3 %v10250_v18  ;;  %v4621_v29 = vadd.f32 %v10297_v12, %v4620_v40 }
 0x2fd   : > { %v4213_v9 = vadd.f32 %v4181_v1, %v10380_v2  ;;  %v10398_v36 = vadd.f32 %v10310_v20, %v4018_v57  ;;  %4724 = vst [vmem:[%s10322_s23 + $0x20] sm:$0xff] %v8709_v61  ;;  %v4085_v57 = vmul.f32 0.5, %v10380_v2 }
 0x2fe   : > { %v3318_v23 = vpop.f32.mrf.mxu2  ;;  %8712 = vtanh.f32 %v4621_v29 }
 0x2ff   : > { %v8711_v53 = vpop.eup %8710  ;;  %v4245_v62 = vmul.f32 0.7978846, %v4213_v9  ;;  %v4118_v58 = vmul.f32 0.044715, %v10398_v36  ;;  %v3359_v30 = vadd.f32 %v3318_v23, %v11395_v15  ;;  %v3648_v34 = vpop.f32.mrf.mxu3  ;;  %v8034_v23 = vpack.c.bf16 %v4862_v3, %v4861_v14 }
 0x300   : > { %v4308_v43 = vadd.f32 1.0, %v8711_v53  ;;  %v3980_v17 = vpop.f32.mrf.mxu0 }
 0x301   : > { %8714 = vtanh.f32 %v4245_v62  ;;  %v4150_v7 = vmul.f32 %v4118_v58, %v10398_v36  ;;  %v3689_v41 = vadd.f32 %v3648_v34, %v3359_v30 }
 0x302   : > { %v4340_v55 = vmul.f32 %v4308_v43, %v4084_v22 }
 0x303   : > { %v4182_v24 = vmul.f32 %v4150_v7, %v10398_v36  ;;  %v4019_v46 = vadd.f32 %v3978_v0, %v3689_v41  ;;  %v4623_v11 = vpop.f32.mrf.mxu1 }
 0x304   : > { %v8713_v13 = vpop.eup %8712  ;;  %4410 = vst [vmem:[#allocation3 + $0xd0] sm:$0xff] %v4340_v55  ;;  %v4624_v26 = vadd.f32 %v10297_v12, %v4623_v11  ;;  %v10407_v28 = vpack.c.bf16 %v4340_v55, %v4339_v31 }
 0x305   : > { %v4214_v63 = vadd.f32 %v4182_v24, %v10398_v36  ;;  %v10413_v5 = vadd.f32 %v10310_v20, %v4019_v46  ;;  %4725 = vst [vmem:[%s10322_s23 + $0x28] sm:$0xff] %v8713_v13  ;;  %v11399_v24 = vld [vmem:[#allocation7_spill] sm:$0xff]  ;;  %v4086_v13 = vmul.f32 0.5, %v10398_v36 }
 0x306   : > { %v3320_v48 = vpop.f32.mrf.mxu2  ;;  %8716 = vtanh.f32 %v4624_v26  ;;  %4662 = vmatmul.bf16.gmra.mxu1 %v10407_v28  ;;  %v11401_v36 = vld [vmem:[#allocation15_spill] sm:$0xff] }
 0x307   : > { %v8715_v0 = vpop.eup %8714  ;;  %v4246_v42 = vmul.f32 0.7978846, %v4214_v63  ;;  %v4119_v51 = vmul.f32 0.044715, %v10413_v5  ;;  %v3360_v31 = vadd.f32 %v3320_v48, %v2906_v37  ;;  %v3650_v1 = vpop.f32.mrf.mxu3 }
 0x308   : > { %v4309_v40 = vadd.f32 1.0, %v8715_v0  ;;  %v3983_v61 = vpop.f32.mrf.mxu0 }
 0x309   : > { %8718 = vtanh.f32 %v4246_v42  ;;  %v4151_v29 = vmul.f32 %v4119_v51, %v10413_v5  ;;  %v3690_v9 = vadd.f32 %v3650_v1, %v3360_v31  ;;  %v11400_v1 = vld [vmem:[#allocation16_spill] sm:$0xff] }
 0x30a   : > { %v4341_v53 = vmul.f32 %v4309_v40, %v4085_v57  ;;  %v2908_v57 = vadd.f32 %v11401_v36, %v11400_v1 }
 0x30b   : > { %v4183_v62 = vmul.f32 %v4151_v29, %v10413_v5  ;;  %v4020_v58 = vadd.f32 %v3980_v17, %v3690_v9  ;;  %8035 = vmatmul.msk.bf16.gmra.mxu2 %vm11354_vm3, %v8034_v23  ;;  %5634 = vmatmul.bf16.gmra.mxu0 %v10277_v49  ;;  %v4625_v30 = vpop.f32.mrf.mxu1  ;;  %v4864_v9 = vld [vmem:[#allocation3 + $0x91] sm:$0xff] }
 0x30c   : > { %v8717_v2 = vpop.eup %8716  ;;  %4411 = vst [vmem:[#allocation3 + $0xd8] sm:$0xff] %v4341_v53  ;;  %5201 = vmatmul.bf16.gmra.mxu3 %v10262_v59  ;;  %v4626_v34 = vadd.f32 %v10297_v12, %v4625_v30  ;;  %v4087_v30 = vmul.f32 0.5, %v10413_v5 }
 0x30d   : > { %v4215_v22 = vadd.f32 %v4183_v62, %v10413_v5  ;;  %v10428_v43 = vadd.f32 %v10310_v20, %v4020_v58  ;;  %4726 = vst [vmem:[%s10322_s23 + $0x30] sm:$0xff] %v8717_v2 }
 0x30e   : > { %v3323_v7 = vpop.f32.mrf.mxu2  ;;  %8720 = vtanh.f32 %v4626_v34 }
 0x30f   : > { %v8719_v17 = vpop.eup %8718  ;;  %v4247_v41 = vmul.f32 0.7978846, %v4215_v22  ;;  %v4120_v55 = vmul.f32 0.044715, %v10428_v43  ;;  %v3361_v46 = vadd.f32 %v3323_v7, %v11399_v24  ;;  %v3653_v11 = vpop.f32.mrf.mxu3  ;;  %v4863_v22 = vld [vmem:[#allocation3 + $0x89] sm:$0xff]  ;;  %v4088_v36 = vmul.f32 0.5, %v10428_v43 }
 0x310   : > { %v4310_v26 = vadd.f32 1.0, %v8719_v17  ;;  %v3985_v33 = vpop.f32.mrf.mxu0 }
 0x311   : > { %8722 = vtanh.f32 %v4247_v41  ;;  %v4152_v16 = vmul.f32 %v4120_v55, %v10428_v43  ;;  %v3691_v37 = vadd.f32 %v3653_v11, %v3361_v46  ;;  %v8037_v41 = vpack.c.bf16 %v4864_v9, %v4863_v22  ;;  %v11404_v22 = vld [vmem:[#allocation18_spill] sm:$0xff] }
 0x312   : > { %v4342_v63 = vmul.f32 %v4310_v26, %v4086_v13  ;;  %v8575_v26 = vld [vmem:[%s11172_s3 + $0xc8] sm:$0xff] }
 0x313   : > { %v4184_v48 = vmul.f32 %v4152_v16, %v10428_v43  ;;  %v4021_v3 = vadd.f32 %v3983_v61, %v3691_v37  ;;  %v4628_v0 = vpop.f32.mrf.mxu1  ;;  %5739 = vmatpush.bf16.msrb.mxu1 %v8575_v26 }
 0x314   : > { %v8721_v42 = vpop.eup %8720  ;;  %4412 = vst [vmem:[#allocation3 + $0xe0] sm:$0xff] %v4342_v63  ;;  %v4629_v51 = vadd.f32 %v10297_v12, %v4628_v0  ;;  %v10437_v31 = vpack.c.bf16 %v4342_v63, %v4341_v53 }
 0x315   : > { %v4216_v40 = vadd.f32 %v4184_v48, %v10428_v43  ;;  %v10443_v14 = vadd.f32 %v10310_v20, %v4021_v3  ;;  %4727 = vst [vmem:[%s10322_s23 + $0x38] sm:$0xff] %v8721_v42  ;;  %v11403_v42 = vld [vmem:[#allocation8_spill] sm:$0xff]  ;;  %v2910_v43 = vadd.f32 %v10283_v50, %v11404_v22 }
 0x316   : > { %v3325_v29 = vpop.f32.mrf.mxu2  ;;  %8724 = vtanh.f32 %v4629_v51  ;;  %4667 = vmatmul.bf16.gmra.mxu1 %v10437_v31 }
 0x317   : > { %v8723_v61 = vpop.eup %8722  ;;  %v4248_v23 = vmul.f32 0.7978846, %v4216_v40  ;;  %v4121_v62 = vmul.f32 0.044715, %v10443_v14  ;;  %v3362_v53 = vadd.f32 %v3325_v29, %v2908_v57  ;;  %v3655_v58 = vpop.f32.mrf.mxu3  ;;  %v4089_v26 = vmul.f32 0.5, %v10443_v14 }
 0x318   : > { %v4311_v2 = vadd.f32 1.0, %v8723_v61  ;;  %v3988_v34 = vpop.f32.mrf.mxu0 }
 0x319   : > { %8726 = vtanh.f32 %v4248_v23  ;;  %v4153_v7 = vmul.f32 %v4121_v62, %v10443_v14  ;;  %v3692_v17 = vadd.f32 %v3655_v58, %v3362_v53 }
 0x31a   : > { %v4343_v55 = vmul.f32 %v4311_v2, %v4087_v30 }
 0x31b   : > { %v4185_v24 = vmul.f32 %v4153_v7, %v10443_v14  ;;  %v4022_v46 = vadd.f32 %v3985_v33, %v3692_v17  ;;  %8038 = vmatmul.msk.bf16.gmra.mxu2 %vm11362_vm4, %v8037_v41  ;;  %5639 = vmatmul.bf16.gmra.mxu0 %v10302_v56  ;;  %v4630_v13 = vpop.f32.mrf.mxu1 }
 0x31c   : > { %v8725_v5 = vpop.eup %8724  ;;  %4413 = vst [vmem:[#allocation3 + $0xe8] sm:$0xff] %v4343_v55  ;;  %5206 = vmatmul.bf16.gmra.mxu3 %v10277_v49  ;;  %v4631_v16 = vadd.f32 %v10297_v12, %v4630_v13 }
 0x31d   : > { %v4217_v37 = vadd.f32 %v4185_v24, %v10443_v14  ;;  %v10461_v33 = vadd.f32 %v10310_v20, %v4022_v46  ;;  %4728 = vst [vmem:[%s10322_s23 + $0x40] sm:$0xff] %v8725_v5  ;;  %v4866_v24 = vld [vmem:[#allocation3 + $0xa1] sm:$0xff] }
 0x31e   : > { %v3328_v63 = vpop.f32.mrf.mxu2  ;;  %8728 = vtanh.f32 %v4631_v16 }
 0x31f   : > { %v8727_v48 = vpop.eup %8726  ;;  %v4249_v3 = vmul.f32 0.7978846, %v4217_v37  ;;  %v4122_v0 = vmul.f32 0.044715, %v10461_v33  ;;  %v3363_v51 = vadd.f32 %v3328_v63, %v11403_v42  ;;  %v3658_v1 = vpop.f32.mrf.mxu3  ;;  %v4865_v37 = vld [vmem:[#allocation3 + $0x99] sm:$0xff]  ;;  %v4090_v22 = vmul.f32 0.5, %v10461_v33 }
 0x320   : > { %v4312_v57 = vadd.f32 1.0, %v8727_v48  ;;  %v3990_v40 = vpop.f32.mrf.mxu0 }
 0x321   : > { %8730 = vtanh.f32 %v4249_v3  ;;  %v4154_v29 = vmul.f32 %v4122_v0, %v10461_v33  ;;  %v3693_v9 = vadd.f32 %v3658_v1, %v3363_v51  ;;  %v8040_v3 = vpack.c.bf16 %v4866_v24, %v4865_v37  ;;  %v4868_v37 = vld [vmem:[#allocation3 + $0xb1] sm:$0xff] }
 0x322   : > { %v4344_v61 = vmul.f32 %v4312_v57, %v4088_v36  ;;  %v8574_v36 = vld [vmem:[%s11172_s3 + $0xc0] sm:$0xff] }
 0x323   : > { %v4186_v23 = vmul.f32 %v4154_v29, %v10461_v33  ;;  %v4023_v62 = vadd.f32 %v3988_v34, %v3693_v9  ;;  %v4633_v53 = vpop.f32.mrf.mxu1  ;;  %5740 = vmatpush.bf16.msrb.mxu1 %v8574_v36  ;;  %v4867_v36 = vld [vmem:[#allocation3 + $0xa9] sm:$0xff] }
 0x324   : > { %v8729_v58 = vpop.eup %8728  ;;  %4414 = vst [vmem:[#allocation3 + $0xf0] sm:$0xff] %v4344_v61  ;;  %v4634_v30 = vadd.f32 %v10297_v12, %v4633_v53  ;;  %v10470_v2 = vpack.c.bf16 %v4344_v61, %v4343_v55 }
 0x325   : > { %v4218_v7 = vadd.f32 %v4186_v23, %v10461_v33  ;;  %v10476_v17 = vadd.f32 %v10310_v20, %v4023_v62  ;;  %4729 = vst [vmem:[%s10322_s23 + $0x48] sm:$0xff] %v8729_v58  ;;  %v10500_v23 = vld [vmem:[%s11173_s4] ss:$0 sm:$0xff] }
 0x326   : > { %v3330_v41 = vpop.f32.mrf.mxu2  ;;  %8732 = vtanh.f32 %v4634_v30  ;;  %4672 = vmatmul.bf16.gmra.mxu1 %v10470_v2 }
 0x327   : > { %v8731_v34 = vpop.eup %8730  ;;  %v4250_v46 = vmul.f32 0.7978846, %v4218_v7  ;;  %v4123_v13 = vmul.f32 0.044715, %v10476_v17  ;;  %v3364_v55 = vadd.f32 %v3330_v41, %v2910_v43  ;;  %v3660_v5 = vpop.f32.mrf.mxu3 }
 0x328   : > { %v4313_v50 = vadd.f32 1.0, %v8731_v34  ;;  %v10482_v16 = vpop.f32.mrf.mxu0 }
 0x329   : > { %8734 = vtanh.f32 %v4250_v46  ;;  %v4155_v63 = vmul.f32 %v4123_v13, %v10476_v17  ;;  %v3694_v48 = vadd.f32 %v3660_v5, %v3364_v55 }
 0x32a   : > { %v4345_v0 = vmul.f32 %v4313_v50, %v4089_v26 }
 0x32b   : > { %v4187_v42 = vmul.f32 %v4155_v63, %v10476_v17  ;;  %v4024_v51 = vadd.f32 %v3990_v40, %v3694_v48  ;;  %8041 = vmatmul.msk.bf16.gmra.mxu2 %vm11369_vm11, %v8040_v3  ;;  %5644 = vmatmul.bf16.gmra.mxu0 %v10344_v25  ;;  %v4635_v14 = vpop.f32.mrf.mxu1 }
 0x32c   : > { %v8733_v57 = vpop.eup %8732  ;;  %4415 = vst [vmem:[#allocation3 + $0xf8] sm:$0xff] %v4345_v0  ;;  %5211 = vmatmul.bf16.gmra.mxu3 %v10302_v56  ;;  %v4636_v29 = vadd.f32 %v10297_v12, %v4635_v14 }
 0x32d   : > { %v4219_v9 = vadd.f32 %v4187_v42, %v10476_v17  ;;  %v4060_v40 = vadd.f32 %v10310_v20, %v4024_v51  ;;  %4730 = vst [vmem:[%s10322_s23 + $0x50] sm:$0xff] %v8733_v57  ;;  %v4091_v42 = vmul.f32 0.5, %v10476_v17  ;;  %v8043_v57 = vpack.c.bf16 %v4868_v37, %v4867_v36  ;;  %v8613_v37 = vld [vmem:[%s11172_s3 + $0x1f8] sm:$0xff] }
 0x32e   : > { %v5035_v61 = vpop.f32.mrf.mxu2  ;;  %8736 = vtanh.f32 %v4636_v29  ;;  %6535 = vmatpush.bf16.msra.mxu0 %v8613_v37 }
 0x32f   : > { %v8735_v62 = vpop.eup %8734  ;;  %v4251_v53 = vmul.f32 0.7978846, %v4219_v9  ;;  %v4124_v58 = vmul.f32 0.044715, %v4060_v40  ;;  %v5172_v30 = vpop.f32.mrf.mxu3 }
 0x330   : > { %v4314_v43 = vadd.f32 1.0, %v8735_v62  ;;  %v5173_v7 = vadd.f32 %v5172_v30, %v5035_v61  ;;  %v10503_v41 = vpop.f32.mrf.mxu0 }
 0x331   : > { %8738 = vtanh.f32 %v4251_v53  ;;  %v4156_v20 = vmul.f32 %v4124_v58, %v4060_v40  ;;  %v8605_v53 = vld [vmem:[%s11172_s3 + $0x1b8] sm:$0xff] }
 0x332   : > { %v4346_v24 = vmul.f32 %v4314_v43, %v4090_v22  ;;  %v5256_v34 = vadd.f32 %v10500_v23, %v5173_v7  ;;  %v8597_v58 = vld [vmem:[%s11172_s3 + $0x178] sm:$0xff]  ;;  %6164 = vmatpush.bf16.msra.mxu2 %v8605_v53 }
 0x333   : > { %v4188_v46 = vmul.f32 %v4156_v20, %v4060_v40  ;;  %v4638_v13 = vpop.f32.mrf.mxu1  ;;  %6301 = vmatpush.bf16.msra.mxu3 %v8597_v58  ;;  %v8621_v53 = vld [vmem:[%s11172_s3 + $0x238] sm:$0xff] }
 0x334   : > { %v8737_v55 = vpop.eup %8736  ;;  %4416 = vst [vmem:[#allocation3 + $0x100] sm:$0xff] %v4346_v24  ;;  %8740 = vtanh.f32 %v5256_v34  ;;  %v4639_v5 = vadd.f32 %v10297_v12, %v4638_v13  ;;  %v10507_v26 = vpack.c.bf16 %v4346_v24, %v4345_v0  ;;  %v4092_v24 = vmul.f32 0.5, %v4060_v40  ;;  %6833 = vmatpush.bf16.msra.mxu1 %v8621_v53  ;;  %v8596_v53 = vld [vmem:[%s11172_s3 + $0x170] sm:$0xff] }
 0x335   : > { %v4220_v33 = vadd.f32 %v4188_v46, %v4060_v40  ;;  %4731 = vst [vmem:[%s10322_s23 + $0x58] sm:$0xff] %v8737_v55 }
 0x336   : > { %v5037_v50 = vpop.f32.mrf.mxu2  ;;  %8742 = vtanh.f32 %v4639_v5  ;;  %4677 = vmatmul.bf16.gmra.mxu1 %v10507_v26 }
 0x337   : > { %v8739_v63 = vpop.eup %8738  ;;  %v4252_v48 = vmul.f32 0.7978846, %v4220_v33  ;;  %v5174_v3 = vpop.f32.mrf.mxu3  ;;  %6302 = vmatpush.bf16.msra.mxu3 %v8596_v53 }
 0x338   : > { %v4315_v51 = vadd.f32 1.0, %v8739_v63  ;;  %v5175_v0 = vadd.f32 %v5174_v3, %v5037_v50  ;;  %v10518_v14 = vpop.f32.mrf.mxu0 }
 0x339   : > { %8744 = vtanh.f32 %v4252_v48 }
 0x33a   : > { %v8741_v29 = vpop.eup %8740  ;;  %v4347_v9 = vmul.f32 %v4315_v51, %v4091_v42  ;;  %v5257_v61 = vadd.f32 %v10500_v23, %v5175_v0  ;;  %v4870_v42 = vld [vmem:[#allocation3 + $0xc1] sm:$0xff] }
 0x33b   : > { %5320 = vst [vmem:[%s10516_s14] sm:$0xff] %v8741_v29  ;;  %8044 = vmatmul.msk.bf16.gmra.mxu2 %vm11372_vm2, %v8043_v57  ;;  %5649 = vmatmul.bf16.gmra.mxu0 %v10374_v60  ;;  %v4640_v62 = vpop.f32.mrf.mxu1  ;;  %v4869_v57 = vld [vmem:[#allocation3 + $0xb9] sm:$0xff] }
 0x33c   : > { %v8743_v30 = vpop.eup %8742  ;;  %4417 = vst [vmem:[#allocation3 + $0x108] sm:$0xff] %v4347_v9  ;;  %8746 = vtanh.f32 %v5257_v61  ;;  %5216 = vmatmul.bf16.gmra.mxu3 %v10344_v25  ;;  %v4641_v22 = vadd.f32 %v10297_v12, %v4640_v62  ;;  %v8046_v29 = vpack.c.bf16 %v4870_v42, %v4869_v57 }
 0x33d   : > { %4732 = vst [vmem:[%s10322_s23 + $0x60] sm:$0xff] %v8743_v30 }
 0x33e   : > { %v5040_v43 = vpop.f32.mrf.mxu2  ;;  %8748 = vtanh.f32 %v4641_v22 }
 0x33f   : > { %v8745_v7 = vpop.eup %8744  ;;  %v5177_v20 = vpop.f32.mrf.mxu3 }
 0x340   : > { %v4316_v34 = vadd.f32 1.0, %v8745_v7  ;;  %v5178_v46 = vadd.f32 %v5177_v20, %v5040_v43  ;;  %v10534_v13 = vpop.f32.mrf.mxu0 }
 0x342   : > { %v8747_v55 = vpop.eup %8746  ;;  %v4348_v5 = vmul.f32 %v4316_v34, %v4092_v24  ;;  %v5258_v33 = vadd.f32 %v10500_v23, %v5178_v46  ;;  %v5353_v24 = vld [vmem:[#allocation3 + $0x20] sm:$0xff] }
 0x343   : > { %5321 = vst [vmem:[%s10516_s14 + $0x8] sm:$0xff] %v8747_v55  ;;  %v4643_v50 = vpop.f32.mrf.mxu1 }
 0x344   : > { %v8749_v63 = vpop.eup %8748  ;;  %4418 = vst [vmem:[#allocation3 + $0x110] sm:$0xff] %v4348_v5  ;;  %8750 = vtanh.f32 %v5258_v33  ;;  %v4644_v40 = vadd.f32 %v10297_v12, %v4643_v50  ;;  %v10542_v48 = vpack.c.bf16 %v4348_v5, %v4347_v9  ;;  %v5352_v5 = vld [vmem:[#allocation3 + $0x18] sm:$0xff] }
 0x345   : > { %4733 = vst [vmem:[%s10322_s23 + $0x68] sm:$0xff] %v8749_v63  ;;  %v10564_v37 = vpack.c.bf16 %v5353_v24, %v5352_v5  ;;  %v8612_v5 = vld [vmem:[%s11172_s3 + $0x1f0] sm:$0xff] }
 0x346   : > { %v5042_v3 = vpop.f32.mrf.mxu2  ;;  %8752 = vtanh.f32 %v4644_v40  ;;  %4682 = vmatmul.bf16.gmra.mxu1 %v10542_v48  ;;  %v4872_v40 = vld [vmem:[#allocation3 + $0xd1] sm:$0xff]  ;;  %6536 = vmatpush.bf16.msra.mxu0 %v8612_v5 }
 0x347   : > { %v5179_v51 = vpop.f32.mrf.mxu3  ;;  %v8603_v5 = vld [vmem:[%s11172_s3 + $0x1a8] sm:$0xff] }
 0x348   : > { %v5180_v0 = vadd.f32 %v5179_v51, %v5042_v3  ;;  %v10546_v36 = vpop.f32.mrf.mxu0 }
 0x34a   : > { %v8751_v61 = vpop.eup %8750  ;;  %v5259_v62 = vadd.f32 %v10500_v23, %v5180_v0  ;;  %v4871_v0 = vld [vmem:[#allocation3 + $0xc9] sm:$0xff] }
 0x34b   : > { %5322 = vst [vmem:[%s10516_s14 + $0x10] sm:$0xff] %v8751_v61  ;;  %8047 = vmatmul.msk.bf16.gmra.mxu2 %vm11374_vm5, %v8046_v29  ;;  %5654 = vmatmul.bf16.gmra.mxu0 %v10407_v28  ;;  %v4645_v9 = vpop.f32.mrf.mxu1  ;;  %v8049_v57 = vpack.c.bf16 %v4872_v40, %v4871_v0  ;;  %v4874_v40 = vld [vmem:[#allocation3 + $0xe1] sm:$0xff] }
 0x34c   : > { %v8753_v58 = vpop.eup %8752  ;;  %8754 = vtanh.f32 %v5259_v62  ;;  %5221 = vmatmul.bf16.gmra.mxu3 %v10374_v60  ;;  %v4646_v30 = vadd.f32 %v10297_v12, %v4645_v9  ;;  %v8604_v9 = vld [vmem:[%s11172_s3 + $0x1b0] sm:$0xff] }
 0x34d   : > { %4734 = vst [vmem:[%s10322_s23 + $0x70] sm:$0xff] %v8753_v58  ;;  %6165 = vmatpush.bf16.msra.mxu2 %v8604_v9 }
 0x34e   : > { %v5045_v22 = vpop.f32.mrf.mxu2  ;;  %8756 = vtanh.f32 %v4646_v30 }
 0x34f   : > { %v5182_v43 = vpop.f32.mrf.mxu3 }
 0x350   : > { %v5183_v7 = vadd.f32 %v5182_v43, %v5045_v22  ;;  %v10559_v20 = vpop.f32.mrf.mxu0 }
 0x351   : > { %6166 = vmatpush.bf16.msra.mxu2 %v8603_v5 }
 0x352   : > { %v8755_v34 = vpop.eup %8754  ;;  %v5260_v46 = vadd.f32 %v10500_v23, %v5183_v7 }
 0x353   : > { %5323 = vst [vmem:[%s10516_s14 + $0x18] sm:$0xff] %v8755_v34  ;;  %v4648_v55 = vpop.f32.mrf.mxu1 }
 0x354   : > { %v8757_v33 = vpop.eup %8756  ;;  %8758 = vtanh.f32 %v5260_v46  ;;  %v4649_v50 = vadd.f32 %v10297_v12, %v4648_v55 }
 0x355   : > { %4735 = vst [vmem:[%s10322_s23 + $0x78] sm:$0xff] %v8757_v33 }
 0x356   : > { %v5047_v63 = vpop.f32.mrf.mxu2  ;;  %8760 = vtanh.f32 %v4649_v50  ;;  %5741 = vmatmul.bf16.vlgmr.msrb.gmra.mxu1 %v10564_v37 }
 0x357   : > { %v5184_v3 = vpop.f32.mrf.mxu3 }
 0x358   : > { %v5185_v42 = vadd.f32 %v5184_v3, %v5047_v63  ;;  %v10568_v51 = vpop.f32.mrf.mxu0 }
 0x35a   : > { %v8759_v29 = vpop.eup %8758  ;;  %v5261_v61 = vadd.f32 %v10500_v23, %v5185_v42 }
 0x35b   : > { %5324 = vst [vmem:[%s10516_s14 + $0x20] sm:$0xff] %v8759_v29  ;;  %8050 = vmatmul.msk.bf16.gmra.mxu2 %vm11376_vm12, %v8049_v57  ;;  %5659 = vmatmul.bf16.gmra.mxu0 %v10437_v31  ;;  %v4650_v62 = vpop.f32.mrf.mxu1  ;;  %v4873_v57 = vld [vmem:[#allocation3 + $0xd9] sm:$0xff] }
 0x35c   : > { %v8761_v58 = vpop.eup %8760  ;;  %8762 = vtanh.f32 %v5261_v61  ;;  %5226 = vmatmul.bf16.gmra.mxu3 %v10407_v28  ;;  %v4651_v30 = vadd.f32 %v10297_v12, %v4650_v62  ;;  %v8052_v29 = vpack.c.bf16 %v4874_v40, %v4873_v57 }
 0x35d   : > { %4736 = vst [vmem:[%s10322_s23 + $0x80] sm:$0xff] %v8761_v58 }
 0x35e   : > { %v5050_v22 = vpop.f32.mrf.mxu2  ;;  %8764 = vtanh.f32 %v4651_v30 }
 0x35f   : > { %v5187_v43 = vpop.f32.mrf.mxu3 }
 0x360   : > { %v5188_v7 = vadd.f32 %v5187_v43, %v5050_v22  ;;  %v10584_v24 = vpop.f32.mrf.mxu0 }
 0x362   : > { %v8763_v34 = vpop.eup %8762  ;;  %v5262_v46 = vadd.f32 %v10500_v23, %v5188_v7 }
 0x363   : > { %5325 = vst [vmem:[%s10516_s14 + $0x28] sm:$0xff] %v8763_v34  ;;  %v4653_v55 = vpop.f32.mrf.mxu1 }
 0x364   : > { %v8765_v33 = vpop.eup %8764  ;;  %8766 = vtanh.f32 %v5262_v46  ;;  %v4654_v50 = vadd.f32 %v10297_v12, %v4653_v55 }
 0x365   : > { %4737 = vst [vmem:[%s10322_s23 + $0x88] sm:$0xff] %v8765_v33  ;;  %v8611_v33 = vld [vmem:[%s11172_s3 + $0x1e8] sm:$0xff] }
 0x366   : > { %v5052_v63 = vpop.f32.mrf.mxu2  ;;  %8768 = vtanh.f32 %v4654_v50  ;;  %5746 = vmatmul.bf16.gmra.mxu1 %v10099_v39  ;;  %v8620_v39 = vld [vmem:[%s11172_s3 + $0x230] sm:$0xff]  ;;  %6537 = vmatpush.bf16.msra.mxu0 %v8611_v33 }
 0x367   : > { %v5189_v3 = vpop.f32.mrf.mxu3  ;;  %6834 = vmatpush.bf16.msra.mxu1 %v8620_v39 }
 0x368   : > { %v5190_v42 = vadd.f32 %v5189_v3, %v5052_v63  ;;  %v10594_v0 = vpop.f32.mrf.mxu0  ;;  %v10623_v63 = vld [vmem:[%s11173_s4] ss:$0 sm:$0xff] }
 0x36a   : > { %v8767_v61 = vpop.eup %8766  ;;  %v5263_v62 = vadd.f32 %v10500_v23, %v5190_v42  ;;  %v4876_v42 = vld [vmem:[#allocation3 + $0xf1] sm:$0xff] }
 0x36b   : > { %5326 = vst [vmem:[%s10516_s14 + $0x30] sm:$0xff] %v8767_v61  ;;  %8053 = vmatmul.msk.bf16.gmra.mxu2 %vm11380_vm15, %v8052_v29  ;;  %5664 = vmatmul.bf16.gmra.mxu0 %v10470_v2  ;;  %v4655_v9 = vpop.f32.mrf.mxu1  ;;  %v8602_v29 = vld [vmem:[%s11172_s3 + $0x1a0] sm:$0xff] }
 0x36c   : > { %v8769_v53 = vpop.eup %8768  ;;  %8770 = vtanh.f32 %v5263_v62  ;;  %5231 = vmatmul.bf16.gmra.mxu3 %v10437_v31  ;;  %v4656_v58 = vadd.f32 %v10297_v12, %v4655_v9  ;;  %v8595_v12 = vld [vmem:[%s11172_s3 + $0x168] sm:$0xff]  ;;  %v8594_v61 = vld [vmem:[%s11172_s3 + $0x160] sm:$0xff]  ;;  %6167 = vmatpush.bf16.msra.mxu2 %v8602_v29 }
 0x36d   : > { %4738 = vst [vmem:[%s10322_s23 + $0x90] sm:$0xff] %v8769_v53  ;;  %6303 = vmatpush.bf16.msra.mxu3 %v8595_v12  ;;  %v8610_v62 = vld [vmem:[%s11172_s3 + $0x1e0] sm:$0xff] }
 0x36e   : > { %v5055_v30 = vpop.f32.mrf.mxu2  ;;  %8772 = vtanh.f32 %v4656_v58  ;;  %v4875_v53 = vld [vmem:[#allocation3 + $0xe9] sm:$0xff]  ;;  %6538 = vmatpush.bf16.msra.mxu0 %v8610_v62 }
 0x36f   : > { %v5192_v22 = vpop.f32.mrf.mxu3  ;;  %v8055_v58 = vpack.c.bf16 %v4876_v42, %v4875_v53  ;;  %v8591_v53 = vld [vmem:[%s11172_s3 + $0x148] sm:$0xff] }
 0x370   : > { %v5193_v43 = vadd.f32 %v5192_v22, %v5055_v30  ;;  %v10607_v7 = vpop.f32.mrf.mxu0 }
 0x371   : > { %6304 = vmatpush.bf16.msra.mxu3 %v8594_v61 }
 0x372   : > { %v8771_v34 = vpop.eup %8770  ;;  %v5264_v46 = vadd.f32 %v10500_v23, %v5193_v43  ;;  %v8601_v43 = vld [vmem:[%s11172_s3 + $0x198] sm:$0xff] }
 0x373   : > { %5327 = vst [vmem:[%s10516_s14 + $0x38] sm:$0xff] %v8771_v34  ;;  %v4658_v55 = vpop.f32.mrf.mxu1  ;;  %v8593_v34 = vld [vmem:[%s11172_s3 + $0x158] sm:$0xff]  ;;  %6168 = vmatpush.bf16.msra.mxu2 %v8601_v43 }
 0x374   : > { %v8773_v50 = vpop.eup %8772  ;;  %8774 = vtanh.f32 %v5264_v46  ;;  %v4659_v40 = vadd.f32 %v10623_v63, %v4658_v55  ;;  %v8609_v46 = vld [vmem:[%s11172_s3 + $0x1d8] sm:$0xff] }
 0x375   : > { %4739 = vst [vmem:[%s10322_s23 + $0x98] sm:$0xff] %v8773_v50  ;;  %6305 = vmatpush.bf16.msra.mxu3 %v8593_v34  ;;  %6539 = vmatpush.bf16.msra.mxu0 %v8609_v46  ;;  %v8600_v50 = vld [vmem:[%s11172_s3 + $0x190] sm:$0xff]  ;;  %v8598_v46 = vld [vmem:[%s11172_s3 + $0x180] sm:$0xff] }
 0x376   : > { %v5057_v3 = vpop.f32.mrf.mxu2  ;;  %8776 = vtanh.f32 %v4659_v40  ;;  %5751 = vmatmul.bf16.gmra.mxu1 %v10140_v47  ;;  %v8592_v40 = vld [vmem:[%s11172_s3 + $0x150] sm:$0xff] }
 0x377   : > { %v5194_v57 = vpop.f32.mrf.mxu3  ;;  %6169 = vmatpush.bf16.msra.mxu2 %v8600_v50  ;;  %v4878_v43 = vld [vmem:[#allocation3 + $0x101] sm:$0xff]  ;;  %v4877_v50 = vld [vmem:[#allocation3 + $0xf9] sm:$0xff] }
 0x378   : > { %v5195_v9 = vadd.f32 %v5194_v57, %v5057_v3  ;;  %v10637_v39 = vpop.f32.mrf.mxu0  ;;  %v8608_v3 = vld [vmem:[%s11172_s3 + $0x1d0] sm:$0xff] }
 0x379   : > { %6306 = vmatpush.bf16.msra.mxu3 %v8592_v40  ;;  %6540 = vmatpush.bf16.msra.mxu0 %v8608_v3 }
 0x37a   : > { %v8775_v47 = vpop.eup %8774  ;;  %v5265_v30 = vadd.f32 %v10500_v23, %v5195_v9  ;;  %v8599_v9 = vld [vmem:[%s11172_s3 + $0x188] sm:$0xff] }
 0x37b   : > { %5328 = vst [vmem:[%s10516_s14 + $0x40] sm:$0xff] %v8775_v47  ;;  %8056 = vmatmul.msk.bf16.gmra.mxu2 %vm11385_vm8, %v8055_v58  ;;  %5669 = vmatmul.bf16.gmra.mxu0 %v10507_v26  ;;  %v4660_v22 = vpop.f32.mrf.mxu1  ;;  %v8607_v58 = vld [vmem:[%s11172_s3 + $0x1c8] sm:$0xff] }
 0x37c   : > { %v8777_v55 = vpop.eup %8776  ;;  %8778 = vtanh.f32 %v5265_v30  ;;  %5236 = vmatmul.bf16.gmra.mxu3 %v10470_v2  ;;  %v4661_v5 = vadd.f32 %v10623_v63, %v4660_v22  ;;  %6170 = vmatpush.bf16.msra.mxu2 %v8599_v9 }
 0x37d   : > { %4740 = vst [vmem:[%s10322_s23 + $0xa0] sm:$0xff] %v8777_v55  ;;  %6307 = vmatpush.bf16.msra.mxu3 %v8591_v53  ;;  %6541 = vmatpush.bf16.msra.mxu0 %v8607_v58  ;;  %v8590_v55 = vld [vmem:[%s11172_s3 + $0x140] sm:$0xff] }
 0x37e   : > { %v5060_v12 = vpop.f32.mrf.mxu2  ;;  %8780 = vtanh.f32 %v4661_v5  ;;  %v8606_v5 = vld [vmem:[%s11172_s3 + $0x1c0] sm:$0xff] }
 0x37f   : > { %v5197_v33 = vpop.f32.mrf.mxu3 }
 0x380   : > { %v5198_v42 = vadd.f32 %v5197_v33, %v5060_v12  ;;  %v10665_v57 = vpop.f32.mrf.mxu0  ;;  %6171 = vmatpush.bf16.msra.mxu2 %v8598_v46 }
 0x381   : > { %6308 = vmatpush.bf16.msra.mxu3 %v8590_v55  ;;  %6542 = vmatpush.bf16.msra.mxu0 %v8606_v5  ;;  %v4879_v5 = vld [vmem:[#allocation3 + $0x109] sm:$0xff] }
 0x382   : > { %v8779_v29 = vpop.eup %8778  ;;  %v5266_v61 = vadd.f32 %v10500_v23, %v5198_v42 }
 0x383   : > { %5329 = vst [vmem:[%s10516_s14 + $0x48] sm:$0xff] %v8779_v29  ;;  %v4663_v62 = vpop.f32.mrf.mxu1  ;;  %v8619_v29 = vld [vmem:[%s11172_s3 + $0x228] sm:$0xff] }
 0x384   : > { %v8781_v47 = vpop.eup %8780  ;;  %8782 = vtanh.f32 %v5266_v61  ;;  %v4664_v30 = vadd.f32 %v10623_v63, %v4663_v62  ;;  %6835 = vmatpush.bf16.msra.mxu1 %v8619_v29 }
 0x385   : > { %4741 = vst [vmem:[%s10322_s23 + $0xa8] sm:$0xff] %v8781_v47 }
 0x386   : > { %v5062_v22 = vpop.f32.mrf.mxu2  ;;  %8784 = vtanh.f32 %v4664_v30  ;;  %5756 = vmatmul.bf16.gmra.mxu1 %v10205_v52  ;;  %v8058_v52 = vpack.c.bf16 %v4878_v43, %v4877_v50 }
 0x387   : > { %v5199_v34 = vpop.f32.mrf.mxu3 }
 0x388   : > { %v5200_v12 = vadd.f32 %v5199_v34, %v5062_v22  ;;  %v10690_v33 = vpop.f32.mrf.mxu0 }
 0x38a   : > { %v8783_v40 = vpop.eup %8782  ;;  %v5267_v3 = vadd.f32 %v10500_v23, %v5200_v12  ;;  %v4880_v12 = vld [vmem:[#allocation3 + $0x111] sm:$0xff] }
 0x38b   : > { %5330 = vst [vmem:[%s10516_s14 + $0x50] sm:$0xff] %v8783_v40  ;;  %8059 = vmatmul.msk.bf16.gmra.mxu2 %vm11388_vm0, %v8058_v52  ;;  %5674 = vmatmul.bf16.gmra.mxu0 %v10542_v48  ;;  %v4665_v42 = vpop.f32.mrf.mxu1 }
 0x38c   : > { %v8785_v61 = vpop.eup %8784  ;;  %8786 = vtanh.f32 %v5267_v3  ;;  %5241 = vmatmul.bf16.gmra.mxu3 %v10507_v26  ;;  %v4666_v62 = vadd.f32 %v10623_v63, %v4665_v42  ;;  %v8061_v3 = vpack.c.bf16 %v4880_v12, %v4879_v5 }
 0x38d   : > { %4742 = vst [vmem:[%s10322_s23 + $0xb0] sm:$0xff] %v8785_v61  ;;  %v11407_v61 = vld [vmem:[#allocation28_spill] sm:$0xff] }
 0x38e   : > { %v5065_v9 = vpop.f32.mrf.mxu2  ;;  %8788 = vtanh.f32 %v4666_v62  ;;  %vm11408_vm9 = vnez %v11407_v61 }
 0x38f   : > { %v5202_v53 = vpop.f32.mrf.mxu3 }
 0x390   : > { %v5203_v58 = vadd.f32 %v5202_v53, %v5065_v9  ;;  %v10703_v47 = vpop.f32.mrf.mxu0 }
 0x392   : > { %v8787_v30 = vpop.eup %8786  ;;  %v5268_v22 = vadd.f32 %v10500_v23, %v5203_v58 }
 0x393   : > { %5331 = vst [vmem:[%s10516_s14 + $0x58] sm:$0xff] %v8787_v30  ;;  %v4668_v43 = vpop.f32.mrf.mxu1 }
 0x394   : > { %v8789_v34 = vpop.eup %8788  ;;  %8790 = vtanh.f32 %v5268_v22  ;;  %v4669_v46 = vadd.f32 %v10623_v63, %v4668_v43 }
 0x395   : > { %4743 = vst [vmem:[%s10322_s23 + $0xb8] sm:$0xff] %v8789_v34 }
 0x396   : > { %v5067_v55 = vpop.f32.mrf.mxu2  ;;  %8792 = vtanh.f32 %v4669_v46  ;;  %5761 = vmatmul.bf16.gmra.mxu1 %v10235_v38 }
 0x397   : > { %v5204_v50 = vpop.f32.mrf.mxu3 }
 0x398   : > { %v5205_v52 = vadd.f32 %v5204_v50, %v5067_v55  ;;  %v10710_v40 = vpop.f32.mrf.mxu0  ;;  %v6020_v50 = vld [vmem:[#allocation3 + $0x21] sm:$0xff] }
 0x39a   : > { %v8791_v42 = vpop.eup %8790  ;;  %v5269_v29 = vadd.f32 %v10500_v23, %v5205_v52  ;;  %v6391_v52 = vld [vmem:[#allocation3 + $0x30] sm:$0xff] }
 0x39b   : > { %5332 = vst [vmem:[%s10516_s14 + $0x60] sm:$0xff] %v8791_v42  ;;  %8062 = vmatmul.msk.bf16.gmra.mxu2 %vm11408_vm9, %v8061_v3  ;;  %5679 = vmatmul.bf16.gmra.mxu0 %v11389_v44  ;;  %v4670_v62 = vpop.f32.mrf.mxu1  ;;  %v6396_v44 = vld [vmem:[#allocation3 + $0x58] sm:$0xff] }
 0x39c   : > { %v8793_v9 = vpop.eup %8792  ;;  %8794 = vtanh.f32 %v5269_v29  ;;  %5246 = vmatmul.bf16.gmra.mxu3 %v10542_v48  ;;  %v4671_v38 = vadd.f32 %v10623_v63, %v4670_v62  ;;  %v6019_v62 = vld [vmem:[#allocation3 + $0x19] sm:$0xff] }
 0x39d   : > { %4744 = vst [vmem:[%s10322_s23 + $0xc0] sm:$0xff] %v8793_v9  ;;  %v6390_v9 = vld [vmem:[#allocation3 + $0x28] sm:$0xff] }
 0x39e   : > { %v5070_v53 = vpop.f32.mrf.mxu2  ;;  %8796 = vtanh.f32 %v4671_v38  ;;  %v8256_v38 = vpack.c.bf16 %v6020_v50, %v6019_v62 }
 0x39f   : > { %v5207_v58 = vpop.f32.mrf.mxu3 }
 0x3a0   : > { %v5208_v30 = vadd.f32 %v5207_v58, %v5070_v53  ;;  %v10720_v22 = vpop.f32.mrf.mxu0  ;;  %v6454_v53 = vpack.c.bf16 %v6391_v52, %v6390_v9 }
 0x3a2   : > { %v8795_v43 = vpop.eup %8794  ;;  %v5270_v34 = vadd.f32 %v10500_v23, %v5208_v30 }
 0x3a3   : > { %5333 = vst [vmem:[%s10516_s14 + $0x68] sm:$0xff] %v8795_v43  ;;  %v4673_v46 = vpop.f32.mrf.mxu1 }
 0x3a4   : > { %v8797_v55 = vpop.eup %8796  ;;  %8798 = vtanh.f32 %v5270_v34  ;;  %v4674_v5 = vadd.f32 %v10623_v63, %v4673_v46 }
 0x3a5   : > { %4745 = vst [vmem:[%s10322_s23 + $0xc8] sm:$0xff] %v8797_v55 }
 0x3a6   : > { %v5072_v12 = vpop.f32.mrf.mxu2  ;;  %8800 = vtanh.f32 %v4674_v5  ;;  %5766 = vmatmul.bf16.gmra.mxu1 %v10250_v18  ;;  %v8618_v18 = vld [vmem:[%s11172_s3 + $0x220] sm:$0xff] }
 0x3a7   : > { %v5209_v3 = vpop.f32.mrf.mxu3  ;;  %6836 = vmatpush.bf16.msra.mxu1 %v8618_v18 }
 0x3a8   : > { %v5210_v42 = vadd.f32 %v5209_v3, %v5072_v12  ;;  %v10727_v29 = vpop.f32.mrf.mxu0 }
 0x3aa   : > { %v8799_v58 = vpop.eup %8798  ;;  %v5271_v30 = vadd.f32 %v10500_v23, %v5210_v42 }
 0x3ab   : > { %5334 = vst [vmem:[%s10516_s14 + $0x70] sm:$0xff] %v8799_v58  ;;  %8257 = vmatmul.msk.bf16.vlgmr.msra.gmra.mxu2 %vm9523_vm7, %v8256_v38  ;;  %6543 = vmatmul.bf16.vlgmr.msra.gmra.mxu0 %v6454_v53  ;;  %v4675_v43 = vpop.f32.mrf.mxu1  ;;  %v6022_v38 = vld [vmem:[#allocation3 + $0x31] sm:$0xff]  ;;  %v6393_v58 = vld [vmem:[#allocation3 + $0x40] sm:$0xff] }
 0x3ac   : > { %v8801_v34 = vpop.eup %8800  ;;  %8802 = vtanh.f32 %v5271_v30  ;;  %6309 = vmatmul.bf16.vlgmr.msra.gmra.mxu3 %v10564_v37  ;;  %v4676_v46 = vadd.f32 %v10623_v63, %v4675_v43 }
 0x3ad   : > { %4746 = vst [vmem:[%s10322_s23 + $0xd0] sm:$0xff] %v8801_v34  ;;  %v6021_v34 = vld [vmem:[#allocation3 + $0x29] sm:$0xff] }
 0x3ae   : > { %v5075_v55 = vpop.f32.mrf.mxu2  ;;  %8804 = vtanh.f32 %v4676_v46  ;;  %v6392_v46 = vld [vmem:[#allocation3 + $0x38] sm:$0xff] }
 0x3af   : > { %v5212_v5 = vpop.f32.mrf.mxu3 }
 0x3b0   : > { %v5213_v12 = vadd.f32 %v5212_v5, %v5075_v55  ;;  %v10739_v50 = vpop.f32.mrf.mxu0  ;;  %v10748_v55 = vpack.c.bf16 %v6022_v38, %v6021_v34  ;;  %v6455_v5 = vpack.c.bf16 %v6393_v58, %v6392_v46 }
 0x3b2   : > { %v8803_v52 = vpop.eup %8802  ;;  %v5272_v3 = vadd.f32 %v10500_v23, %v5213_v12 }
 0x3b3   : > { %5335 = vst [vmem:[%s10516_s14 + $0x78] sm:$0xff] %v8803_v52  ;;  %v4678_v42 = vpop.f32.mrf.mxu1 }
 0x3b4   : > { %v8805_v62 = vpop.eup %8804  ;;  %8806 = vtanh.f32 %v5272_v3  ;;  %v4679_v37 = vadd.f32 %v10623_v63, %v4678_v42 }
 0x3b5   : > { %4747 = vst [vmem:[%s10322_s23 + $0xd8] sm:$0xff] %v8805_v62 }
 0x3b6   : > { %v5077_v9 = vpop.f32.mrf.mxu2  ;;  %8808 = vtanh.f32 %v4679_v37  ;;  %5771 = vmatmul.bf16.gmra.mxu1 %v10262_v59 }
 0x3b7   : > { %v5214_v30 = vpop.f32.mrf.mxu3 }
 0x3b8   : > { %v5215_v43 = vadd.f32 %v5214_v30, %v5077_v9  ;;  %v10746_v18 = vpop.f32.mrf.mxu0 }
 0x3ba   : > { %v8807_v12 = vpop.eup %8806  ;;  %v5273_v52 = vadd.f32 %v10500_v23, %v5215_v43 }
 0x3bb   : > { %5336 = vst [vmem:[%s10516_s14 + $0x80] sm:$0xff] %v8807_v12  ;;  %8260 = vmatmul.msk.bf16.gmra.mxu2 %vm11337_vm1, %v10748_v55  ;;  %6548 = vmatmul.bf16.gmra.mxu0 %v6455_v5  ;;  %v4680_v59 = vpop.f32.mrf.mxu1  ;;  %v6024_v12 = vld [vmem:[#allocation3 + $0x41] sm:$0xff] }
 0x3bc   : > { %v8809_v3 = vpop.eup %8808  ;;  %8810 = vtanh.f32 %v5273_v52  ;;  %6314 = vmatmul.bf16.gmra.mxu3 %v6454_v53  ;;  %v4681_v42 = vadd.f32 %v10623_v63, %v4680_v59  ;;  %v6395_v52 = vld [vmem:[#allocation3 + $0x50] sm:$0xff] }
 0x3bd   : > { %4748 = vst [vmem:[%s10322_s23 + $0xe0] sm:$0xff] %v8809_v3 }
 0x3be   : > { %v5080_v62 = vpop.f32.mrf.mxu2  ;;  %8812 = vtanh.f32 %v4681_v42 }
 0x3bf   : > { %v5217_v37 = vpop.f32.mrf.mxu3 }
 0x3c0   : > { %v5218_v9 = vadd.f32 %v5217_v37, %v5080_v62  ;;  %v10757_v38 = vpop.f32.mrf.mxu0  ;;  %v6023_v62 = vld [vmem:[#allocation3 + $0x39] sm:$0xff]  ;;  %v6394_v37 = vld [vmem:[#allocation3 + $0x48] sm:$0xff] }
 0x3c2   : > { %v8811_v58 = vpop.eup %8810  ;;  %v5274_v30 = vadd.f32 %v10500_v23, %v5218_v9  ;;  %v10766_v9 = vpack.c.bf16 %v6024_v12, %v6023_v62 }
 0x3c3   : > { %5337 = vst [vmem:[%s10516_s14 + $0x88] sm:$0xff] %v8811_v58  ;;  %v4683_v43 = vpop.f32.mrf.mxu1  ;;  %v6456_v58 = vpack.c.bf16 %v6395_v52, %v6394_v37 }
 0x3c4   : > { %v8813_v34 = vpop.eup %8812  ;;  %8814 = vtanh.f32 %v5274_v30  ;;  %v4684_v46 = vadd.f32 %v10623_v63, %v4683_v43 }
 0x3c5   : > { %4749 = vst [vmem:[%s10322_s23 + $0xe8] sm:$0xff] %v8813_v34  ;;  %v8617_v34 = vld [vmem:[%s11172_s3 + $0x218] sm:$0xff] }
 0x3c6   : > { %v5082_v53 = vpop.f32.mrf.mxu2  ;;  %8816 = vtanh.f32 %v4684_v46  ;;  %5776 = vmatmul.bf16.gmra.mxu1 %v10277_v49 }
 0x3c7   : > { %v5219_v59 = vpop.f32.mrf.mxu3  ;;  %6837 = vmatpush.bf16.msra.mxu1 %v8617_v34 }
 0x3c8   : > { %v5220_v3 = vadd.f32 %v5219_v59, %v5082_v53  ;;  %v10764_v42 = vpop.f32.mrf.mxu0 }
 0x3ca   : > { %v8815_v30 = vpop.eup %8814  ;;  %v5275_v43 = vadd.f32 %v10500_v23, %v5220_v3 }
 0x3cb   : > { %5338 = vst [vmem:[%s10516_s14 + $0x90] sm:$0xff] %v8815_v30  ;;  %8263 = vmatmul.msk.bf16.gmra.mxu2 %vm11338_vm6, %v10766_v9  ;;  %6553 = vmatmul.bf16.gmra.mxu0 %v6456_v58  ;;  %v4685_v49 = vpop.f32.mrf.mxu1  ;;  %v10784_v30 = vld [vmem:[%s11173_s4] ss:$0 sm:$0xff] }
 0x3cc   : > { %v8817_v46 = vpop.eup %8816  ;;  %8818 = vtanh.f32 %v5275_v43  ;;  %6319 = vmatmul.bf16.gmra.mxu3 %v6455_v5  ;;  %v4686_v53 = vadd.f32 %v10623_v63, %v4685_v49 }
 0x3cd   : > { %4750 = vst [vmem:[%s10322_s23 + $0xf0] sm:$0xff] %v8817_v46  ;;  %v6026_v46 = vld [vmem:[#allocation3 + $0x51] sm:$0xff] }
 0x3ce   : > { %v5085_v12 = vpop.f32.mrf.mxu2  ;;  %8820 = vtanh.f32 %v4686_v53  ;;  %v6397_v53 = vld [vmem:[#allocation3 + $0x60] sm:$0xff] }
 0x3cf   : > { %v5222_v52 = vpop.f32.mrf.mxu3 }
 0x3d0   : > { %v5223_v59 = vadd.f32 %v5222_v52, %v5085_v12  ;;  %v10778_v3 = vpop.f32.mrf.mxu0 }
 0x3d2   : > { %v8819_v62 = vpop.eup %8818  ;;  %v5276_v37 = vadd.f32 %v10500_v23, %v5223_v59 }
 0x3d3   : > { %5339 = vst [vmem:[%s10516_s14 + $0x98] sm:$0xff] %v8819_v62  ;;  %v5742_v5 = vpop.f32.mrf.mxu1  ;;  %v6025_v62 = vld [vmem:[#allocation3 + $0x49] sm:$0xff] }
 0x3d4   : > { %v8821_v63 = vpop.eup %8820  ;;  %8822 = vtanh.f32 %v5276_v37  ;;  %v5743_v43 = vadd.f32 %v5742_v5, %v10482_v16  ;;  %v10793_v37 = vpack.c.bf16 %v6026_v46, %v6025_v62  ;;  %v6457_v16 = vpack.c.bf16 %v6397_v53, %v6396_v44 }
 0x3d5   : > { %4751 = vst [vmem:[%s10322_s23 + $0xf8] sm:$0xff] %v8821_v63 }
 0x3d6   : > { %v5087_v49 = vpop.f32.mrf.mxu2  ;;  %v5826_v34 = vadd.f32 %v10784_v30, %v5743_v43  ;;  %5781 = vmatmul.bf16.gmra.mxu1 %v10302_v56 }
 0x3d7   : > { %v5224_v12 = vpop.f32.mrf.mxu3 }
 0x3d8   : > { %v5225_v52 = vadd.f32 %v5224_v12, %v5087_v49  ;;  %v10791_v59 = vpop.f32.mrf.mxu0  ;;  %8824 = vtanh.f32 %v5826_v34 }
 0x3da   : > { %v8823_v5 = vpop.eup %8822  ;;  %v5277_v63 = vadd.f32 %v10500_v23, %v5225_v52 }
 0x3db   : > { %5340 = vst [vmem:[%s10516_s14 + $0xa0] sm:$0xff] %v8823_v5  ;;  %8266 = vmatmul.msk.bf16.gmra.mxu2 %vm11339_vm10, %v10793_v37  ;;  %6558 = vmatmul.bf16.gmra.mxu0 %v6457_v16  ;;  %v5744_v56 = vpop.f32.mrf.mxu1 }
 0x3dc   : > { %8826 = vtanh.f32 %v5277_v63  ;;  %6324 = vmatmul.bf16.gmra.mxu3 %v6456_v58  ;;  %v5745_v44 = vadd.f32 %v5744_v56, %v10503_v41 }
 0x3de   : > { %v8825_v43 = vpop.eup %8824  ;;  %v5090_v49 = vpop.f32.mrf.mxu2  ;;  %v5827_v34 = vadd.f32 %v10784_v30, %v5745_v44  ;;  %v6028_v44 = vld [vmem:[#allocation3 + $0x61] sm:$0xff] }
 0x3df   : > { %5890 = vst [vmem:[%s10804_s21] sm:$0xff] %v8825_v43  ;;  %v5227_v46 = vpop.f32.mrf.mxu3  ;;  %v6399_v43 = vld [vmem:[#allocation3 + $0x70] sm:$0xff] }
 0x3e0   : > { %v5228_v53 = vadd.f32 %v5227_v46, %v5090_v49  ;;  %v10809_v12 = vpop.f32.mrf.mxu0  ;;  %8828 = vtanh.f32 %v5827_v34 }
 0x3e2   : > { %v8827_v52 = vpop.eup %8826  ;;  %v5278_v62 = vadd.f32 %v10500_v23, %v5228_v53  ;;  %v6027_v53 = vld [vmem:[#allocation3 + $0x59] sm:$0xff] }
 0x3e3   : > { %5341 = vst [vmem:[%s10516_s14 + $0xa8] sm:$0xff] %v8827_v52  ;;  %v5747_v5 = vpop.f32.mrf.mxu1  ;;  %v6398_v52 = vld [vmem:[#allocation3 + $0x68] sm:$0xff] }
 0x3e4   : > { %8830 = vtanh.f32 %v5278_v62  ;;  %v5748_v58 = vadd.f32 %v5747_v5, %v10518_v14  ;;  %v10819_v62 = vpack.c.bf16 %v6028_v44, %v6027_v53  ;;  %v6458_v14 = vpack.c.bf16 %v6399_v43, %v6398_v52 }
 0x3e6   : > { %v8829_v41 = vpop.eup %8828  ;;  %v5092_v63 = vpop.f32.mrf.mxu2  ;;  %v5828_v56 = vadd.f32 %v10784_v30, %v5748_v58  ;;  %5786 = vmatmul.bf16.gmra.mxu1 %v10344_v25  ;;  %v8616_v58 = vld [vmem:[%s11172_s3 + $0x210] sm:$0xff] }
 0x3e7   : > { %5891 = vst [vmem:[%s10804_s21 + $0x8] sm:$0xff] %v8829_v41  ;;  %v5229_v49 = vpop.f32.mrf.mxu3  ;;  %6838 = vmatpush.bf16.msra.mxu1 %v8616_v58  ;;  %v6030_v58 = vld [vmem:[#allocation3 + $0x71] sm:$0xff] }
 0x3e8   : > { %v5230_v34 = vadd.f32 %v5229_v49, %v5092_v63  ;;  %v10817_v46 = vpop.f32.mrf.mxu0  ;;  %8832 = vtanh.f32 %v5828_v56 }
 0x3ea   : > { %v8831_v5 = vpop.eup %8830  ;;  %v5279_v61 = vadd.f32 %v10500_v23, %v5230_v34 }
 0x3eb   : > { %5342 = vst [vmem:[%s10516_s14 + $0xb0] sm:$0xff] %v8831_v5  ;;  %8269 = vmatmul.msk.bf16.gmra.mxu2 %vm11340_vm13, %v10819_v62  ;;  %6563 = vmatmul.bf16.gmra.mxu0 %v6458_v14  ;;  %v5749_v25 = vpop.f32.mrf.mxu1 }
 0x3ec   : > { %8834 = vtanh.f32 %v5279_v61  ;;  %6329 = vmatmul.bf16.gmra.mxu3 %v6457_v16  ;;  %v5750_v41 = vadd.f32 %v5749_v25, %v10534_v13 }
 0x3ee   : > { %v8833_v63 = vpop.eup %8832  ;;  %v5095_v56 = vpop.f32.mrf.mxu2  ;;  %v5829_v44 = vadd.f32 %v10784_v30, %v5750_v41  ;;  %v6401_v41 = vld [vmem:[#allocation3 + $0x80] sm:$0xff] }
 0x3ef   : > { %5892 = vst [vmem:[%s10804_s21 + $0x10] sm:$0xff] %v8833_v63  ;;  %v5232_v43 = vpop.f32.mrf.mxu3 }
 0x3f0   : > { %v5233_v49 = vadd.f32 %v5232_v43, %v5095_v56  ;;  %v10832_v34 = vpop.f32.mrf.mxu0  ;;  %8836 = vtanh.f32 %v5829_v44  ;;  %v6400_v43 = vld [vmem:[#allocation3 + $0x78] sm:$0xff] }
 0x3f2   : > { %v8835_v53 = vpop.eup %8834  ;;  %v5280_v52 = vadd.f32 %v10500_v23, %v5233_v49  ;;  %v6029_v23 = vld [vmem:[#allocation3 + $0x69] sm:$0xff] }
 0x3f3   : > { %5343 = vst [vmem:[%s10516_s14 + $0xb8] sm:$0xff] %v8835_v53  ;;  %v5752_v61 = vpop.f32.mrf.mxu1  ;;  %v10842_v49 = vpack.c.bf16 %v6030_v58, %v6029_v23 }
 0x3f4   : > { %8838 = vtanh.f32 %v5280_v52  ;;  %v5753_v13 = vadd.f32 %v5752_v61, %v10546_v36  ;;  %v6459_v36 = vpack.c.bf16 %v6401_v41, %v6400_v43  ;;  %v10847_v52 = vld [vmem:[%s11173_s4] ss:$0 sm:$0xff] }
 0x3f6   : > { %v8837_v16 = vpop.eup %8836  ;;  %v5097_v5 = vpop.f32.mrf.mxu2  ;;  %v5830_v25 = vadd.f32 %v10784_v30, %v5753_v13  ;;  %5791 = vmatmul.bf16.gmra.mxu1 %v10374_v60 }
 0x3f7   : > { %5893 = vst [vmem:[%s10804_s21 + $0x18] sm:$0xff] %v8837_v16  ;;  %v5234_v63 = vpop.f32.mrf.mxu3 }
 0x3f8   : > { %v5235_v56 = vadd.f32 %v5234_v63, %v5097_v5  ;;  %v10840_v44 = vpop.f32.mrf.mxu0  ;;  %8840 = vtanh.f32 %v5830_v25 }
 0x3fa   : > { %v8839_v53 = vpop.eup %8838  ;;  %v5281_v60 = vadd.f32 %v10847_v52, %v5235_v56 }
 0x3fb   : > { %5344 = vst [vmem:[%s10516_s14 + $0xc0] sm:$0xff] %v8839_v53  ;;  %8272 = vmatmul.msk.bf16.gmra.mxu2 %vm11346_vm14, %v10842_v49  ;;  %6568 = vmatmul.bf16.gmra.mxu0 %v6459_v36  ;;  %v5754_v61 = vpop.f32.mrf.mxu1 }
 0x3fc   : > { %8842 = vtanh.f32 %v5281_v60  ;;  %6334 = vmatmul.bf16.gmra.mxu3 %v6458_v14  ;;  %v5755_v13 = vadd.f32 %v5754_v61, %v10559_v20  ;;  %v6032_v61 = vld [vmem:[#allocation3 + $0x81] sm:$0xff] }
 0x3fe   : > { %v8841_v16 = vpop.eup %8840  ;;  %v5100_v5 = vpop.f32.mrf.mxu2  ;;  %v5831_v25 = vadd.f32 %v10784_v30, %v5755_v13  ;;  %v6403_v13 = vld [vmem:[#allocation3 + $0x90] sm:$0xff] }
 0x3ff   : > { %5894 = vst [vmem:[%s10804_s21 + $0x20] sm:$0xff] %v8841_v16  ;;  %v5237_v58 = vpop.f32.mrf.mxu3 }
 0x400   : > { %v5238_v41 = vadd.f32 %v5237_v58, %v5100_v5  ;;  %v10857_v63 = vpop.f32.mrf.mxu0  ;;  %8844 = vtanh.f32 %v5831_v25  ;;  %v6031_v58 = vld [vmem:[#allocation3 + $0x79] sm:$0xff] }
 0x402   : > { %v8843_v56 = vpop.eup %8842  ;;  %v5282_v23 = vadd.f32 %v10847_v52, %v5238_v41  ;;  %v6402_v41 = vld [vmem:[#allocation3 + $0x88] sm:$0xff] }
 0x403   : > { %5345 = vst [vmem:[%s10516_s14 + $0xc8] sm:$0xff] %v8843_v56  ;;  %v5757_v43 = vpop.f32.mrf.mxu1  ;;  %v10867_v56 = vpack.c.bf16 %v6032_v61, %v6031_v58 }
 0x404   : > { %8846 = vtanh.f32 %v5282_v23  ;;  %v5758_v14 = vadd.f32 %v5757_v43, %v10568_v51  ;;  %v6460_v51 = vpack.c.bf16 %v6403_v13, %v6402_v41 }
 0x406   : > { %v8845_v20 = vpop.eup %8844  ;;  %v5102_v53 = vpop.f32.mrf.mxu2  ;;  %v5832_v60 = vadd.f32 %v10784_v30, %v5758_v14  ;;  %5796 = vmatmul.bf16.gmra.mxu1 %v10407_v28  ;;  %v8615_v14 = vld [vmem:[%s11172_s3 + $0x208] sm:$0xff] }
 0x407   : > { %5895 = vst [vmem:[%s10804_s21 + $0x28] sm:$0xff] %v8845_v20  ;;  %v5239_v16 = vpop.f32.mrf.mxu3  ;;  %6839 = vmatpush.bf16.msra.mxu1 %v8615_v14  ;;  %v6034_v14 = vld [vmem:[#allocation3 + $0x91] sm:$0xff] }
 0x408   : > { %v5240_v5 = vadd.f32 %v5239_v16, %v5102_v53  ;;  %v10865_v25 = vpop.f32.mrf.mxu0  ;;  %8848 = vtanh.f32 %v5832_v60 }
 0x40a   : > { %v8847_v23 = vpop.eup %8846  ;;  %v5283_v43 = vadd.f32 %v10847_v52, %v5240_v5 }
 0x40b   : > { %5346 = vst [vmem:[%s10516_s14 + $0xd0] sm:$0xff] %v8847_v23  ;;  %8275 = vmatmul.msk.bf16.gmra.mxu2 %vm11354_vm3, %v10867_v56  ;;  %6573 = vmatmul.bf16.gmra.mxu0 %v6460_v51  ;;  %v5759_v28 = vpop.f32.mrf.mxu1 }
 0x40c   : > { %8850 = vtanh.f32 %v5283_v43  ;;  %6339 = vmatmul.bf16.gmra.mxu3 %v6459_v36  ;;  %v5760_v20 = vadd.f32 %v5759_v28, %v10584_v24 }
 0x40e   : > { %v8849_v53 = vpop.eup %8848  ;;  %v5105_v60 = vpop.f32.mrf.mxu2  ;;  %v5833_v61 = vadd.f32 %v10784_v30, %v5760_v20  ;;  %v6405_v20 = vld [vmem:[#allocation3 + $0xa0] sm:$0xff] }
 0x40f   : > { %5896 = vst [vmem:[%s10804_s21 + $0x30] sm:$0xff] %v8849_v53  ;;  %v5242_v13 = vpop.f32.mrf.mxu3 }
 0x410   : > { %v5243_v16 = vadd.f32 %v5242_v13, %v5105_v60  ;;  %v10880_v5 = vpop.f32.mrf.mxu0  ;;  %8852 = vtanh.f32 %v5833_v61  ;;  %v6033_v13 = vld [vmem:[#allocation3 + $0x89] sm:$0xff] }
 0x412   : > { %v8851_v58 = vpop.eup %8850  ;;  %v5284_v41 = vadd.f32 %v10847_v52, %v5243_v16  ;;  %v6404_v16 = vld [vmem:[#allocation3 + $0x98] sm:$0xff] }
 0x413   : > { %5347 = vst [vmem:[%s10516_s14 + $0xd8] sm:$0xff] %v8851_v58  ;;  %v5762_v23 = vpop.f32.mrf.mxu1  ;;  %v10890_v58 = vpack.c.bf16 %v6034_v14, %v6033_v13 }
 0x414   : > { %8854 = vtanh.f32 %v5284_v41  ;;  %v5763_v24 = vadd.f32 %v5762_v23, %v10594_v0  ;;  %v6461_v0 = vpack.c.bf16 %v6405_v20, %v6404_v16 }
 0x416   : > { %v8853_v36 = vpop.eup %8852  ;;  %v5107_v43 = vpop.f32.mrf.mxu2  ;;  %v5834_v28 = vadd.f32 %v10784_v30, %v5763_v24  ;;  %5801 = vmatmul.bf16.gmra.mxu1 %v10437_v31 }
 0x417   : > { %5897 = vst [vmem:[%s10804_s21 + $0x38] sm:$0xff] %v8853_v36  ;;  %v5244_v53 = vpop.f32.mrf.mxu3 }
 0x418   : > { %v5245_v60 = vadd.f32 %v5244_v53, %v5107_v43  ;;  %v10888_v61 = vpop.f32.mrf.mxu0  ;;  %8856 = vtanh.f32 %v5834_v28 }
 0x41a   : > { %v8855_v41 = vpop.eup %8854  ;;  %v5285_v23 = vadd.f32 %v10847_v52, %v5245_v60  ;;  %v8614_v60 = vld [vmem:[%s11172_s3 + $0x200] sm:$0xff] }
 0x41b   : > { %5348 = vst [vmem:[%s10516_s14 + $0xe0] sm:$0xff] %v8855_v41  ;;  %8278 = vmatmul.msk.bf16.gmra.mxu2 %vm11362_vm4, %v10890_v58  ;;  %6578 = vmatmul.bf16.gmra.mxu0 %v6461_v0  ;;  %v5764_v31 = vpop.f32.mrf.mxu1 }
 0x41c   : > { %8858 = vtanh.f32 %v5285_v23  ;;  %6344 = vmatmul.bf16.gmra.mxu3 %v6460_v51  ;;  %v5765_v24 = vadd.f32 %v5764_v31, %v10607_v7  ;;  %6840 = vmatpush.bf16.msra.mxu1 %v8614_v60  ;;  %v6406_v60 = vld [vmem:[#allocation3 + $0xa8] sm:$0xff] }
 0x41e   : > { %v8857_v36 = vpop.eup %8856  ;;  %v5110_v43 = vpop.f32.mrf.mxu2  ;;  %v5835_v28 = vadd.f32 %v10784_v30, %v5765_v24  ;;  %v6036_v24 = vld [vmem:[#allocation3 + $0xa1] sm:$0xff] }
 0x41f   : > { %5898 = vst [vmem:[%s10804_s21 + $0x40] sm:$0xff] %v8857_v36  ;;  %v5247_v14 = vpop.f32.mrf.mxu3  ;;  %v6407_v36 = vld [vmem:[#allocation3 + $0xb0] sm:$0xff] }
 0x420   : > { %v5248_v20 = vadd.f32 %v5247_v14, %v5110_v43  ;;  %v10900_v53 = vpop.f32.mrf.mxu0  ;;  %8860 = vtanh.f32 %v5835_v28 }
 0x422   : > { %v8859_v13 = vpop.eup %8858  ;;  %v5286_v51 = vadd.f32 %v10847_v52, %v5248_v20  ;;  %v6035_v20 = vld [vmem:[#allocation3 + $0x99] sm:$0xff] }
 0x423   : > { %5349 = vst [vmem:[%s10516_s14 + $0xe8] sm:$0xff] %v8859_v13  ;;  %v5767_v7 = vpop.f32.mrf.mxu1  ;;  %v10911_v13 = vpack.c.bf16 %v6036_v24, %v6035_v20 }
 0x424   : > { %8862 = vtanh.f32 %v5286_v51  ;;  %v5768_v16 = vadd.f32 %v5767_v7, %v10637_v39  ;;  %v6462_v39 = vpack.c.bf16 %v6407_v36, %v6406_v60 }
 0x426   : > { %v8861_v41 = vpop.eup %8860  ;;  %v5112_v23 = vpop.f32.mrf.mxu2  ;;  %v5836_v31 = vadd.f32 %v10784_v30, %v5768_v16  ;;  %5806 = vmatmul.bf16.gmra.mxu1 %v10470_v2 }
 0x427   : > { %5899 = vst [vmem:[%s10804_s21 + $0x48] sm:$0xff] %v8861_v41  ;;  %v5249_v43 = vpop.f32.mrf.mxu3 }
 0x428   : > { %v5250_v28 = vadd.f32 %v5249_v43, %v5112_v23  ;;  %v6544_v14 = vpop.f32.mrf.mxu0  ;;  %8864 = vtanh.f32 %v5836_v31 }
 0x42a   : > { %v8863_v51 = vpop.eup %8862  ;;  %v5287_v7 = vadd.f32 %v10847_v52, %v5250_v28 }
 0x42b   : > { %5350 = vst [vmem:[%s10516_s14 + $0xf0] sm:$0xff] %v8863_v51  ;;  %8281 = vmatmul.msk.bf16.gmra.mxu2 %vm11369_vm11, %v10911_v13  ;;  %6583 = vmatmul.bf16.gmra.mxu0 %v6462_v39  ;;  %v5769_v2 = vpop.f32.mrf.mxu1 }
 0x42c   : > { %8866 = vtanh.f32 %v5287_v7  ;;  %6349 = vmatmul.bf16.gmra.mxu3 %v6461_v0  ;;  %v5770_v16 = vadd.f32 %v5769_v2, %v10665_v57  ;;  %v6038_v7 = vld [vmem:[#allocation3 + $0xb1] sm:$0xff]  ;;  %v6409_v2 = vld [vmem:[#allocation3 + $0xc0] sm:$0xff] }
 0x42e   : > { %v8865_v41 = vpop.eup %8864  ;;  %v6173_v23 = vpop.f32.mrf.mxu2  ;;  %v5837_v31 = vadd.f32 %v10784_v30, %v5770_v16 }
 0x42f   : > { %5900 = vst [vmem:[%s10804_s21 + $0x50] sm:$0xff] %v8865_v41  ;;  %v6310_v24 = vpop.f32.mrf.mxu3 }
 0x430   : > { %v6311_v52 = vadd.f32 %v6310_v24, %v6173_v23  ;;  %v6546_v36 = vpop.f32.mrf.mxu0  ;;  %8868 = vtanh.f32 %v5837_v31  ;;  %v6408_v31 = vld [vmem:[#allocation3 + $0xb8] sm:$0xff] }
 0x432   : > { %v8867_v43 = vpop.eup %8866  ;;  %v10921_v28 = vadd.f32 %v6544_v14, %v6311_v52  ;;  %v6037_v14 = vld [vmem:[#allocation3 + $0xa9] sm:$0xff]  ;;  %v6463_v52 = vpack.c.bf16 %v6409_v2, %v6408_v31 }
 0x433   : > { %5351 = vst [vmem:[%s10516_s14 + $0xf8] sm:$0xff] %v8867_v43  ;;  %v5772_v20 = vpop.f32.mrf.mxu1  ;;  %v10928_v24 = vpack.c.bf16 %v6038_v7, %v6037_v14  ;;  %v6411_v31 = vld [vmem:[#allocation3 + $0xd0] sm:$0xff] }
 0x434   : > { %v5773_v60 = vadd.f32 %v5772_v20, %v10690_v33 }
 0x436   : > { %v8869_v0 = vpop.eup %8868  ;;  %v6175_v51 = vpop.f32.mrf.mxu2  ;;  %v5838_v57 = vadd.f32 %v10784_v30, %v5773_v60  ;;  %5811 = vmatmul.bf16.gmra.mxu1 %v10507_v26 }
 0x437   : > { %5901 = vst [vmem:[%s10804_s21 + $0x58] sm:$0xff] %v8869_v0  ;;  %v6312_v16 = vpop.f32.mrf.mxu3 }
 0x438   : > { %v6313_v41 = vadd.f32 %v6312_v16, %v6175_v51  ;;  %v6549_v23 = vpop.f32.mrf.mxu0  ;;  %8870 = vtanh.f32 %v5838_v57 }
 0x43a   : > { %v10930_v33 = vadd.f32 %v6546_v36, %v6313_v41 }
 0x43b   : > { %8284 = vmatmul.msk.bf16.gmra.mxu2 %vm11372_vm2, %v10928_v24  ;;  %6588 = vmatmul.bf16.gmra.mxu0 %v6463_v52  ;;  %v5774_v43 = vpop.f32.mrf.mxu1 }
 0x43c   : > { %6354 = vmatmul.bf16.gmra.mxu3 %v6462_v39  ;;  %v5775_v26 = vadd.f32 %v5774_v43, %v10703_v47  ;;  %v6040_v47 = vld [vmem:[#allocation3 + $0xc1] sm:$0xff] }
 0x43e   : > { %v8871_v20 = vpop.eup %8870  ;;  %v6178_v60 = vpop.f32.mrf.mxu2  ;;  %v5839_v0 = vadd.f32 %v10784_v30, %v5775_v26 }
 0x43f   : > { %5902 = vst [vmem:[%s10804_s21 + $0x60] sm:$0xff] %v8871_v20  ;;  %v6315_v51 = vpop.f32.mrf.mxu3  ;;  %v6039_v20 = vld [vmem:[#allocation3 + $0xb9] sm:$0xff] }
 0x440   : > { %v6316_v57 = vadd.f32 %v6315_v51, %v6178_v60  ;;  %8872 = vtanh.f32 %v5839_v0  ;;  %v6551_v36 = vpop.f32.mrf.mxu0  ;;  %v6410_v60 = vld [vmem:[#allocation3 + $0xc8] sm:$0xff] }
 0x441   : > { %v6464_v0 = vpack.c.bf16 %v6411_v31, %v6410_v60  ;;  %v6413_v60 = vld [vmem:[#allocation3 + $0xe0] sm:$0xff] }
 0x442   : > { %v10938_v7 = vadd.f32 %v6549_v23, %v6316_v57  ;;  %v10944_v23 = vpack.c.bf16 %v6040_v47, %v6039_v20 }
 0x443   : > { %v5777_v2 = vpop.f32.mrf.mxu1 }
 0x444   : > { %v5778_v16 = vadd.f32 %v5777_v2, %v10710_v40 }
 0x446   : > { %v8873_v41 = vpop.eup %8872  ;;  %v6180_v14 = vpop.f32.mrf.mxu2  ;;  %v5840_v39 = vadd.f32 %v10784_v30, %v5778_v16  ;;  %5816 = vmatmul.bf16.gmra.mxu1 %v10542_v48 }
 0x447   : > { %5903 = vst [vmem:[%s10804_s21 + $0x68] sm:$0xff] %v8873_v41  ;;  %v6317_v43 = vpop.f32.mrf.mxu3 }
 0x448   : > { %v6318_v26 = vadd.f32 %v6317_v43, %v6180_v14  ;;  %8874 = vtanh.f32 %v5840_v39  ;;  %v6554_v40 = vpop.f32.mrf.mxu0 }
 0x44a   : > { %v10946_v51 = vadd.f32 %v6551_v36, %v6318_v26 }
 0x44b   : > { %8287 = vmatmul.msk.bf16.gmra.mxu2 %vm11374_vm5, %v10944_v23  ;;  %6593 = vmatmul.bf16.gmra.mxu0 %v6464_v0  ;;  %v5779_v57 = vpop.f32.mrf.mxu1 }
 0x44c   : > { %6359 = vmatmul.bf16.gmra.mxu3 %v6463_v52  ;;  %v5780_v48 = vadd.f32 %v5779_v57, %v10720_v22  ;;  %v6042_v22 = vld [vmem:[#allocation3 + $0xd1] sm:$0xff] }
 0x44e   : > { %v8875_v2 = vpop.eup %8874  ;;  %v6183_v16 = vpop.f32.mrf.mxu2  ;;  %v5841_v41 = vadd.f32 %v10784_v30, %v5780_v48 }
 0x44f   : > { %5904 = vst [vmem:[%s10804_s21 + $0x70] sm:$0xff] %v8875_v2  ;;  %v6320_v14 = vpop.f32.mrf.mxu3  ;;  %v6412_v2 = vld [vmem:[#allocation3 + $0xd8] sm:$0xff] }
 0x450   : > { %v6321_v39 = vadd.f32 %v6320_v14, %v6183_v16  ;;  %8876 = vtanh.f32 %v5841_v41  ;;  %v6556_v43 = vpop.f32.mrf.mxu0 }
 0x452   : > { %v10954_v36 = vadd.f32 %v6554_v40, %v6321_v39  ;;  %v6041_v40 = vld [vmem:[#allocation3 + $0xc9] sm:$0xff] }
 0x453   : > { %v5782_v47 = vpop.f32.mrf.mxu1  ;;  %v10962_v16 = vpack.c.bf16 %v6042_v22, %v6041_v40 }
 0x454   : > { %v5783_v31 = vadd.f32 %v5782_v47, %v10727_v29  ;;  %v6465_v29 = vpack.c.bf16 %v6413_v60, %v6412_v2 }
 0x456   : > { %v8877_v26 = vpop.eup %8876  ;;  %v6185_v20 = vpop.f32.mrf.mxu2  ;;  %v5842_v52 = vadd.f32 %v10784_v30, %v5783_v31  ;;  %8433 = vmatmul.msk.bf16.vlgmr.msra.gmra.mxu1 %vm9523_vm7, %v10748_v55 }
 0x457   : > { %5905 = vst [vmem:[%s10804_s21 + $0x78] sm:$0xff] %v8877_v26  ;;  %v6322_v57 = vpop.f32.mrf.mxu3 }
 0x458   : > { %v6323_v48 = vadd.f32 %v6322_v57, %v6185_v20  ;;  %8878 = vtanh.f32 %v5842_v52  ;;  %v6559_v31 = vpop.f32.mrf.mxu0 }
 0x45a   : > { %v10964_v41 = vadd.f32 %v6556_v43, %v6323_v48  ;;  %v6415_v48 = vld [vmem:[#allocation3 + $0xf0] sm:$0xff] }
 0x45b   : > { %8290 = vmatmul.msk.bf16.gmra.mxu2 %vm11376_vm12, %v10962_v16  ;;  %6598 = vmatmul.bf16.gmra.mxu0 %v6465_v29  ;;  %v5784_v14 = vpop.f32.mrf.mxu1 }
 0x45c   : > { %6364 = vmatmul.bf16.gmra.mxu3 %v6464_v0  ;;  %v5785_v10 = vadd.f32 %v5784_v14, %v10739_v50  ;;  %v6044_v50 = vld [vmem:[#allocation3 + $0xe1] sm:$0xff]  ;;  %v6043_v14 = vld [vmem:[#allocation3 + $0xd9] sm:$0xff] }
 0x45e   : > { %v8879_v55 = vpop.eup %8878  ;;  %v6188_v39 = vpop.f32.mrf.mxu2  ;;  %v5843_v47 = vadd.f32 %v10784_v30, %v5785_v10  ;;  %v6414_v10 = vld [vmem:[#allocation3 + $0xe8] sm:$0xff] }
 0x45f   : > { %5906 = vst [vmem:[%s10804_s21 + $0x80] sm:$0xff] %v8879_v55  ;;  %v6325_v26 = vpop.f32.mrf.mxu3 }
 0x460   : > { %v6326_v20 = vadd.f32 %v6325_v26, %v6188_v39  ;;  %8880 = vtanh.f32 %v5843_v47  ;;  %v6561_v55 = vpop.f32.mrf.mxu0  ;;  %v10980_v39 = vpack.c.bf16 %v6044_v50, %v6043_v14 }
 0x462   : > { %v10972_v43 = vadd.f32 %v6559_v31, %v6326_v20 }
 0x463   : > { %v5787_v52 = vpop.f32.mrf.mxu1 }
 0x464   : > { %v5788_v22 = vadd.f32 %v5787_v52, %v10746_v18  ;;  %v6466_v18 = vpack.c.bf16 %v6415_v48, %v6414_v10 }
 0x466   : > { %v8881_v60 = vpop.eup %8880  ;;  %v6190_v57 = vpop.f32.mrf.mxu2  ;;  %v5844_v0 = vadd.f32 %v10784_v30, %v5788_v22  ;;  %8436 = vmatmul.msk.bf16.gmra.mxu1 %vm11337_vm1, %v10766_v9 }
 0x467   : > { %5907 = vst [vmem:[%s10804_s21 + $0x88] sm:$0xff] %v8881_v60  ;;  %v6327_v40 = vpop.f32.mrf.mxu3 }
 0x468   : > { %v6328_v2 = vadd.f32 %v6327_v40, %v6190_v57  ;;  %8882 = vtanh.f32 %v5844_v0  ;;  %v6046_v57 = vld [vmem:[#allocation3 + $0xf1] sm:$0xff]  ;;  %v6417_v0 = vld [vmem:[#allocation3 + $0x100] sm:$0xff]  ;;  %v6564_v1 = vpop.f32.mrf.mxu0 }
 0x46a   : > { %v10982_v47 = vadd.f32 %v6561_v55, %v6328_v2 }
 0x46b   : > { %8293 = vmatmul.msk.bf16.gmra.mxu2 %vm11380_vm15, %v10980_v39  ;;  %6603 = vmatmul.bf16.gmra.mxu0 %v6466_v18  ;;  %v5789_v35 = vpop.f32.mrf.mxu1 }
 0x46c   : > { %6369 = vmatmul.bf16.gmra.mxu3 %v6465_v29  ;;  %v5790_v9 = vadd.f32 %v5789_v35, %v10757_v38  ;;  %v6045_v38 = vld [vmem:[#allocation3 + $0xe9] sm:$0xff]  ;;  %v6416_v29 = vld [vmem:[#allocation3 + $0xf8] sm:$0xff]  ;;  %v6048_v35 = vld [vmem:[#allocation3 + $0x101] sm:$0xff] }
 0x46d   : > { %v10996_v50 = vpack.c.bf16 %v6046_v57, %v6045_v38  ;;  %v6467_v48 = vpack.c.bf16 %v6417_v0, %v6416_v29  ;;  %v6049_v0 = vld [vmem:[#allocation3 + $0x109] sm:$0xff]  ;;  %v6050_v38 = vld [vmem:[#allocation3 + $0x111] sm:$0xff] }
 0x46e   : > { %v8883_v31 = vpop.eup %8882  ;;  %v5845_v26 = vadd.f32 %v10784_v30, %v5790_v9  ;;  %v6419_v9 = vld [vmem:[#allocation3 + $0x110] sm:$0xff] }
 0x46f   : > { %5908 = vst [vmem:[%s10804_s21 + $0x90] sm:$0xff] %v8883_v31 }
 0x470   : > { %8884 = vtanh.f32 %v5845_v26 }
 0x473   : > { %v5792_v20 = vpop.f32.mrf.mxu1 }
 0x474   : > { %v5793_v52 = vadd.f32 %v5792_v20, %v10764_v42 }
 0x476   : > { %v8885_v22 = vpop.eup %8884  ;;  %v5846_v60 = vadd.f32 %v10784_v30, %v5793_v52  ;;  %8439 = vmatmul.msk.bf16.gmra.mxu1 %vm11338_vm6, %v10793_v37 }
 0x477   : > { %5909 = vst [vmem:[%s10804_s21 + $0x98] sm:$0xff] %v8885_v22 }
 0x478   : > { %8886 = vtanh.f32 %v5846_v60 }
 0x47b   : > { %8296 = vmatmul.msk.bf16.gmra.mxu2 %vm11385_vm8, %v10996_v50  ;;  %6608 = vmatmul.bf16.gmra.mxu0 %v6467_v48  ;;  %v5794_v42 = vpop.f32.mrf.mxu1 }
 0x47c   : > { %6374 = vmatmul.bf16.gmra.mxu3 %v6466_v18  ;;  %v5795_v40 = vadd.f32 %v5794_v42, %v10778_v3  ;;  %v6047_v3 = vld [vmem:[#allocation3 + $0xf9] sm:$0xff]  ;;  %v6418_v18 = vld [vmem:[#allocation3 + $0x108] sm:$0xff] }
 0x47d   : > { %v11010_v31 = vpack.c.bf16 %v6048_v35, %v6047_v3  ;;  %v6468_v26 = vpack.c.bf16 %v6419_v9, %v6418_v18 }
 0x47e   : > { %v8887_v2 = vpop.eup %8886  ;;  %v5847_v4 = vadd.f32 %v10784_v30, %v5795_v40 }
 0x47f   : > { %5910 = vst [vmem:[%s10804_s21 + $0xa0] sm:$0xff] %v8887_v2 }
 0x480   : > { %8888 = vtanh.f32 %v5847_v4 }
 0x483   : > { %v5797_v37 = vpop.f32.mrf.mxu1 }
 0x484   : > { %v5798_v14 = vadd.f32 %v5797_v37, %v10791_v59 }
 0x486   : > { %v8889_v10 = vpop.eup %8888  ;;  %v5848_v55 = vadd.f32 %v10784_v30, %v5798_v14  ;;  %8442 = vmatmul.msk.bf16.gmra.mxu1 %vm11339_vm10, %v10819_v62 }
 0x487   : > { %5911 = vst [vmem:[%s10804_s21 + $0xa8] sm:$0xff] %v8889_v10 }
 0x488   : > { %8890 = vtanh.f32 %v5848_v55 }
 0x48b   : > { %8299 = vmatmul.msk.bf16.gmra.mxu2 %vm11388_vm0, %v11010_v31  ;;  %6613 = vmatmul.bf16.gmra.mxu0 %v6468_v26  ;;  %v5799_v59 = vpop.f32.mrf.mxu1 }
 0x48c   : > { %6379 = vmatmul.bf16.gmra.mxu3 %v6467_v48  ;;  %v5800_v20 = vadd.f32 %v5799_v59, %v10809_v12  ;;  %v11024_v12 = vpack.c.bf16 %v6050_v38, %v6049_v0  ;;  %v11410_v48 = vmov 0.0|0.0  }
 0x48e   : > { %v8891_v52 = vpop.eup %8890  ;;  %v5849_v8 = vadd.f32 %v10784_v30, %v5800_v20 }
 0x48f   : > { %5912 = vst [vmem:[%s10804_s21 + $0xb0] sm:$0xff] %v8891_v52 }
 0x490   : > { %8892 = vtanh.f32 %v5849_v8 }
 0x493   : > { %v5802_v62 = vpop.f32.mrf.mxu1 }
 0x494   : > { %v5803_v22 = vadd.f32 %v5802_v62, %v10817_v46 }
 0x496   : > { %v8893_v60 = vpop.eup %8892  ;;  %v5850_v57 = vadd.f32 %v10784_v30, %v5803_v22  ;;  %8445 = vmatmul.msk.bf16.gmra.mxu1 %vm11340_vm13, %v10842_v49  ;;  %v6330_v22 = vpop.f32.mrf.mxu3 }
 0x497   : > { %5913 = vst [vmem:[%s10804_s21 + $0xb8] sm:$0xff] %v8893_v60 }
 0x498   : > { %8894 = vtanh.f32 %v5850_v57 }
 0x49b   : > { %8302 = vmatmul.msk.bf16.gmra.mxu2 %vm11408_vm9, %v11024_v12  ;;  %v5804_v46 = vpop.f32.mrf.mxu1  ;;  %6618 = vmatmul.bf16.gmra.mxu0 %v11410_v48 }
 0x49c   : > { %6384 = vmatmul.bf16.gmra.mxu3 %v6468_v26  ;;  %v5805_v42 = vadd.f32 %v5804_v46, %v10832_v34 }
 0x49e   : > { %v8895_v40 = vpop.eup %8894  ;;  %v5851_v32 = vadd.f32 %v10784_v30, %v5805_v42 }
 0x49f   : > { %5914 = vst [vmem:[%s10804_s21 + $0xc0] sm:$0xff] %v8895_v40 }
 0x4a0   : > { %8896 = vtanh.f32 %v5851_v32  ;;  %v6566_v32 = vpop.f32.mrf.mxu0 }
 0x4a3   : > { %v5807_v49 = vpop.f32.mrf.mxu1 }
 0x4a4   : > { %v5808_v2 = vadd.f32 %v5807_v49, %v10840_v44 }
 0x4a6   : > { %v8897_v4 = vpop.eup %8896  ;;  %v5852_v37 = vadd.f32 %v10784_v30, %v5808_v2  ;;  %8448 = vmatmul.msk.bf16.gmra.mxu1 %vm11346_vm14, %v10867_v56 }
 0x4a7   : > { %5915 = vst [vmem:[%s10804_s21 + $0xc8] sm:$0xff] %v8897_v4 }
 0x4a8   : > { %8898 = vtanh.f32 %v5852_v37 }
 0x4ab   : > { %v5809_v34 = vpop.f32.mrf.mxu1 }
 0x4ac   : > { %v5810_v14 = vadd.f32 %v5809_v34, %v10857_v63 }
 0x4ae   : > { %v8899_v10 = vpop.eup %8898  ;;  %v5853_v55 = vadd.f32 %v10784_v30, %v5810_v14 }
 0x4af   : > { %5916 = vst [vmem:[%s10804_s21 + $0xd0] sm:$0xff] %v8899_v10 }
 0x4b0   : > { %8900 = vtanh.f32 %v5853_v55 }
 0x4b3   : > { %v5812_v44 = vpop.f32.mrf.mxu1 }
 0x4b4   : > { %v5813_v35 = vadd.f32 %v5812_v44, %v10865_v25 }
 0x4b6   : > { %v8901_v9 = vpop.eup %8900  ;;  %v5854_v3 = vadd.f32 %v10784_v30, %v5813_v35  ;;  %8451 = vmatmul.msk.bf16.gmra.mxu1 %vm11354_vm3, %v10890_v58 }
 0x4b7   : > { %5917 = vst [vmem:[%s10804_s21 + $0xd8] sm:$0xff] %v8901_v9 }
 0x4b8   : > { %8902 = vtanh.f32 %v5854_v3 }
 0x4bb   : > { %v5814_v19 = vpop.f32.mrf.mxu1 }
 0x4bc   : > { %v5815_v63 = vadd.f32 %v5814_v19, %v10880_v5 }
 0x4be   : > { %v8903_v56 = vpop.eup %8902  ;;  %v5855_v18 = vadd.f32 %v10784_v30, %v5815_v63 }
 0x4bf   : > { %5918 = vst [vmem:[%s10804_s21 + $0xe0] sm:$0xff] %v8903_v56 }
 0x4c0   : > { %8904 = vtanh.f32 %v5855_v18 }
 0x4c3   : > { %v5817_v25 = vpop.f32.mrf.mxu1 }
 0x4c4   : > { %v5818_v26 = vadd.f32 %v5817_v25, %v10888_v61  ;;  %v11063_v61 = vld [vmem:[%s11173_s4] ss:$0 sm:$0xff] }
 0x4c6   : > { %v8905_v59 = vpop.eup %8904  ;;  %v5856_v20 = vadd.f32 %v10784_v30, %v5818_v26  ;;  %8454 = vmatmul.msk.bf16.gmra.mxu1 %vm11362_vm4, %v10911_v13 }
 0x4c7   : > { %5919 = vst [vmem:[%s10804_s21 + $0xe8] sm:$0xff] %v8905_v59 }
 0x4c8   : > { %8906 = vtanh.f32 %v5856_v20 }
 0x4cb   : > { %v5819_v15 = vpop.f32.mrf.mxu1 }
 0x4cc   : > { %v5820_v5 = vadd.f32 %v5819_v15, %v10900_v53  ;;  %v6193_v53 = vpop.f32.mrf.mxu2 }
 0x4cd   : > { %v6331_v59 = vadd.f32 %v6330_v22, %v6193_v53 }
 0x4ce   : > { %v8907_v58 = vpop.eup %8906  ;;  %v5857_v52 = vadd.f32 %v10784_v30, %v5820_v5 }
 0x4cf   : > { %5920 = vst [vmem:[%s10804_s21 + $0xf0] sm:$0xff] %v8907_v58  ;;  %v6632_v5 = vadd.f32 %v6564_v1, %v6331_v59 }
 0x4d0   : > { %8908 = vtanh.f32 %v5857_v52 }
 0x4d3   : > { %v6842_v8 = vpop.f32.mrf.mxu1 }
 0x4d4   : > { %v6922_v11 = vadd.f32 %v6842_v8, %v10921_v28  ;;  %v6195_v29 = vpop.f32.mrf.mxu2 }
 0x4d6   : > { %v8909_v13 = vpop.eup %8908  ;;  %v6958_v62 = vadd.f32 %v11063_v61, %v6922_v11  ;;  %8457 = vmatmul.msk.bf16.gmra.mxu1 %vm11369_vm11, %v10928_v24 }
 0x4d7   : > { %5921 = vst [vmem:[%s10804_s21 + $0xf8] sm:$0xff] %v8909_v13 }
 0x4d8   : > { %8910 = vtanh.f32 %v6958_v62 }
 0x4db   : > { %v6844_v30 = vpop.f32.mrf.mxu1 }
 0x4dc   : > { %v6923_v28 = vadd.f32 %v6844_v30, %v10930_v33  ;;  %v6332_v33 = vpop.f32.mrf.mxu3 }
 0x4dd   : > { %v6333_v8 = vadd.f32 %v6332_v33, %v6195_v29 }
 0x4de   : > { %v8911_v60 = vpop.eup %8910  ;;  %v6959_v57 = vadd.f32 %v11063_v61, %v6923_v28 }
 0x4df   : > { %7022 = vst [vmem:[%s11075_s19] sm:$0xff] %v8911_v60  ;;  %v6633_v62 = vadd.f32 %v6566_v32, %v6333_v8 }
 0x4e0   : > { %8912 = vtanh.f32 %v6959_v57 }
 0x4e3   : > { %v6847_v24 = vpop.f32.mrf.mxu1 }
 0x4e4   : > { %v6924_v0 = vadd.f32 %v6847_v24, %v10938_v7  ;;  %v6198_v7 = vpop.f32.mrf.mxu2  ;;  %v6335_v4 = vpop.f32.mrf.mxu3 }
 0x4e5   : > { %v6336_v22 = vadd.f32 %v6335_v4, %v6198_v7 }
 0x4e6   : > { %v8913_v38 = vpop.eup %8912  ;;  %v6960_v46 = vadd.f32 %v11063_v61, %v6924_v0  ;;  %8460 = vmatmul.msk.bf16.gmra.mxu1 %vm11372_vm2, %v10944_v23 }
 0x4e7   : > { %7023 = vst [vmem:[%s11075_s19 + $0x8] sm:$0xff] %v8913_v38 }
 0x4e8   : > { %8914 = vtanh.f32 %v6960_v46 }
 0x4eb   : > { %v6849_v42 = vpop.f32.mrf.mxu1 }
 0x4ec   : > { %v6925_v40 = vadd.f32 %v6849_v42, %v10946_v51  ;;  %v6569_v51 = vpop.f32.mrf.mxu0  ;;  %v6200_v14 = vpop.f32.mrf.mxu2 }
 0x4ed   : > { %v6337_v10 = vpop.f32.mrf.mxu3  ;;  %v6634_v24 = vadd.f32 %v6569_v51, %v6336_v22 }
 0x4ee   : > { %v8915_v49 = vpop.eup %8914  ;;  %v6961_v2 = vadd.f32 %v11063_v61, %v6925_v40  ;;  %v6338_v29 = vadd.f32 %v6337_v10, %v6200_v14 }
 0x4ef   : > { %7024 = vst [vmem:[%s11075_s19 + $0x10] sm:$0xff] %v8915_v49 }
 0x4f0   : > { %8916 = vtanh.f32 %v6961_v2 }
 0x4f3   : > { %v6852_v37 = vpop.f32.mrf.mxu1 }
 0x4f4   : > { %v6926_v17 = vadd.f32 %v6852_v37, %v10954_v36  ;;  %v6571_v36 = vpop.f32.mrf.mxu0  ;;  %v6203_v19 = vpop.f32.mrf.mxu2 }
 0x4f5   : > { %v6635_v42 = vadd.f32 %v6571_v36, %v6338_v29 }
 0x4f6   : > { %v8917_v23 = vpop.eup %8916  ;;  %v6962_v34 = vadd.f32 %v11063_v61, %v6926_v17  ;;  %8463 = vmatmul.msk.bf16.gmra.mxu1 %vm11374_vm5, %v10962_v16  ;;  %v6340_v16 = vpop.f32.mrf.mxu3 }
 0x4f7   : > { %7025 = vst [vmem:[%s11075_s19 + $0x18] sm:$0xff] %v8917_v23  ;;  %v6341_v4 = vadd.f32 %v6340_v16, %v6203_v19 }
 0x4f8   : > { %8918 = vtanh.f32 %v6962_v34 }
 0x4fb   : > { %v6854_v55 = vpop.f32.mrf.mxu1 }
 0x4fc   : > { %v6927_v44 = vadd.f32 %v6854_v55, %v10964_v41  ;;  %v6574_v41 = vpop.f32.mrf.mxu0  ;;  %v6205_v20 = vpop.f32.mrf.mxu2 }
 0x4fd   : > { %v6636_v17 = vadd.f32 %v6574_v41, %v6341_v4 }
 0x4fe   : > { %v8919_v35 = vpop.eup %8918  ;;  %v6963_v9 = vadd.f32 %v11063_v61, %v6927_v44  ;;  %v6342_v15 = vpop.f32.mrf.mxu3 }
 0x4ff   : > { %7026 = vst [vmem:[%s11075_s19 + $0x20] sm:$0xff] %v8919_v35  ;;  %v6343_v51 = vadd.f32 %v6342_v15, %v6205_v20 }
 0x500   : > { %8920 = vtanh.f32 %v6963_v9 }
 0x503   : > { %v6857_v3 = vpop.f32.mrf.mxu1 }
 0x504   : > { %v6928_v6 = vadd.f32 %v6857_v3, %v10972_v43  ;;  %v6576_v45 = vpop.f32.mrf.mxu0 }
 0x505   : > { %v6637_v44 = vadd.f32 %v6576_v45, %v6343_v51 }
 0x506   : > { %v8921_v63 = vpop.eup %8920  ;;  %v6964_v56 = vadd.f32 %v11063_v61, %v6928_v6  ;;  %8466 = vmatmul.msk.bf16.gmra.mxu1 %vm11376_vm12, %v10980_v39  ;;  %v6345_v13 = vpop.f32.mrf.mxu3 }
 0x507   : > { %7027 = vst [vmem:[%s11075_s19 + $0x28] sm:$0xff] %v8921_v63 }
 0x508   : > { %8922 = vtanh.f32 %v6964_v56 }
 0x50b   : > { %v6859_v18 = vpop.f32.mrf.mxu1 }
 0x50c   : > { %v6929_v25 = vadd.f32 %v6859_v18, %v10982_v47  ;;  %v6208_v47 = vpop.f32.mrf.mxu2  ;;  %v6579_v57 = vpop.f32.mrf.mxu0 }
 0x50d   : > { %v6346_v19 = vadd.f32 %v6345_v13, %v6208_v47 }
 0x50e   : > { %v8923_v26 = vpop.eup %8922  ;;  %v6965_v43 = vadd.f32 %v11063_v61, %v6929_v25  ;;  %v6347_v0 = vpop.f32.mrf.mxu3 }
 0x50f   : > { %7028 = vst [vmem:[%s11075_s19 + $0x30] sm:$0xff] %v8923_v26  ;;  %v6638_v56 = vadd.f32 %v6579_v57, %v6346_v19 }
 0x510   : > { %8924 = vtanh.f32 %v6965_v43 }
 0x513   : > { %v6862_v58 = vpop.f32.mrf.mxu1 }
 0x514   : > { %v6930_v52 = vadd.f32 %v6862_v58, %v6632_v5  ;;  %v6210_v1 = vpop.f32.mrf.mxu2  ;;  %v6581_v33 = vpop.f32.mrf.mxu0 }
 0x515   : > { %v6348_v18 = vadd.f32 %v6347_v0, %v6210_v1 }
 0x516   : > { %v8925_v39 = vpop.eup %8924  ;;  %v6966_v11 = vadd.f32 %v11063_v61, %v6930_v52  ;;  %8469 = vmatmul.msk.bf16.gmra.mxu1 %vm11380_vm15, %v10996_v50  ;;  %v6350_v2 = vpop.f32.mrf.mxu3 }
 0x517   : > { %7029 = vst [vmem:[%s11075_s19 + $0x38] sm:$0xff] %v8925_v39  ;;  %v6639_v20 = vadd.f32 %v6581_v33, %v6348_v18 }
 0x518   : > { %8926 = vtanh.f32 %v6966_v11 }
 0x51b   : > { %v6864_v30 = vpop.f32.mrf.mxu1 }
 0x51c   : > { %v6931_v53 = vadd.f32 %v6864_v30, %v6633_v62  ;;  %v6213_v32 = vpop.f32.mrf.mxu2  ;;  %v6584_v23 = vpop.f32.mrf.mxu0 }
 0x51d   : > { %v6351_v52 = vadd.f32 %v6350_v2, %v6213_v32 }
 0x51e   : > { %v8927_v28 = vpop.eup %8926  ;;  %v6967_v60 = vadd.f32 %v11063_v61, %v6931_v53  ;;  %v6352_v55 = vpop.f32.mrf.mxu3 }
 0x51f   : > { %7030 = vst [vmem:[%s11075_s19 + $0x40] sm:$0xff] %v8927_v28  ;;  %v6640_v8 = vadd.f32 %v6584_v23, %v6351_v52 }
 0x520   : > { %8928 = vtanh.f32 %v6967_v60 }
 0x523   : > { %v6867_v21 = vpop.f32.mrf.mxu1 }
 0x524   : > { %v6932_v50 = vadd.f32 %v6867_v21, %v6634_v24  ;;  %v6215_v14 = vpop.f32.mrf.mxu2  ;;  %v6586_v36 = vpop.f32.mrf.mxu0 }
 0x525   : > { %v6353_v30 = vadd.f32 %v6352_v55, %v6215_v14 }
 0x526   : > { %v8929_v38 = vpop.eup %8928  ;;  %v6968_v46 = vadd.f32 %v11063_v61, %v6932_v50  ;;  %8472 = vmatmul.msk.bf16.gmra.mxu1 %vm11385_vm8, %v11010_v31  ;;  %v6355_v63 = vpop.f32.mrf.mxu3 }
 0x527   : > { %7031 = vst [vmem:[%s11075_s19 + $0x48] sm:$0xff] %v8929_v38  ;;  %v6641_v28 = vadd.f32 %v6586_v36, %v6353_v30 }
 0x528   : > { %8930 = vtanh.f32 %v6968_v46 }
 0x52b   : > { %v6869_v40 = vpop.f32.mrf.mxu1 }
 0x52c   : > { %v6933_v49 = vadd.f32 %v6869_v40, %v6635_v42  ;;  %v6218_v16 = vpop.f32.mrf.mxu2  ;;  %v6589_v26 = vpop.f32.mrf.mxu0 }
 0x52d   : > { %v6356_v24 = vadd.f32 %v6355_v63, %v6218_v16 }
 0x52e   : > { %v8931_v7 = vpop.eup %8930  ;;  %v6969_v37 = vadd.f32 %v11063_v61, %v6933_v49  ;;  %v6357_v43 = vpop.f32.mrf.mxu3 }
 0x52f   : > { %7032 = vst [vmem:[%s11075_s19 + $0x50] sm:$0xff] %v8931_v7  ;;  %v6642_v38 = vadd.f32 %v6589_v26, %v6356_v24 }
 0x530   : > { %8932 = vtanh.f32 %v6969_v37 }
 0x533   : > { %v6872_v34 = vpop.f32.mrf.mxu1 }
 0x534   : > { %v6934_v27 = vadd.f32 %v6872_v34, %v6636_v17  ;;  %v6220_v59 = vpop.f32.mrf.mxu2  ;;  %v6591_v39 = vpop.f32.mrf.mxu0 }
 0x535   : > { %v6358_v40 = vadd.f32 %v6357_v43, %v6220_v59 }
 0x536   : > { %v8933_v31 = vpop.eup %8932  ;;  %v6970_v10 = vadd.f32 %v11063_v61, %v6934_v27  ;;  %8475 = vmatmul.msk.bf16.gmra.mxu1 %vm11388_vm0, %v11024_v12  ;;  %v6360_v13 = vpop.f32.mrf.mxu3 }
 0x537   : > { %7033 = vst [vmem:[%s11075_s19 + $0x58] sm:$0xff] %v8933_v31  ;;  %v6643_v7 = vadd.f32 %v6591_v39, %v6358_v40 }
 0x538   : > { %8934 = vtanh.f32 %v6970_v10 }
 0x53b   : > { %v6874_v35 = vpop.f32.mrf.mxu1 }
 0x53c   : > { %v6935_v9 = vadd.f32 %v6874_v35, %v6637_v44  ;;  %v6223_v47 = vpop.f32.mrf.mxu2  ;;  %v6594_v22 = vpop.f32.mrf.mxu0 }
 0x53d   : > { %v6361_v23 = vadd.f32 %v6360_v13, %v6223_v47 }
 0x53e   : > { %v8935_v3 = vpop.eup %8934  ;;  %v6971_v6 = vadd.f32 %v11063_v61, %v6935_v9  ;;  %v6362_v50 = vpop.f32.mrf.mxu3 }
 0x53f   : > { %7034 = vst [vmem:[%s11075_s19 + $0x60] sm:$0xff] %v8935_v3  ;;  %v6644_v51 = vadd.f32 %v6594_v22, %v6361_v23 }
 0x540   : > { %8936 = vtanh.f32 %v6971_v6 }
 0x543   : > { %v6877_v41 = vpop.f32.mrf.mxu1 }
 0x544   : > { %v6936_v54 = vadd.f32 %v6877_v41, %v6638_v56  ;;  %v6225_v0 = vpop.f32.mrf.mxu2  ;;  %v6596_v33 = vpop.f32.mrf.mxu0 }
 0x545   : > { %v6363_v35 = vadd.f32 %v6362_v50, %v6225_v0 }
 0x546   : > { %v8937_v12 = vpop.eup %8936  ;;  %v6972_v25 = vadd.f32 %v11063_v61, %v6936_v54  ;;  %6916 = vmatmul.bf16.gmra.mxu1 %v11410_v48  ;;  %v6365_v2 = vpop.f32.mrf.mxu3 }
 0x547   : > { %7035 = vst [vmem:[%s11075_s19 + $0x68] sm:$0xff] %v8937_v12  ;;  %v6645_v3 = vadd.f32 %v6596_v33, %v6363_v35 }
 0x548   : > { %8938 = vtanh.f32 %v6972_v25 }
 0x54b   : > { %v6879_v15 = vpop.f32.mrf.mxu1 }
 0x54c   : > { %v6937_v5 = vadd.f32 %v6879_v15, %v6639_v20  ;;  %v6228_v49 = vpop.f32.mrf.mxu2  ;;  %v6599_v27 = vpop.f32.mrf.mxu0 }
 0x54d   : > { %v6366_v41 = vadd.f32 %v6365_v2, %v6228_v49 }
 0x54e   : > { %v8939_v58 = vpop.eup %8938  ;;  %v6973_v45 = vadd.f32 %v11063_v61, %v6937_v5  ;;  %v6367_v14 = vpop.f32.mrf.mxu3 }
 0x54f   : > { %7036 = vst [vmem:[%s11075_s19 + $0x70] sm:$0xff] %v8939_v58  ;;  %v6646_v12 = vadd.f32 %v6599_v27, %v6366_v41 }
 0x550   : > { %8940 = vtanh.f32 %v6973_v45 }
 0x553   : > { %v6882_v11 = vpop.f32.mrf.mxu1 }
 0x554   : > { %v6938_v48 = vadd.f32 %v6882_v11, %v6640_v8  ;;  %v6230_v31 = vpop.f32.mrf.mxu2  ;;  %v6601_v36 = vpop.f32.mrf.mxu0 }
 0x555   : > { %v6368_v20 = vadd.f32 %v6367_v14, %v6230_v31 }
 0x556   : > { %v8941_v62 = vpop.eup %8940  ;;  %v6974_v53 = vadd.f32 %v11063_v61, %v6938_v48  ;;  %v6370_v63 = vpop.f32.mrf.mxu3 }
 0x557   : > { %7037 = vst [vmem:[%s11075_s19 + $0x78] sm:$0xff] %v8941_v62  ;;  %v6647_v58 = vadd.f32 %v6601_v36, %v6368_v20 }
 0x558   : > { %8942 = vtanh.f32 %v6974_v53 }
 0x55b   : > { %v6884_v60 = vpop.f32.mrf.mxu1 }
 0x55c   : > { %v6939_v57 = vadd.f32 %v6884_v60, %v6641_v28  ;;  %v6233_v6 = vpop.f32.mrf.mxu2  ;;  %v6604_v18 = vpop.f32.mrf.mxu0 }
 0x55d   : > { %v6371_v11 = vadd.f32 %v6370_v63, %v6233_v6 }
 0x55e   : > { %v8943_v1 = vpop.eup %8942  ;;  %v6975_v21 = vadd.f32 %v11063_v61, %v6939_v57  ;;  %v6372_v5 = vpop.f32.mrf.mxu3 }
 0x55f   : > { %7038 = vst [vmem:[%s11075_s19 + $0x80] sm:$0xff] %v8943_v1  ;;  %v6648_v62 = vadd.f32 %v6604_v18, %v6371_v11 }
 0x560   : > { %8944 = vtanh.f32 %v6975_v21 }
 0x563   : > { %v6887_v29 = vpop.f32.mrf.mxu1 }
 0x564   : > { %v6940_v46 = vadd.f32 %v6887_v29, %v6642_v38  ;;  %v6235_v43 = vpop.f32.mrf.mxu2  ;;  %v6606_v39 = vpop.f32.mrf.mxu0 }
 0x565   : > { %v6373_v22 = vadd.f32 %v6372_v5, %v6235_v43 }
 0x566   : > { %v8945_v42 = vpop.eup %8944  ;;  %v6976_v32 = vadd.f32 %v11063_v61, %v6940_v46  ;;  %v6375_v13 = vpop.f32.mrf.mxu3 }
 0x567   : > { %7039 = vst [vmem:[%s11075_s19 + $0x88] sm:$0xff] %v8945_v42  ;;  %v6649_v24 = vadd.f32 %v6606_v39, %v6373_v22 }
 0x568   : > { %8946 = vtanh.f32 %v6976_v32 }
 0x56b   : > { %v6889_v4 = vpop.f32.mrf.mxu1 }
 0x56c   : > { %v6941_v37 = vadd.f32 %v6889_v4, %v6643_v7  ;;  %v6238_v48 = vpop.f32.mrf.mxu2  ;;  %v6609_v57 = vpop.f32.mrf.mxu0 }
 0x56d   : > { %v6376_v29 = vadd.f32 %v6375_v13, %v6238_v48 }
 0x56e   : > { %v8947_v17 = vpop.eup %8946  ;;  %v6977_v34 = vadd.f32 %v11063_v61, %v6941_v37  ;;  %v6377_v0 = vpop.f32.mrf.mxu3 }
 0x56f   : > { %7040 = vst [vmem:[%s11075_s19 + $0x90] sm:$0xff] %v8947_v17  ;;  %v6650_v42 = vadd.f32 %v6609_v57, %v6376_v29 }
 0x570   : > { %8948 = vtanh.f32 %v6977_v34 }
 0x573   : > { %v6892_v10 = vpop.f32.mrf.mxu1 }
 0x574   : > { %v6942_v55 = vadd.f32 %v6892_v10, %v6644_v51  ;;  %v6240_v1 = vpop.f32.mrf.mxu2  ;;  %v6611_v33 = vpop.f32.mrf.mxu0 }
 0x575   : > { %v6378_v4 = vadd.f32 %v6377_v0, %v6240_v1 }
 0x576   : > { %v8949_v44 = vpop.eup %8948  ;;  %v6978_v9 = vadd.f32 %v11063_v61, %v6942_v55  ;;  %v6380_v2 = vpop.f32.mrf.mxu3 }
 0x577   : > { %7041 = vst [vmem:[%s11075_s19 + $0x98] sm:$0xff] %v8949_v44  ;;  %v6651_v17 = vadd.f32 %v6611_v33, %v6378_v4 }
 0x578   : > { %8950 = vtanh.f32 %v6978_v9 }
 0x57b   : > { %v6894_v19 = vpop.f32.mrf.mxu1 }
 0x57c   : > { %v6943_v16 = vadd.f32 %v6894_v19, %v6645_v3  ;;  %v6243_v32 = vpop.f32.mrf.mxu2  ;;  %v6614_v23 = vpop.f32.mrf.mxu0 }
 0x57d   : > { %v6381_v51 = vadd.f32 %v6380_v2, %v6243_v32 }
 0x57e   : > { %v8951_v56 = vpop.eup %8950  ;;  %v6979_v54 = vadd.f32 %v11063_v61, %v6943_v16  ;;  %v6382_v55 = vpop.f32.mrf.mxu3 }
 0x57f   : > { %7042 = vst [vmem:[%s11075_s19 + $0xa0] sm:$0xff] %v8951_v56  ;;  %v6652_v44 = vadd.f32 %v6614_v23, %v6381_v51 }
 0x580   : > { %8952 = vtanh.f32 %v6979_v54 }
 0x583   : > { %v6897_v25 = vpop.f32.mrf.mxu1 }
 0x584   : > { %v6944_v26 = vadd.f32 %v6897_v25, %v6646_v12  ;;  %v6245_v14 = vpop.f32.mrf.mxu2  ;;  %v6616_v36 = vpop.f32.mrf.mxu0 }
 0x585   : > { %v6383_v19 = vadd.f32 %v6382_v55, %v6245_v14 }
 0x586   : > { %v8953_v59 = vpop.eup %8952  ;;  %v6980_v15 = vadd.f32 %v11063_v61, %v6944_v26  ;;  %v6385_v63 = vpop.f32.mrf.mxu3 }
 0x587   : > { %7043 = vst [vmem:[%s11075_s19 + $0xa8] sm:$0xff] %v8953_v59  ;;  %v6653_v56 = vadd.f32 %v6616_v36, %v6383_v19 }
 0x588   : > { %8954 = vtanh.f32 %v6980_v15 }
 0x58b   : > { %v6899_v52 = vpop.f32.mrf.mxu1 }
 0x58c   : > { %v6945_v45 = vadd.f32 %v6899_v52, %v6647_v58  ;;  %v6248_v16 = vpop.f32.mrf.mxu2  ;;  %v6619_v12 = vpop.f32.mrf.mxu0 }
 0x58d   : > { %v6386_v25 = vadd.f32 %v6385_v63, %v6248_v16 }
 0x58e   : > { %v8955_v8 = vpop.eup %8954  ;;  %v6981_v47 = vadd.f32 %v11063_v61, %v6945_v45  ;;  %v6387_v43 = vpop.f32.mrf.mxu3 }
 0x58f   : > { %7044 = vst [vmem:[%s11075_s19 + $0xb0] sm:$0xff] %v8955_v8  ;;  %v6654_v59 = vadd.f32 %v6619_v12, %v6386_v25 }
 0x590   : > { %8956 = vtanh.f32 %v6981_v47 }
 0x593   : > { %v6902_v30 = vpop.f32.mrf.mxu1 }
 0x594   : > { %v6946_v53 = vadd.f32 %v6902_v30, %v6648_v62  ;;  %v6250_v20 = vpop.f32.mrf.mxu2  ;;  %v6621_v39 = vpop.f32.mrf.mxu0 }
 0x595   : > { %v6388_v52 = vadd.f32 %v6387_v43, %v6250_v20 }
 0x596   : > { %v8957_v28 = vpop.eup %8956  ;;  %v6982_v60 = vadd.f32 %v11063_v61, %v6946_v53 }
 0x597   : > { %7045 = vst [vmem:[%s11075_s19 + $0xb8] sm:$0xff] %v8957_v28  ;;  %v6655_v8 = vadd.f32 %v6621_v39, %v6388_v52 }
 0x598   : > { %8958 = vtanh.f32 %v6982_v60 }
 0x59b   : > { %v6904_v21 = vpop.f32.mrf.mxu1 }
 0x59c   : > { %v6947_v50 = vadd.f32 %v6904_v21, %v6649_v24 }
 0x59e   : > { %v8959_v38 = vpop.eup %8958  ;;  %v6983_v46 = vadd.f32 %v11063_v61, %v6947_v50 }
 0x59f   : > { %7046 = vst [vmem:[%s11075_s19 + $0xc0] sm:$0xff] %v8959_v38 }
 0x5a0   : > { %8960 = vtanh.f32 %v6983_v46 }
 0x5a3   : > { %v6907_v40 = vpop.f32.mrf.mxu1 }
 0x5a4   : > { %v6948_v49 = vadd.f32 %v6907_v40, %v6650_v42 }
 0x5a6   : > { %v8961_v7 = vpop.eup %8960  ;;  %v6984_v37 = vadd.f32 %v11063_v61, %v6948_v49 }
 0x5a7   : > { %7047 = vst [vmem:[%s11075_s19 + $0xc8] sm:$0xff] %v8961_v7 }
 0x5a8   : > { %8962 = vtanh.f32 %v6984_v37 }
 0x5ab   : > { %v6909_v34 = vpop.f32.mrf.mxu1 }
 0x5ac   : > { %v6949_v27 = vadd.f32 %v6909_v34, %v6651_v17 }
 0x5ae   : > { %v8963_v31 = vpop.eup %8962  ;;  %v6985_v10 = vadd.f32 %v11063_v61, %v6949_v27 }
 0x5af   : > { %7048 = vst [vmem:[%s11075_s19 + $0xd0] sm:$0xff] %v8963_v31 }
 0x5b0   : > { %8964 = vtanh.f32 %v6985_v10 }
 0x5b3   : > { %v6912_v35 = vpop.f32.mrf.mxu1 }
 0x5b4   : > { %v6950_v9 = vadd.f32 %v6912_v35, %v6652_v44 }
 0x5b6   : > { %v8965_v3 = vpop.eup %8964  ;;  %v6986_v6 = vadd.f32 %v11063_v61, %v6950_v9 }
 0x5b7   : > { %7049 = vst [vmem:[%s11075_s19 + $0xd8] sm:$0xff] %v8965_v3 }
 0x5b8   : > { %8966 = vtanh.f32 %v6986_v6 }
 0x5bb   : > { %v6914_v41 = vpop.f32.mrf.mxu1 }
 0x5bc   : > { %v6951_v54 = vadd.f32 %v6914_v41, %v6653_v56 }
 0x5be   : > { %v8967_v18 = vpop.eup %8966  ;;  %v6987_v26 = vadd.f32 %v11063_v61, %v6951_v54 }
 0x5bf   : > { %7050 = vst [vmem:[%s11075_s19 + $0xe0] sm:$0xff] %v8967_v18 }
 0x5c0   : > { %8968 = vtanh.f32 %v6987_v26 }
 0x5c3   : > { %v6917_v15 = vpop.f32.mrf.mxu1 }
 0x5c4   : > { %v6952_v5 = vadd.f32 %v6917_v15, %v6654_v59 }
 0x5c6   : > { %v8969_v58 = vpop.eup %8968  ;;  %v6988_v45 = vadd.f32 %v11063_v61, %v6952_v5 }
 0x5c7   : > { %7051 = vst [vmem:[%s11075_s19 + $0xe8] sm:$0xff] %v8969_v58 }
 0x5c8   : > { %8970 = vtanh.f32 %v6988_v45 }
 0x5cb   : > { %v6919_v11 = vpop.f32.mrf.mxu1 }
 0x5cc   : > { %v6953_v47 = vadd.f32 %v6919_v11, %v6655_v8 }
 0x5ce   : > { %v8971_v48 = vpop.eup %8970  ;;  %v6989_v13 = vadd.f32 %v11063_v61, %v6953_v47 }
 0x5cf   : > { %7052 = vst [vmem:[%s11075_s19 + $0xf0] sm:$0xff] %v8971_v48 }
 0x5d0   : > { %8972 = vtanh.f32 %v6989_v13 }
 0x5d6   : > { %v8973_v62 = vpop.eup %8972 }
 0x5d7   : > { %7053 = vst [vmem:[%s11075_s19 + $0xf8] sm:$0xff] %v8973_v62 }
 0x5d8 PF: > { %s19_s27 = sadd.s32 1, %s8983_s27  }
 0x5d9   : > { %p16_p4 = scmp.ge.s32.totalorder %s19_s27, 4  }
 0x5db   :  { %18 = sbr.rel (!%p16_p4) target bundleno = 1 (0x1), region = 122 }

</bundles_post_ra>
